<compile_context>
chip_gen: v6e
topology: v6e:2x2x1
jax: 0.10.0
libtpu: 0.0.40
codegen_flags: <defaults>
</compile_context>

<pallas_src>
import functools

import jax
import jax.numpy as jnp
import numpy as np
from jax.experimental import pallas as pl
from jax.experimental.pallas import tpu as pltpu

LEAKY_SLOPE = 0.01  # nn.LeakyReLU() default (as used by LeakyReLUConv2d)


# ----------------------------------------------------------------------------
# The single fused kernel: one grid step == one discriminator tower.
# ----------------------------------------------------------------------------
def _fused_dis_kernel(x_ref, w0_ref, b0_ref, w1_ref, b1_ref, wh_ref, bh_ref,
                      s_ref, o_ref, *, slope, nb, h, w):
    c8 = x_ref.shape[-1]           # Cin padded to 8
    ch = w0_ref.shape[-1]          # layer-0 output channels
    c2 = w1_ref.shape[-1]          # layer-1 output channels
    m1 = nb * h * w                # stride-1 layer-0 rows
    m2 = s_ref.shape[1]            # Nb * Ho2 * Wo2 (final spatial positions)

    # ---- Layer 0: 3x3 conv evaluated at stride 1 over the zero-padded input.
    # The stride-2 decimation is folded into the layer-1 gather matrices, so
    # every tap here is a contiguous VMEM slice (no strided loads).
    acc0 = jnp.zeros((m1, ch), jnp.float32)
    for dy in range(3):
        for dx in range(3):
            tap = x_ref[:, pl.ds(dy, h), pl.ds(dx, w), :]        # (nb, h, w, c8)
            acc0 = acc0 + jnp.dot(tap.reshape(m1, c8), w0_ref[dy * 3 + dx],
                                  preferred_element_type=jnp.float32)
    a0 = acc0 + b0_ref[...]                                      # (m1, ch) f32
    a0 = jnp.where(a0 >= 0.0, a0, slope * a0)

    # ---- Layer 1: 3x3 stride-2 conv.  Tap gather (+ decimation + zero pad)
    # is a constant 0/1 selection matmul per tap, then the weight matmul.
    acc1 = jnp.zeros((m2, c2), jnp.float32)
    for t in range(9):
        g = jnp.dot(s_ref[t], a0, preferred_element_type=jnp.float32)     # (m2, ch)
        acc1 = acc1 + jnp.dot(g, w1_ref[t], preferred_element_type=jnp.float32)
    a1 = acc1 + b1_ref[...]                                      # (m2, c2)
    a1 = jnp.where(a1 >= 0.0, a1, slope * a1)

    # ---- 1x1 conv head, fused; emitted lane-dense (8 rows x m2 lanes; only
    # row 0 carries real head weights, rows 1..7 are zero padding).
    out = jnp.dot(wh_ref[...], a1.T, preferred_element_type=jnp.float32)
    o_ref[...] = out + bh_ref[...]


# ----------------------------------------------------------------------------
# Host-side (outside jit) parameter packing & gather-matrix construction.
# ----------------------------------------------------------------------------
def pack_params(all_params, c8):
    """Stack per-tower PyTorch-layout conv params into fused-kernel operands."""
    w0s, b0s, w1s, b1s, whs, bhs = [], [], [], [], [], []
    for p in all_params:
        assert len(p) == 3, "fused kernel is specialized to n_layer == 2"
        (w0, b0), (w1, b1), (wh, bh) = p
        w0 = np.asarray(w0, np.float32)                      # (ch, cin, 3, 3)
        w0 = np.pad(w0, ((0, 0), (0, c8 - w0.shape[1]), (0, 0), (0, 0)))
        w0s.append(np.transpose(w0, (2, 3, 1, 0)).reshape(9, c8, w0.shape[0]))
        b0s.append(np.asarray(b0, np.float32).reshape(1, -1))
        w1 = np.asarray(w1, np.float32)                      # (2ch, ch, 3, 3)
        w1s.append(np.transpose(w1, (2, 3, 1, 0)).reshape(9, w1.shape[1],
                                                          w1.shape[0]))
        b1s.append(np.asarray(b1, np.float32).reshape(1, -1))
        wh2 = np.asarray(wh, np.float32).reshape(1, -1)      # (1, 2ch)
        whs.append(np.pad(wh2, ((0, 7), (0, 0))))            # pad rows -> 8
        bhs.append(np.tile(np.asarray(bh, np.float32).reshape(1, 1), (8, 1)))
    return tuple(jnp.asarray(np.stack(a))
                 for a in (w0s, b0s, w1s, b1s, whs, bhs))


def build_layer1_gather(nb, h, w):
    """0/1 matrices (shared by all towers) folding the stride-2 decimation of
    layer 0 and layer 1's 3x3 tap gather (incl. zero padding) into matmuls."""
    assert h % 4 == 0 and w % 4 == 0, "spatial dims must be divisible by 4"
    h2, w2 = h // 4, w // 4
    m1, m2 = nb * h * w, nb * h2 * w2
    s = np.zeros((9, m2, m1), np.float32)
    for dy in range(3):
        for dx in range(3):
            t = dy * 3 + dx
            for n in range(nb):
                for u in range(h2):
                    y = 4 * u + 2 * dy - 2
                    if not (0 <= y < h):
                        continue
                    for v in range(w2):
                        x = 4 * v + 2 * dx - 2
                        if 0 <= x < w:
                            s[t, (n * h2 + u) * w2 + v, (n * h + y) * w + x] = 1.0
    return jnp.asarray(s)


# ----------------------------------------------------------------------------
# Jitted forward: minimal input glue + ONE pallas_call for the whole model.
# ----------------------------------------------------------------------------
def _prep_inputs(xs, c8):
    """NCHW -> stacked NHWC, channel pad to c8, spatial zero-pad by 1."""
    if len({x.shape[1] for x in xs}) == 1:
        xst = jnp.transpose(jnp.stack(xs), (0, 1, 3, 4, 2)).astype(jnp.float32)
        return jnp.pad(xst, ((0, 0), (0, 0), (1, 1), (1, 1),
                             (0, c8 - xst.shape[-1])))
    padded = [jnp.pad(jnp.transpose(x, (0, 2, 3, 1)).astype(jnp.float32),
                      ((0, 0), (0, 0), (0, 0), (0, c8 - x.shape[1])))
              for x in xs]
    return jnp.pad(jnp.stack(padded), ((0, 0), (0, 0), (1, 1), (1, 1), (0, 0)))


@jax.jit
def coco_dis_triple_forward(packed, gather, x_bA, x_aB, x_bC, x_cB):
    w0s, b0s, w1s, b1s, whs, bhs = packed
    xs = (x_bA, x_aB, x_bC, x_cB)
    T = len(xs)
    nb, _, h, w = x_bA.shape
    c8, ch = w0s.shape[2], w0s.shape[3]
    c2 = w1s.shape[-1]
    m1, m2 = nb * h * w, gather.shape[1]
    assert gather.shape[2] == m1 and m2 == nb * (h // 4) * (w // 4)

    xp = _prep_inputs(xs, c8)                    # (T, nb, h+2, w+2, c8) f32

    out = pl.pallas_call(
        functools.partial(_fused_dis_kernel, slope=LEAKY_SLOPE,
                          nb=nb, h=h, w=w),
        out_shape=jax.ShapeDtypeStruct((T, 8, m2), jnp.float32),
        grid=(T,),
        in_specs=[
            pl.BlockSpec((None, nb, h + 2, w + 2, c8), lambda t: (t, 0, 0, 0, 0)),
            pl.BlockSpec((None, 9, c8, ch), lambda t: (t, 0, 0, 0)),
            pl.BlockSpec((None, 1, ch), lambda t: (t, 0, 0)),
            pl.BlockSpec((None, 9, ch, c2), lambda t: (t, 0, 0, 0)),
            pl.BlockSpec((None, 1, c2), lambda t: (t, 0, 0)),
            pl.BlockSpec((None, 8, c2), lambda t: (t, 0, 0)),
            pl.BlockSpec((None, 8, 1), lambda t: (t, 0, 0)),
            pl.BlockSpec((9, m2, m1), lambda t: (0, 0, 0)),   # shared gather
        ],
        out_specs=pl.BlockSpec((None, 8, m2), lambda t: (t, 0, 0)),
        compiler_params=pltpu.CompilerParams(
            dimension_semantics=("parallel",)),
    )(xp, w0s, b0s, w1s, b1s, whs, bhs, gather)

    flat = out[:, 0, :]                          # (T, nb*Ho2*Wo2), f32
    # Matches torch's .view(-1) on the NCHW (N, 1, Ho2, Wo2) output.
    return ([flat[0]], [flat[1]], [flat[2]], [flat[3]])


# ----------------------------------------------------------------------------
# Synthetic params (PyTorch Conv2d layout) + pure-JAX f32 reference
# ----------------------------------------------------------------------------
def init_net_params(key, ch, input_dim, n_layer):
    params = []
    dims = [(input_dim, ch)]
    tch = ch
    for _ in range(1, n_layer):
        dims.append((tch, tch * 2))
        tch *= 2
    for cin, cout in dims:
        key, k1, k2 = jax.random.split(key, 3)
        wconv = jax.random.normal(k1, (cout, cin, 3, 3), jnp.float32) * 0.05
        bconv = jax.random.normal(k2, (cout,), jnp.float32) * 0.01
        params.append((wconv, bconv))
    key, k1, k2 = jax.random.split(key, 3)
    whead = jax.random.normal(k1, (1, tch, 1, 1), jnp.float32) * 0.05
    bhead = jax.random.normal(k2, (1,), jnp.float32) * 0.01
    params.append((whead, bhead))
    return params, key


def _ref_apply_net(params, x_nchw):
    h = jnp.transpose(x_nchw, (0, 2, 3, 1)).astype(jnp.float32)
    for wconv, bconv in params[:-1]:
        h = jax.lax.conv_general_dilated(
            h, jnp.transpose(wconv, (2, 3, 1, 0)).astype(jnp.float32),
            window_strides=(2, 2), padding=((1, 1), (1, 1)),
            dimension_numbers=('NHWC', 'HWIO', 'NHWC'))
        h = h + bconv
        h = jnp.where(h >= 0.0, h, LEAKY_SLOPE * h)
    whead, bhead = params[-1]
    h = jnp.einsum('nhwc,oc->nhwo', h,
                   whead.reshape(whead.shape[0], whead.shape[1])) + bhead
    return h.reshape(-1)


if __name__ == "__main__":
    # params['ch']=8, input_dim_a=b=c=3 (input_dim_d=input_dim_c), n_layer=2.
    ch, n_layer = 8, 2
    in_a = in_b = in_c = 3
    in_d = in_c

    key = jax.random.PRNGKey(0)
    pA, key = init_net_params(key, ch, in_a, n_layer)
    pB, key = init_net_params(key, ch, in_b, n_layer)
    pC, key = init_net_params(key, ch, in_c, n_layer)
    pD, key = init_net_params(key, ch, in_d, n_layer)
    all_params = (pA, pB, pC, pD)

    key, k1, k2, k3, k4 = jax.random.split(key, 5)
    x_bA = jax.random.normal(k1, (2, in_a, 16, 16), jnp.float32)
    x_aB = jax.random.normal(k2, (2, in_b, 16, 16), jnp.float32)
    x_bC = jax.random.normal(k3, (2, in_c, 16, 16), jnp.float32)
    x_cB = jax.random.normal(k4, (2, in_d, 16, 16), jnp.float32)

    # Static packing, hoisted out of the jitted forward (done once).
    C8 = 8
    packed = pack_params(all_params, C8)
    gather = build_layer1_gather(nb=2, h=16, w=16)

    outs = coco_dis_triple_forward(packed, gather, x_bA, x_aB, x_bC, x_cB)
    jax.block_until_ready(outs)

    # shape check: (N * Ho2 * Wo2) flattened logits per tower
    for o in outs:
        assert o[0].shape == (2 * 4 * 4,), o[0].shape

    # numerical check vs. a pure-JAX f32 reference
    refs = [_ref_apply_net(p, x)
            for p, x in zip(all_params, (x_bA, x_aB, x_bC, x_cB))]
    for o, r in zip(outs, refs):
        err = float(np.max(np.abs(np.asarray(o[0]) - np.asarray(r))))
        assert np.allclose(np.asarray(o[0]), np.asarray(r),
                           rtol=5e-2, atol=1e-2), err

    print("KERNEL_OK")
</pallas_src>

<mosaic_0001>
module attributes {stable_mosaic.version = 11 : i64} {
  func.func @_fused_dis_kernel(%arg0: i32, %arg1: memref<1x2x18x18x8xf32, #tpu.memory_space<vmem>>, %arg2: memref<1x9x8x8xf32, #tpu.memory_space<vmem>>, %arg3: memref<1x1x8xf32, #tpu.memory_space<vmem>>, %arg4: memref<1x9x8x16xf32, #tpu.memory_space<vmem>>, %arg5: memref<1x1x16xf32, #tpu.memory_space<vmem>>, %arg6: memref<1x8x16xf32, #tpu.memory_space<vmem>>, %arg7: memref<1x8x1xf32, #tpu.memory_space<vmem>>, %arg8: memref<9x32x512xf32, #tpu.memory_space<vmem>>, %arg9: memref<1x8x32xf32, #tpu.memory_space<vmem>>) attributes {dimension_semantics = [#tpu.dimension_semantics<parallel>], iteration_bounds = array<i64: 4>, scalar_prefetch = 0 : i64, scratch_operands = 0 : i64, tpu.core_type = #tpu.core_type<tc>, window_params = [{transform_indices = @transform_0, window_bounds = array<i64: 1, 2, 18, 18, 8>}, {transform_indices = @transform_1, window_bounds = array<i64: 1, 9, 8, 8>}, {transform_indices = @transform_2, window_bounds = array<i64: 1, 1, 8>}, {transform_indices = @transform_3, window_bounds = array<i64: 1, 9, 8, 16>}, {transform_indices = @transform_4, window_bounds = array<i64: 1, 1, 16>}, {transform_indices = @transform_5, window_bounds = array<i64: 1, 8, 16>}, {transform_indices = @transform_6, window_bounds = array<i64: 1, 8, 1>}, {pipeline_mode = #tpu.pipeline_mode<synchronous>, transform_indices = @transform_7, window_bounds = array<i64: 9, 32, 512>}, {transform_indices = @transform_8, window_bounds = array<i64: 1, 8, 32>}]} {
    %cst = arith.constant 0.000000e+00 : f32
    %0 = vector.broadcast %cst : f32 to vector<512x8xf32>
    %c0 = arith.constant 0 : index
    %c0_0 = arith.constant 0 : index
    %c0_1 = arith.constant 0 : index
    %c0_2 = arith.constant 0 : index
    %c0_3 = arith.constant 0 : index
    %1 = vector.load %arg1[%c0, %c0_0, %c0_1, %c0_2, %c0_3] : memref<1x2x18x18x8xf32, #tpu.memory_space<vmem>>, vector<1x2x16x16x8xf32>
    %2 = vector.shape_cast %1 : vector<1x2x16x16x8xf32> to vector<2x16x16x8xf32>
    %3 = vector.shape_cast %2 : vector<2x16x16x8xf32> to vector<512x8xf32>
    %c0_4 = arith.constant 0 : index
    %c0_5 = arith.constant 0 : index
    %c0_6 = arith.constant 0 : index
    %c0_7 = arith.constant 0 : index
    %4 = vector.load %arg2[%c0_4, %c0_5, %c0_6, %c0_7] : memref<1x9x8x8xf32, #tpu.memory_space<vmem>>, vector<1x1x8x8xf32>
    %5 = vector.shape_cast %4 : vector<1x1x8x8xf32> to vector<8x8xf32>
    %cst_8 = arith.constant dense<0.000000e+00> : vector<512x8xf32>
    %6 = tpu.matmul %3, %5, %cst_8 {dimension_numbers = #tpu.dot_dimension_numbers<[1], [0], [0], [1], [0, 0, 1, 1], [], []>} : vector<512x8xf32>, vector<8x8xf32>, vector<512x8xf32> -> vector<512x8xf32>
    %7 = arith.addf %0, %6 : vector<512x8xf32>
    %c0_9 = arith.constant 0 : index
    %c0_10 = arith.constant 0 : index
    %c0_11 = arith.constant 0 : index
    %c1 = arith.constant 1 : index
    %c0_12 = arith.constant 0 : index
    %8 = vector.load %arg1[%c0_9, %c0_10, %c0_11, %c1, %c0_12] : memref<1x2x18x18x8xf32, #tpu.memory_space<vmem>>, vector<1x2x16x16x8xf32>
    %9 = vector.shape_cast %8 : vector<1x2x16x16x8xf32> to vector<2x16x16x8xf32>
    %10 = vector.shape_cast %9 : vector<2x16x16x8xf32> to vector<512x8xf32>
    %c0_13 = arith.constant 0 : index
    %c1_14 = arith.constant 1 : index
    %c0_15 = arith.constant 0 : index
    %c0_16 = arith.constant 0 : index
    %11 = vector.load %arg2[%c0_13, %c1_14, %c0_15, %c0_16] : memref<1x9x8x8xf32, #tpu.memory_space<vmem>>, vector<1x1x8x8xf32>
    %12 = vector.shape_cast %11 : vector<1x1x8x8xf32> to vector<8x8xf32>
    %cst_17 = arith.constant dense<0.000000e+00> : vector<512x8xf32>
    %13 = tpu.matmul %10, %12, %cst_17 {dimension_numbers = #tpu.dot_dimension_numbers<[1], [0], [0], [1], [0, 0, 1, 1], [], []>} : vector<512x8xf32>, vector<8x8xf32>, vector<512x8xf32> -> vector<512x8xf32>
    %14 = arith.addf %7, %13 : vector<512x8xf32>
    %c0_18 = arith.constant 0 : index
    %c0_19 = arith.constant 0 : index
    %c0_20 = arith.constant 0 : index
    %c2 = arith.constant 2 : index
    %c0_21 = arith.constant 0 : index
    %15 = vector.load %arg1[%c0_18, %c0_19, %c0_20, %c2, %c0_21] : memref<1x2x18x18x8xf32, #tpu.memory_space<vmem>>, vector<1x2x16x16x8xf32>
    %16 = vector.shape_cast %15 : vector<1x2x16x16x8xf32> to vector<2x16x16x8xf32>
    %17 = vector.shape_cast %16 : vector<2x16x16x8xf32> to vector<512x8xf32>
    %c0_22 = arith.constant 0 : index
    %c2_23 = arith.constant 2 : index
    %c0_24 = arith.constant 0 : index
    %c0_25 = arith.constant 0 : index
    %18 = vector.load %arg2[%c0_22, %c2_23, %c0_24, %c0_25] : memref<1x9x8x8xf32, #tpu.memory_space<vmem>>, vector<1x1x8x8xf32>
    %19 = vector.shape_cast %18 : vector<1x1x8x8xf32> to vector<8x8xf32>
    %cst_26 = arith.constant dense<0.000000e+00> : vector<512x8xf32>
    %20 = tpu.matmul %17, %19, %cst_26 {dimension_numbers = #tpu.dot_dimension_numbers<[1], [0], [0], [1], [0, 0, 1, 1], [], []>} : vector<512x8xf32>, vector<8x8xf32>, vector<512x8xf32> -> vector<512x8xf32>
    %21 = arith.addf %14, %20 : vector<512x8xf32>
    %c0_27 = arith.constant 0 : index
    %c0_28 = arith.constant 0 : index
    %c1_29 = arith.constant 1 : index
    %c0_30 = arith.constant 0 : index
    %c0_31 = arith.constant 0 : index
    %22 = vector.load %arg1[%c0_27, %c0_28, %c1_29, %c0_30, %c0_31] : memref<1x2x18x18x8xf32, #tpu.memory_space<vmem>>, vector<1x2x16x16x8xf32>
    %23 = vector.shape_cast %22 : vector<1x2x16x16x8xf32> to vector<2x16x16x8xf32>
    %24 = vector.shape_cast %23 : vector<2x16x16x8xf32> to vector<512x8xf32>
    %c0_32 = arith.constant 0 : index
    %c3 = arith.constant 3 : index
    %c0_33 = arith.constant 0 : index
    %c0_34 = arith.constant 0 : index
    %25 = vector.load %arg2[%c0_32, %c3, %c0_33, %c0_34] : memref<1x9x8x8xf32, #tpu.memory_space<vmem>>, vector<1x1x8x8xf32>
    %26 = vector.shape_cast %25 : vector<1x1x8x8xf32> to vector<8x8xf32>
    %cst_35 = arith.constant dense<0.000000e+00> : vector<512x8xf32>
    %27 = tpu.matmul %24, %26, %cst_35 {dimension_numbers = #tpu.dot_dimension_numbers<[1], [0], [0], [1], [0, 0, 1, 1], [], []>} : vector<512x8xf32>, vector<8x8xf32>, vector<512x8xf32> -> vector<512x8xf32>
    %28 = arith.addf %21, %27 : vector<512x8xf32>
    %c0_36 = arith.constant 0 : index
    %c0_37 = arith.constant 0 : index
    %c1_38 = arith.constant 1 : index
    %c1_39 = arith.constant 1 : index
    %c0_40 = arith.constant 0 : index
    %29 = vector.load %arg1[%c0_36, %c0_37, %c1_38, %c1_39, %c0_40] : memref<1x2x18x18x8xf32, #tpu.memory_space<vmem>>, vector<1x2x16x16x8xf32>
    %30 = vector.shape_cast %29 : vector<1x2x16x16x8xf32> to vector<2x16x16x8xf32>
    %31 = vector.shape_cast %30 : vector<2x16x16x8xf32> to vector<512x8xf32>
    %c0_41 = arith.constant 0 : index
    %c4 = arith.constant 4 : index
    %c0_42 = arith.constant 0 : index
    %c0_43 = arith.constant 0 : index
    %32 = vector.load %arg2[%c0_41, %c4, %c0_42, %c0_43] : memref<1x9x8x8xf32, #tpu.memory_space<vmem>>, vector<1x1x8x8xf32>
    %33 = vector.shape_cast %32 : vector<1x1x8x8xf32> to vector<8x8xf32>
    %cst_44 = arith.constant dense<0.000000e+00> : vector<512x8xf32>
    %34 = tpu.matmul %31, %33, %cst_44 {dimension_numbers = #tpu.dot_dimension_numbers<[1], [0], [0], [1], [0, 0, 1, 1], [], []>} : vector<512x8xf32>, vector<8x8xf32>, vector<512x8xf32> -> vector<512x8xf32>
    %35 = arith.addf %28, %34 : vector<512x8xf32>
    %c0_45 = arith.constant 0 : index
    %c0_46 = arith.constant 0 : index
    %c1_47 = arith.constant 1 : index
    %c2_48 = arith.constant 2 : index
    %c0_49 = arith.constant 0 : index
    %36 = vector.load %arg1[%c0_45, %c0_46, %c1_47, %c2_48, %c0_49] : memref<1x2x18x18x8xf32, #tpu.memory_space<vmem>>, vector<1x2x16x16x8xf32>
    %37 = vector.shape_cast %36 : vector<1x2x16x16x8xf32> to vector<2x16x16x8xf32>
    %38 = vector.shape_cast %37 : vector<2x16x16x8xf32> to vector<512x8xf32>
    %c0_50 = arith.constant 0 : index
    %c5 = arith.constant 5 : index
    %c0_51 = arith.constant 0 : index
    %c0_52 = arith.constant 0 : index
    %39 = vector.load %arg2[%c0_50, %c5, %c0_51, %c0_52] : memref<1x9x8x8xf32, #tpu.memory_space<vmem>>, vector<1x1x8x8xf32>
    %40 = vector.shape_cast %39 : vector<1x1x8x8xf32> to vector<8x8xf32>
    %cst_53 = arith.constant dense<0.000000e+00> : vector<512x8xf32>
    %41 = tpu.matmul %38, %40, %cst_53 {dimension_numbers = #tpu.dot_dimension_numbers<[1], [0], [0], [1], [0, 0, 1, 1], [], []>} : vector<512x8xf32>, vector<8x8xf32>, vector<512x8xf32> -> vector<512x8xf32>
    %42 = arith.addf %35, %41 : vector<512x8xf32>
    %c0_54 = arith.constant 0 : index
    %c0_55 = arith.constant 0 : index
    %c2_56 = arith.constant 2 : index
    %c0_57 = arith.constant 0 : index
    %c0_58 = arith.constant 0 : index
    %43 = vector.load %arg1[%c0_54, %c0_55, %c2_56, %c0_57, %c0_58] : memref<1x2x18x18x8xf32, #tpu.memory_space<vmem>>, vector<1x2x16x16x8xf32>
    %44 = vector.shape_cast %43 : vector<1x2x16x16x8xf32> to vector<2x16x16x8xf32>
    %45 = vector.shape_cast %44 : vector<2x16x16x8xf32> to vector<512x8xf32>
    %c0_59 = arith.constant 0 : index
    %c6 = arith.constant 6 : index
    %c0_60 = arith.constant 0 : index
    %c0_61 = arith.constant 0 : index
    %46 = vector.load %arg2[%c0_59, %c6, %c0_60, %c0_61] : memref<1x9x8x8xf32, #tpu.memory_space<vmem>>, vector<1x1x8x8xf32>
    %47 = vector.shape_cast %46 : vector<1x1x8x8xf32> to vector<8x8xf32>
    %cst_62 = arith.constant dense<0.000000e+00> : vector<512x8xf32>
    %48 = tpu.matmul %45, %47, %cst_62 {dimension_numbers = #tpu.dot_dimension_numbers<[1], [0], [0], [1], [0, 0, 1, 1], [], []>} : vector<512x8xf32>, vector<8x8xf32>, vector<512x8xf32> -> vector<512x8xf32>
    %49 = arith.addf %42, %48 : vector<512x8xf32>
    %c0_63 = arith.constant 0 : index
    %c0_64 = arith.constant 0 : index
    %c2_65 = arith.constant 2 : index
    %c1_66 = arith.constant 1 : index
    %c0_67 = arith.constant 0 : index
    %50 = vector.load %arg1[%c0_63, %c0_64, %c2_65, %c1_66, %c0_67] : memref<1x2x18x18x8xf32, #tpu.memory_space<vmem>>, vector<1x2x16x16x8xf32>
    %51 = vector.shape_cast %50 : vector<1x2x16x16x8xf32> to vector<2x16x16x8xf32>
    %52 = vector.shape_cast %51 : vector<2x16x16x8xf32> to vector<512x8xf32>
    %c0_68 = arith.constant 0 : index
    %c7 = arith.constant 7 : index
    %c0_69 = arith.constant 0 : index
    %c0_70 = arith.constant 0 : index
    %53 = vector.load %arg2[%c0_68, %c7, %c0_69, %c0_70] : memref<1x9x8x8xf32, #tpu.memory_space<vmem>>, vector<1x1x8x8xf32>
    %54 = vector.shape_cast %53 : vector<1x1x8x8xf32> to vector<8x8xf32>
    %cst_71 = arith.constant dense<0.000000e+00> : vector<512x8xf32>
    %55 = tpu.matmul %52, %54, %cst_71 {dimension_numbers = #tpu.dot_dimension_numbers<[1], [0], [0], [1], [0, 0, 1, 1], [], []>} : vector<512x8xf32>, vector<8x8xf32>, vector<512x8xf32> -> vector<512x8xf32>
    %56 = arith.addf %49, %55 : vector<512x8xf32>
    %c0_72 = arith.constant 0 : index
    %c0_73 = arith.constant 0 : index
    %c2_74 = arith.constant 2 : index
    %c2_75 = arith.constant 2 : index
    %c0_76 = arith.constant 0 : index
    %57 = vector.load %arg1[%c0_72, %c0_73, %c2_74, %c2_75, %c0_76] : memref<1x2x18x18x8xf32, #tpu.memory_space<vmem>>, vector<1x2x16x16x8xf32>
    %58 = vector.shape_cast %57 : vector<1x2x16x16x8xf32> to vector<2x16x16x8xf32>
    %59 = vector.shape_cast %58 : vector<2x16x16x8xf32> to vector<512x8xf32>
    %c0_77 = arith.constant 0 : index
    %c8 = arith.constant 8 : index
    %c0_78 = arith.constant 0 : index
    %c0_79 = arith.constant 0 : index
    %60 = vector.load %arg2[%c0_77, %c8, %c0_78, %c0_79] : memref<1x9x8x8xf32, #tpu.memory_space<vmem>>, vector<1x1x8x8xf32>
    %61 = vector.shape_cast %60 : vector<1x1x8x8xf32> to vector<8x8xf32>
    %cst_80 = arith.constant dense<0.000000e+00> : vector<512x8xf32>
    %62 = tpu.matmul %59, %61, %cst_80 {dimension_numbers = #tpu.dot_dimension_numbers<[1], [0], [0], [1], [0, 0, 1, 1], [], []>} : vector<512x8xf32>, vector<8x8xf32>, vector<512x8xf32> -> vector<512x8xf32>
    %63 = arith.addf %56, %62 : vector<512x8xf32>
    %c0_81 = arith.constant 0 : index
    %c0_82 = arith.constant 0 : index
    %c0_83 = arith.constant 0 : index
    %64 = vector.load %arg3[%c0_81, %c0_82, %c0_83] : memref<1x1x8xf32, #tpu.memory_space<vmem>>, vector<1x1x8xf32>
    %65 = vector.shape_cast %64 : vector<1x1x8xf32> to vector<1x8xf32>
    %66 = vector.broadcast %65 : vector<1x8xf32> to vector<512x8xf32>
    %67 = arith.addf %63, %66 : vector<512x8xf32>
    %cst_84 = arith.constant 0.000000e+00 : f32
    %68 = vector.broadcast %cst_84 : f32 to vector<512x8xf32>
    %69 = arith.cmpf oge, %67, %68 : vector<512x8xf32>
    %cst_85 = arith.constant 0.00999999977 : f32
    %70 = vector.broadcast %cst_85 : f32 to vector<512x8xf32>
    %71 = arith.mulf %70, %67 : vector<512x8xf32>
    %72 = arith.select %69, %67, %71 : vector<512x8xi1>, vector<512x8xf32>
    %cst_86 = arith.constant 0.000000e+00 : f32
    %73 = vector.broadcast %cst_86 : f32 to vector<32x16xf32>
    %c0_87 = arith.constant 0 : index
    %c0_88 = arith.constant 0 : index
    %c0_89 = arith.constant 0 : index
    %74 = vector.load %arg8[%c0_87, %c0_88, %c0_89] : memref<9x32x512xf32, #tpu.memory_space<vmem>>, vector<1x32x512xf32>
    %75 = vector.shape_cast %74 : vector<1x32x512xf32> to vector<32x512xf32>
    %cst_90 = arith.constant dense<0.000000e+00> : vector<32x8xf32>
    %76 = tpu.matmul %75, %72, %cst_90 {dimension_numbers = #tpu.dot_dimension_numbers<[1], [0], [0], [1], [0, 0, 1, 1], [], []>} : vector<32x512xf32>, vector<512x8xf32>, vector<32x8xf32> -> vector<32x8xf32>
    %c0_91 = arith.constant 0 : index
    %c0_92 = arith.constant 0 : index
    %c0_93 = arith.constant 0 : index
    %c0_94 = arith.constant 0 : index
    %77 = vector.load %arg4[%c0_91, %c0_92, %c0_93, %c0_94] : memref<1x9x8x16xf32, #tpu.memory_space<vmem>>, vector<1x1x8x16xf32>
    %78 = vector.shape_cast %77 : vector<1x1x8x16xf32> to vector<8x16xf32>
    %cst_95 = arith.constant dense<0.000000e+00> : vector<32x16xf32>
    %79 = tpu.matmul %76, %78, %cst_95 {dimension_numbers = #tpu.dot_dimension_numbers<[1], [0], [0], [1], [0, 0, 1, 1], [], []>} : vector<32x8xf32>, vector<8x16xf32>, vector<32x16xf32> -> vector<32x16xf32>
    %80 = arith.addf %73, %79 : vector<32x16xf32>
    %c1_96 = arith.constant 1 : index
    %c0_97 = arith.constant 0 : index
    %c0_98 = arith.constant 0 : index
    %81 = vector.load %arg8[%c1_96, %c0_97, %c0_98] : memref<9x32x512xf32, #tpu.memory_space<vmem>>, vector<1x32x512xf32>
    %82 = vector.shape_cast %81 : vector<1x32x512xf32> to vector<32x512xf32>
    %cst_99 = arith.constant dense<0.000000e+00> : vector<32x8xf32>
    %83 = tpu.matmul %82, %72, %cst_99 {dimension_numbers = #tpu.dot_dimension_numbers<[1], [0], [0], [1], [0, 0, 1, 1], [], []>} : vector<32x512xf32>, vector<512x8xf32>, vector<32x8xf32> -> vector<32x8xf32>
    %c0_100 = arith.constant 0 : index
    %c1_101 = arith.constant 1 : index
    %c0_102 = arith.constant 0 : index
    %c0_103 = arith.constant 0 : index
    %84 = vector.load %arg4[%c0_100, %c1_101, %c0_102, %c0_103] : memref<1x9x8x16xf32, #tpu.memory_space<vmem>>, vector<1x1x8x16xf32>
    %85 = vector.shape_cast %84 : vector<1x1x8x16xf32> to vector<8x16xf32>
    %cst_104 = arith.constant dense<0.000000e+00> : vector<32x16xf32>
    %86 = tpu.matmul %83, %85, %cst_104 {dimension_numbers = #tpu.dot_dimension_numbers<[1], [0], [0], [1], [0, 0, 1, 1], [], []>} : vector<32x8xf32>, vector<8x16xf32>, vector<32x16xf32> -> vector<32x16xf32>
    %87 = arith.addf %80, %86 : vector<32x16xf32>
    %c2_105 = arith.constant 2 : index
    %c0_106 = arith.constant 0 : index
    %c0_107 = arith.constant 0 : index
    %88 = vector.load %arg8[%c2_105, %c0_106, %c0_107] : memref<9x32x512xf32, #tpu.memory_space<vmem>>, vector<1x32x512xf32>
    %89 = vector.shape_cast %88 : vector<1x32x512xf32> to vector<32x512xf32>
    %cst_108 = arith.constant dense<0.000000e+00> : vector<32x8xf32>
    %90 = tpu.matmul %89, %72, %cst_108 {dimension_numbers = #tpu.dot_dimension_numbers<[1], [0], [0], [1], [0, 0, 1, 1], [], []>} : vector<32x512xf32>, vector<512x8xf32>, vector<32x8xf32> -> vector<32x8xf32>
    %c0_109 = arith.constant 0 : index
    %c2_110 = arith.constant 2 : index
    %c0_111 = arith.constant 0 : index
    %c0_112 = arith.constant 0 : index
    %91 = vector.load %arg4[%c0_109, %c2_110, %c0_111, %c0_112] : memref<1x9x8x16xf32, #tpu.memory_space<vmem>>, vector<1x1x8x16xf32>
    %92 = vector.shape_cast %91 : vector<1x1x8x16xf32> to vector<8x16xf32>
    %cst_113 = arith.constant dense<0.000000e+00> : vector<32x16xf32>
    %93 = tpu.matmul %90, %92, %cst_113 {dimension_numbers = #tpu.dot_dimension_numbers<[1], [0], [0], [1], [0, 0, 1, 1], [], []>} : vector<32x8xf32>, vector<8x16xf32>, vector<32x16xf32> -> vector<32x16xf32>
    %94 = arith.addf %87, %93 : vector<32x16xf32>
    %c3_114 = arith.constant 3 : index
    %c0_115 = arith.constant 0 : index
    %c0_116 = arith.constant 0 : index
    %95 = vector.load %arg8[%c3_114, %c0_115, %c0_116] : memref<9x32x512xf32, #tpu.memory_space<vmem>>, vector<1x32x512xf32>
    %96 = vector.shape_cast %95 : vector<1x32x512xf32> to vector<32x512xf32>
    %cst_117 = arith.constant dense<0.000000e+00> : vector<32x8xf32>
    %97 = tpu.matmul %96, %72, %cst_117 {dimension_numbers = #tpu.dot_dimension_numbers<[1], [0], [0], [1], [0, 0, 1, 1], [], []>} : vector<32x512xf32>, vector<512x8xf32>, vector<32x8xf32> -> vector<32x8xf32>
    %c0_118 = arith.constant 0 : index
    %c3_119 = arith.constant 3 : index
    %c0_120 = arith.constant 0 : index
    %c0_121 = arith.constant 0 : index
    %98 = vector.load %arg4[%c0_118, %c3_119, %c0_120, %c0_121] : memref<1x9x8x16xf32, #tpu.memory_space<vmem>>, vector<1x1x8x16xf32>
    %99 = vector.shape_cast %98 : vector<1x1x8x16xf32> to vector<8x16xf32>
    %cst_122 = arith.constant dense<0.000000e+00> : vector<32x16xf32>
    %100 = tpu.matmul %97, %99, %cst_122 {dimension_numbers = #tpu.dot_dimension_numbers<[1], [0], [0], [1], [0, 0, 1, 1], [], []>} : vector<32x8xf32>, vector<8x16xf32>, vector<32x16xf32> -> vector<32x16xf32>
    %101 = arith.addf %94, %100 : vector<32x16xf32>
    %c4_123 = arith.constant 4 : index
    %c0_124 = arith.constant 0 : index
    %c0_125 = arith.constant 0 : index
    %102 = vector.load %arg8[%c4_123, %c0_124, %c0_125] : memref<9x32x512xf32, #tpu.memory_space<vmem>>, vector<1x32x512xf32>
    %103 = vector.shape_cast %102 : vector<1x32x512xf32> to vector<32x512xf32>
    %cst_126 = arith.constant dense<0.000000e+00> : vector<32x8xf32>
    %104 = tpu.matmul %103, %72, %cst_126 {dimension_numbers = #tpu.dot_dimension_numbers<[1], [0], [0], [1], [0, 0, 1, 1], [], []>} : vector<32x512xf32>, vector<512x8xf32>, vector<32x8xf32> -> vector<32x8xf32>
    %c0_127 = arith.constant 0 : index
    %c4_128 = arith.constant 4 : index
    %c0_129 = arith.constant 0 : index
    %c0_130 = arith.constant 0 : index
    %105 = vector.load %arg4[%c0_127, %c4_128, %c0_129, %c0_130] : memref<1x9x8x16xf32, #tpu.memory_space<vmem>>, vector<1x1x8x16xf32>
    %106 = vector.shape_cast %105 : vector<1x1x8x16xf32> to vector<8x16xf32>
    %cst_131 = arith.constant dense<0.000000e+00> : vector<32x16xf32>
    %107 = tpu.matmul %104, %106, %cst_131 {dimension_numbers = #tpu.dot_dimension_numbers<[1], [0], [0], [1], [0, 0, 1, 1], [], []>} : vector<32x8xf32>, vector<8x16xf32>, vector<32x16xf32> -> vector<32x16xf32>
    %108 = arith.addf %101, %107 : vector<32x16xf32>
    %c5_132 = arith.constant 5 : index
    %c0_133 = arith.constant 0 : index
    %c0_134 = arith.constant 0 : index
    %109 = vector.load %arg8[%c5_132, %c0_133, %c0_134] : memref<9x32x512xf32, #tpu.memory_space<vmem>>, vector<1x32x512xf32>
    %110 = vector.shape_cast %109 : vector<1x32x512xf32> to vector<32x512xf32>
    %cst_135 = arith.constant dense<0.000000e+00> : vector<32x8xf32>
    %111 = tpu.matmul %110, %72, %cst_135 {dimension_numbers = #tpu.dot_dimension_numbers<[1], [0], [0], [1], [0, 0, 1, 1], [], []>} : vector<32x512xf32>, vector<512x8xf32>, vector<32x8xf32> -> vector<32x8xf32>
    %c0_136 = arith.constant 0 : index
    %c5_137 = arith.constant 5 : index
    %c0_138 = arith.constant 0 : index
    %c0_139 = arith.constant 0 : index
    %112 = vector.load %arg4[%c0_136, %c5_137, %c0_138, %c0_139] : memref<1x9x8x16xf32, #tpu.memory_space<vmem>>, vector<1x1x8x16xf32>
    %113 = vector.shape_cast %112 : vector<1x1x8x16xf32> to vector<8x16xf32>
    %cst_140 = arith.constant dense<0.000000e+00> : vector<32x16xf32>
    %114 = tpu.matmul %111, %113, %cst_140 {dimension_numbers = #tpu.dot_dimension_numbers<[1], [0], [0], [1], [0, 0, 1, 1], [], []>} : vector<32x8xf32>, vector<8x16xf32>, vector<32x16xf32> -> vector<32x16xf32>
    %115 = arith.addf %108, %114 : vector<32x16xf32>
    %c6_141 = arith.constant 6 : index
    %c0_142 = arith.constant 0 : index
    %c0_143 = arith.constant 0 : index
    %116 = vector.load %arg8[%c6_141, %c0_142, %c0_143] : memref<9x32x512xf32, #tpu.memory_space<vmem>>, vector<1x32x512xf32>
    %117 = vector.shape_cast %116 : vector<1x32x512xf32> to vector<32x512xf32>
    %cst_144 = arith.constant dense<0.000000e+00> : vector<32x8xf32>
    %118 = tpu.matmul %117, %72, %cst_144 {dimension_numbers = #tpu.dot_dimension_numbers<[1], [0], [0], [1], [0, 0, 1, 1], [], []>} : vector<32x512xf32>, vector<512x8xf32>, vector<32x8xf32> -> vector<32x8xf32>
    %c0_145 = arith.constant 0 : index
    %c6_146 = arith.constant 6 : index
    %c0_147 = arith.constant 0 : index
    %c0_148 = arith.constant 0 : index
    %119 = vector.load %arg4[%c0_145, %c6_146, %c0_147, %c0_148] : memref<1x9x8x16xf32, #tpu.memory_space<vmem>>, vector<1x1x8x16xf32>
    %120 = vector.shape_cast %119 : vector<1x1x8x16xf32> to vector<8x16xf32>
    %cst_149 = arith.constant dense<0.000000e+00> : vector<32x16xf32>
    %121 = tpu.matmul %118, %120, %cst_149 {dimension_numbers = #tpu.dot_dimension_numbers<[1], [0], [0], [1], [0, 0, 1, 1], [], []>} : vector<32x8xf32>, vector<8x16xf32>, vector<32x16xf32> -> vector<32x16xf32>
    %122 = arith.addf %115, %121 : vector<32x16xf32>
    %c7_150 = arith.constant 7 : index
    %c0_151 = arith.constant 0 : index
    %c0_152 = arith.constant 0 : index
    %123 = vector.load %arg8[%c7_150, %c0_151, %c0_152] : memref<9x32x512xf32, #tpu.memory_space<vmem>>, vector<1x32x512xf32>
    %124 = vector.shape_cast %123 : vector<1x32x512xf32> to vector<32x512xf32>
    %cst_153 = arith.constant dense<0.000000e+00> : vector<32x8xf32>
    %125 = tpu.matmul %124, %72, %cst_153 {dimension_numbers = #tpu.dot_dimension_numbers<[1], [0], [0], [1], [0, 0, 1, 1], [], []>} : vector<32x512xf32>, vector<512x8xf32>, vector<32x8xf32> -> vector<32x8xf32>
    %c0_154 = arith.constant 0 : index
    %c7_155 = arith.constant 7 : index
    %c0_156 = arith.constant 0 : index
    %c0_157 = arith.constant 0 : index
    %126 = vector.load %arg4[%c0_154, %c7_155, %c0_156, %c0_157] : memref<1x9x8x16xf32, #tpu.memory_space<vmem>>, vector<1x1x8x16xf32>
    %127 = vector.shape_cast %126 : vector<1x1x8x16xf32> to vector<8x16xf32>
    %cst_158 = arith.constant dense<0.000000e+00> : vector<32x16xf32>
    %128 = tpu.matmul %125, %127, %cst_158 {dimension_numbers = #tpu.dot_dimension_numbers<[1], [0], [0], [1], [0, 0, 1, 1], [], []>} : vector<32x8xf32>, vector<8x16xf32>, vector<32x16xf32> -> vector<32x16xf32>
    %129 = arith.addf %122, %128 : vector<32x16xf32>
    %c8_159 = arith.constant 8 : index
    %c0_160 = arith.constant 0 : index
    %c0_161 = arith.constant 0 : index
    %130 = vector.load %arg8[%c8_159, %c0_160, %c0_161] : memref<9x32x512xf32, #tpu.memory_space<vmem>>, vector<1x32x512xf32>
    %131 = vector.shape_cast %130 : vector<1x32x512xf32> to vector<32x512xf32>
    %cst_162 = arith.constant dense<0.000000e+00> : vector<32x8xf32>
    %132 = tpu.matmul %131, %72, %cst_162 {dimension_numbers = #tpu.dot_dimension_numbers<[1], [0], [0], [1], [0, 0, 1, 1], [], []>} : vector<32x512xf32>, vector<512x8xf32>, vector<32x8xf32> -> vector<32x8xf32>
    %c0_163 = arith.constant 0 : index
    %c8_164 = arith.constant 8 : index
    %c0_165 = arith.constant 0 : index
    %c0_166 = arith.constant 0 : index
    %133 = vector.load %arg4[%c0_163, %c8_164, %c0_165, %c0_166] : memref<1x9x8x16xf32, #tpu.memory_space<vmem>>, vector<1x1x8x16xf32>
    %134 = vector.shape_cast %133 : vector<1x1x8x16xf32> to vector<8x16xf32>
    %cst_167 = arith.constant dense<0.000000e+00> : vector<32x16xf32>
    %135 = tpu.matmul %132, %134, %cst_167 {dimension_numbers = #tpu.dot_dimension_numbers<[1], [0], [0], [1], [0, 0, 1, 1], [], []>} : vector<32x8xf32>, vector<8x16xf32>, vector<32x16xf32> -> vector<32x16xf32>
    %136 = arith.addf %129, %135 : vector<32x16xf32>
    %c0_168 = arith.constant 0 : index
    %c0_169 = arith.constant 0 : index
    %c0_170 = arith.constant 0 : index
    %137 = vector.load %arg5[%c0_168, %c0_169, %c0_170] : memref<1x1x16xf32, #tpu.memory_space<vmem>>, vector<1x1x16xf32>
    %138 = vector.shape_cast %137 : vector<1x1x16xf32> to vector<1x16xf32>
    %139 = vector.broadcast %138 : vector<1x16xf32> to vector<32x16xf32>
    %140 = arith.addf %136, %139 : vector<32x16xf32>
    %cst_171 = arith.constant 0.000000e+00 : f32
    %141 = vector.broadcast %cst_171 : f32 to vector<32x16xf32>
    %142 = arith.cmpf oge, %140, %141 : vector<32x16xf32>
    %cst_172 = arith.constant 0.00999999977 : f32
    %143 = vector.broadcast %cst_172 : f32 to vector<32x16xf32>
    %144 = arith.mulf %143, %140 : vector<32x16xf32>
    %145 = arith.select %142, %140, %144 : vector<32x16xi1>, vector<32x16xf32>
    %c0_173 = arith.constant 0 : index
    %c0_174 = arith.constant 0 : index
    %c0_175 = arith.constant 0 : index
    %146 = vector.load %arg6[%c0_173, %c0_174, %c0_175] : memref<1x8x16xf32, #tpu.memory_space<vmem>>, vector<1x8x16xf32>
    %147 = vector.shape_cast %146 : vector<1x8x16xf32> to vector<8x16xf32>
    %148 = tpu.transpose %145, [1, 0] : vector<32x16xf32> -> vector<16x32xf32>
    %cst_176 = arith.constant dense<0.000000e+00> : vector<8x32xf32>
    %149 = tpu.matmul %147, %148, %cst_176 {dimension_numbers = #tpu.dot_dimension_numbers<[1], [0], [0], [1], [0, 0, 1, 1], [], []>} : vector<8x16xf32>, vector<16x32xf32>, vector<8x32xf32> -> vector<8x32xf32>
    %c0_177 = arith.constant 0 : index
    %c0_178 = arith.constant 0 : index
    %c0_179 = arith.constant 0 : index
    %150 = vector.load %arg7[%c0_177, %c0_178, %c0_179] : memref<1x8x1xf32, #tpu.memory_space<vmem>>, vector<1x8x1xf32>
    %151 = vector.shape_cast %150 : vector<1x8x1xf32> to vector<8x1xf32>
    %152 = vector.broadcast %151 : vector<8x1xf32> to vector<8x32xf32>
    %153 = arith.addf %149, %152 : vector<8x32xf32>
    %c0_180 = arith.constant 0 : index
    %c0_181 = arith.constant 0 : index
    %c0_182 = arith.constant 0 : index
    %154 = vector.load %arg9[%c0_180, %c0_181, %c0_182] : memref<1x8x32xf32, #tpu.memory_space<vmem>>, vector<1x8x32xf32>
    %155 = vector.shape_cast %154 : vector<1x8x32xf32> to vector<8x32xf32>
    %156 = vector.shape_cast %153 : vector<8x32xf32> to vector<1x8x32xf32>
    tpu.vector_store %arg9[%c0_180, %c0_181, %c0_182], %156 {strides = array<i32>} : memref<1x8x32xf32, #tpu.memory_space<vmem>>, vector<1x8x32xf32>,
    return
  }
  func.func @transform_0(%arg0: i32) -> (i32, i32, i32, i32, i32) {
    %c0_i32 = arith.constant 0 : i32
    %c0_i32_0 = arith.constant 0 : i32
    %c0_i32_1 = arith.constant 0 : i32
    %c0_i32_2 = arith.constant 0 : i32
    %c0_i32_3 = arith.constant 0 : i32
    return %arg0, %c0_i32, %c0_i32_0, %c0_i32_1, %c0_i32_2 : i32, i32, i32, i32, i32
  }
  func.func @transform_1(%arg0: i32) -> (i32, i32, i32, i32) {
    %c0_i32 = arith.constant 0 : i32
    %c0_i32_0 = arith.constant 0 : i32
    %c0_i32_1 = arith.constant 0 : i32
    %c0_i32_2 = arith.constant 0 : i32
    return %arg0, %c0_i32, %c0_i32_0, %c0_i32_1 : i32, i32, i32, i32
  }
  func.func @transform_2(%arg0: i32) -> (i32, i32, i32) {
    %c0_i32 = arith.constant 0 : i32
    %c0_i32_0 = arith.constant 0 : i32
    %c0_i32_1 = arith.constant 0 : i32
    return %arg0, %c0_i32, %c0_i32_0 : i32, i32, i32
  }
  func.func @transform_3(%arg0: i32) -> (i32, i32, i32, i32) {
    %c0_i32 = arith.constant 0 : i32
    %c0_i32_0 = arith.constant 0 : i32
    %c0_i32_1 = arith.constant 0 : i32
    %c0_i32_2 = arith.constant 0 : i32
    return %arg0, %c0_i32, %c0_i32_0, %c0_i32_1 : i32, i32, i32, i32
  }
  func.func @transform_4(%arg0: i32) -> (i32, i32, i32) {
    %c0_i32 = arith.constant 0 : i32
    %c0_i32_0 = arith.constant 0 : i32
    %c0_i32_1 = arith.constant 0 : i32
    return %arg0, %c0_i32, %c0_i32_0 : i32, i32, i32
  }
  func.func @transform_5(%arg0: i32) -> (i32, i32, i32) {
    %c0_i32 = arith.constant 0 : i32
    %c0_i32_0 = arith.constant 0 : i32
    %c0_i32_1 = arith.constant 0 : i32
    return %arg0, %c0_i32, %c0_i32_0 : i32, i32, i32
  }
  func.func @transform_6(%arg0: i32) -> (i32, i32, i32) {
    %c0_i32 = arith.constant 0 : i32
    %c0_i32_0 = arith.constant 0 : i32
    %c0_i32_1 = arith.constant 0 : i32
    return %arg0, %c0_i32, %c0_i32_0 : i32, i32, i32
  }
  func.func @transform_7(%arg0: i32) -> (i32, i32, i32) {
    %c0_i32 = arith.constant 0 : i32
    %c0_i32_0 = arith.constant 0 : i32
    %c0_i32_1 = arith.constant 0 : i32
    %c0_i32_2 = arith.constant 0 : i32
    return %c0_i32, %c0_i32_0, %c0_i32_1 : i32, i32, i32
  }
  func.func @transform_8(%arg0: i32) -> (i32, i32, i32) {
    %c0_i32 = arith.constant 0 : i32
    %c0_i32_0 = arith.constant 0 : i32
    %c0_i32_1 = arith.constant 0 : i32
    return %arg0, %c0_i32, %c0_i32_0 : i32, i32, i32
  }
}

</mosaic_0001>

<bundles_post_ra>
// kernel: coco_dis_triple_forward.1
= control target key start
LH: loop header
LB: loop body
LE: loop exit
PB: predicated region body
PF: predicated region fallthrough
CT: control target
= control target key end

     0   :  { %s13365_s27 = smov 0   ;;  %s17849_s0 = inlined_call_operand.vmem [shape: f32[4,2,18,18,8], index: 0, kind: input, shape index: {}]   ;;  %s17850_s1 = inlined_call_operand.vmem [shape: f32[4,9,8,8], index: 1, kind: input, shape index: {}]   ;;  %s17851_s2 = inlined_call_operand.vmem [shape: f32[4,1,8], index: 2, kind: input, shape index: {}]   ;;  %s17852_s3 = inlined_call_operand.vmem [shape: f32[4,9,8,16], index: 3, kind: input, shape index: {}]   ;;  %s17853_s4 = inlined_call_operand.vmem [shape: f32[4,1,16], index: 4, kind: input, shape index: {}]   ;;  %s17854_s5 = inlined_call_operand.vmem [shape: f32[4,8,16], index: 5, kind: input, shape index: {}]   ;;  %s17855_s6 = inlined_call_operand.vmem [shape: f32[4,8,1], index: 6, kind: input, shape index: {}]   ;;  %s17856_s7 = inlined_call_operand.vmem [shape: f32[9,32,512], index: 7, kind: input, shape index: {}]   ;;  %s17857_s8 = inlined_call_operand.vmem [shape: f32[4,8,32], index: 8, kind: output, shape index: {}]  }
   0x1 LB: > { %s9743_s28 = sadd.s32 4294967295, %s13315_s27   ;;  %p9747_p0 = scmp.ge.s32.totalorder %s13315_s27, 1  ;;  %s13315_s27 = sphi %s13365_s27, %s18_s27  }
   0x2   : > { %p316_p1 = scmp.lt.s32.totalorder %s13315_s27, 5 }
   0x4   : > { %p317_p2 = pnand %p9747_p0, %p316_p1 }
   0x6   : > { %320 = sbr.rel (%p317_p2) target bundleno = 3232 (0xca0), region = 52 }
   0xb   : > { %p373_p3 = scmp.lt.s32.totalorder %s9743_s28, 3  ;;  %vm537_vm0 = vcmask 64512  }
   0xd   : > { %s18807_s28 = smov (!%p373_p3, %s9743_s28), 3 }
   0xe   : > { %s13295_s29 = smul.u32 864, %s18807_s28  ;;  %s385_s21 = scalar_lea.vmem %s17851_s2, %s18807_s28 }
   0xf   : > { %s13296_s30 = smul.u32 72, %s18807_s28  ;;  %s393_s9 = scalar_lea.vmem %s17853_s4, %s18807_s28 }
  0x10   : > { %s13380_s11 = scalar_lea.vmem %s17849_s0, %s13295_s29 }
  0x11   : > { %s13387_s14 = scalar_lea.vmem %s17850_s1, %s13296_s30  ;;  %v471_v0 = vld [vmem:[%s13380_s11 + $0x1] sm:$0xff]  ;;  %v472_v2 = vld [vmem:[%s13380_s11 + $0x9] sm:$0xff]  ;;  %v473_v6 = vld [vmem:[%s13380_s11 + $0x19] sm:$0xff]  ;;  %s16438_s24 = scalar_lea.vmem %s17852_s3, %s13296_s30 }
  0x12   : > { %v406_v1 = vld [vmem:[%s13380_s11] sm:$0xff]  ;;  %v9754_v3 = vld [vmem:[%s13387_s14 + $0x8] sm:$0xff]  ;;  %12332 = vmatprep.mubr.msk.f32.mxu0 %vm537_vm0, %v471_v0  ;;  %v13399_v7 = vld [vmem:[%s13380_s11 + $0x18] sm:$0xff] }
  0x13   : > { %v470_v4 = vld [vmem:[%s13387_s14] sm:$0xff]  ;;  %12430 = vmatprep.mubr.msk.f32.mxu1 %vm537_vm0, %v406_v1  ;;  %v407_v5 = vld [vmem:[%s13380_s11 + $0x8] sm:$0xff]  ;;  %12330 = vmatprep.subr.mxu0 %v9754_v3  ;;  %v475_v10 = vld [vmem:[%s13380_s11 + $0x31] sm:$0xff] }
  0x14   : > { %12428 = vmatprep.subr.mxu1 %v470_v4  ;;  %12331 = vmatpush3.msra.mxu0 %v9754_v3  ;;  %v474_v8 = vld [vmem:[%s13380_s11 + $0x21] sm:$0xff]  ;;  %v13412_v11 = vld [vmem:[%s13380_s11 + $0x30] sm:$0xff]  ;;  %v476_v12 = vld [vmem:[%s13380_s11 + $0x39] sm:$0xff] }
  0x15   : > { %12429 = vmatpush3.msra.mxu1 %v470_v4  ;;  %12333 = vmatmul.mubr.msk.f32.vlgmr.msra.gmra.mxu0 %vm537_vm0, %v472_v2  ;;  %v13408_v9 = vld [vmem:[%s13380_s11 + $0x20] sm:$0xff]  ;;  %v13422_v13 = vld [vmem:[%s13380_s11 + $0x38] sm:$0xff]  ;;  %v477_v14 = vld [vmem:[%s13380_s11 + $0x49] sm:$0xff] }
  0x16   : > { %12431 = vmatmul.mubr.msk.f32.vlgmr.msra.gmra.mxu1 %vm537_vm0, %v407_v5  ;;  %12335 = vmatprep.mubr.msk.f32.mxu0 %vm537_vm0, %v473_v6  ;;  %v13426_v15 = vld [vmem:[%s13380_s11 + $0x48] sm:$0xff]  ;;  %v478_v16 = vld [vmem:[%s13380_s11 + $0x51] sm:$0xff]  ;;  %v13440_v19 = vld [vmem:[%s13380_s11 + $0x60] sm:$0xff] }
  0x17   : > { %12433 = vmatprep.mubr.msk.f32.mxu1 %vm537_vm0, %v13399_v7  ;;  %v13436_v17 = vld [vmem:[%s13380_s11 + $0x50] sm:$0xff]  ;;  %v479_v18 = vld [vmem:[%s13380_s11 + $0x61] sm:$0xff]  ;;  %v481_v22 = vld [vmem:[%s13380_s11 + $0x79] sm:$0xff] }
  0x18   : > { %v480_v20 = vld [vmem:[%s13380_s11 + $0x69] sm:$0xff]  ;;  %v13454_v23 = vld [vmem:[%s13380_s11 + $0x78] sm:$0xff]  ;;  %v482_v24 = vld [vmem:[%s13380_s11 + $0x81] sm:$0xff] }
  0x19   : > { %12336 = vmatmul.mubr.msk.f32.gmra.mxu0 %vm537_vm0, %v474_v8  ;;  %v13450_v21 = vld [vmem:[%s13380_s11 + $0x68] sm:$0xff]  ;;  %v13464_v25 = vld [vmem:[%s13380_s11 + $0x80] sm:$0xff]  ;;  %v483_v26 = vld [vmem:[%s13380_s11 + $0x91] sm:$0xff] }
  0x1a   : > { %12434 = vmatmul.mubr.msk.f32.gmra.mxu1 %vm537_vm0, %v13408_v9  ;;  %12338 = vmatprep.mubr.msk.f32.mxu0 %vm537_vm0, %v475_v10  ;;  %v13468_v27 = vld [vmem:[%s13380_s11 + $0x90] sm:$0xff]  ;;  %v484_v29 = vld [vmem:[%s13380_s11 + $0x99] sm:$0xff]  ;;  %v13483_v32 = vld [vmem:[%s13380_s11 + $0xa8] sm:$0xff] }
  0x1b   : > { %12436 = vmatprep.mubr.msk.f32.mxu1 %vm537_vm0, %v13412_v11  ;;  %v9883_v28 = vld [vmem:[%s13387_s14 + $0x10] sm:$0xff]  ;;  %v13479_v30 = vld [vmem:[%s13380_s11 + $0x98] sm:$0xff]  ;;  %v487_v35 = vld [vmem:[%s13380_s11 + $0xc1] sm:$0xff] }
  0x1c   : > { %12526 = vmatprep.subr.mxu0 %v9883_v28  ;;  %v485_v31 = vld [vmem:[%s13380_s11 + $0xa9] sm:$0xff]  ;;  %v486_v33 = vld [vmem:[%s13380_s11 + $0xb1] sm:$0xff]  ;;  %v13497_v36 = vld [vmem:[%s13380_s11 + $0xc0] sm:$0xff] }
  0x1d   : > { %12339 = vmatmul.mubr.msk.f32.gmra.mxu0 %vm537_vm0, %v476_v12  ;;  %v13493_v34 = vld [vmem:[%s13380_s11 + $0xb0] sm:$0xff]  ;;  %v13507_v38 = vld [vmem:[%s13380_s11 + $0xc8] sm:$0xff]  ;;  %v489_v39 = vld [vmem:[%s13380_s11 + $0xd9] sm:$0xff] }
  0x1e   : > { %12437 = vmatmul.mubr.msk.f32.gmra.mxu1 %vm537_vm0, %v13422_v13  ;;  %12341 = vmatprep.mubr.msk.f32.mxu0 %vm537_vm0, %v477_v14  ;;  %v488_v37 = vld [vmem:[%s13380_s11 + $0xc9] sm:$0xff]  ;;  %v13511_v40 = vld [vmem:[%s13380_s11 + $0xd8] sm:$0xff]  ;;  %v490_v41 = vld [vmem:[%s13380_s11 + $0xe1] sm:$0xff] }
  0x1f   : > { %12439 = vmatprep.mubr.msk.f32.mxu1 %vm537_vm0, %v13426_v15  ;;  %12527 = vmatpush3.msra.mxu0 %v9883_v28  ;;  %v13521_v42 = vld [vmem:[%s13380_s11 + $0xe0] sm:$0xff]  ;;  %v491_v43 = vld [vmem:[%s13380_s11 + $0xf1] sm:$0xff]  ;;  %v493_v47 = vld [vmem:[%s13380_s11 + $0x109] sm:$0xff] }
  0x20   : > { %v13525_v44 = vld [vmem:[%s13380_s11 + $0xf0] sm:$0xff]  ;;  %v492_v45 = vld [vmem:[%s13380_s11 + $0xf9] sm:$0xff]  ;;  %v13539_v48 = vld [vmem:[%s13380_s11 + $0x108] sm:$0xff] }
  0x21   : > { %12342 = vmatmul.mubr.msk.f32.gmra.mxu0 %vm537_vm0, %v478_v16  ;;  %v13535_v46 = vld [vmem:[%s13380_s11 + $0xf8] sm:$0xff]  ;;  %v13550_v51 = vld [vmem:[%s13380_s11 + $0x110] sm:$0xff]  ;;  %v495_v52 = vld [vmem:[%s13380_s11 + $0x121] sm:$0xff] }
  0x22   : > { %12440 = vmatmul.mubr.msk.f32.gmra.mxu1 %vm537_vm0, %v13436_v17  ;;  %12344 = vmatprep.mubr.msk.f32.mxu0 %vm537_vm0, %v479_v18  ;;  %v10012_v49 = vld [vmem:[%s13387_s14 + $0x18] sm:$0xff]  ;;  %v13554_v53 = vld [vmem:[%s13380_s11 + $0x120] sm:$0xff]  ;;  %v496_v54 = vld [vmem:[%s13380_s11 + $0x129] sm:$0xff] }
  0x23   : > { %12442 = vmatprep.mubr.msk.f32.mxu1 %vm537_vm0, %v13440_v19  ;;  %v494_v50 = vld [vmem:[%s13380_s11 + $0x111] sm:$0xff]  ;;  %12624 = vmatprep.subr.mxu1 %v10012_v49  ;;  %v13564_v55 = vld [vmem:[%s13380_s11 + $0x128] sm:$0xff]  ;;  %v497_v56 = vld [vmem:[%s13380_s11 + $0x139] sm:$0xff] }
  0x24   : > { %12625 = vmatpush3.msra.mxu1 %v10012_v49  ;;  %v13568_v57 = vld [vmem:[%s13380_s11 + $0x138] sm:$0xff]  ;;  %v498_v58 = vld [vmem:[%s13380_s11 + $0x141] sm:$0xff]  ;;  %v13582_v61 = vld [vmem:[%s13380_s11 + $0x150] sm:$0xff] }
  0x25   : > { %12345 = vmatmul.mubr.msk.f32.gmra.mxu0 %vm537_vm0, %v480_v20  ;;  %v13578_v59 = vld [vmem:[%s13380_s11 + $0x140] sm:$0xff]  ;;  %v499_v60 = vld [vmem:[%s13380_s11 + $0x151] sm:$0xff]  ;;  %v501_v0 = vld [vmem:[%s13380_s11 + $0x169] sm:$0xff] }
  0x26   : > { %12443 = vmatmul.mubr.msk.f32.gmra.mxu1 %vm537_vm0, %v13450_v21  ;;  %12347 = vmatprep.mubr.msk.f32.mxu0 %vm537_vm0, %v481_v22  ;;  %v500_v62 = vld [vmem:[%s13380_s11 + $0x159] sm:$0xff]  ;;  %v13596_v1 = vld [vmem:[%s13380_s11 + $0x168] sm:$0xff]  ;;  %v502_v2 = vld [vmem:[%s13380_s11 + $0x171] sm:$0xff] }
  0x27   : > { %12445 = vmatprep.mubr.msk.f32.mxu1 %vm537_vm0, %v13454_v23  ;;  %v13592_v63 = vld [vmem:[%s13380_s11 + $0x158] sm:$0xff]  ;;  %v13606_v3 = vld [vmem:[%s13380_s11 + $0x170] sm:$0xff]  ;;  %v13618_v10 = vld [vmem:[%s13387_s14 + $0x20] sm:$0xff] }
  0x28   : > { %v503_v4 = vld [vmem:[%s13380_s11 + $0x1b1] sm:$0xff]  ;;  %v504_v6 = vld [vmem:[%s13380_s11 + $0x1b9] sm:$0xff]  ;;  %v505_v12 = vld [vmem:[%s13380_s11 + $0x1c9] sm:$0xff]  ;;  %12722 = vmatprep.subr.mxu0 %v13618_v10 }
  0x29   : > { %12348 = vmatmul.mubr.msk.f32.gmra.mxu0 %vm537_vm0, %v482_v24  ;;  %v438_v5 = vld [vmem:[%s13380_s11 + $0x1b0] sm:$0xff]  ;;  %v439_v8 = vld [vmem:[%s13380_s11 + $0x1b8] sm:$0xff]  ;;  %v13622_v14 = vld [vmem:[%s13380_s11 + $0x1c8] sm:$0xff] }
  0x2a   : > { %12446 = vmatmul.mubr.msk.f32.gmra.mxu1 %vm537_vm0, %v13464_v25  ;;  %12350 = vmatprep.mubr.msk.f32.mxu0 %vm537_vm0, %v483_v26  ;;  %v506_v16 = vld [vmem:[%s13380_s11 + $0x1d1] sm:$0xff]  ;;  %v507_v20 = vld [vmem:[%s13380_s11 + $0x1e1] sm:$0xff]  ;;  %v508_v24 = vld [vmem:[%s13380_s11 + $0x1e9] sm:$0xff] }
  0x2b   : > { %12448 = vmatprep.mubr.msk.f32.mxu1 %vm537_vm0, %v13468_v27  ;;  %v13632_v18 = vld [vmem:[%s13380_s11 + $0x1d0] sm:$0xff]  ;;  %v13636_v22 = vld [vmem:[%s13380_s11 + $0x1e0] sm:$0xff]  ;;  %v13646_v26 = vld [vmem:[%s13380_s11 + $0x1e8] sm:$0xff] }
  0x2c   : > { %v509_v28 = vld [vmem:[%s13380_s11 + $0x1f9] sm:$0xff]  ;;  %v13688_v49 = vld [vmem:[%s13380_s11 + $0x230] sm:$0xff] }
  0x2d   : > { %12351 = vmatmul.mubr.msk.f32.gmra.mxu0 %vm537_vm0, %v484_v29  ;;  %v13650_v29 = vld [vmem:[%s13380_s11 + $0x1f8] sm:$0xff] }
  0x2e   : > { %12449 = vmatmul.mubr.msk.f32.gmra.mxu1 %vm537_vm0, %v13479_v30  ;;  %12353 = vmatprep.mubr.msk.f32.mxu0 %vm537_vm0, %v485_v31  ;;  %v510_v31 = vld [vmem:[%s13380_s11 + $0x201] sm:$0xff] }
  0x2f   : > { %12451 = vmatprep.mubr.msk.f32.mxu1 %vm537_vm0, %v13483_v32 }
  0x31   : > { %12354 = vmatmul.mubr.msk.f32.gmra.mxu0 %vm537_vm0, %v486_v33  ;;  %v13660_v33 = vld [vmem:[%s13380_s11 + $0x200] sm:$0xff] }
  0x32   : > { %12452 = vmatmul.mubr.msk.f32.gmra.mxu1 %vm537_vm0, %v13493_v34  ;;  %12356 = vmatprep.mubr.msk.f32.mxu0 %vm537_vm0, %v487_v35  ;;  %v511_v35 = vld [vmem:[%s13380_s11 + $0x211] sm:$0xff] }
  0x33   : > { %12454 = vmatprep.mubr.msk.f32.mxu1 %vm537_vm0, %v13497_v36 }
  0x35   : > { %12357 = vmatmul.mubr.msk.f32.gmra.mxu0 %vm537_vm0, %v488_v37  ;;  %v13664_v37 = vld [vmem:[%s13380_s11 + $0x210] sm:$0xff] }
  0x36   : > { %12455 = vmatmul.mubr.msk.f32.gmra.mxu1 %vm537_vm0, %v13507_v38  ;;  %12359 = vmatprep.mubr.msk.f32.mxu0 %vm537_vm0, %v489_v39  ;;  %v512_v39 = vld [vmem:[%s13380_s11 + $0x219] sm:$0xff] }
  0x37   : > { %12457 = vmatprep.mubr.msk.f32.mxu1 %vm537_vm0, %v13511_v40 }
  0x39   : > { %12360 = vmatmul.mubr.msk.f32.gmra.mxu0 %vm537_vm0, %v490_v41  ;;  %v13674_v41 = vld [vmem:[%s13380_s11 + $0x218] sm:$0xff] }
  0x3a   : > { %12458 = vmatmul.mubr.msk.f32.gmra.mxu1 %vm537_vm0, %v13521_v42  ;;  %12362 = vmatprep.mubr.msk.f32.mxu0 %vm537_vm0, %v491_v43  ;;  %v513_v43 = vld [vmem:[%s13380_s11 + $0x229] sm:$0xff] }
  0x3b   : > { %12460 = vmatprep.mubr.msk.f32.mxu1 %vm537_vm0, %v13525_v44 }
  0x3d   : > { %12363 = vmatmul.mubr.msk.f32.gmra.mxu0 %vm537_vm0, %v492_v45  ;;  %v13678_v45 = vld [vmem:[%s13380_s11 + $0x228] sm:$0xff] }
  0x3e   : > { %12461 = vmatmul.mubr.msk.f32.gmra.mxu1 %vm537_vm0, %v13535_v46  ;;  %12365 = vmatprep.mubr.msk.f32.mxu0 %vm537_vm0, %v493_v47  ;;  %v514_v47 = vld [vmem:[%s13380_s11 + $0x231] sm:$0xff] }
  0x3f   : > { %12463 = vmatprep.mubr.msk.f32.mxu1 %vm537_vm0, %v13539_v48 }
  0x41   : > { %12366 = vmatmul.mubr.msk.f32.gmra.mxu0 %vm537_vm0, %v494_v50  ;;  %v515_v50 = vld [vmem:[%s13380_s11 + $0x241] sm:$0xff] }
  0x42   : > { %12464 = vmatmul.mubr.msk.f32.gmra.mxu1 %vm537_vm0, %v13550_v51  ;;  %12368 = vmatprep.mubr.msk.f32.mxu0 %vm537_vm0, %v495_v52  ;;  %v13692_v52 = vld [vmem:[%s13380_s11 + $0x240] sm:$0xff] }
  0x43   : > { %12466 = vmatprep.mubr.msk.f32.mxu1 %vm537_vm0, %v13554_v53 }
  0x45   : > { %12369 = vmatmul.mubr.msk.f32.gmra.mxu0 %vm537_vm0, %v496_v54  ;;  %v516_v54 = vld [vmem:[%s13380_s11 + $0x249] sm:$0xff] }
  0x46   : > { %12467 = vmatmul.mubr.msk.f32.gmra.mxu1 %vm537_vm0, %v13564_v55  ;;  %12371 = vmatprep.mubr.msk.f32.mxu0 %vm537_vm0, %v497_v56  ;;  %v13702_v56 = vld [vmem:[%s13380_s11 + $0x248] sm:$0xff] }
  0x47   : > { %12469 = vmatprep.mubr.msk.f32.mxu1 %vm537_vm0, %v13568_v57 }
  0x49   : > { %12372 = vmatmul.mubr.msk.f32.gmra.mxu0 %vm537_vm0, %v498_v58  ;;  %v517_v58 = vld [vmem:[%s13380_s11 + $0x259] sm:$0xff] }
  0x4a   : > { %12470 = vmatmul.mubr.msk.f32.gmra.mxu1 %vm537_vm0, %v13578_v59  ;;  %12374 = vmatprep.mubr.msk.f32.mxu0 %vm537_vm0, %v499_v60  ;;  %v13706_v60 = vld [vmem:[%s13380_s11 + $0x258] sm:$0xff] }
  0x4b   : > { %12472 = vmatprep.mubr.msk.f32.mxu1 %vm537_vm0, %v13582_v61 }
  0x4d   : > { %12375 = vmatmul.mubr.msk.f32.gmra.mxu0 %vm537_vm0, %v500_v62  ;;  %v518_v62 = vld [vmem:[%s13380_s11 + $0x261] sm:$0xff] }
  0x4e   : > { %12473 = vmatmul.mubr.msk.f32.gmra.mxu1 %vm537_vm0, %v13592_v63  ;;  %12377 = vmatprep.mubr.msk.f32.mxu0 %vm537_vm0, %v501_v0  ;;  %v13716_v0 = vld [vmem:[%s13380_s11 + $0x260] sm:$0xff] }
  0x4f   : > { %12475 = vmatprep.mubr.msk.f32.mxu1 %vm537_vm0, %v13596_v1 }
  0x51   : > { %12378 = vmatmul.mubr.msk.f32.gmra.mxu0 %vm537_vm0, %v502_v2  ;;  %v519_v2 = vld [vmem:[%s13380_s11 + $0x271] sm:$0xff] }
  0x52   : > { %12476 = vmatmul.mubr.msk.f32.gmra.mxu1 %vm537_vm0, %v13606_v3  ;;  %12380 = vmatprep.mubr.msk.f32.mxu0 %vm537_vm0, %v503_v4  ;;  %v13720_v4 = vld [vmem:[%s13380_s11 + $0x270] sm:$0xff] }
  0x53   : > { %12478 = vmatprep.mubr.msk.f32.mxu1 %vm537_vm0, %v438_v5  ;;  %v520_v5 = vld [vmem:[%s13380_s11 + $0x279] sm:$0xff] }
  0x55   : > { %12381 = vmatmul.mubr.msk.f32.gmra.mxu0 %vm537_vm0, %v504_v6  ;;  %v13730_v6 = vld [vmem:[%s13380_s11 + $0x278] sm:$0xff] }
  0x56   : > { %12479 = vmatmul.mubr.msk.f32.gmra.mxu1 %vm537_vm0, %v439_v8  ;;  %12383 = vmatprep.mubr.msk.f32.mxu0 %vm537_vm0, %v505_v12  ;;  %v521_v8 = vld [vmem:[%s13380_s11 + $0x289] sm:$0xff] }
  0x57   : > { %12481 = vmatprep.mubr.msk.f32.mxu1 %vm537_vm0, %v13622_v14  ;;  %v13734_v12 = vld [vmem:[%s13380_s11 + $0x288] sm:$0xff] }
  0x59   : > { %12384 = vmatmul.mubr.msk.f32.gmra.mxu0 %vm537_vm0, %v506_v16  ;;  %v522_v16 = vld [vmem:[%s13380_s11 + $0x291] sm:$0xff] }
  0x5a   : > { %12482 = vmatmul.mubr.msk.f32.gmra.mxu1 %vm537_vm0, %v13632_v18  ;;  %12386 = vmatprep.mubr.msk.f32.mxu0 %vm537_vm0, %v507_v20  ;;  %v13744_v20 = vld [vmem:[%s13380_s11 + $0x290] sm:$0xff] }
  0x5b   : > { %12484 = vmatprep.mubr.msk.f32.mxu1 %vm537_vm0, %v13636_v22 }
  0x5d   : > { %12387 = vmatmul.mubr.msk.f32.gmra.mxu0 %vm537_vm0, %v508_v24  ;;  %v523_v24 = vld [vmem:[%s13380_s11 + $0x2a1] sm:$0xff] }
  0x5e   : > { %12485 = vmatmul.mubr.msk.f32.gmra.mxu1 %vm537_vm0, %v13646_v26  ;;  %12389 = vmatprep.mubr.msk.f32.mxu0 %vm537_vm0, %v509_v28  ;;  %v13748_v28 = vld [vmem:[%s13380_s11 + $0x2a0] sm:$0xff] }
  0x5f   : > { %12487 = vmatprep.mubr.msk.f32.mxu1 %vm537_vm0, %v13650_v29 }
  0x61   : > { %12390 = vmatmul.mubr.msk.f32.gmra.mxu0 %vm537_vm0, %v510_v31  ;;  %v524_v31 = vld [vmem:[%s13380_s11 + $0x2a9] sm:$0xff] }
  0x62   : > { %12488 = vmatmul.mubr.msk.f32.gmra.mxu1 %vm537_vm0, %v13660_v33  ;;  %12392 = vmatprep.mubr.msk.f32.mxu0 %vm537_vm0, %v511_v35  ;;  %v13758_v35 = vld [vmem:[%s13380_s11 + $0x2a8] sm:$0xff] }
  0x63   : > { %12490 = vmatprep.mubr.msk.f32.mxu1 %vm537_vm0, %v13664_v37 }
  0x65   : > { %12393 = vmatmul.mubr.msk.f32.gmra.mxu0 %vm537_vm0, %v512_v39  ;;  %v525_v39 = vld [vmem:[%s13380_s11 + $0x2b9] sm:$0xff] }
  0x66   : > { %12491 = vmatmul.mubr.msk.f32.gmra.mxu1 %vm537_vm0, %v13674_v41  ;;  %12395 = vmatprep.mubr.msk.f32.mxu0 %vm537_vm0, %v513_v43  ;;  %v13762_v43 = vld [vmem:[%s13380_s11 + $0x2b8] sm:$0xff] }
  0x67   : > { %12493 = vmatprep.mubr.msk.f32.mxu1 %vm537_vm0, %v13678_v45 }
  0x69   : > { %12396 = vmatmul.mubr.msk.f32.gmra.mxu0 %vm537_vm0, %v514_v47  ;;  %v526_v47 = vld [vmem:[%s13380_s11 + $0x2c1] sm:$0xff] }
  0x6a   : > { %12494 = vmatmul.mubr.msk.f32.gmra.mxu1 %vm537_vm0, %v13688_v49  ;;  %12398 = vmatprep.mubr.msk.f32.mxu0 %vm537_vm0, %v515_v50  ;;  %v13772_v50 = vld [vmem:[%s13380_s11 + $0x2c0] sm:$0xff] }
  0x6b   : > { %12496 = vmatprep.mubr.msk.f32.mxu1 %vm537_vm0, %v13692_v52 }
  0x6d   : > { %12399 = vmatmul.mubr.msk.f32.gmra.mxu0 %vm537_vm0, %v516_v54  ;;  %v527_v54 = vld [vmem:[%s13380_s11 + $0x2d1] sm:$0xff] }
  0x6e   : > { %12497 = vmatmul.mubr.msk.f32.gmra.mxu1 %vm537_vm0, %v13702_v56  ;;  %12401 = vmatprep.mubr.msk.f32.mxu0 %vm537_vm0, %v517_v58  ;;  %v13776_v58 = vld [vmem:[%s13380_s11 + $0x2d0] sm:$0xff] }
  0x6f   : > { %12499 = vmatprep.mubr.msk.f32.mxu1 %vm537_vm0, %v13706_v60 }
  0x71   : > { %12402 = vmatmul.mubr.msk.f32.gmra.mxu0 %vm537_vm0, %v518_v62  ;;  %v528_v62 = vld [vmem:[%s13380_s11 + $0x2d9] sm:$0xff] }
  0x72   : > { %12500 = vmatmul.mubr.msk.f32.gmra.mxu1 %vm537_vm0, %v13716_v0  ;;  %12404 = vmatprep.mubr.msk.f32.mxu0 %vm537_vm0, %v519_v2  ;;  %v13786_v2 = vld [vmem:[%s13380_s11 + $0x2d8] sm:$0xff] }
  0x73   : > { %12502 = vmatprep.mubr.msk.f32.mxu1 %vm537_vm0, %v13720_v4 }
  0x75   : > { %12405 = vmatmul.mubr.msk.f32.gmra.mxu0 %vm537_vm0, %v520_v5  ;;  %v529_v5 = vld [vmem:[%s13380_s11 + $0x2e9] sm:$0xff] }
  0x76   : > { %12503 = vmatmul.mubr.msk.f32.gmra.mxu1 %vm537_vm0, %v13730_v6  ;;  %12407 = vmatprep.mubr.msk.f32.mxu0 %vm537_vm0, %v521_v8  ;;  %v13790_v8 = vld [vmem:[%s13380_s11 + $0x2e8] sm:$0xff] }
  0x77   : > { %12505 = vmatprep.mubr.msk.f32.mxu1 %vm537_vm0, %v13734_v12 }
  0x79   : > { %12408 = vmatmul.mubr.msk.f32.gmra.mxu0 %vm537_vm0, %v522_v16  ;;  %v530_v16 = vld [vmem:[%s13380_s11 + $0x2f1] sm:$0xff] }
  0x7a   : > { %12506 = vmatmul.mubr.msk.f32.gmra.mxu1 %vm537_vm0, %v13744_v20  ;;  %12410 = vmatprep.mubr.msk.f32.mxu0 %vm537_vm0, %v523_v24  ;;  %v13800_v24 = vld [vmem:[%s13380_s11 + $0x2f0] sm:$0xff] }
  0x7b   : > { %12508 = vmatprep.mubr.msk.f32.mxu1 %vm537_vm0, %v13748_v28 }
  0x7d   : > { %12411 = vmatmul.mubr.msk.f32.gmra.mxu0 %vm537_vm0, %v524_v31  ;;  %v531_v31 = vld [vmem:[%s13380_s11 + $0x301] sm:$0xff] }
  0x7e   : > { %12509 = vmatmul.mubr.msk.f32.gmra.mxu1 %vm537_vm0, %v13758_v35  ;;  %12413 = vmatprep.mubr.msk.f32.mxu0 %vm537_vm0, %v525_v39  ;;  %v13804_v39 = vld [vmem:[%s13380_s11 + $0x300] sm:$0xff] }
  0x7f   : > { %12511 = vmatprep.mubr.msk.f32.mxu1 %vm537_vm0, %v13762_v43  ;;  %18032 = vst [vmem:[#allocation2_spill] sm:$0xff] %v13804_v39 }
  0x81   : > { %12414 = vmatmul.mubr.msk.f32.gmra.mxu0 %vm537_vm0, %v526_v47  ;;  %v532_v47 = vld [vmem:[%s13380_s11 + $0x309] sm:$0xff] }
  0x82   : > { %12512 = vmatmul.mubr.msk.f32.gmra.mxu1 %vm537_vm0, %v13772_v50  ;;  %12416 = vmatprep.mubr.msk.f32.mxu0 %vm537_vm0, %v527_v54  ;;  %v13814_v54 = vld [vmem:[%s13380_s11 + $0x308] sm:$0xff] }
  0x83   : > { %12514 = vmatprep.mubr.msk.f32.mxu1 %vm537_vm0, %v13776_v58 }
  0x85   : > { %12417 = vmatmul.mubr.msk.f32.gmra.mxu0 %vm537_vm0, %v528_v62  ;;  %v533_v62 = vld [vmem:[%s13380_s11 + $0x319] sm:$0xff] }
  0x86   : > { %12515 = vmatmul.mubr.msk.f32.gmra.mxu1 %vm537_vm0, %v13786_v2  ;;  %12419 = vmatprep.mubr.msk.f32.mxu0 %vm537_vm0, %v529_v5  ;;  %v13818_v5 = vld [vmem:[%s13380_s11 + $0x318] sm:$0xff] }
  0x87   : > { %12517 = vmatprep.mubr.msk.f32.mxu1 %vm537_vm0, %v13790_v8  ;;  %18033 = vst [vmem:[#allocation3_spill] sm:$0xff] %v13818_v5 }
  0x89   : > { %12420 = vmatmul.mubr.msk.f32.gmra.mxu0 %vm537_vm0, %v530_v16  ;;  %v534_v16 = vld [vmem:[%s13380_s11 + $0x321] sm:$0xff] }
  0x8a   : > { %12518 = vmatmul.mubr.msk.f32.gmra.mxu1 %vm537_vm0, %v13800_v24  ;;  %12422 = vmatprep.mubr.msk.f32.mxu0 %vm537_vm0, %v531_v31  ;;  %v13828_v31 = vld [vmem:[%s13380_s11 + $0x320] sm:$0xff] }
  0x8b   : > { %12520 = vmatprep.mubr.msk.f32.mxu1 %vm537_vm0, %v13804_v39  ;;  %v1692_v39 = vld [vmem:[%s13380_s11 + $0x2] sm:$0xff] }
  0x8d   : > { %12423 = vmatmul.mubr.msk.f32.gmra.mxu0 %vm537_vm0, %v532_v47  ;;  %v1693_v47 = vld [vmem:[%s13380_s11 + $0xa] sm:$0xff] }
  0x8e   : > { %12521 = vmatmul.mubr.msk.f32.gmra.mxu1 %vm537_vm0, %v13814_v54  ;;  %12425 = vmatprep.mubr.msk.f32.mxu0 %vm537_vm0, %v533_v62  ;;  %v13839_v62 = vld [vmem:[%s13380_s11 + $0x1a] sm:$0xff] }
  0x8f   : > { %12523 = vmatprep.mubr.msk.f32.mxu1 %vm537_vm0, %v13818_v5  ;;  %v10270_v5 = vld [vmem:[%s13387_s14 + $0x28] sm:$0xff] }
  0x90   : > { %12820 = vmatprep.subr.mxu1 %v10270_v5 }
  0x91   : > { %12426 = vmatmul.mubr.msk.f32.gmra.mxu0 %vm537_vm0, %v534_v16  ;;  %v13848_v16 = vld [vmem:[%s13380_s11 + $0x22] sm:$0xff] }
  0x92   : > { %12524 = vmatmul.mubr.msk.f32.gmra.mxu1 %vm537_vm0, %v13828_v31  ;;  %12528 = vmatprep.mubr.msk.f32.mxu0 %vm537_vm0, %v1692_v39  ;;  %v9979_v39 = vld [vmem:[%s13380_s11 + $0x188] sm:$0xff] }
  0x93   : > { %12626 = vmatprep.mubr.msk.f32.mxu1 %vm537_vm0, %v13399_v7  ;;  %v13853_v7 = vld [vmem:[%s13380_s11 + $0x32] sm:$0xff] }
  0x95   : > { %12529 = vmatmul.mubr.msk.f32.vlgmr.msra.gmra.mxu0 %vm537_vm0, %v1693_v47  ;;  %v14062_v47 = vld [vmem:[%s13387_s14 + $0x30] sm:$0xff] }
  0x96   : > { %12627 = vmatmul.mubr.msk.f32.vlgmr.msra.gmra.mxu1 %vm537_vm0, %v13408_v9  ;;  %12531 = vmatprep.mubr.msk.f32.mxu0 %vm537_vm0, %v13839_v62  ;;  %v13863_v9 = vld [vmem:[%s13380_s11 + $0x3a] sm:$0xff] }
  0x97   : > { %12629 = vmatprep.mubr.msk.f32.mxu1 %vm537_vm0, %v13412_v11  ;;  %12723 = vmatpush3.msra.mxu0 %v13618_v10  ;;  %v13868_v11 = vld [vmem:[%s13380_s11 + $0x4a] sm:$0xff]  ;;  %v13882_v10 = vld [vmem:[%s13380_s11 + $0x62] sm:$0xff] }
  0x98   : > { %12821 = vmatpush3.msra.mxu1 %v10270_v5  ;;  %v1725_v5 = vld [vmem:[%s13380_s11 + $0x1ba] sm:$0xff]  ;;  %12918 = vmatprep.subr.mxu0 %v14062_v47 }
  0x99   : > { %12532 = vmatmul.mubr.msk.f32.gmra.mxu0 %vm537_vm0, %v13848_v16 }
  0x9a   : > { %12630 = vmatmul.mubr.msk.f32.gmra.mxu1 %vm537_vm0, %v13422_v13  ;;  %12534 = vmatprep.mubr.msk.f32.mxu0 %vm537_vm0, %v13853_v7  ;;  %v13877_v13 = vld [vmem:[%s13380_s11 + $0x52] sm:$0xff] }
  0x9b   : > { %12632 = vmatprep.mubr.msk.f32.mxu1 %vm537_vm0, %v13426_v15  ;;  %v13891_v15 = vld [vmem:[%s13380_s11 + $0x6a] sm:$0xff] }
  0x9d   : > { %12535 = vmatmul.mubr.msk.f32.gmra.mxu0 %vm537_vm0, %v13863_v9 }
  0x9e   : > { %12633 = vmatmul.mubr.msk.f32.gmra.mxu1 %vm537_vm0, %v13436_v17  ;;  %12537 = vmatprep.mubr.msk.f32.mxu0 %vm537_vm0, %v13868_v11  ;;  %v13896_v17 = vld [vmem:[%s13380_s11 + $0x7a] sm:$0xff] }
  0x9f   : > { %12635 = vmatprep.mubr.msk.f32.mxu1 %vm537_vm0, %v13440_v19  ;;  %v13905_v19 = vld [vmem:[%s13380_s11 + $0x82] sm:$0xff] }
  0xa1   : > { %12538 = vmatmul.mubr.msk.f32.gmra.mxu0 %vm537_vm0, %v13877_v13 }
  0xa2   : > { %12636 = vmatmul.mubr.msk.f32.gmra.mxu1 %vm537_vm0, %v13450_v21  ;;  %12540 = vmatprep.mubr.msk.f32.mxu0 %vm537_vm0, %v13882_v10  ;;  %v13910_v21 = vld [vmem:[%s13380_s11 + $0x92] sm:$0xff] }
  0xa3   : > { %12638 = vmatprep.mubr.msk.f32.mxu1 %vm537_vm0, %v13454_v23  ;;  %v13919_v23 = vld [vmem:[%s13380_s11 + $0x9a] sm:$0xff] }
  0xa5   : > { %12541 = vmatmul.mubr.msk.f32.gmra.mxu0 %vm537_vm0, %v13891_v15 }
  0xa6   : > { %12639 = vmatmul.mubr.msk.f32.gmra.mxu1 %vm537_vm0, %v13464_v25  ;;  %12543 = vmatprep.mubr.msk.f32.mxu0 %vm537_vm0, %v13896_v17  ;;  %v13924_v25 = vld [vmem:[%s13380_s11 + $0xaa] sm:$0xff] }
  0xa7   : > { %12641 = vmatprep.mubr.msk.f32.mxu1 %vm537_vm0, %v13468_v27  ;;  %v13933_v27 = vld [vmem:[%s13380_s11 + $0xb2] sm:$0xff] }
  0xa9   : > { %12544 = vmatmul.mubr.msk.f32.gmra.mxu0 %vm537_vm0, %v13905_v19 }
  0xaa   : > { %12642 = vmatmul.mubr.msk.f32.gmra.mxu1 %vm537_vm0, %v13479_v30  ;;  %12546 = vmatprep.mubr.msk.f32.mxu0 %vm537_vm0, %v13910_v21  ;;  %v13938_v30 = vld [vmem:[%s13380_s11 + $0xc2] sm:$0xff] }
  0xab   : > { %12644 = vmatprep.mubr.msk.f32.mxu1 %vm537_vm0, %v13483_v32  ;;  %v13947_v32 = vld [vmem:[%s13380_s11 + $0xca] sm:$0xff] }
  0xad   : > { %12547 = vmatmul.mubr.msk.f32.gmra.mxu0 %vm537_vm0, %v13919_v23 }
  0xae   : > { %12645 = vmatmul.mubr.msk.f32.gmra.mxu1 %vm537_vm0, %v13493_v34  ;;  %12549 = vmatprep.mubr.msk.f32.mxu0 %vm537_vm0, %v13924_v25  ;;  %v13952_v34 = vld [vmem:[%s13380_s11 + $0xda] sm:$0xff] }
  0xaf   : > { %12647 = vmatprep.mubr.msk.f32.mxu1 %vm537_vm0, %v13497_v36  ;;  %v13961_v36 = vld [vmem:[%s13380_s11 + $0xe2] sm:$0xff] }
  0xb1   : > { %12550 = vmatmul.mubr.msk.f32.gmra.mxu0 %vm537_vm0, %v13933_v27 }
  0xb2   : > { %12648 = vmatmul.mubr.msk.f32.gmra.mxu1 %vm537_vm0, %v13507_v38  ;;  %12552 = vmatprep.mubr.msk.f32.mxu0 %vm537_vm0, %v13938_v30  ;;  %v13966_v38 = vld [vmem:[%s13380_s11 + $0xf2] sm:$0xff] }
  0xb3   : > { %12650 = vmatprep.mubr.msk.f32.mxu1 %vm537_vm0, %v13511_v40  ;;  %v13975_v40 = vld [vmem:[%s13380_s11 + $0xfa] sm:$0xff] }
  0xb5   : > { %12553 = vmatmul.mubr.msk.f32.gmra.mxu0 %vm537_vm0, %v13947_v32 }
  0xb6   : > { %12651 = vmatmul.mubr.msk.f32.gmra.mxu1 %vm537_vm0, %v13521_v42  ;;  %12555 = vmatprep.mubr.msk.f32.mxu0 %vm537_vm0, %v13952_v34  ;;  %v13980_v42 = vld [vmem:[%s13380_s11 + $0x10a] sm:$0xff] }
  0xb7   : > { %12653 = vmatprep.mubr.msk.f32.mxu1 %vm537_vm0, %v13525_v44  ;;  %v13989_v44 = vld [vmem:[%s13380_s11 + $0x112] sm:$0xff] }
  0xb9   : > { %12556 = vmatmul.mubr.msk.f32.gmra.mxu0 %vm537_vm0, %v13961_v36 }
  0xba   : > { %12654 = vmatmul.mubr.msk.f32.gmra.mxu1 %vm537_vm0, %v13535_v46  ;;  %12558 = vmatprep.mubr.msk.f32.mxu0 %vm537_vm0, %v13966_v38  ;;  %v13994_v46 = vld [vmem:[%s13380_s11 + $0x122] sm:$0xff] }
  0xbb   : > { %12656 = vmatprep.mubr.msk.f32.mxu1 %vm537_vm0, %v13539_v48  ;;  %v14003_v48 = vld [vmem:[%s13380_s11 + $0x12a] sm:$0xff] }
  0xbd   : > { %12559 = vmatmul.mubr.msk.f32.gmra.mxu0 %vm537_vm0, %v13975_v40 }
  0xbe   : > { %12657 = vmatmul.mubr.msk.f32.gmra.mxu1 %vm537_vm0, %v13550_v51  ;;  %12561 = vmatprep.mubr.msk.f32.mxu0 %vm537_vm0, %v13980_v42  ;;  %v14008_v51 = vld [vmem:[%s13380_s11 + $0x13a] sm:$0xff] }
  0xbf   : > { %12659 = vmatprep.mubr.msk.f32.mxu1 %vm537_vm0, %v13554_v53  ;;  %v14017_v53 = vld [vmem:[%s13380_s11 + $0x142] sm:$0xff] }
  0xc1   : > { %12562 = vmatmul.mubr.msk.f32.gmra.mxu0 %vm537_vm0, %v13989_v44 }
  0xc2   : > { %12660 = vmatmul.mubr.msk.f32.gmra.mxu1 %vm537_vm0, %v13564_v55  ;;  %12564 = vmatprep.mubr.msk.f32.mxu0 %vm537_vm0, %v13994_v46  ;;  %v14022_v55 = vld [vmem:[%s13380_s11 + $0x152] sm:$0xff] }
  0xc3   : > { %12662 = vmatprep.mubr.msk.f32.mxu1 %vm537_vm0, %v13568_v57  ;;  %v14031_v57 = vld [vmem:[%s13380_s11 + $0x15a] sm:$0xff] }
  0xc4   : > { %18034 = vst [vmem:[#allocation4_spill] sm:$0xff] %v14031_v57 }
  0xc5   : > { %12565 = vmatmul.mubr.msk.f32.gmra.mxu0 %vm537_vm0, %v14003_v48 }
  0xc6   : > { %12663 = vmatmul.mubr.msk.f32.gmra.mxu1 %vm537_vm0, %v13578_v59  ;;  %12567 = vmatprep.mubr.msk.f32.mxu0 %vm537_vm0, %v14008_v51  ;;  %v14036_v59 = vld [vmem:[%s13380_s11 + $0x16a] sm:$0xff] }
  0xc7   : > { %12665 = vmatprep.mubr.msk.f32.mxu1 %vm537_vm0, %v13582_v61  ;;  %18035 = vst [vmem:[#allocation5_spill] sm:$0xff] %v14036_v59  ;;  %v9978_v61 = vld [vmem:[%s13380_s11 + $0x180] sm:$0xff] }
  0xc9   : > { %12568 = vmatmul.mubr.msk.f32.gmra.mxu0 %vm537_vm0, %v14017_v53 }
  0xca   : > { %12666 = vmatmul.mubr.msk.f32.gmra.mxu1 %vm537_vm0, %v13592_v63  ;;  %12570 = vmatprep.mubr.msk.f32.mxu0 %vm537_vm0, %v14022_v55  ;;  %v14046_v63 = vld [vmem:[%s13380_s11 + $0x172] sm:$0xff] }
  0xcb   : > { %12668 = vmatprep.mubr.msk.f32.mxu1 %vm537_vm0, %v13596_v1  ;;  %18036 = vst [vmem:[#allocation6_spill] sm:$0xff] %v14046_v63  ;;  %v1724_v1 = vld [vmem:[%s13380_s11 + $0x1b2] sm:$0xff] }
  0xcd   : > { %12571 = vmatmul.mubr.msk.f32.gmra.mxu0 %vm537_vm0, %v14031_v57  ;;  %v14077_v57 = vld [vmem:[%s13380_s11 + $0x1e2] sm:$0xff] }
  0xce   : > { %12669 = vmatmul.mubr.msk.f32.gmra.mxu1 %vm537_vm0, %v13606_v3  ;;  %12573 = vmatprep.mubr.msk.f32.mxu0 %vm537_vm0, %v14036_v59  ;;  %v14059_v3 = vld [vmem:[%s13380_s11 + $0x1ca] sm:$0xff] }
  0xcf   : > { %12671 = vmatprep.mubr.msk.f32.mxu1 %vm537_vm0, %v9978_v61  ;;  %18037 = vst [vmem:[#allocation7_spill] sm:$0xff] %v14059_v3 }
  0xd1   : > { %12574 = vmatmul.mubr.msk.f32.gmra.mxu0 %vm537_vm0, %v14046_v63 }
  0xd2   : > { %12672 = vmatmul.mubr.msk.f32.gmra.mxu1 %vm537_vm0, %v9979_v39  ;;  %12576 = vmatprep.mubr.msk.f32.mxu0 %vm537_vm0, %v1724_v1  ;;  %v14072_v1 = vld [vmem:[%s13380_s11 + $0x1d2] sm:$0xff] }
  0xd3   : > { %12674 = vmatprep.mubr.msk.f32.mxu1 %vm537_vm0, %v13622_v14  ;;  %18039 = vst [vmem:[#allocation9_spill] sm:$0xff] %v14072_v1 }
  0xd5   : > { %v12334_v61 = vpop.f32.mrf.mxu0  ;;  %12577 = vmatmul.mubr.msk.f32.gmra.mxu0 %vm537_vm0, %v1725_v5 }
  0xd6   : > { %v12432_v59 = vpop.f32.mrf.mxu1  ;;  %12675 = vmatmul.mubr.msk.f32.gmra.mxu1 %vm537_vm0, %v13632_v18  ;;  %12579 = vmatprep.mubr.msk.f32.mxu0 %vm537_vm0, %v14059_v3 }
  0xd7   : > { %v14067_v39 = vadd.f32 %v12432_v59, %v12334_v61  ;;  %12677 = vmatprep.mubr.msk.f32.mxu1 %vm537_vm0, %v13636_v22  ;;  %v796_v14 = vpop.f32.mrf.mxu0  ;;  %v14091_v22 = vld [vmem:[%s13380_s11 + $0x1ea] sm:$0xff] }
  0xd8   : > { %v1373_v63 = vpop.f32.mrf.mxu1 }
  0xd9   : > { %18038 = vst [vmem:[#allocation8_spill] sm:$0xff] %v14067_v39  ;;  %v14080_v5 = vadd.f32 %v1373_v63, %v796_v14  ;;  %v12337_v18 = vpop.f32.mrf.mxu0  ;;  %12580 = vmatmul.mubr.msk.f32.gmra.mxu0 %vm537_vm0, %v14072_v1 }
  0xda   : > { %v12435_v59 = vpop.f32.mrf.mxu1  ;;  %12678 = vmatmul.mubr.msk.f32.gmra.mxu1 %vm537_vm0, %v13646_v26  ;;  %12582 = vmatprep.mubr.msk.f32.mxu0 %vm537_vm0, %v14077_v57 }
  0xdb   : > { %18040 = vst [vmem:[#allocation10_spill] sm:$0xff] %v14080_v5  ;;  %v14086_v61 = vadd.f32 %v12435_v59, %v12337_v18  ;;  %12680 = vmatprep.mubr.msk.f32.mxu1 %vm537_vm0, %v13650_v29  ;;  %v806_v63 = vpop.f32.mrf.mxu0  ;;  %v14096_v5 = vld [vmem:[%s13380_s11 + $0x1fa] sm:$0xff]  ;;  %v14109_v29 = vld [vmem:[%s13380_s11 + $0x202] sm:$0xff] }
  0xdc   : > { %v1383_v14 = vpop.f32.mrf.mxu1 }
  0xdd   : > { %18041 = vst [vmem:[#allocation11_spill] sm:$0xff] %v14086_v61  ;;  %v14098_v39 = vadd.f32 %v1383_v14, %v806_v63  ;;  %v12340_v1 = vpop.f32.mrf.mxu0  ;;  %12583 = vmatmul.mubr.msk.f32.gmra.mxu0 %vm537_vm0, %v14091_v22  ;;  %v14114_v63 = vld [vmem:[%s13380_s11 + $0x212] sm:$0xff] }
  0xde   : > { %v12438_v3 = vpop.f32.mrf.mxu1  ;;  %12681 = vmatmul.mubr.msk.f32.gmra.mxu1 %vm537_vm0, %v13660_v33  ;;  %12585 = vmatprep.mubr.msk.f32.mxu0 %vm537_vm0, %v14096_v5 }
  0xdf   : > { %18042 = vst [vmem:[#allocation12_spill] sm:$0xff] %v14098_v39  ;;  %v14104_v26 = vadd.f32 %v12438_v3, %v12340_v1  ;;  %12683 = vmatprep.mubr.msk.f32.mxu1 %vm537_vm0, %v13664_v37  ;;  %v816_v18 = vpop.f32.mrf.mxu0  ;;  %v14127_v37 = vld [vmem:[%s13380_s11 + $0x21a] sm:$0xff] }
  0xe0   : > { %v1393_v59 = vpop.f32.mrf.mxu1 }
  0xe1   : > { %18043 = vst [vmem:[#allocation13_spill] sm:$0xff] %v14104_v26  ;;  %v14116_v14 = vadd.f32 %v1393_v59, %v816_v18  ;;  %v12343_v39 = vpop.f32.mrf.mxu0  ;;  %12586 = vmatmul.mubr.msk.f32.gmra.mxu0 %vm537_vm0, %v14109_v29  ;;  %v14132_v18 = vld [vmem:[%s13380_s11 + $0x22a] sm:$0xff] }
  0xe2   : > { %v12441_v61 = vpop.f32.mrf.mxu1  ;;  %12684 = vmatmul.mubr.msk.f32.gmra.mxu1 %vm537_vm0, %v13674_v41  ;;  %12588 = vmatprep.mubr.msk.f32.mxu0 %vm537_vm0, %v14114_v63 }
  0xe3   : > { %18044 = vst [vmem:[#allocation14_spill] sm:$0xff] %v14116_v14  ;;  %v14122_v33 = vadd.f32 %v12441_v61, %v12343_v39  ;;  %12686 = vmatprep.mubr.msk.f32.mxu1 %vm537_vm0, %v13678_v45  ;;  %v826_v3 = vpop.f32.mrf.mxu0  ;;  %v14145_v45 = vld [vmem:[%s13380_s11 + $0x232] sm:$0xff] }
  0xe4   : > { %v1403_v1 = vpop.f32.mrf.mxu1 }
  0xe5   : > { %18045 = vst [vmem:[#allocation15_spill] sm:$0xff] %v14122_v33  ;;  %v14134_v59 = vadd.f32 %v1403_v1, %v826_v3  ;;  %v12346_v14 = vpop.f32.mrf.mxu0  ;;  %12589 = vmatmul.mubr.msk.f32.gmra.mxu0 %vm537_vm0, %v14127_v37  ;;  %v14150_v3 = vld [vmem:[%s13380_s11 + $0x242] sm:$0xff] }
  0xe6   : > { %v12444_v26 = vpop.f32.mrf.mxu1  ;;  %12687 = vmatmul.mubr.msk.f32.gmra.mxu1 %vm537_vm0, %v13688_v49  ;;  %12591 = vmatprep.mubr.msk.f32.mxu0 %vm537_vm0, %v14132_v18 }
  0xe7   : > { %18046 = vst [vmem:[#allocation16_spill] sm:$0xff] %v14134_v59  ;;  %v14140_v41 = vadd.f32 %v12444_v26, %v12346_v14  ;;  %12689 = vmatprep.mubr.msk.f32.mxu1 %vm537_vm0, %v13692_v52  ;;  %v836_v39 = vpop.f32.mrf.mxu0  ;;  %v14163_v52 = vld [vmem:[%s13380_s11 + $0x24a] sm:$0xff] }
  0xe8   : > { %v1413_v61 = vpop.f32.mrf.mxu1 }
  0xe9   : > { %18047 = vst [vmem:[#allocation17_spill] sm:$0xff] %v14140_v41  ;;  %v14152_v1 = vadd.f32 %v1413_v61, %v836_v39  ;;  %v12349_v59 = vpop.f32.mrf.mxu0  ;;  %12592 = vmatmul.mubr.msk.f32.gmra.mxu0 %vm537_vm0, %v14145_v45  ;;  %v14168_v39 = vld [vmem:[%s13380_s11 + $0x25a] sm:$0xff] }
  0xea   : > { %v12447_v33 = vpop.f32.mrf.mxu1  ;;  %12690 = vmatmul.mubr.msk.f32.gmra.mxu1 %vm537_vm0, %v13702_v56  ;;  %12594 = vmatprep.mubr.msk.f32.mxu0 %vm537_vm0, %v14150_v3 }
  0xeb   : > { %18048 = vst [vmem:[#allocation18_spill] sm:$0xff] %v14152_v1  ;;  %v14158_v49 = vadd.f32 %v12447_v33, %v12349_v59  ;;  %12692 = vmatprep.mubr.msk.f32.mxu1 %vm537_vm0, %v13706_v60  ;;  %v846_v26 = vpop.f32.mrf.mxu0  ;;  %v14181_v60 = vld [vmem:[%s13380_s11 + $0x262] sm:$0xff] }
  0xec   : > { %v1423_v14 = vpop.f32.mrf.mxu1 }
  0xed   : > { %18049 = vst [vmem:[#allocation19_spill] sm:$0xff] %v14158_v49  ;;  %v14170_v61 = vadd.f32 %v1423_v14, %v846_v26  ;;  %v12352_v1 = vpop.f32.mrf.mxu0  ;;  %12595 = vmatmul.mubr.msk.f32.gmra.mxu0 %vm537_vm0, %v14163_v52  ;;  %v14186_v26 = vld [vmem:[%s13380_s11 + $0x272] sm:$0xff] }
  0xee   : > { %v12450_v41 = vpop.f32.mrf.mxu1  ;;  %12693 = vmatmul.mubr.msk.f32.gmra.mxu1 %vm537_vm0, %v13716_v0  ;;  %12597 = vmatprep.mubr.msk.f32.mxu0 %vm537_vm0, %v14168_v39 }
  0xef   : > { %18050 = vst [vmem:[#allocation20_spill] sm:$0xff] %v14170_v61  ;;  %v14176_v56 = vadd.f32 %v12450_v41, %v12352_v1  ;;  %12695 = vmatprep.mubr.msk.f32.mxu1 %vm537_vm0, %v13720_v4  ;;  %v856_v33 = vpop.f32.mrf.mxu0  ;;  %v14199_v4 = vld [vmem:[%s13380_s11 + $0x27a] sm:$0xff] }
  0xf0   : > { %v1433_v59 = vpop.f32.mrf.mxu1 }
  0xf1   : > { %18051 = vst [vmem:[#allocation21_spill] sm:$0xff] %v14176_v56  ;;  %v14188_v14 = vadd.f32 %v1433_v59, %v856_v33  ;;  %v12355_v61 = vpop.f32.mrf.mxu0  ;;  %12598 = vmatmul.mubr.msk.f32.gmra.mxu0 %vm537_vm0, %v14181_v60  ;;  %v14204_v33 = vld [vmem:[%s13380_s11 + $0x28a] sm:$0xff] }
  0xf2   : > { %v12453_v49 = vpop.f32.mrf.mxu1  ;;  %12696 = vmatmul.mubr.msk.f32.gmra.mxu1 %vm537_vm0, %v13730_v6  ;;  %12600 = vmatprep.mubr.msk.f32.mxu0 %vm537_vm0, %v14186_v26 }
  0xf3   : > { %18052 = vst [vmem:[#allocation22_spill] sm:$0xff] %v14188_v14  ;;  %v14194_v0 = vadd.f32 %v12453_v49, %v12355_v61  ;;  %12698 = vmatprep.mubr.msk.f32.mxu1 %vm537_vm0, %v13734_v12  ;;  %v866_v41 = vpop.f32.mrf.mxu0  ;;  %v14217_v12 = vld [vmem:[%s13380_s11 + $0x292] sm:$0xff] }
  0xf4   : > { %v1443_v1 = vpop.f32.mrf.mxu1 }
  0xf5   : > { %18053 = vst [vmem:[#allocation23_spill] sm:$0xff] %v14194_v0  ;;  %v14206_v59 = vadd.f32 %v1443_v1, %v866_v41  ;;  %v12358_v14 = vpop.f32.mrf.mxu0  ;;  %12601 = vmatmul.mubr.msk.f32.gmra.mxu0 %vm537_vm0, %v14199_v4  ;;  %v14222_v41 = vld [vmem:[%s13380_s11 + $0x2a2] sm:$0xff] }
  0xf6   : > { %v12456_v56 = vpop.f32.mrf.mxu1  ;;  %12699 = vmatmul.mubr.msk.f32.gmra.mxu1 %vm537_vm0, %v13744_v20  ;;  %12603 = vmatprep.mubr.msk.f32.mxu0 %vm537_vm0, %v14204_v33 }
  0xf7   : > { %18054 = vst [vmem:[#allocation24_spill] sm:$0xff] %v14206_v59  ;;  %v14212_v6 = vadd.f32 %v12456_v56, %v12358_v14  ;;  %12701 = vmatprep.mubr.msk.f32.mxu1 %vm537_vm0, %v13748_v28  ;;  %v876_v49 = vpop.f32.mrf.mxu0  ;;  %v14235_v28 = vld [vmem:[%s13380_s11 + $0x2aa] sm:$0xff] }
  0xf8   : > { %v1453_v61 = vpop.f32.mrf.mxu1 }
  0xf9   : > { %18055 = vst [vmem:[#allocation25_spill] sm:$0xff] %v14212_v6  ;;  %v14224_v1 = vadd.f32 %v1453_v61, %v876_v49  ;;  %v12361_v59 = vpop.f32.mrf.mxu0  ;;  %12604 = vmatmul.mubr.msk.f32.gmra.mxu0 %vm537_vm0, %v14217_v12  ;;  %v14240_v49 = vld [vmem:[%s13380_s11 + $0x2ba] sm:$0xff] }
  0xfa   : > { %v12459_v0 = vpop.f32.mrf.mxu1  ;;  %12702 = vmatmul.mubr.msk.f32.gmra.mxu1 %vm537_vm0, %v13758_v35  ;;  %12606 = vmatprep.mubr.msk.f32.mxu0 %vm537_vm0, %v14222_v41 }
  0xfb   : > { %18056 = vst [vmem:[#allocation26_spill] sm:$0xff] %v14224_v1  ;;  %v14230_v20 = vadd.f32 %v12459_v0, %v12361_v59  ;;  %12704 = vmatprep.mubr.msk.f32.mxu1 %vm537_vm0, %v13762_v43  ;;  %v886_v56 = vpop.f32.mrf.mxu0  ;;  %v14253_v43 = vld [vmem:[%s13380_s11 + $0x2c2] sm:$0xff] }
  0xfc   : > { %v1463_v14 = vpop.f32.mrf.mxu1 }
  0xfd   : > { %18057 = vst [vmem:[#allocation27_spill] sm:$0xff] %v14230_v20  ;;  %v14242_v61 = vadd.f32 %v1463_v14, %v886_v56  ;;  %v12364_v1 = vpop.f32.mrf.mxu0  ;;  %12607 = vmatmul.mubr.msk.f32.gmra.mxu0 %vm537_vm0, %v14235_v28  ;;  %v14258_v56 = vld [vmem:[%s13380_s11 + $0x2d2] sm:$0xff] }
  0xfe   : > { %v12462_v6 = vpop.f32.mrf.mxu1  ;;  %12705 = vmatmul.mubr.msk.f32.gmra.mxu1 %vm537_vm0, %v13772_v50  ;;  %12609 = vmatprep.mubr.msk.f32.mxu0 %vm537_vm0, %v14240_v49 }
  0xff   : > { %18058 = vst [vmem:[#allocation28_spill] sm:$0xff] %v14242_v61  ;;  %v14248_v35 = vadd.f32 %v12462_v6, %v12364_v1  ;;  %12707 = vmatprep.mubr.msk.f32.mxu1 %vm537_vm0, %v13776_v58  ;;  %v896_v0 = vpop.f32.mrf.mxu0  ;;  %v14271_v58 = vld [vmem:[%s13380_s11 + $0x2da] sm:$0xff] }
 0x100   : > { %v1473_v59 = vpop.f32.mrf.mxu1 }
 0x101   : > { %18059 = vst [vmem:[#allocation29_spill] sm:$0xff] %v14248_v35  ;;  %v14260_v14 = vadd.f32 %v1473_v59, %v896_v0  ;;  %v12367_v61 = vpop.f32.mrf.mxu0  ;;  %12610 = vmatmul.mubr.msk.f32.gmra.mxu0 %vm537_vm0, %v14253_v43  ;;  %v14276_v0 = vld [vmem:[%s13380_s11 + $0x2ea] sm:$0xff] }
 0x102   : > { %v12465_v20 = vpop.f32.mrf.mxu1  ;;  %12708 = vmatmul.mubr.msk.f32.gmra.mxu1 %vm537_vm0, %v13786_v2  ;;  %12612 = vmatprep.mubr.msk.f32.mxu0 %vm537_vm0, %v14258_v56 }
 0x103   : > { %18060 = vst [vmem:[#allocation30_spill] sm:$0xff] %v14260_v14  ;;  %v14266_v50 = vadd.f32 %v12465_v20, %v12367_v61  ;;  %12710 = vmatprep.mubr.msk.f32.mxu1 %vm537_vm0, %v13790_v8  ;;  %v906_v6 = vpop.f32.mrf.mxu0  ;;  %v14289_v8 = vld [vmem:[%s13380_s11 + $0x2f2] sm:$0xff]  ;;  %v18065_v20 = vld [vmem:[#allocation2_spill] sm:$0xff] }
 0x104   : > { %v1483_v1 = vpop.f32.mrf.mxu1  ;;  %18064 = vst [vmem:[#allocation34_spill] sm:$0xff] %v14289_v8 }
 0x105   : > { %18061 = vst [vmem:[#allocation31_spill] sm:$0xff] %v14266_v50  ;;  %v14278_v59 = vadd.f32 %v1483_v1, %v906_v6  ;;  %v12370_v14 = vpop.f32.mrf.mxu0  ;;  %12613 = vmatmul.mubr.msk.f32.gmra.mxu0 %vm537_vm0, %v14271_v58  ;;  %v14294_v1 = vld [vmem:[%s13380_s11 + $0x302] sm:$0xff] }
 0x106   : > { %v12468_v35 = vpop.f32.mrf.mxu1  ;;  %12711 = vmatmul.mubr.msk.f32.gmra.mxu1 %vm537_vm0, %v13800_v24  ;;  %12615 = vmatprep.mubr.msk.f32.mxu0 %vm537_vm0, %v14276_v0  ;;  %18066 = vst [vmem:[#allocation2_spill] sm:$0xff] %v14294_v1 }
 0x107   : > { %18062 = vst [vmem:[#allocation32_spill] sm:$0xff] %v14278_v59  ;;  %v14284_v2 = vadd.f32 %v12468_v35, %v12370_v14  ;;  %12713 = vmatprep.mubr.msk.f32.mxu1 %vm537_vm0, %v18065_v20  ;;  %v916_v61 = vpop.f32.mrf.mxu0  ;;  %v14307_v14 = vld [vmem:[%s13380_s11 + $0x30a] sm:$0xff] }
 0x108   : > { %v1493_v6 = vpop.f32.mrf.mxu1  ;;  %18069 = vst [vmem:[#allocation37_spill] sm:$0xff] %v14307_v14  ;;  %v18070_v20 = vld [vmem:[#allocation3_spill] sm:$0xff] }
 0x109   : > { %18063 = vst [vmem:[#allocation33_spill] sm:$0xff] %v14284_v2  ;;  %v14296_v59 = vadd.f32 %v1493_v6, %v916_v61  ;;  %v12373_v50 = vpop.f32.mrf.mxu0  ;;  %12616 = vmatmul.mubr.msk.f32.gmra.mxu0 %vm537_vm0, %v14289_v8  ;;  %v10010_v2 = vld [vmem:[%s13380_s11 + $0x330] sm:$0xff] }
 0x10a   : > { %v12471_v24 = vpop.f32.mrf.mxu1  ;;  %12714 = vmatmul.mubr.msk.f32.gmra.mxu1 %vm537_vm0, %v13814_v54  ;;  %12618 = vmatprep.mubr.msk.f32.mxu0 %vm537_vm0, %v14294_v1 }
 0x10b   : > { %18067 = vst [vmem:[#allocation35_spill] sm:$0xff] %v14296_v59  ;;  %v14302_v35 = vadd.f32 %v12471_v24, %v12373_v50  ;;  %12716 = vmatprep.mubr.msk.f32.mxu1 %vm537_vm0, %v18070_v20  ;;  %v926_v61 = vpop.f32.mrf.mxu0  ;;  %v14312_v59 = vld [vmem:[%s13380_s11 + $0x31a] sm:$0xff]  ;;  %v14326_v20 = vld [vmem:[%s13380_s11 + $0x322] sm:$0xff] }
 0x10c   : > { %v1503_v6 = vpop.f32.mrf.mxu1  ;;  %18071 = vst [vmem:[#allocation3_spill] sm:$0xff] %v14312_v59  ;;  %18074 = vst [vmem:[#allocation40_spill] sm:$0xff] %v14326_v20 }
 0x10d   : > { %18068 = vst [vmem:[#allocation36_spill] sm:$0xff] %v14302_v35  ;;  %v14315_v8 = vadd.f32 %v1503_v6, %v926_v61  ;;  %v12376_v54 = vpop.f32.mrf.mxu0  ;;  %12619 = vmatmul.mubr.msk.f32.gmra.mxu0 %vm537_vm0, %v14307_v14  ;;  %v10011_v61 = vld [vmem:[%s13380_s11 + $0x338] sm:$0xff] }
 0x10e   : > { %v12474_v50 = vpop.f32.mrf.mxu1  ;;  %12717 = vmatmul.mubr.msk.f32.gmra.mxu1 %vm537_vm0, %v13828_v31  ;;  %12621 = vmatprep.mubr.msk.f32.mxu0 %vm537_vm0, %v14312_v59  ;;  %v10077_v35 = vld [vmem:[%s13380_s11 + $0x19] sm:$0xff] }
 0x10f   : > { %18072 = vst [vmem:[#allocation38_spill] sm:$0xff] %v14315_v8  ;;  %v14321_v24 = vadd.f32 %v12474_v50, %v12376_v54  ;;  %12719 = vmatprep.mubr.msk.f32.mxu1 %vm537_vm0, %v10010_v2  ;;  %v936_v6 = vpop.f32.mrf.mxu0  ;;  %v10078_v2 = vld [vmem:[%s13380_s11 + $0x21] sm:$0xff] }
 0x110   : > { %v1513_v8 = vpop.f32.mrf.mxu1 }
 0x111   : > { %18073 = vst [vmem:[#allocation39_spill] sm:$0xff] %v14321_v24  ;;  %v14331_v14 = vadd.f32 %v1513_v8, %v936_v6  ;;  %v12379_v1 = vpop.f32.mrf.mxu0  ;;  %12622 = vmatmul.mubr.msk.f32.gmra.mxu0 %vm537_vm0, %v14326_v20  ;;  %v14343_v6 = vld [vmem:[%s13380_s11 + $0x31] sm:$0xff] }
 0x112   : > { %v12477_v31 = vpop.f32.mrf.mxu1  ;;  %12720 = vmatmul.mubr.msk.f32.gmra.mxu1 %vm537_vm0, %v10011_v61  ;;  %12724 = vmatprep.mubr.msk.f32.mxu0 %vm537_vm0, %v10077_v35  ;;  %v10528_v24 = vld [vmem:[%s13387_s14 + $0x38] sm:$0xff] }
 0x113   : > { %18075 = vst [vmem:[#allocation41_spill] sm:$0xff] %v14331_v14  ;;  %v14336_v54 = vadd.f32 %v12477_v31, %v12379_v1  ;;  %12822 = vmatprep.mubr.msk.f32.mxu1 %vm537_vm0, %v13839_v62  ;;  %v946_v50 = vpop.f32.mrf.mxu0  ;;  %v14356_v62 = vld [vmem:[%s13380_s11 + $0x39] sm:$0xff]  ;;  %v14361_v31 = vld [vmem:[%s13380_s11 + $0x49] sm:$0xff]  ;;  %13016 = vmatprep.subr.mxu1 %v10528_v24 }
 0x114   : > { %v1523_v8 = vpop.f32.mrf.mxu1 }
 0x115   : > { %v14345_v14 = vadd.f32 %v1523_v8, %v946_v50  ;;  %v12382_v20 = vpop.f32.mrf.mxu0  ;;  %12725 = vmatmul.mubr.msk.f32.vlgmr.msra.gmra.mxu0 %vm537_vm0, %v10078_v2  ;;  %v14375_v2 = vld [vmem:[%s13380_s11 + $0x51] sm:$0xff]  ;;  %v14380_v50 = vld [vmem:[%s13380_s11 + $0x61] sm:$0xff] }
 0x116   : > { %v12480_v59 = vpop.f32.mrf.mxu1  ;;  %12823 = vmatmul.mubr.msk.f32.vlgmr.msra.gmra.mxu1 %vm537_vm0, %v13848_v16  ;;  %12727 = vmatprep.mubr.msk.f32.mxu0 %vm537_vm0, %v14343_v6 }
 0x117   : > { %v14351_v1 = vadd.f32 %v12480_v59, %v12382_v20  ;;  %12825 = vmatprep.mubr.msk.f32.mxu1 %vm537_vm0, %v13853_v7  ;;  %v956_v35 = vpop.f32.mrf.mxu0  ;;  %12919 = vmatpush3.msra.mxu0 %v14062_v47 }
 0x118   : > { %v1533_v61 = vpop.f32.mrf.mxu1  ;;  %13017 = vmatpush3.msra.mxu1 %v10528_v24 }
 0x119   : > { %v14364_v16 = vadd.f32 %v1533_v61, %v956_v35  ;;  %v12385_v59 = vpop.f32.mrf.mxu0  ;;  %12728 = vmatmul.mubr.msk.f32.gmra.mxu0 %vm537_vm0, %v14356_v62 }
 0x11a   : > { %v12483_v20 = vpop.f32.mrf.mxu1  ;;  %12826 = vmatmul.mubr.msk.f32.gmra.mxu1 %vm537_vm0, %v13863_v9  ;;  %12730 = vmatprep.mubr.msk.f32.mxu0 %vm537_vm0, %v14361_v31 }
 0x11b   : > { %v14370_v7 = vadd.f32 %v12483_v20, %v12385_v59  ;;  %12828 = vmatprep.mubr.msk.f32.mxu1 %vm537_vm0, %v13868_v11  ;;  %v966_v47 = vpop.f32.mrf.mxu0  ;;  %v14393_v11 = vld [vmem:[%s13380_s11 + $0x69] sm:$0xff] }
 0x11c   : > { %v1543_v24 = vpop.f32.mrf.mxu1 }
 0x11d   : > { %18076 = vst [vmem:[#allocation42_spill] sm:$0xff] %v14370_v7  ;;  %v14382_v8 = vadd.f32 %v1543_v24, %v966_v47  ;;  %v12388_v35 = vpop.f32.mrf.mxu0  ;;  %12731 = vmatmul.mubr.msk.f32.gmra.mxu0 %vm537_vm0, %v14375_v2  ;;  %v14398_v47 = vld [vmem:[%s13380_s11 + $0x79] sm:$0xff] }
 0x11e   : > { %v12486_v61 = vpop.f32.mrf.mxu1  ;;  %12829 = vmatmul.mubr.msk.f32.gmra.mxu1 %vm537_vm0, %v13877_v13  ;;  %12733 = vmatprep.mubr.msk.f32.mxu0 %vm537_vm0, %v14380_v50 }
 0x11f   : > { %18077 = vst [vmem:[#allocation43_spill] sm:$0xff] %v14382_v8  ;;  %v14388_v9 = vadd.f32 %v12486_v61, %v12388_v35  ;;  %12831 = vmatprep.mubr.msk.f32.mxu1 %vm537_vm0, %v13882_v10  ;;  %v976_v59 = vpop.f32.mrf.mxu0  ;;  %v14411_v10 = vld [vmem:[%s13380_s11 + $0x81] sm:$0xff] }
 0x120   : > { %v1553_v20 = vpop.f32.mrf.mxu1 }
 0x121   : > { %18078 = vst [vmem:[#allocation44_spill] sm:$0xff] %v14388_v9  ;;  %v14400_v24 = vadd.f32 %v1553_v20, %v976_v59  ;;  %v12391_v8 = vpop.f32.mrf.mxu0  ;;  %12734 = vmatmul.mubr.msk.f32.gmra.mxu0 %vm537_vm0, %v14393_v11  ;;  %v14416_v59 = vld [vmem:[%s13380_s11 + $0x91] sm:$0xff] }
 0x122   : > { %v12489_v7 = vpop.f32.mrf.mxu1  ;;  %12832 = vmatmul.mubr.msk.f32.gmra.mxu1 %vm537_vm0, %v13891_v15  ;;  %12736 = vmatprep.mubr.msk.f32.mxu0 %vm537_vm0, %v14398_v47 }
 0x123   : > { %18079 = vst [vmem:[#allocation45_spill] sm:$0xff] %v14400_v24  ;;  %v14406_v13 = vadd.f32 %v12489_v7, %v12391_v8  ;;  %12834 = vmatprep.mubr.msk.f32.mxu1 %vm537_vm0, %v13896_v17  ;;  %v986_v35 = vpop.f32.mrf.mxu0  ;;  %v14429_v17 = vld [vmem:[%s13380_s11 + $0x99] sm:$0xff] }
 0x124   : > { %v1563_v61 = vpop.f32.mrf.mxu1 }
 0x125   : > { %18080 = vst [vmem:[#allocation46_spill] sm:$0xff] %v14406_v13  ;;  %v14418_v20 = vadd.f32 %v1563_v61, %v986_v35  ;;  %v12394_v24 = vpop.f32.mrf.mxu0  ;;  %12737 = vmatmul.mubr.msk.f32.gmra.mxu0 %vm537_vm0, %v14411_v10  ;;  %v14434_v35 = vld [vmem:[%s13380_s11 + $0xa9] sm:$0xff] }
 0x126   : > { %v12492_v9 = vpop.f32.mrf.mxu1  ;;  %12835 = vmatmul.mubr.msk.f32.gmra.mxu1 %vm537_vm0, %v13905_v19  ;;  %12739 = vmatprep.mubr.msk.f32.mxu0 %vm537_vm0, %v14416_v59 }
 0x127   : > { %18081 = vst [vmem:[#allocation47_spill] sm:$0xff] %v14418_v20  ;;  %v14424_v15 = vadd.f32 %v12492_v9, %v12394_v24  ;;  %12837 = vmatprep.mubr.msk.f32.mxu1 %vm537_vm0, %v13910_v21  ;;  %v996_v7 = vpop.f32.mrf.mxu0  ;;  %v14447_v21 = vld [vmem:[%s13380_s11 + $0xb1] sm:$0xff] }
 0x128   : > { %v1573_v8 = vpop.f32.mrf.mxu1 }
 0x129   : > { %18082 = vst [vmem:[#allocation48_spill] sm:$0xff] %v14424_v15  ;;  %v14436_v61 = vadd.f32 %v1573_v8, %v996_v7  ;;  %v12397_v20 = vpop.f32.mrf.mxu0  ;;  %12740 = vmatmul.mubr.msk.f32.gmra.mxu0 %vm537_vm0, %v14429_v17  ;;  %v14452_v7 = vld [vmem:[%s13380_s11 + $0xc1] sm:$0xff] }
 0x12a   : > { %v12495_v13 = vpop.f32.mrf.mxu1  ;;  %12838 = vmatmul.mubr.msk.f32.gmra.mxu1 %vm537_vm0, %v13919_v23  ;;  %12742 = vmatprep.mubr.msk.f32.mxu0 %vm537_vm0, %v14434_v35 }
 0x12b   : > { %18083 = vst [vmem:[#allocation49_spill] sm:$0xff] %v14436_v61  ;;  %v14442_v19 = vadd.f32 %v12495_v13, %v12397_v20  ;;  %12840 = vmatprep.mubr.msk.f32.mxu1 %vm537_vm0, %v13924_v25  ;;  %v1006_v9 = vpop.f32.mrf.mxu0  ;;  %v14465_v25 = vld [vmem:[%s13380_s11 + $0xc9] sm:$0xff] }
 0x12c   : > { %v1583_v24 = vpop.f32.mrf.mxu1 }
 0x12d   : > { %18084 = vst [vmem:[#allocation50_spill] sm:$0xff] %v14442_v19  ;;  %v14454_v8 = vadd.f32 %v1583_v24, %v1006_v9  ;;  %v12400_v61 = vpop.f32.mrf.mxu0  ;;  %12743 = vmatmul.mubr.msk.f32.gmra.mxu0 %vm537_vm0, %v14447_v21  ;;  %v14470_v9 = vld [vmem:[%s13380_s11 + $0xd9] sm:$0xff] }
 0x12e   : > { %v12498_v15 = vpop.f32.mrf.mxu1  ;;  %12841 = vmatmul.mubr.msk.f32.gmra.mxu1 %vm537_vm0, %v13933_v27  ;;  %12745 = vmatprep.mubr.msk.f32.mxu0 %vm537_vm0, %v14452_v7 }
 0x12f   : > { %18085 = vst [vmem:[#allocation51_spill] sm:$0xff] %v14454_v8  ;;  %v14460_v23 = vadd.f32 %v12498_v15, %v12400_v61  ;;  %12843 = vmatprep.mubr.msk.f32.mxu1 %vm537_vm0, %v13938_v30  ;;  %v1016_v13 = vpop.f32.mrf.mxu0  ;;  %v14483_v30 = vld [vmem:[%s13380_s11 + $0xe1] sm:$0xff] }
 0x130   : > { %v1593_v20 = vpop.f32.mrf.mxu1 }
 0x131   : > { %18086 = vst [vmem:[#allocation52_spill] sm:$0xff] %v14460_v23  ;;  %v14472_v24 = vadd.f32 %v1593_v20, %v1016_v13  ;;  %v12403_v8 = vpop.f32.mrf.mxu0  ;;  %12746 = vmatmul.mubr.msk.f32.gmra.mxu0 %vm537_vm0, %v14465_v25  ;;  %v14488_v13 = vld [vmem:[%s13380_s11 + $0xf1] sm:$0xff] }
 0x132   : > { %v12501_v19 = vpop.f32.mrf.mxu1  ;;  %12844 = vmatmul.mubr.msk.f32.gmra.mxu1 %vm537_vm0, %v13947_v32  ;;  %12748 = vmatprep.mubr.msk.f32.mxu0 %vm537_vm0, %v14470_v9 }
 0x133   : > { %18087 = vst [vmem:[#allocation53_spill] sm:$0xff] %v14472_v24  ;;  %v14478_v27 = vadd.f32 %v12501_v19, %v12403_v8  ;;  %12846 = vmatprep.mubr.msk.f32.mxu1 %vm537_vm0, %v13952_v34  ;;  %v1026_v15 = vpop.f32.mrf.mxu0  ;;  %v14501_v34 = vld [vmem:[%s13380_s11 + $0xf9] sm:$0xff] }
 0x134   : > { %v1603_v61 = vpop.f32.mrf.mxu1 }
 0x135   : > { %18088 = vst [vmem:[#allocation54_spill] sm:$0xff] %v14478_v27  ;;  %v14490_v20 = vadd.f32 %v1603_v61, %v1026_v15  ;;  %v12406_v24 = vpop.f32.mrf.mxu0  ;;  %12749 = vmatmul.mubr.msk.f32.gmra.mxu0 %vm537_vm0, %v14483_v30  ;;  %v14506_v15 = vld [vmem:[%s13380_s11 + $0x109] sm:$0xff] }
 0x136   : > { %v12504_v23 = vpop.f32.mrf.mxu1  ;;  %12847 = vmatmul.mubr.msk.f32.gmra.mxu1 %vm537_vm0, %v13961_v36  ;;  %12751 = vmatprep.mubr.msk.f32.mxu0 %vm537_vm0, %v14488_v13 }
 0x137   : > { %18089 = vst [vmem:[#allocation55_spill] sm:$0xff] %v14490_v20  ;;  %v14496_v32 = vadd.f32 %v12504_v23, %v12406_v24  ;;  %12849 = vmatprep.mubr.msk.f32.mxu1 %vm537_vm0, %v13966_v38  ;;  %v1036_v19 = vpop.f32.mrf.mxu0  ;;  %v14519_v38 = vld [vmem:[%s13380_s11 + $0x111] sm:$0xff] }
 0x138   : > { %v1613_v8 = vpop.f32.mrf.mxu1 }
 0x139   : > { %18090 = vst [vmem:[#allocation56_spill] sm:$0xff] %v14496_v32  ;;  %v14508_v61 = vadd.f32 %v1613_v8, %v1036_v19  ;;  %v12409_v20 = vpop.f32.mrf.mxu0  ;;  %12752 = vmatmul.mubr.msk.f32.gmra.mxu0 %vm537_vm0, %v14501_v34  ;;  %v14524_v19 = vld [vmem:[%s13380_s11 + $0x121] sm:$0xff] }
 0x13a   : > { %v12507_v27 = vpop.f32.mrf.mxu1  ;;  %12850 = vmatmul.mubr.msk.f32.gmra.mxu1 %vm537_vm0, %v13975_v40  ;;  %12754 = vmatprep.mubr.msk.f32.mxu0 %vm537_vm0, %v14506_v15 }
 0x13b   : > { %18091 = vst [vmem:[#allocation57_spill] sm:$0xff] %v14508_v61  ;;  %v14514_v36 = vadd.f32 %v12507_v27, %v12409_v20  ;;  %12852 = vmatprep.mubr.msk.f32.mxu1 %vm537_vm0, %v13980_v42  ;;  %v1046_v23 = vpop.f32.mrf.mxu0  ;;  %v14537_v42 = vld [vmem:[%s13380_s11 + $0x129] sm:$0xff] }
 0x13c   : > { %v1623_v24 = vpop.f32.mrf.mxu1 }
 0x13d   : > { %18092 = vst [vmem:[#allocation58_spill] sm:$0xff] %v14514_v36  ;;  %v14526_v8 = vadd.f32 %v1623_v24, %v1046_v23  ;;  %v12412_v61 = vpop.f32.mrf.mxu0  ;;  %12755 = vmatmul.mubr.msk.f32.gmra.mxu0 %vm537_vm0, %v14519_v38  ;;  %v14542_v23 = vld [vmem:[%s13380_s11 + $0x139] sm:$0xff] }
 0x13e   : > { %v12510_v32 = vpop.f32.mrf.mxu1  ;;  %12853 = vmatmul.mubr.msk.f32.gmra.mxu1 %vm537_vm0, %v13989_v44  ;;  %12757 = vmatprep.mubr.msk.f32.mxu0 %vm537_vm0, %v14524_v19  ;;  %18095 = vst [vmem:[#allocation61_spill] sm:$0xff] %v14542_v23 }
 0x13f   : > { %18093 = vst [vmem:[#allocation59_spill] sm:$0xff] %v14526_v8  ;;  %v14532_v40 = vadd.f32 %v12510_v32, %v12412_v61  ;;  %12855 = vmatprep.mubr.msk.f32.mxu1 %vm537_vm0, %v13994_v46  ;;  %v1056_v27 = vpop.f32.mrf.mxu0  ;;  %v14555_v46 = vld [vmem:[%s13380_s11 + $0x141] sm:$0xff] }
 0x140   : > { %v1633_v20 = vpop.f32.mrf.mxu1  ;;  %18098 = vst [vmem:[#allocation64_spill] sm:$0xff] %v14555_v46 }
 0x141   : > { %18094 = vst [vmem:[#allocation60_spill] sm:$0xff] %v14532_v40  ;;  %v14544_v24 = vadd.f32 %v1633_v20, %v1056_v27  ;;  %v12415_v8 = vpop.f32.mrf.mxu0  ;;  %12758 = vmatmul.mubr.msk.f32.gmra.mxu0 %vm537_vm0, %v14537_v42  ;;  %v14560_v27 = vld [vmem:[%s13380_s11 + $0x151] sm:$0xff] }
 0x142   : > { %v12513_v36 = vpop.f32.mrf.mxu1  ;;  %12856 = vmatmul.mubr.msk.f32.gmra.mxu1 %vm537_vm0, %v14003_v48  ;;  %12760 = vmatprep.mubr.msk.f32.mxu0 %vm537_vm0, %v14542_v23  ;;  %18099 = vst [vmem:[#allocation65_spill] sm:$0xff] %v14560_v27  ;;  %v14662_v23 = vld [vmem:[%s13380_s11 + $0x201] sm:$0xff] }
 0x143   : > { %18096 = vst [vmem:[#allocation62_spill] sm:$0xff] %v14544_v24  ;;  %v14550_v44 = vadd.f32 %v12513_v36, %v12415_v8  ;;  %12858 = vmatprep.mubr.msk.f32.mxu1 %vm537_vm0, %v14008_v51  ;;  %v1066_v32 = vpop.f32.mrf.mxu0  ;;  %v14573_v51 = vld [vmem:[%s13380_s11 + $0x159] sm:$0xff] }
 0x144   : > { %v1643_v61 = vpop.f32.mrf.mxu1  ;;  %18102 = vst [vmem:[#allocation68_spill] sm:$0xff] %v14573_v51 }
 0x145   : > { %18097 = vst [vmem:[#allocation63_spill] sm:$0xff] %v14550_v44  ;;  %v14562_v20 = vadd.f32 %v1643_v61, %v1066_v32  ;;  %v12418_v24 = vpop.f32.mrf.mxu0  ;;  %12761 = vmatmul.mubr.msk.f32.gmra.mxu0 %vm537_vm0, %v14555_v46  ;;  %v14578_v32 = vld [vmem:[%s13380_s11 + $0x169] sm:$0xff] }
 0x146   : > { %v12516_v40 = vpop.f32.mrf.mxu1  ;;  %12859 = vmatmul.mubr.msk.f32.gmra.mxu1 %vm537_vm0, %v14017_v53  ;;  %12763 = vmatprep.mubr.msk.f32.mxu0 %vm537_vm0, %v14560_v27  ;;  %18103 = vst [vmem:[#allocation69_spill] sm:$0xff] %v14578_v32 }
 0x147   : > { %18100 = vst [vmem:[#allocation66_spill] sm:$0xff] %v14562_v20  ;;  %v14568_v48 = vadd.f32 %v12516_v40, %v12418_v24  ;;  %12861 = vmatprep.mubr.msk.f32.mxu1 %vm537_vm0, %v14022_v55  ;;  %v1076_v36 = vpop.f32.mrf.mxu0  ;;  %v18105_v40 = vld [vmem:[#allocation4_spill] sm:$0xff] }
 0x148   : > { %v1653_v8 = vpop.f32.mrf.mxu1  ;;  %v14591_v55 = vld [vmem:[%s13380_s11 + $0x171] sm:$0xff] }
 0x149   : > { %18101 = vst [vmem:[#allocation67_spill] sm:$0xff] %v14568_v48  ;;  %v14580_v61 = vadd.f32 %v1653_v8, %v1076_v36  ;;  %v12421_v20 = vpop.f32.mrf.mxu0  ;;  %12764 = vmatmul.mubr.msk.f32.gmra.mxu0 %vm537_vm0, %v14573_v51  ;;  %18107 = vst [vmem:[#allocation71_spill] sm:$0xff] %v14591_v55  ;;  %v18108_v48 = vld [vmem:[#allocation5_spill] sm:$0xff]  ;;  %v10236_v51 = vld [vmem:[%s13380_s11 + $0x182] sm:$0xff] }
 0x14a   : > { %v12519_v53 = vpop.f32.mrf.mxu1  ;;  %12862 = vmatmul.mubr.msk.f32.gmra.mxu1 %vm537_vm0, %v18105_v40  ;;  %12766 = vmatprep.mubr.msk.f32.mxu0 %vm537_vm0, %v14578_v32  ;;  %v10109_v32 = vld [vmem:[%s13380_s11 + $0x1c9] sm:$0xff] }
 0x14b   : > { %18104 = vst [vmem:[#allocation70_spill] sm:$0xff] %v14580_v61  ;;  %v14586_v24 = vadd.f32 %v12519_v53, %v12421_v20  ;;  %12864 = vmatprep.mubr.msk.f32.mxu1 %vm537_vm0, %v18108_v48  ;;  %v1086_v36 = vpop.f32.mrf.mxu0  ;;  %v14596_v61 = vld [vmem:[%s13380_s11 + $0x181] sm:$0xff]  ;;  %v14610_v48 = vld [vmem:[%s13380_s11 + $0x189] sm:$0xff] }
 0x14c   : > { %v1663_v8 = vpop.f32.mrf.mxu1  ;;  %18109 = vst [vmem:[#allocation5_spill] sm:$0xff] %v14596_v61  ;;  %v18111_v53 = vld [vmem:[#allocation6_spill] sm:$0xff]  ;;  %18113 = vst [vmem:[#allocation73_spill] sm:$0xff] %v14610_v48 }
 0x14d   : > { %18106 = vst [vmem:[#allocation4_spill] sm:$0xff] %v14586_v24  ;;  %v14599_v27 = vadd.f32 %v1663_v8, %v1086_v36  ;;  %v12424_v40 = vpop.f32.mrf.mxu0  ;;  %12767 = vmatmul.mubr.msk.f32.gmra.mxu0 %vm537_vm0, %v14591_v55  ;;  %v10237_v36 = vld [vmem:[%s13380_s11 + $0x18a] sm:$0xff] }
 0x14e   : > { %v12522_v20 = vpop.f32.mrf.mxu1  ;;  %12865 = vmatmul.mubr.msk.f32.gmra.mxu1 %vm537_vm0, %v18111_v53  ;;  %12769 = vmatprep.mubr.msk.f32.mxu0 %vm537_vm0, %v14596_v61  ;;  %v14632_v61 = vld [vmem:[%s13387_s14 + $0x40] sm:$0xff] }
 0x14f   : > { %18110 = vst [vmem:[#allocation72_spill] sm:$0xff] %v14599_v27  ;;  %v14605_v24 = vadd.f32 %v12522_v20, %v12424_v40  ;;  %12867 = vmatprep.mubr.msk.f32.mxu1 %vm537_vm0, %v10236_v51  ;;  %v1096_v8 = vpop.f32.mrf.mxu0  ;;  %v10110_v51 = vld [vmem:[%s13380_s11 + $0x1d1] sm:$0xff]  ;;  %v18116_v20 = vld [vmem:[#allocation7_spill] sm:$0xff]  ;;  %13114 = vmatprep.subr.mxu0 %v14632_v61 }
 0x150   : > { %v1673_v27 = vpop.f32.mrf.mxu1 }
 0x151   : > { %18112 = vst [vmem:[#allocation6_spill] sm:$0xff] %v14605_v24  ;;  %v14615_v55 = vadd.f32 %v1673_v27, %v1096_v8  ;;  %v12427_v44 = vpop.f32.mrf.mxu0  ;;  %12770 = vmatmul.mubr.msk.f32.gmra.mxu0 %vm537_vm0, %v14610_v48  ;;  %v14627_v8 = vld [vmem:[%s13380_s11 + $0x1e1] sm:$0xff] }
 0x152   : > { %v12525_v53 = vpop.f32.mrf.mxu1  ;;  %12868 = vmatmul.mubr.msk.f32.gmra.mxu1 %vm537_vm0, %v10237_v36  ;;  %12772 = vmatprep.mubr.msk.f32.mxu0 %vm537_vm0, %v10109_v32  ;;  %18117 = vst [vmem:[#allocation7_spill] sm:$0xff] %v14627_v8  ;;  %v18119_v36 = vld [vmem:[#allocation9_spill] sm:$0xff]  ;;  %v18120_v32 = vld [vmem:[#allocation8_spill] sm:$0xff] }
 0x153   : > { %18114 = vst [vmem:[#allocation74_spill] sm:$0xff] %v14615_v55  ;;  %v14620_v40 = vadd.f32 %v12525_v53, %v12427_v44  ;;  %12870 = vmatprep.mubr.msk.f32.mxu1 %vm537_vm0, %v18116_v20  ;;  %v1106_v24 = vpop.f32.mrf.mxu0  ;;  %v14641_v20 = vld [vmem:[%s13380_s11 + $0x1e9] sm:$0xff] }
 0x154   : > { %v1683_v27 = vpop.f32.mrf.mxu1 }
 0x155   : > { %18115 = vst [vmem:[#allocation75_spill] sm:$0xff] %v14620_v40  ;;  %v14629_v55 = vadd.f32 %v1683_v27, %v1106_v24  ;;  %v12530_v48 = vpop.f32.mrf.mxu0  ;;  %12773 = vmatmul.mubr.msk.f32.gmra.mxu0 %vm537_vm0, %v10110_v51  ;;  %v18121_v51 = vld [vmem:[#allocation10_spill] sm:$0xff] }
 0x156   : > { %v12628_v44 = vpop.f32.mrf.mxu1  ;;  %12871 = vmatmul.mubr.msk.f32.gmra.mxu1 %vm537_vm0, %v18119_v36  ;;  %v2336_v53 = vadd.f32 %v12530_v48, %v18120_v32  ;;  %12775 = vmatprep.mubr.msk.f32.mxu0 %vm537_vm0, %v14627_v8 }
 0x157   : > { %18118 = vst [vmem:[#allocation76_spill] sm:$0xff] %v14629_v55  ;;  %12873 = vmatprep.mubr.msk.f32.mxu1 %vm537_vm0, %v14077_v57  ;;  %v2016_v24 = vpop.f32.mrf.mxu0  ;;  %v14646_v55 = vld [vmem:[%s13380_s11 + $0x1f9] sm:$0xff]  ;;  %v18123_v57 = vld [vmem:[#allocation11_spill] sm:$0xff] }
 0x158   : > { %v2724_v27 = vpop.f32.mrf.mxu1  ;;  %v2335_v36 = vadd.f32 %v2016_v24, %v18121_v51  ;;  %v14650_v40 = vadd.f32 %v12628_v44, %v2336_v53  ;;  %v14667_v24 = vld [vmem:[%s13380_s11 + $0x211] sm:$0xff] }
 0x159   : > { %v12533_v48 = vpop.f32.mrf.mxu0  ;;  %12776 = vmatmul.mubr.msk.f32.gmra.mxu0 %vm537_vm0, %v14641_v20  ;;  %v18125_v51 = vld [vmem:[#allocation12_spill] sm:$0xff] }
 0x15a   : > { %18122 = vst [vmem:[#allocation9_spill] sm:$0xff] %v14650_v40  ;;  %v12631_v32 = vpop.f32.mrf.mxu1  ;;  %12874 = vmatmul.mubr.msk.f32.gmra.mxu1 %vm537_vm0, %v14091_v22  ;;  %v2338_v8 = vadd.f32 %v12533_v48, %v18123_v57  ;;  %v14657_v46 = vadd.f32 %v2724_v27, %v2335_v36  ;;  %12778 = vmatprep.mubr.msk.f32.mxu0 %vm537_vm0, %v14646_v55  ;;  %v18127_v48 = vld [vmem:[#allocation13_spill] sm:$0xff] }
 0x15b   : > { %12876 = vmatprep.mubr.msk.f32.mxu1 %vm537_vm0, %v14096_v5  ;;  %v2026_v44 = vpop.f32.mrf.mxu0 }
 0x15c   : > { %18124 = vst [vmem:[#allocation8_spill] sm:$0xff] %v14657_v46  ;;  %v2734_v53 = vpop.f32.mrf.mxu1  ;;  %v2337_v22 = vadd.f32 %v2026_v44, %v18125_v51  ;;  %v14670_v40 = vadd.f32 %v12631_v32, %v2338_v8  ;;  %v14682_v46 = vld [vmem:[%s13380_s11 + $0x219] sm:$0xff]  ;;  %v14687_v44 = vld [vmem:[%s13380_s11 + $0x229] sm:$0xff] }
 0x15d   : > { %v12536_v27 = vpop.f32.mrf.mxu0  ;;  %12779 = vmatmul.mubr.msk.f32.gmra.mxu0 %vm537_vm0, %v14662_v23  ;;  %v18129_v51 = vld [vmem:[#allocation14_spill] sm:$0xff] }
 0x15e   : > { %18126 = vst [vmem:[#allocation10_spill] sm:$0xff] %v14670_v40  ;;  %v12634_v36 = vpop.f32.mrf.mxu1  ;;  %12877 = vmatmul.mubr.msk.f32.gmra.mxu1 %vm537_vm0, %v14109_v29  ;;  %v2340_v57 = vadd.f32 %v12536_v27, %v18127_v48  ;;  %v14677_v5 = vadd.f32 %v2734_v53, %v2337_v22  ;;  %12781 = vmatprep.mubr.msk.f32.mxu0 %vm537_vm0, %v14667_v24  ;;  %v18131_v27 = vld [vmem:[#allocation15_spill] sm:$0xff] }
 0x15f   : > { %12879 = vmatprep.mubr.msk.f32.mxu1 %vm537_vm0, %v14114_v63  ;;  %v2036_v8 = vpop.f32.mrf.mxu0 }
 0x160   : > { %18128 = vst [vmem:[#allocation11_spill] sm:$0xff] %v14677_v5  ;;  %v2744_v32 = vpop.f32.mrf.mxu1  ;;  %v2339_v29 = vadd.f32 %v2036_v8, %v18129_v51  ;;  %v14690_v40 = vadd.f32 %v12634_v36, %v2340_v57  ;;  %v14702_v5 = vld [vmem:[%s13380_s11 + $0x231] sm:$0xff]  ;;  %v14707_v8 = vld [vmem:[%s13380_s11 + $0x241] sm:$0xff] }
 0x161   : > { %v12539_v53 = vpop.f32.mrf.mxu0  ;;  %12782 = vmatmul.mubr.msk.f32.gmra.mxu0 %vm537_vm0, %v14682_v46  ;;  %v18133_v51 = vld [vmem:[#allocation16_spill] sm:$0xff] }
 0x162   : > { %18130 = vst [vmem:[#allocation12_spill] sm:$0xff] %v14690_v40  ;;  %v12637_v22 = vpop.f32.mrf.mxu1  ;;  %12880 = vmatmul.mubr.msk.f32.gmra.mxu1 %vm537_vm0, %v14127_v37  ;;  %v2342_v48 = vadd.f32 %v12539_v53, %v18131_v27  ;;  %v14697_v63 = vadd.f32 %v2744_v32, %v2339_v29  ;;  %12784 = vmatprep.mubr.msk.f32.mxu0 %vm537_vm0, %v14687_v44  ;;  %v18135_v53 = vld [vmem:[#allocation17_spill] sm:$0xff] }
 0x163   : > { %12882 = vmatprep.mubr.msk.f32.mxu1 %vm537_vm0, %v14132_v18  ;;  %v2046_v36 = vpop.f32.mrf.mxu0 }
 0x164   : > { %18132 = vst [vmem:[#allocation13_spill] sm:$0xff] %v14697_v63  ;;  %v2754_v57 = vpop.f32.mrf.mxu1  ;;  %v2341_v37 = vadd.f32 %v2046_v36, %v18133_v51  ;;  %v14710_v40 = vadd.f32 %v12637_v22, %v2342_v48  ;;  %v14722_v63 = vld [vmem:[%s13380_s11 + $0x249] sm:$0xff]  ;;  %v14727_v36 = vld [vmem:[%s13380_s11 + $0x259] sm:$0xff] }
 0x165   : > { %v12542_v32 = vpop.f32.mrf.mxu0  ;;  %12785 = vmatmul.mubr.msk.f32.gmra.mxu0 %vm537_vm0, %v14702_v5  ;;  %v18137_v51 = vld [vmem:[#allocation18_spill] sm:$0xff] }
 0x166   : > { %18134 = vst [vmem:[#allocation14_spill] sm:$0xff] %v14710_v40  ;;  %v12640_v29 = vpop.f32.mrf.mxu1  ;;  %12883 = vmatmul.mubr.msk.f32.gmra.mxu1 %vm537_vm0, %v14145_v45  ;;  %v2344_v27 = vadd.f32 %v12542_v32, %v18135_v53  ;;  %v14717_v18 = vadd.f32 %v2754_v57, %v2341_v37  ;;  %12787 = vmatprep.mubr.msk.f32.mxu0 %vm537_vm0, %v14707_v8  ;;  %v18139_v32 = vld [vmem:[#allocation19_spill] sm:$0xff] }
 0x167   : > { %12885 = vmatprep.mubr.msk.f32.mxu1 %vm537_vm0, %v14150_v3  ;;  %v2056_v22 = vpop.f32.mrf.mxu0 }
 0x168   : > { %18136 = vst [vmem:[#allocation15_spill] sm:$0xff] %v14717_v18  ;;  %v2764_v48 = vpop.f32.mrf.mxu1  ;;  %v2343_v45 = vadd.f32 %v2056_v22, %v18137_v51  ;;  %v14730_v40 = vadd.f32 %v12640_v29, %v2344_v27  ;;  %v14742_v18 = vld [vmem:[%s13380_s11 + $0x261] sm:$0xff]  ;;  %v14747_v22 = vld [vmem:[%s13380_s11 + $0x271] sm:$0xff] }
 0x169   : > { %v12545_v57 = vpop.f32.mrf.mxu0  ;;  %12788 = vmatmul.mubr.msk.f32.gmra.mxu0 %vm537_vm0, %v14722_v63  ;;  %v18141_v51 = vld [vmem:[#allocation20_spill] sm:$0xff] }
 0x16a   : > { %18138 = vst [vmem:[#allocation16_spill] sm:$0xff] %v14730_v40  ;;  %v12643_v37 = vpop.f32.mrf.mxu1  ;;  %12886 = vmatmul.mubr.msk.f32.gmra.mxu1 %vm537_vm0, %v14163_v52  ;;  %v2346_v53 = vadd.f32 %v12545_v57, %v18139_v32  ;;  %v14737_v3 = vadd.f32 %v2764_v48, %v2343_v45  ;;  %12790 = vmatprep.mubr.msk.f32.mxu0 %vm537_vm0, %v14727_v36  ;;  %v18143_v57 = vld [vmem:[#allocation21_spill] sm:$0xff] }
 0x16b   : > { %12888 = vmatprep.mubr.msk.f32.mxu1 %vm537_vm0, %v14168_v39  ;;  %v2066_v29 = vpop.f32.mrf.mxu0 }
 0x16c   : > { %18140 = vst [vmem:[#allocation17_spill] sm:$0xff] %v14737_v3  ;;  %v2774_v27 = vpop.f32.mrf.mxu1  ;;  %v2345_v52 = vadd.f32 %v2066_v29, %v18141_v51  ;;  %v14750_v40 = vadd.f32 %v12643_v37, %v2346_v53  ;;  %v14762_v3 = vld [vmem:[%s13380_s11 + $0x279] sm:$0xff]  ;;  %v14767_v29 = vld [vmem:[%s13380_s11 + $0x289] sm:$0xff] }
 0x16d   : > { %v12548_v48 = vpop.f32.mrf.mxu0  ;;  %12791 = vmatmul.mubr.msk.f32.gmra.mxu0 %vm537_vm0, %v14742_v18  ;;  %v18145_v51 = vld [vmem:[#allocation22_spill] sm:$0xff] }
 0x16e   : > { %18142 = vst [vmem:[#allocation18_spill] sm:$0xff] %v14750_v40  ;;  %v12646_v45 = vpop.f32.mrf.mxu1  ;;  %12889 = vmatmul.mubr.msk.f32.gmra.mxu1 %vm537_vm0, %v14181_v60  ;;  %v2348_v32 = vadd.f32 %v12548_v48, %v18143_v57  ;;  %v14757_v39 = vadd.f32 %v2774_v27, %v2345_v52  ;;  %12793 = vmatprep.mubr.msk.f32.mxu0 %vm537_vm0, %v14747_v22  ;;  %v18147_v48 = vld [vmem:[#allocation23_spill] sm:$0xff] }
 0x16f   : > { %12891 = vmatprep.mubr.msk.f32.mxu1 %vm537_vm0, %v14186_v26  ;;  %v2076_v37 = vpop.f32.mrf.mxu0 }
 0x170   : > { %18144 = vst [vmem:[#allocation19_spill] sm:$0xff] %v14757_v39  ;;  %v2784_v53 = vpop.f32.mrf.mxu1  ;;  %v2347_v60 = vadd.f32 %v2076_v37, %v18145_v51  ;;  %v14770_v40 = vadd.f32 %v12646_v45, %v2348_v32  ;;  %v14782_v39 = vld [vmem:[%s13380_s11 + $0x291] sm:$0xff]  ;;  %v14787_v37 = vld [vmem:[%s13380_s11 + $0x2a1] sm:$0xff] }
 0x171   : > { %v12551_v27 = vpop.f32.mrf.mxu0  ;;  %12794 = vmatmul.mubr.msk.f32.gmra.mxu0 %vm537_vm0, %v14762_v3  ;;  %v18149_v51 = vld [vmem:[#allocation24_spill] sm:$0xff] }
 0x172   : > { %18146 = vst [vmem:[#allocation20_spill] sm:$0xff] %v14770_v40  ;;  %v12649_v52 = vpop.f32.mrf.mxu1  ;;  %12892 = vmatmul.mubr.msk.f32.gmra.mxu1 %vm537_vm0, %v14199_v4  ;;  %v2350_v57 = vadd.f32 %v12551_v27, %v18147_v48  ;;  %v14777_v26 = vadd.f32 %v2784_v53, %v2347_v60  ;;  %12796 = vmatprep.mubr.msk.f32.mxu0 %vm537_vm0, %v14767_v29  ;;  %v18151_v27 = vld [vmem:[#allocation25_spill] sm:$0xff] }
 0x173   : > { %12894 = vmatprep.mubr.msk.f32.mxu1 %vm537_vm0, %v14204_v33  ;;  %v2086_v45 = vpop.f32.mrf.mxu0 }
 0x174   : > { %18148 = vst [vmem:[#allocation21_spill] sm:$0xff] %v14777_v26  ;;  %v2794_v32 = vpop.f32.mrf.mxu1  ;;  %v2349_v4 = vadd.f32 %v2086_v45, %v18149_v51  ;;  %v14790_v40 = vadd.f32 %v12649_v52, %v2350_v57  ;;  %v14802_v26 = vld [vmem:[%s13380_s11 + $0x2a9] sm:$0xff]  ;;  %v14807_v45 = vld [vmem:[%s13380_s11 + $0x2b9] sm:$0xff] }
 0x175   : > { %v12554_v53 = vpop.f32.mrf.mxu0  ;;  %12797 = vmatmul.mubr.msk.f32.gmra.mxu0 %vm537_vm0, %v14782_v39  ;;  %v18153_v51 = vld [vmem:[#allocation26_spill] sm:$0xff] }
 0x176   : > { %18150 = vst [vmem:[#allocation22_spill] sm:$0xff] %v14790_v40  ;;  %v12652_v60 = vpop.f32.mrf.mxu1  ;;  %12895 = vmatmul.mubr.msk.f32.gmra.mxu1 %vm537_vm0, %v14217_v12  ;;  %v2352_v48 = vadd.f32 %v12554_v53, %v18151_v27  ;;  %v14797_v33 = vadd.f32 %v2794_v32, %v2349_v4  ;;  %12799 = vmatprep.mubr.msk.f32.mxu0 %vm537_vm0, %v14787_v37  ;;  %v18155_v53 = vld [vmem:[#allocation27_spill] sm:$0xff] }
 0x177   : > { %12897 = vmatprep.mubr.msk.f32.mxu1 %vm537_vm0, %v14222_v41  ;;  %v2096_v52 = vpop.f32.mrf.mxu0 }
 0x178   : > { %18152 = vst [vmem:[#allocation23_spill] sm:$0xff] %v14797_v33  ;;  %v2804_v57 = vpop.f32.mrf.mxu1  ;;  %v2351_v12 = vadd.f32 %v2096_v52, %v18153_v51  ;;  %v14810_v40 = vadd.f32 %v12652_v60, %v2352_v48  ;;  %v14822_v33 = vld [vmem:[%s13380_s11 + $0x2c1] sm:$0xff]  ;;  %v14827_v52 = vld [vmem:[%s13380_s11 + $0x2d1] sm:$0xff] }
 0x179   : > { %v12557_v32 = vpop.f32.mrf.mxu0  ;;  %12800 = vmatmul.mubr.msk.f32.gmra.mxu0 %vm537_vm0, %v14802_v26  ;;  %v18157_v51 = vld [vmem:[#allocation28_spill] sm:$0xff] }
 0x17a   : > { %18154 = vst [vmem:[#allocation24_spill] sm:$0xff] %v14810_v40  ;;  %v12655_v4 = vpop.f32.mrf.mxu1  ;;  %12898 = vmatmul.mubr.msk.f32.gmra.mxu1 %vm537_vm0, %v14235_v28  ;;  %v2354_v27 = vadd.f32 %v12557_v32, %v18155_v53  ;;  %v14817_v41 = vadd.f32 %v2804_v57, %v2351_v12  ;;  %12802 = vmatprep.mubr.msk.f32.mxu0 %vm537_vm0, %v14807_v45  ;;  %v18159_v32 = vld [vmem:[#allocation29_spill] sm:$0xff] }
 0x17b   : > { %12900 = vmatprep.mubr.msk.f32.mxu1 %vm537_vm0, %v14240_v49  ;;  %v2106_v60 = vpop.f32.mrf.mxu0 }
 0x17c   : > { %18156 = vst [vmem:[#allocation25_spill] sm:$0xff] %v14817_v41  ;;  %v2814_v48 = vpop.f32.mrf.mxu1  ;;  %v2353_v28 = vadd.f32 %v2106_v60, %v18157_v51  ;;  %v14830_v40 = vadd.f32 %v12655_v4, %v2354_v27  ;;  %v14842_v41 = vld [vmem:[%s13380_s11 + $0x2d9] sm:$0xff]  ;;  %v14847_v60 = vld [vmem:[%s13380_s11 + $0x2e9] sm:$0xff] }
 0x17d   : > { %v12560_v57 = vpop.f32.mrf.mxu0  ;;  %12803 = vmatmul.mubr.msk.f32.gmra.mxu0 %vm537_vm0, %v14822_v33  ;;  %18161 = vst [vmem:[#allocation28_spill] sm:$0xff] %v14842_v41  ;;  %18162 = vst [vmem:[#allocation29_spill] sm:$0xff] %v14847_v60  ;;  %v18163_v51 = vld [vmem:[#allocation30_spill] sm:$0xff] }
 0x17e   : > { %18158 = vst [vmem:[#allocation26_spill] sm:$0xff] %v14830_v40  ;;  %v12658_v12 = vpop.f32.mrf.mxu1  ;;  %12901 = vmatmul.mubr.msk.f32.gmra.mxu1 %vm537_vm0, %v14253_v43  ;;  %v2356_v53 = vadd.f32 %v12560_v57, %v18159_v32  ;;  %v14837_v49 = vadd.f32 %v2814_v48, %v2353_v28  ;;  %12805 = vmatprep.mubr.msk.f32.mxu0 %vm537_vm0, %v14827_v52  ;;  %v18165_v57 = vld [vmem:[#allocation31_spill] sm:$0xff] }
 0x17f   : > { %12903 = vmatprep.mubr.msk.f32.mxu1 %vm537_vm0, %v14258_v56  ;;  %v2116_v4 = vpop.f32.mrf.mxu0 }
 0x180   : > { %18160 = vst [vmem:[#allocation27_spill] sm:$0xff] %v14837_v49  ;;  %v2824_v27 = vpop.f32.mrf.mxu1  ;;  %v2355_v43 = vadd.f32 %v2116_v4, %v18163_v51  ;;  %v14850_v40 = vadd.f32 %v12658_v12, %v2356_v53  ;;  %v14862_v49 = vld [vmem:[%s13380_s11 + $0x2f1] sm:$0xff]  ;;  %v14867_v4 = vld [vmem:[%s13380_s11 + $0x301] sm:$0xff] }
 0x181   : > { %v12563_v48 = vpop.f32.mrf.mxu0  ;;  %12806 = vmatmul.mubr.msk.f32.gmra.mxu0 %vm537_vm0, %v14842_v41  ;;  %18167 = vst [vmem:[#allocation77_spill] sm:$0xff] %v14862_v49  ;;  %18168 = vst [vmem:[#allocation78_spill] sm:$0xff] %v14867_v4  ;;  %v18169_v51 = vld [vmem:[#allocation32_spill] sm:$0xff]  ;;  %v14923_v41 = vld [vmem:[%s13380_s11 + $0x339] sm:$0xff] }
 0x182   : > { %18164 = vst [vmem:[#allocation30_spill] sm:$0xff] %v14850_v40  ;;  %v12661_v28 = vpop.f32.mrf.mxu1  ;;  %12904 = vmatmul.mubr.msk.f32.gmra.mxu1 %vm537_vm0, %v14271_v58  ;;  %v2358_v32 = vadd.f32 %v12563_v48, %v18165_v57  ;;  %v14857_v56 = vadd.f32 %v2824_v27, %v2355_v43  ;;  %12808 = vmatprep.mubr.msk.f32.mxu0 %vm537_vm0, %v14847_v60  ;;  %v18171_v48 = vld [vmem:[#allocation34_spill] sm:$0xff]  ;;  %v18172_v57 = vld [vmem:[#allocation33_spill] sm:$0xff]  ;;  %v14882_v60 = vld [vmem:[%s13380_s11 + $0x309] sm:$0xff] }
 0x183   : > { %12906 = vmatprep.mubr.msk.f32.mxu1 %vm537_vm0, %v14276_v0  ;;  %v2126_v12 = vpop.f32.mrf.mxu0  ;;  %18174 = vst [vmem:[#allocation33_spill] sm:$0xff] %v14882_v60 }
 0x184   : > { %18166 = vst [vmem:[#allocation31_spill] sm:$0xff] %v14857_v56  ;;  %v2834_v53 = vpop.f32.mrf.mxu1  ;;  %v2357_v58 = vadd.f32 %v2126_v12, %v18169_v51  ;;  %v14870_v40 = vadd.f32 %v12661_v28, %v2358_v32  ;;  %v18175_v28 = vld [vmem:[#allocation2_spill] sm:$0xff] }
 0x185   : > { %v12566_v27 = vpop.f32.mrf.mxu0  ;;  %12809 = vmatmul.mubr.msk.f32.gmra.mxu0 %vm537_vm0, %v14862_v49  ;;  %v14887_v51 = vld [vmem:[%s13380_s11 + $0x319] sm:$0xff]  ;;  %v14902_v49 = vld [vmem:[%s13380_s11 + $0x321] sm:$0xff] }
 0x186   : > { %18170 = vst [vmem:[#allocation32_spill] sm:$0xff] %v14870_v40  ;;  %v12664_v43 = vpop.f32.mrf.mxu1  ;;  %12907 = vmatmul.mubr.msk.f32.gmra.mxu1 %vm537_vm0, %v18171_v48  ;;  %v2360_v56 = vadd.f32 %v12566_v27, %v18172_v57  ;;  %v14877_v0 = vadd.f32 %v2834_v53, %v2357_v58  ;;  %12811 = vmatprep.mubr.msk.f32.mxu0 %vm537_vm0, %v14867_v4  ;;  %18176 = vst [vmem:[#allocation2_spill] sm:$0xff] %v14887_v51  ;;  %v18177_v48 = vld [vmem:[#allocation35_spill] sm:$0xff]  ;;  %v18179_v57 = vld [vmem:[#allocation37_spill] sm:$0xff] }
 0x187   : > { %12909 = vmatprep.mubr.msk.f32.mxu1 %vm537_vm0, %v18175_v28  ;;  %v2136_v32 = vpop.f32.mrf.mxu0 }
 0x188   : > { %18173 = vst [vmem:[#allocation34_spill] sm:$0xff] %v14877_v0  ;;  %v2844_v12 = vpop.f32.mrf.mxu1  ;;  %v2359_v40 = vadd.f32 %v2136_v32, %v18177_v48  ;;  %v14890_v27 = vadd.f32 %v12664_v43, %v2360_v56  ;;  %v18180_v0 = vld [vmem:[#allocation36_spill] sm:$0xff]  ;;  %v18183_v56 = vld [vmem:[#allocation3_spill] sm:$0xff] }
 0x189   : > { %v12569_v53 = vpop.f32.mrf.mxu0  ;;  %12812 = vmatmul.mubr.msk.f32.gmra.mxu0 %vm537_vm0, %v14882_v60  ;;  %18182 = vst [vmem:[#allocation36_spill] sm:$0xff] %v14902_v49  ;;  %v14907_v48 = vld [vmem:[%s13380_s11 + $0x331] sm:$0xff] }
 0x18a   : > { %18178 = vst [vmem:[#allocation35_spill] sm:$0xff] %v14890_v27  ;;  %v12667_v58 = vpop.f32.mrf.mxu1  ;;  %12910 = vmatmul.mubr.msk.f32.gmra.mxu1 %vm537_vm0, %v18179_v57  ;;  %v2362_v28 = vadd.f32 %v12569_v53, %v18180_v0  ;;  %v14897_v4 = vadd.f32 %v2844_v12, %v2359_v40  ;;  %12814 = vmatprep.mubr.msk.f32.mxu0 %vm537_vm0, %v14887_v51  ;;  %v10268_v57 = vld [vmem:[%s13380_s11 + $0x332] sm:$0xff]  ;;  %v18184_v27 = vld [vmem:[#allocation38_spill] sm:$0xff] }
 0x18b   : > { %12912 = vmatprep.mubr.msk.f32.mxu1 %vm537_vm0, %v18183_v56  ;;  %v2146_v43 = vpop.f32.mrf.mxu0  ;;  %v18187_v56 = vld [vmem:[#allocation39_spill] sm:$0xff] }
 0x18c   : > { %18181 = vst [vmem:[#allocation37_spill] sm:$0xff] %v14897_v4  ;;  %v2854_v32 = vpop.f32.mrf.mxu1  ;;  %v2361_v0 = vadd.f32 %v2146_v43, %v18184_v27  ;;  %v14911_v40 = vadd.f32 %v12667_v58, %v2362_v28  ;;  %v18186_v4 = vld [vmem:[#allocation40_spill] sm:$0xff]  ;;  %v10269_v27 = vld [vmem:[%s13380_s11 + $0x33a] sm:$0xff] }
 0x18d   : > { %v12572_v12 = vpop.f32.mrf.mxu0  ;;  %12815 = vmatmul.mubr.msk.f32.gmra.mxu0 %vm537_vm0, %v14902_v49  ;;  %v10335_v43 = vld [vmem:[%s13380_s11 + $0x30] sm:$0xff] }
 0x18e   : > { %18185 = vst [vmem:[#allocation3_spill] sm:$0xff] %v14911_v40  ;;  %v12670_v53 = vpop.f32.mrf.mxu1  ;;  %12913 = vmatmul.mubr.msk.f32.gmra.mxu1 %vm537_vm0, %v18186_v4  ;;  %v2364_v51 = vadd.f32 %v12572_v12, %v18187_v56  ;;  %v14918_v60 = vadd.f32 %v2854_v32, %v2361_v0  ;;  %12817 = vmatprep.mubr.msk.f32.mxu0 %vm537_vm0, %v14907_v48  ;;  %v18188_v40 = vld [vmem:[#allocation41_spill] sm:$0xff] }
 0x18f   : > { %12915 = vmatprep.mubr.msk.f32.mxu1 %vm537_vm0, %v10268_v57  ;;  %v2156_v58 = vpop.f32.mrf.mxu0  ;;  %v10336_v57 = vld [vmem:[%s13380_s11 + $0x38] sm:$0xff] }
 0x190   : > { %v2864_v28 = vpop.f32.mrf.mxu1  ;;  %v2363_v49 = vadd.f32 %v2156_v58, %v18188_v40  ;;  %v14929_v4 = vadd.f32 %v12670_v53, %v2364_v51  ;;  %v10337_v53 = vld [vmem:[%s13380_s11 + $0x48] sm:$0xff] }
 0x191   : > { %v12575_v12 = vpop.f32.mrf.mxu0  ;;  %12818 = vmatmul.mubr.msk.f32.gmra.mxu0 %vm537_vm0, %v14923_v41 }
 0x192   : > { %18189 = vst [vmem:[#allocation38_spill] sm:$0xff] %v14929_v4  ;;  %v12673_v32 = vpop.f32.mrf.mxu1  ;;  %12916 = vmatmul.mubr.msk.f32.gmra.mxu1 %vm537_vm0, %v10269_v27  ;;  %v2366_v0 = vadd.f32 %v12575_v12, %v14336_v54  ;;  %v14935_v56 = vadd.f32 %v2864_v28, %v2363_v49  ;;  %12920 = vmatprep.mubr.msk.f32.mxu0 %vm537_vm0, %v10335_v43  ;;  %v10339_v12 = vld [vmem:[%s13380_s11 + $0x60] sm:$0xff] }
 0x193   : > { %13018 = vmatprep.mubr.msk.f32.mxu1 %vm537_vm0, %v14343_v6  ;;  %v2166_v51 = vpop.f32.mrf.mxu0  ;;  %v10338_v6 = vld [vmem:[%s13380_s11 + $0x50] sm:$0xff] }
 0x194   : > { %v2874_v40 = vpop.f32.mrf.mxu1  ;;  %v2365_v58 = vadd.f32 %v2166_v51, %v14345_v14  ;;  %v14943_v4 = vadd.f32 %v12673_v32, %v2366_v0 }
 0x195   : > { %v12578_v27 = vpop.f32.mrf.mxu0  ;;  %12921 = vmatmul.mubr.msk.f32.vlgmr.msra.gmra.mxu0 %vm537_vm0, %v10336_v57  ;;  %v18190_v57 = vld [vmem:[#allocation42_spill] sm:$0xff] }
 0x196   : > { %v12676_v54 = vpop.f32.mrf.mxu1  ;;  %13019 = vmatmul.mubr.msk.f32.vlgmr.msra.gmra.mxu1 %vm537_vm0, %v14356_v62  ;;  %v2368_v49 = vadd.f32 %v12578_v27, %v14351_v1  ;;  %v14949_v28 = vadd.f32 %v2874_v40, %v2365_v58  ;;  %12923 = vmatprep.mubr.msk.f32.mxu0 %vm537_vm0, %v10337_v53  ;;  %v10340_v40 = vld [vmem:[%s13380_s11 + $0x68] sm:$0xff]  ;;  %v10341_v53 = vld [vmem:[%s13380_s11 + $0x78] sm:$0xff] }
 0x197   : > { %13021 = vmatprep.mubr.msk.f32.mxu1 %vm537_vm0, %v14361_v31  ;;  %v2176_v14 = vpop.f32.mrf.mxu0  ;;  %13115 = vmatpush3.msra.mxu0 %v14632_v61  ;;  %v18191_v58 = vld [vmem:[#allocation43_spill] sm:$0xff] }
 0x198   : > { %v2884_v43 = vpop.f32.mrf.mxu1  ;;  %v2367_v32 = vadd.f32 %v2176_v14, %v14364_v16  ;;  %v14958_v62 = vadd.f32 %v12676_v54, %v2368_v49 }
 0x199   : > { %v12581_v1 = vpop.f32.mrf.mxu0  ;;  %12924 = vmatmul.mubr.msk.f32.gmra.mxu0 %vm537_vm0, %v10338_v6  ;;  %v18192_v6 = vld [vmem:[#allocation44_spill] sm:$0xff] }
 0x19a   : > { %v12679_v0 = vpop.f32.mrf.mxu1  ;;  %13022 = vmatmul.mubr.msk.f32.gmra.mxu1 %vm537_vm0, %v14375_v2  ;;  %v2370_v51 = vadd.f32 %v12581_v1, %v18190_v57  ;;  %v14964_v31 = vadd.f32 %v2884_v43, %v2367_v32  ;;  %12926 = vmatprep.mubr.msk.f32.mxu0 %vm537_vm0, %v10339_v12  ;;  %v10343_v1 = vld [vmem:[%s13380_s11 + $0x90] sm:$0xff] }
 0x19b   : > { %13024 = vmatprep.mubr.msk.f32.mxu1 %vm537_vm0, %v14380_v50  ;;  %v2186_v16 = vpop.f32.mrf.mxu0  ;;  %v10342_v50 = vld [vmem:[%s13380_s11 + $0x80] sm:$0xff] }
 0x19c   : > { %v2894_v61 = vpop.f32.mrf.mxu1  ;;  %v2369_v27 = vadd.f32 %v2186_v16, %v18191_v58  ;;  %v14972_v54 = vadd.f32 %v12679_v0, %v2370_v51  ;;  %v18193_v0 = vld [vmem:[#allocation45_spill] sm:$0xff]  ;;  %v18194_v16 = vld [vmem:[#allocation46_spill] sm:$0xff] }
 0x19d   : > { %v12584_v2 = vpop.f32.mrf.mxu0  ;;  %12927 = vmatmul.mubr.msk.f32.gmra.mxu0 %vm537_vm0, %v10340_v40 }
 0x19e   : > { %v12682_v49 = vpop.f32.mrf.mxu1  ;;  %13025 = vmatmul.mubr.msk.f32.gmra.mxu1 %vm537_vm0, %v14393_v11  ;;  %v2372_v14 = vadd.f32 %v12584_v2, %v18192_v6  ;;  %v14978_v43 = vadd.f32 %v2894_v61, %v2369_v27  ;;  %12929 = vmatprep.mubr.msk.f32.mxu0 %vm537_vm0, %v10341_v53  ;;  %v10345_v2 = vld [vmem:[%s13380_s11 + $0xa8] sm:$0xff] }
 0x19f   : > { %13027 = vmatprep.mubr.msk.f32.mxu1 %vm537_vm0, %v14398_v47  ;;  %v2196_v12 = vpop.f32.mrf.mxu0  ;;  %v10344_v47 = vld [vmem:[%s13380_s11 + $0x98] sm:$0xff] }
 0x1a0   : > { %v2904_v32 = vpop.f32.mrf.mxu1  ;;  %v2371_v57 = vadd.f32 %v2196_v12, %v18193_v0  ;;  %v14986_v51 = vadd.f32 %v12682_v49, %v2372_v14  ;;  %v18195_v49 = vld [vmem:[#allocation47_spill] sm:$0xff]  ;;  %v18196_v12 = vld [vmem:[#allocation48_spill] sm:$0xff] }
 0x1a1   : > { %v12587_v11 = vpop.f32.mrf.mxu0  ;;  %12930 = vmatmul.mubr.msk.f32.gmra.mxu0 %vm537_vm0, %v10342_v50 }
 0x1a2   : > { %v12685_v40 = vpop.f32.mrf.mxu1  ;;  %13028 = vmatmul.mubr.msk.f32.gmra.mxu1 %vm537_vm0, %v14411_v10  ;;  %v2374_v61 = vadd.f32 %v12587_v11, %v18194_v16  ;;  %v14992_v53 = vadd.f32 %v2904_v32, %v2371_v57  ;;  %12932 = vmatprep.mubr.msk.f32.mxu0 %vm537_vm0, %v10343_v1  ;;  %v10347_v11 = vld [vmem:[%s13380_s11 + $0xc0] sm:$0xff] }
 0x1a3   : > { %13030 = vmatprep.mubr.msk.f32.mxu1 %vm537_vm0, %v14416_v59  ;;  %v2206_v58 = vpop.f32.mrf.mxu0  ;;  %v10346_v59 = vld [vmem:[%s13380_s11 + $0xb0] sm:$0xff] }
 0x1a4   : > { %v2914_v27 = vpop.f32.mrf.mxu1  ;;  %v2373_v6 = vadd.f32 %v2206_v58, %v18195_v49  ;;  %v15000_v14 = vadd.f32 %v12685_v40, %v2374_v61  ;;  %v18197_v40 = vld [vmem:[#allocation49_spill] sm:$0xff]  ;;  %v18198_v58 = vld [vmem:[#allocation50_spill] sm:$0xff] }
 0x1a5   : > { %v12590_v10 = vpop.f32.mrf.mxu0  ;;  %12933 = vmatmul.mubr.msk.f32.gmra.mxu0 %vm537_vm0, %v10344_v47 }
 0x1a6   : > { %v12688_v50 = vpop.f32.mrf.mxu1  ;;  %13031 = vmatmul.mubr.msk.f32.gmra.mxu1 %vm537_vm0, %v14429_v17  ;;  %v2376_v32 = vadd.f32 %v12590_v10, %v18196_v12  ;;  %v15006_v1 = vadd.f32 %v2914_v27, %v2373_v6  ;;  %12935 = vmatprep.mubr.msk.f32.mxu0 %vm537_vm0, %v10345_v2  ;;  %v10349_v10 = vld [vmem:[%s13380_s11 + $0xd8] sm:$0xff] }
 0x1a7   : > { %13033 = vmatprep.mubr.msk.f32.mxu1 %vm537_vm0, %v14434_v35  ;;  %v2216_v0 = vpop.f32.mrf.mxu0  ;;  %v10348_v35 = vld [vmem:[%s13380_s11 + $0xc8] sm:$0xff] }
 0x1a8   : > { %v2924_v57 = vpop.f32.mrf.mxu1  ;;  %v2375_v16 = vadd.f32 %v2216_v0, %v18197_v40  ;;  %v15014_v61 = vadd.f32 %v12688_v50, %v2376_v32  ;;  %v18199_v50 = vld [vmem:[#allocation51_spill] sm:$0xff]  ;;  %v18200_v0 = vld [vmem:[#allocation52_spill] sm:$0xff] }
 0x1a9   : > { %v12593_v17 = vpop.f32.mrf.mxu0  ;;  %12936 = vmatmul.mubr.msk.f32.gmra.mxu0 %vm537_vm0, %v10346_v59 }
 0x1aa   : > { %v12691_v47 = vpop.f32.mrf.mxu1  ;;  %13034 = vmatmul.mubr.msk.f32.gmra.mxu1 %vm537_vm0, %v14447_v21  ;;  %v2378_v27 = vadd.f32 %v12593_v17, %v18198_v58  ;;  %v15020_v2 = vadd.f32 %v2924_v57, %v2375_v16  ;;  %12938 = vmatprep.mubr.msk.f32.mxu0 %vm537_vm0, %v10347_v11  ;;  %v10351_v17 = vld [vmem:[%s13380_s11 + $0xf0] sm:$0xff] }
 0x1ab   : > { %13036 = vmatprep.mubr.msk.f32.mxu1 %vm537_vm0, %v14452_v7  ;;  %v2226_v49 = vpop.f32.mrf.mxu0  ;;  %v10350_v7 = vld [vmem:[%s13380_s11 + $0xe0] sm:$0xff] }
 0x1ac   : > { %v2934_v6 = vpop.f32.mrf.mxu1  ;;  %v2377_v12 = vadd.f32 %v2226_v49, %v18199_v50  ;;  %v15028_v32 = vadd.f32 %v12691_v47, %v2378_v27  ;;  %v18201_v47 = vld [vmem:[#allocation53_spill] sm:$0xff]  ;;  %v18202_v49 = vld [vmem:[#allocation54_spill] sm:$0xff] }
 0x1ad   : > { %v12596_v21 = vpop.f32.mrf.mxu0  ;;  %12939 = vmatmul.mubr.msk.f32.gmra.mxu0 %vm537_vm0, %v10348_v35 }
 0x1ae   : > { %v12694_v59 = vpop.f32.mrf.mxu1  ;;  %13037 = vmatmul.mubr.msk.f32.gmra.mxu1 %vm537_vm0, %v14465_v25  ;;  %v2380_v57 = vadd.f32 %v12596_v21, %v18200_v0  ;;  %v15034_v11 = vadd.f32 %v2934_v6, %v2377_v12  ;;  %12941 = vmatprep.mubr.msk.f32.mxu0 %vm537_vm0, %v10349_v10  ;;  %v10353_v21 = vld [vmem:[%s13380_s11 + $0x108] sm:$0xff] }
 0x1af   : > { %13039 = vmatprep.mubr.msk.f32.mxu1 %vm537_vm0, %v14470_v9  ;;  %v2236_v40 = vpop.f32.mrf.mxu0  ;;  %v10352_v9 = vld [vmem:[%s13380_s11 + $0xf8] sm:$0xff] }
 0x1b0   : > { %v2944_v16 = vpop.f32.mrf.mxu1  ;;  %v2379_v58 = vadd.f32 %v2236_v40, %v18201_v47  ;;  %v15042_v27 = vadd.f32 %v12694_v59, %v2380_v57  ;;  %v18203_v59 = vld [vmem:[#allocation55_spill] sm:$0xff]  ;;  %v18204_v40 = vld [vmem:[#allocation56_spill] sm:$0xff] }
 0x1b1   : > { %v12599_v25 = vpop.f32.mrf.mxu0  ;;  %12942 = vmatmul.mubr.msk.f32.gmra.mxu0 %vm537_vm0, %v10350_v7 }
 0x1b2   : > { %v12697_v35 = vpop.f32.mrf.mxu1  ;;  %13040 = vmatmul.mubr.msk.f32.gmra.mxu1 %vm537_vm0, %v14483_v30  ;;  %v2382_v6 = vadd.f32 %v12599_v25, %v18202_v49  ;;  %v15048_v10 = vadd.f32 %v2944_v16, %v2379_v58  ;;  %12944 = vmatprep.mubr.msk.f32.mxu0 %vm537_vm0, %v10351_v17  ;;  %v10355_v25 = vld [vmem:[%s13380_s11 + $0x120] sm:$0xff] }
 0x1b3   : > { %13042 = vmatprep.mubr.msk.f32.mxu1 %vm537_vm0, %v14488_v13  ;;  %v2246_v50 = vpop.f32.mrf.mxu0  ;;  %v10354_v13 = vld [vmem:[%s13380_s11 + $0x110] sm:$0xff] }
 0x1b4   : > { %v2954_v12 = vpop.f32.mrf.mxu1  ;;  %v2381_v0 = vadd.f32 %v2246_v50, %v18203_v59  ;;  %v15056_v57 = vadd.f32 %v12697_v35, %v2382_v6  ;;  %v18205_v35 = vld [vmem:[#allocation57_spill] sm:$0xff]  ;;  %v18206_v50 = vld [vmem:[#allocation58_spill] sm:$0xff] }
 0x1b5   : > { %v12602_v30 = vpop.f32.mrf.mxu0  ;;  %12945 = vmatmul.mubr.msk.f32.gmra.mxu0 %vm537_vm0, %v10352_v9 }
 0x1b6   : > { %v12700_v7 = vpop.f32.mrf.mxu1  ;;  %13043 = vmatmul.mubr.msk.f32.gmra.mxu1 %vm537_vm0, %v14501_v34  ;;  %v2384_v16 = vadd.f32 %v12602_v30, %v18204_v40  ;;  %v15062_v17 = vadd.f32 %v2954_v12, %v2381_v0  ;;  %12947 = vmatprep.mubr.msk.f32.mxu0 %vm537_vm0, %v10353_v21  ;;  %v10357_v30 = vld [vmem:[%s13380_s11 + $0x138] sm:$0xff] }
 0x1b7   : > { %13045 = vmatprep.mubr.msk.f32.mxu1 %vm537_vm0, %v14506_v15  ;;  %v2256_v47 = vpop.f32.mrf.mxu0  ;;  %v10356_v15 = vld [vmem:[%s13380_s11 + $0x128] sm:$0xff] }
 0x1b8   : > { %v2964_v58 = vpop.f32.mrf.mxu1  ;;  %v2383_v49 = vadd.f32 %v2256_v47, %v18205_v35  ;;  %v15070_v6 = vadd.f32 %v12700_v7, %v2384_v16  ;;  %v18207_v7 = vld [vmem:[#allocation59_spill] sm:$0xff]  ;;  %v18208_v47 = vld [vmem:[#allocation60_spill] sm:$0xff]  ;;  %v18209_v35 = vld [vmem:[#allocation61_spill] sm:$0xff] }
 0x1b9   : > { %v12605_v34 = vpop.f32.mrf.mxu0  ;;  %12948 = vmatmul.mubr.msk.f32.gmra.mxu0 %vm537_vm0, %v10354_v13 }
 0x1ba   : > { %v12703_v9 = vpop.f32.mrf.mxu1  ;;  %13046 = vmatmul.mubr.msk.f32.gmra.mxu1 %vm537_vm0, %v14519_v38  ;;  %v2386_v12 = vadd.f32 %v12605_v34, %v18206_v50  ;;  %v15076_v21 = vadd.f32 %v2964_v58, %v2383_v49  ;;  %12950 = vmatprep.mubr.msk.f32.mxu0 %vm537_vm0, %v10355_v25  ;;  %v18210_v50 = vld [vmem:[#allocation62_spill] sm:$0xff] }
 0x1bb   : > { %13048 = vmatprep.mubr.msk.f32.mxu1 %vm537_vm0, %v14524_v19  ;;  %v2266_v59 = vpop.f32.mrf.mxu0  ;;  %v10358_v19 = vld [vmem:[%s13380_s11 + $0x140] sm:$0xff] }
 0x1bc   : > { %v2974_v0 = vpop.f32.mrf.mxu1  ;;  %v2385_v40 = vadd.f32 %v2266_v59, %v18207_v7  ;;  %v15084_v16 = vadd.f32 %v12703_v9, %v2386_v12  ;;  %v10359_v9 = vld [vmem:[%s13380_s11 + $0x150] sm:$0xff] }
 0x1bd   : > { %v12608_v38 = vpop.f32.mrf.mxu0  ;;  %12951 = vmatmul.mubr.msk.f32.gmra.mxu0 %vm537_vm0, %v10356_v15 }
 0x1be   : > { %v12706_v13 = vpop.f32.mrf.mxu1  ;;  %13049 = vmatmul.mubr.msk.f32.gmra.mxu1 %vm537_vm0, %v14537_v42  ;;  %v2388_v58 = vadd.f32 %v12608_v38, %v18208_v47  ;;  %v15090_v25 = vadd.f32 %v2974_v0, %v2385_v40  ;;  %12953 = vmatprep.mubr.msk.f32.mxu0 %vm537_vm0, %v10357_v30  ;;  %v18212_v0 = vld [vmem:[#allocation64_spill] sm:$0xff]  ;;  %v18213_v30 = vld [vmem:[#allocation63_spill] sm:$0xff]  ;;  %v10360_v38 = vld [vmem:[%s13380_s11 + $0x158] sm:$0xff] }
 0x1bf   : > { %13051 = vmatprep.mubr.msk.f32.mxu1 %vm537_vm0, %v18209_v35  ;;  %v2276_v49 = vpop.f32.mrf.mxu0  ;;  %v18215_v47 = vld [vmem:[#allocation65_spill] sm:$0xff]  ;;  %v10361_v35 = vld [vmem:[%s13380_s11 + $0x168] sm:$0xff] }
 0x1c0   : > { %v2984_v34 = vpop.f32.mrf.mxu1  ;;  %v2387_v12 = vadd.f32 %v2276_v49, %v18210_v50  ;;  %v15098_v15 = vadd.f32 %v12706_v13, %v2388_v58 }
 0x1c1   : > { %v12611_v42 = vpop.f32.mrf.mxu0  ;;  %12954 = vmatmul.mubr.msk.f32.gmra.mxu0 %vm537_vm0, %v10358_v19  ;;  %v18216_v19 = vld [vmem:[#allocation66_spill] sm:$0xff] }
 0x1c2   : > { %18211 = vst [vmem:[#allocation40_spill] sm:$0xff] %v15098_v15  ;;  %v12709_v59 = vpop.f32.mrf.mxu1  ;;  %13052 = vmatmul.mubr.msk.f32.gmra.mxu1 %vm537_vm0, %v18212_v0  ;;  %v2390_v7 = vadd.f32 %v12611_v42, %v18213_v30  ;;  %v15104_v40 = vadd.f32 %v2984_v34, %v2387_v12  ;;  %12956 = vmatprep.mubr.msk.f32.mxu0 %vm537_vm0, %v10359_v9  ;;  %v18218_v12 = vld [vmem:[#allocation68_spill] sm:$0xff]  ;;  %v18219_v9 = vld [vmem:[#allocation67_spill] sm:$0xff] }
 0x1c3   : > { %13054 = vmatprep.mubr.msk.f32.mxu1 %vm537_vm0, %v18215_v47  ;;  %v2286_v13 = vpop.f32.mrf.mxu0  ;;  %v10362_v47 = vld [vmem:[%s13380_s11 + $0x170] sm:$0xff] }
 0x1c4   : > { %18214 = vst [vmem:[#allocation39_spill] sm:$0xff] %v15104_v40  ;;  %v2994_v58 = vpop.f32.mrf.mxu1  ;;  %v2389_v49 = vadd.f32 %v2286_v13, %v18216_v19  ;;  %v15112_v50 = vadd.f32 %v12709_v59, %v2390_v7  ;;  %v18221_v40 = vld [vmem:[#allocation69_spill] sm:$0xff]  ;;  %v18222_v13 = vld [vmem:[#allocation70_spill] sm:$0xff] }
 0x1c5   : > { %v12614_v0 = vpop.f32.mrf.mxu0  ;;  %12957 = vmatmul.mubr.msk.f32.gmra.mxu0 %vm537_vm0, %v10360_v38  ;;  %v10363_v38 = vld [vmem:[%s13380_s11 + $0x180] sm:$0xff] }
 0x1c6   : > { %18217 = vst [vmem:[#allocation41_spill] sm:$0xff] %v15112_v50  ;;  %v12712_v34 = vpop.f32.mrf.mxu1  ;;  %13055 = vmatmul.mubr.msk.f32.gmra.mxu1 %vm537_vm0, %v18218_v12  ;;  %v2392_v42 = vadd.f32 %v12614_v0, %v18219_v9  ;;  %v15118_v30 = vadd.f32 %v2994_v58, %v2389_v49  ;;  %12959 = vmatprep.mubr.msk.f32.mxu0 %vm537_vm0, %v10361_v35  ;;  %v18224_v49 = vld [vmem:[#allocation71_spill] sm:$0xff]  ;;  %v18225_v35 = vld [vmem:[#allocation4_spill] sm:$0xff] }
 0x1c7   : > { %13057 = vmatprep.mubr.msk.f32.mxu1 %vm537_vm0, %v18221_v40  ;;  %v2296_v59 = vpop.f32.mrf.mxu0  ;;  %v10364_v40 = vld [vmem:[%s13380_s11 + $0x188] sm:$0xff] }
 0x1c8   : > { %18220 = vst [vmem:[#allocation42_spill] sm:$0xff] %v15118_v30  ;;  %v3004_v7 = vpop.f32.mrf.mxu1  ;;  %v2391_v19 = vadd.f32 %v2296_v59, %v18222_v13  ;;  %v15126_v50 = vadd.f32 %v12712_v34, %v2392_v42  ;;  %v18227_v30 = vld [vmem:[#allocation5_spill] sm:$0xff]  ;;  %v18228_v13 = vld [vmem:[#allocation72_spill] sm:$0xff] }
 0x1c9   : > { %v12617_v12 = vpop.f32.mrf.mxu0  ;;  %12960 = vmatmul.mubr.msk.f32.gmra.mxu0 %vm537_vm0, %v10362_v47  ;;  %v10365_v59 = vld [vmem:[%s13380_s11 + $0x198] sm:$0xff] }
 0x1ca   : > { %18223 = vst [vmem:[#allocation43_spill] sm:$0xff] %v15126_v50  ;;  %v12715_v58 = vpop.f32.mrf.mxu1  ;;  %13058 = vmatmul.mubr.msk.f32.gmra.mxu1 %vm537_vm0, %v18224_v49  ;;  %v2394_v0 = vadd.f32 %v12617_v12, %v18225_v35  ;;  %v15132_v9 = vadd.f32 %v3004_v7, %v2391_v19  ;;  %12962 = vmatprep.mubr.msk.f32.mxu0 %vm537_vm0, %v10363_v38  ;;  %v10494_v47 = vld [vmem:[%s13380_s11 + $0x199] sm:$0xff] }
 0x1cb   : > { %13060 = vmatprep.mubr.msk.f32.mxu1 %vm537_vm0, %v18227_v30  ;;  %v2306_v34 = vpop.f32.mrf.mxu0  ;;  %v18230_v38 = vld [vmem:[#allocation73_spill] sm:$0xff]  ;;  %v18231_v19 = vld [vmem:[#allocation6_spill] sm:$0xff] }
 0x1cc   : > { %18226 = vst [vmem:[#allocation44_spill] sm:$0xff] %v15132_v9  ;;  %v3014_v42 = vpop.f32.mrf.mxu1  ;;  %v2393_v50 = vadd.f32 %v2306_v34, %v18228_v13  ;;  %v15141_v49 = vadd.f32 %v12715_v58, %v2394_v0  ;;  %v10366_v9 = vld [vmem:[%s13380_s11 + $0x1a0] sm:$0xff] }
 0x1cd   : > { %v12620_v12 = vpop.f32.mrf.mxu0  ;;  %12963 = vmatmul.mubr.msk.f32.gmra.mxu0 %vm537_vm0, %v10364_v40  ;;  %v10495_v34 = vld [vmem:[%s13380_s11 + $0x1a1] sm:$0xff] }
 0x1ce   : > { %18229 = vst [vmem:[#allocation45_spill] sm:$0xff] %v15141_v49  ;;  %v12718_v7 = vpop.f32.mrf.mxu1  ;;  %13061 = vmatmul.mubr.msk.f32.gmra.mxu1 %vm537_vm0, %v18230_v38  ;;  %v2396_v35 = vadd.f32 %v12620_v12, %v18231_v19  ;;  %v15147_v30 = vadd.f32 %v3014_v42, %v2393_v50  ;;  %12965 = vmatprep.mubr.msk.f32.mxu0 %vm537_vm0, %v10365_v59  ;;  %v10367_v13 = vld [vmem:[%s13380_s11 + $0x1e0] sm:$0xff]  ;;  %v18234_v42 = vld [vmem:[#allocation75_spill] sm:$0xff] }
 0x1cf   : > { %13063 = vmatprep.mubr.msk.f32.mxu1 %vm537_vm0, %v10494_v47  ;;  %v2316_v58 = vpop.f32.mrf.mxu0  ;;  %v18232_v40 = vld [vmem:[#allocation74_spill] sm:$0xff]  ;;  %v10368_v47 = vld [vmem:[%s13380_s11 + $0x1e8] sm:$0xff] }
 0x1d0   : > { %v3024_v0 = vpop.f32.mrf.mxu1  ;;  %v2395_v49 = vadd.f32 %v2316_v58, %v18232_v40  ;;  %v15155_v15 = vadd.f32 %v12718_v7, %v2396_v35  ;;  %v18235_v19 = vld [vmem:[#allocation7_spill] sm:$0xff]  ;;  %v10369_v35 = vld [vmem:[%s13380_s11 + $0x1f8] sm:$0xff]  ;;  %v18236_v40 = vld [vmem:[#allocation76_spill] sm:$0xff] }
 0x1d1   : > { %v12623_v38 = vpop.f32.mrf.mxu0  ;;  %12966 = vmatmul.mubr.msk.f32.gmra.mxu0 %vm537_vm0, %v10366_v9 }
 0x1d2   : > { %18233 = vst [vmem:[#allocation46_spill] sm:$0xff] %v15155_v15  ;;  %v12721_v50 = vpop.f32.mrf.mxu1  ;;  %13064 = vmatmul.mubr.msk.f32.gmra.mxu1 %vm537_vm0, %v10495_v34  ;;  %v2398_v59 = vadd.f32 %v12623_v38, %v18234_v42  ;;  %v15160_v12 = vadd.f32 %v3024_v0, %v2395_v49  ;;  %12968 = vmatprep.mubr.msk.f32.mxu0 %vm537_vm0, %v10367_v13  ;;  %v18237_v13 = vld [vmem:[#allocation9_spill] sm:$0xff]  ;;  %v10370_v42 = vld [vmem:[%s13380_s11 + $0x200] sm:$0xff] }
 0x1d3   : > { %13066 = vmatprep.mubr.msk.f32.mxu1 %vm537_vm0, %v18235_v19  ;;  %v2326_v58 = vpop.f32.mrf.mxu0  ;;  %v10371_v19 = vld [vmem:[%s13380_s11 + $0x210] sm:$0xff] }
 0x1d4   : > { %v3034_v7 = vpop.f32.mrf.mxu1  ;;  %v2397_v9 = vadd.f32 %v2326_v58, %v18236_v40  ;;  %v15168_v15 = vadd.f32 %v12721_v50, %v2398_v59 }
 0x1d5   : > { %v12726_v34 = vpop.f32.mrf.mxu0  ;;  %12969 = vmatmul.mubr.msk.f32.gmra.mxu0 %vm537_vm0, %v10368_v47  ;;  %v18238_v47 = vld [vmem:[#allocation8_spill] sm:$0xff] }
 0x1d6   : > { %v12824_v49 = vpop.f32.mrf.mxu1  ;;  %13067 = vmatmul.mubr.msk.f32.gmra.mxu1 %vm537_vm0, %v14641_v20  ;;  %v15173_v0 = vadd.f32 %v3034_v7, %v2397_v9  ;;  %v3751_v38 = vadd.f32 %v12726_v34, %v18237_v13  ;;  %12971 = vmatprep.mubr.msk.f32.mxu0 %vm537_vm0, %v10369_v35  ;;  %v18239_v35 = vld [vmem:[#allocation10_spill] sm:$0xff] }
 0x1d7   : > { %13069 = vmatprep.mubr.msk.f32.mxu1 %vm537_vm0, %v14646_v55  ;;  %v3431_v50 = vpop.f32.mrf.mxu0  ;;  %v10372_v55 = vld [vmem:[%s13380_s11 + $0x218] sm:$0xff] }
 0x1d8   : > { %v4138_v59 = vpop.f32.mrf.mxu1  ;;  %v3750_v58 = vadd.f32 %v3431_v50, %v18238_v47  ;;  %v15182_v40 = vadd.f32 %v12824_v49, %v3751_v38  ;;  %v10373_v38 = vld [vmem:[%s13380_s11 + $0x228] sm:$0xff] }
 0x1d9   : > { %v12729_v20 = vpop.f32.mrf.mxu0  ;;  %12972 = vmatmul.mubr.msk.f32.gmra.mxu0 %vm537_vm0, %v10370_v42  ;;  %v18240_v42 = vld [vmem:[#allocation11_spill] sm:$0xff] }
 0x1da   : > { %v12827_v7 = vpop.f32.mrf.mxu1  ;;  %13070 = vmatmul.mubr.msk.f32.gmra.mxu1 %vm537_vm0, %v14662_v23  ;;  %v3753_v9 = vadd.f32 %v12729_v20, %v18239_v35  ;;  %v15188_v34 = vadd.f32 %v4138_v59, %v3750_v58  ;;  %12974 = vmatprep.mubr.msk.f32.mxu0 %vm537_vm0, %v10371_v19  ;;  %v18241_v19 = vld [vmem:[#allocation12_spill] sm:$0xff] }
 0x1db   : > { %13072 = vmatprep.mubr.msk.f32.mxu1 %vm537_vm0, %v14667_v24  ;;  %v3441_v49 = vpop.f32.mrf.mxu0  ;;  %v10374_v24 = vld [vmem:[%s13380_s11 + $0x230] sm:$0xff] }
 0x1dc   : > { %v4148_v13 = vpop.f32.mrf.mxu1  ;;  %v3752_v50 = vadd.f32 %v3441_v49, %v18240_v42  ;;  %v15196_v47 = vadd.f32 %v12827_v7, %v3753_v9  ;;  %v10375_v9 = vld [vmem:[%s13380_s11 + $0x240] sm:$0xff] }
 0x1dd   : > { %v12732_v23 = vpop.f32.mrf.mxu0  ;;  %12975 = vmatmul.mubr.msk.f32.gmra.mxu0 %vm537_vm0, %v10372_v55  ;;  %v18242_v55 = vld [vmem:[#allocation13_spill] sm:$0xff] }
 0x1de   : > { %v12830_v59 = vpop.f32.mrf.mxu1  ;;  %13073 = vmatmul.mubr.msk.f32.gmra.mxu1 %vm537_vm0, %v14682_v46  ;;  %v3755_v58 = vadd.f32 %v12732_v23, %v18241_v19  ;;  %v15202_v20 = vadd.f32 %v4148_v13, %v3752_v50  ;;  %12977 = vmatprep.mubr.msk.f32.mxu0 %vm537_vm0, %v10373_v38  ;;  %v18243_v38 = vld [vmem:[#allocation14_spill] sm:$0xff] }
 0x1df   : > { %13075 = vmatprep.mubr.msk.f32.mxu1 %vm537_vm0, %v14687_v44  ;;  %v3451_v7 = vpop.f32.mrf.mxu0  ;;  %v10376_v44 = vld [vmem:[%s13380_s11 + $0x248] sm:$0xff] }
 0x1e0   : > { %v4158_v35 = vpop.f32.mrf.mxu1  ;;  %v3754_v49 = vadd.f32 %v3451_v7, %v18242_v55  ;;  %v15210_v42 = vadd.f32 %v12830_v59, %v3755_v58  ;;  %v10377_v58 = vld [vmem:[%s13380_s11 + $0x258] sm:$0xff] }
 0x1e1   : > { %v12735_v46 = vpop.f32.mrf.mxu0  ;;  %12978 = vmatmul.mubr.msk.f32.gmra.mxu0 %vm537_vm0, %v10374_v24  ;;  %v18244_v24 = vld [vmem:[#allocation15_spill] sm:$0xff] }
 0x1e2   : > { %v12833_v13 = vpop.f32.mrf.mxu1  ;;  %13076 = vmatmul.mubr.msk.f32.gmra.mxu1 %vm537_vm0, %v14702_v5  ;;  %v3757_v50 = vadd.f32 %v12735_v46, %v18243_v38  ;;  %v15216_v23 = vadd.f32 %v4158_v35, %v3754_v49  ;;  %12980 = vmatprep.mubr.msk.f32.mxu0 %vm537_vm0, %v10375_v9  ;;  %v18245_v9 = vld [vmem:[#allocation16_spill] sm:$0xff] }
 0x1e3   : > { %13078 = vmatprep.mubr.msk.f32.mxu1 %vm537_vm0, %v14707_v8  ;;  %v3461_v59 = vpop.f32.mrf.mxu0  ;;  %v10378_v8 = vld [vmem:[%s13380_s11 + $0x260] sm:$0xff] }
 0x1e4   : > { %v4168_v19 = vpop.f32.mrf.mxu1  ;;  %v3756_v7 = vadd.f32 %v3461_v59, %v18244_v24  ;;  %v15224_v55 = vadd.f32 %v12833_v13, %v3757_v50  ;;  %v10379_v50 = vld [vmem:[%s13380_s11 + $0x270] sm:$0xff] }
 0x1e5   : > { %v12738_v5 = vpop.f32.mrf.mxu0  ;;  %12981 = vmatmul.mubr.msk.f32.gmra.mxu0 %vm537_vm0, %v10376_v44  ;;  %v18246_v44 = vld [vmem:[#allocation17_spill] sm:$0xff] }
 0x1e6   : > { %v12836_v35 = vpop.f32.mrf.mxu1  ;;  %13079 = vmatmul.mubr.msk.f32.gmra.mxu1 %vm537_vm0, %v14722_v63  ;;  %v3759_v49 = vadd.f32 %v12738_v5, %v18245_v9  ;;  %v15230_v46 = vadd.f32 %v4168_v19, %v3756_v7  ;;  %12983 = vmatprep.mubr.msk.f32.mxu0 %vm537_vm0, %v10377_v58  ;;  %v18247_v58 = vld [vmem:[#allocation18_spill] sm:$0xff] }
 0x1e7   : > { %13081 = vmatprep.mubr.msk.f32.mxu1 %vm537_vm0, %v14727_v36  ;;  %v3471_v13 = vpop.f32.mrf.mxu0  ;;  %v10380_v36 = vld [vmem:[%s13380_s11 + $0x278] sm:$0xff] }
 0x1e8   : > { %v4178_v38 = vpop.f32.mrf.mxu1  ;;  %v3758_v59 = vadd.f32 %v3471_v13, %v18246_v44  ;;  %v15238_v24 = vadd.f32 %v12836_v35, %v3759_v49  ;;  %v10381_v49 = vld [vmem:[%s13380_s11 + $0x288] sm:$0xff] }
 0x1e9   : > { %v12741_v63 = vpop.f32.mrf.mxu0  ;;  %12984 = vmatmul.mubr.msk.f32.gmra.mxu0 %vm537_vm0, %v10378_v8  ;;  %v18248_v8 = vld [vmem:[#allocation19_spill] sm:$0xff] }
 0x1ea   : > { %v12839_v19 = vpop.f32.mrf.mxu1  ;;  %13082 = vmatmul.mubr.msk.f32.gmra.mxu1 %vm537_vm0, %v14742_v18  ;;  %v3761_v7 = vadd.f32 %v12741_v63, %v18247_v58  ;;  %v15244_v5 = vadd.f32 %v4178_v38, %v3758_v59  ;;  %12986 = vmatprep.mubr.msk.f32.mxu0 %vm537_vm0, %v10379_v50  ;;  %v18249_v50 = vld [vmem:[#allocation20_spill] sm:$0xff] }
 0x1eb   : > { %13084 = vmatprep.mubr.msk.f32.mxu1 %vm537_vm0, %v14747_v22  ;;  %v3481_v35 = vpop.f32.mrf.mxu0  ;;  %v10382_v22 = vld [vmem:[%s13380_s11 + $0x290] sm:$0xff] }
 0x1ec   : > { %v4188_v9 = vpop.f32.mrf.mxu1  ;;  %v3760_v13 = vadd.f32 %v3481_v35, %v18248_v8  ;;  %v15252_v44 = vadd.f32 %v12839_v19, %v3761_v7  ;;  %v10383_v7 = vld [vmem:[%s13380_s11 + $0x2a0] sm:$0xff] }
 0x1ed   : > { %v12744_v18 = vpop.f32.mrf.mxu0  ;;  %12987 = vmatmul.mubr.msk.f32.gmra.mxu0 %vm537_vm0, %v10380_v36  ;;  %v18250_v36 = vld [vmem:[#allocation21_spill] sm:$0xff] }
 0x1ee   : > { %v12842_v38 = vpop.f32.mrf.mxu1  ;;  %13085 = vmatmul.mubr.msk.f32.gmra.mxu1 %vm537_vm0, %v14762_v3  ;;  %v3763_v59 = vadd.f32 %v12744_v18, %v18249_v50  ;;  %v15258_v63 = vadd.f32 %v4188_v9, %v3760_v13  ;;  %12989 = vmatprep.mubr.msk.f32.mxu0 %vm537_vm0, %v10381_v49  ;;  %v18251_v49 = vld [vmem:[#allocation22_spill] sm:$0xff] }
 0x1ef   : > { %13087 = vmatprep.mubr.msk.f32.mxu1 %vm537_vm0, %v14767_v29  ;;  %v3491_v19 = vpop.f32.mrf.mxu0  ;;  %v10384_v29 = vld [vmem:[%s13380_s11 + $0x2a8] sm:$0xff] }
 0x1f0   : > { %v4198_v58 = vpop.f32.mrf.mxu1  ;;  %v3762_v35 = vadd.f32 %v3491_v19, %v18250_v36  ;;  %v15266_v8 = vadd.f32 %v12842_v38, %v3763_v59  ;;  %v10385_v59 = vld [vmem:[%s13380_s11 + $0x2b8] sm:$0xff] }
 0x1f1   : > { %v12747_v3 = vpop.f32.mrf.mxu0  ;;  %12990 = vmatmul.mubr.msk.f32.gmra.mxu0 %vm537_vm0, %v10382_v22  ;;  %v18252_v22 = vld [vmem:[#allocation23_spill] sm:$0xff] }
 0x1f2   : > { %v12845_v9 = vpop.f32.mrf.mxu1  ;;  %13088 = vmatmul.mubr.msk.f32.gmra.mxu1 %vm537_vm0, %v14782_v39  ;;  %v3765_v13 = vadd.f32 %v12747_v3, %v18251_v49  ;;  %v15272_v18 = vadd.f32 %v4198_v58, %v3762_v35  ;;  %12992 = vmatprep.mubr.msk.f32.mxu0 %vm537_vm0, %v10383_v7  ;;  %v18253_v7 = vld [vmem:[#allocation24_spill] sm:$0xff] }
 0x1f3   : > { %13090 = vmatprep.mubr.msk.f32.mxu1 %vm537_vm0, %v14787_v37  ;;  %v3501_v38 = vpop.f32.mrf.mxu0  ;;  %v10386_v37 = vld [vmem:[%s13380_s11 + $0x2c0] sm:$0xff] }
 0x1f4   : > { %v4208_v50 = vpop.f32.mrf.mxu1  ;;  %v3764_v19 = vadd.f32 %v3501_v38, %v18252_v22  ;;  %v15280_v36 = vadd.f32 %v12845_v9, %v3765_v13  ;;  %v10387_v13 = vld [vmem:[%s13380_s11 + $0x2d0] sm:$0xff] }
 0x1f5   : > { %v12750_v39 = vpop.f32.mrf.mxu0  ;;  %12993 = vmatmul.mubr.msk.f32.gmra.mxu0 %vm537_vm0, %v10384_v29  ;;  %v18255_v29 = vld [vmem:[#allocation25_spill] sm:$0xff] }
 0x1f6   : > { %v12848_v58 = vpop.f32.mrf.mxu1  ;;  %13091 = vmatmul.mubr.msk.f32.gmra.mxu1 %vm537_vm0, %v14802_v26  ;;  %v3767_v35 = vadd.f32 %v12750_v39, %v18253_v7  ;;  %v15286_v3 = vadd.f32 %v4208_v50, %v3764_v19  ;;  %12995 = vmatprep.mubr.msk.f32.mxu0 %vm537_vm0, %v10385_v59  ;;  %v18257_v59 = vld [vmem:[#allocation26_spill] sm:$0xff]  ;;  %v10388_v19 = vld [vmem:[%s13380_s11 + $0x2d8] sm:$0xff]  ;;  %v10389_v7 = vld [vmem:[%s13380_s11 + $0x2e8] sm:$0xff] }
 0x1f7   : > { %13093 = vmatprep.mubr.msk.f32.mxu1 %vm537_vm0, %v14807_v45  ;;  %v3511_v9 = vpop.f32.mrf.mxu0 }
 0x1f8   : > { %v15292_v49 = vpop.f32.mrf.mxu1  ;;  %v15296_v38 = vadd.f32 %v3511_v9, %v18255_v29  ;;  %v15298_v26 = vadd.f32 %v12848_v58, %v3767_v35  ;;  %v18259_v35 = vld [vmem:[#allocation27_spill] sm:$0xff] }
 0x1f9   : > { %18254 = vst [vmem:[#allocation47_spill] sm:$0xff] %v15292_v49  ;;  %v12753_v22 = vpop.f32.mrf.mxu0  ;;  %12996 = vmatmul.mubr.msk.f32.gmra.mxu0 %vm537_vm0, %v10386_v37  ;;  %v10392_v49 = vld [vmem:[%s13380_s11 + $0x308] sm:$0xff] }
 0x1fa   : > { %18256 = vst [vmem:[#allocation48_spill] sm:$0xff] %v15296_v38  ;;  %v12851_v50 = vpop.f32.mrf.mxu1  ;;  %13094 = vmatmul.mubr.msk.f32.gmra.mxu1 %vm537_vm0, %v14822_v33  ;;  %v3769_v45 = vadd.f32 %v12753_v22, %v18257_v59  ;;  %12998 = vmatprep.mubr.msk.f32.mxu0 %vm537_vm0, %v10387_v13  ;;  %v18261_v22 = vld [vmem:[#allocation28_spill] sm:$0xff]  ;;  %v18262_v13 = vld [vmem:[#allocation30_spill] sm:$0xff] }
 0x1fb   : > { %13096 = vmatprep.mubr.msk.f32.mxu1 %vm537_vm0, %v14827_v52  ;;  %v3521_v39 = vpop.f32.mrf.mxu0  ;;  %v10390_v59 = vld [vmem:[%s13380_s11 + $0x2f0] sm:$0xff]  ;;  %v10394_v38 = vld [vmem:[%s13380_s11 + $0x320] sm:$0xff] }
 0x1fc   : > { %v15308_v58 = vpop.f32.mrf.mxu1  ;;  %v15312_v37 = vadd.f32 %v3521_v39, %v18259_v35  ;;  %v15314_v9 = vadd.f32 %v12851_v50, %v3769_v45  ;;  %v10391_v45 = vld [vmem:[%s13380_s11 + $0x300] sm:$0xff]  ;;  %v18265_v35 = vld [vmem:[#allocation31_spill] sm:$0xff] }
 0x1fd   : > { %18258 = vst [vmem:[#allocation49_spill] sm:$0xff] %v15308_v58  ;;  %v12756_v33 = vpop.f32.mrf.mxu0  ;;  %12999 = vmatmul.mubr.msk.f32.gmra.mxu0 %vm537_vm0, %v10388_v19  ;;  %v18263_v58 = vld [vmem:[#allocation29_spill] sm:$0xff] }
 0x1fe   : > { %18260 = vst [vmem:[#allocation50_spill] sm:$0xff] %v15312_v37  ;;  %v12854_v29 = vpop.f32.mrf.mxu1  ;;  %13097 = vmatmul.mubr.msk.f32.gmra.mxu1 %vm537_vm0, %v18261_v22  ;;  %v3771_v52 = vadd.f32 %v12756_v33, %v18262_v13  ;;  %13001 = vmatprep.mubr.msk.f32.mxu0 %vm537_vm0, %v10389_v7  ;;  %v18267_v13 = vld [vmem:[#allocation77_spill] sm:$0xff]  ;;  %v18268_v7 = vld [vmem:[#allocation32_spill] sm:$0xff] }
 0x1ff   : > { %13099 = vmatprep.mubr.msk.f32.mxu1 %vm537_vm0, %v18263_v58  ;;  %v3531_v39 = vpop.f32.mrf.mxu0 }
 0x200   : > { %v15324_v50 = vpop.f32.mrf.mxu1  ;;  %v15328_v19 = vadd.f32 %v3531_v39, %v18265_v35  ;;  %v15330_v37 = vadd.f32 %v12854_v29, %v3771_v52  ;;  %v10393_v52 = vld [vmem:[%s13380_s11 + $0x318] sm:$0xff]  ;;  %v18271_v35 = vld [vmem:[#allocation34_spill] sm:$0xff] }
 0x201   : > { %18264 = vst [vmem:[#allocation51_spill] sm:$0xff] %v15324_v50  ;;  %v12759_v22 = vpop.f32.mrf.mxu0  ;;  %13002 = vmatmul.mubr.msk.f32.gmra.mxu0 %vm537_vm0, %v10390_v59  ;;  %v18269_v50 = vld [vmem:[#allocation78_spill] sm:$0xff] }
 0x202   : > { %18266 = vst [vmem:[#allocation52_spill] sm:$0xff] %v15328_v19  ;;  %v12857_v33 = vpop.f32.mrf.mxu1  ;;  %13100 = vmatmul.mubr.msk.f32.gmra.mxu1 %vm537_vm0, %v18267_v13  ;;  %v3773_v58 = vadd.f32 %v12759_v22, %v18268_v7  ;;  %13004 = vmatprep.mubr.msk.f32.mxu0 %vm537_vm0, %v10391_v45  ;;  %v18274_v7 = vld [vmem:[#allocation33_spill] sm:$0xff]  ;;  %v18275_v45 = vld [vmem:[#allocation35_spill] sm:$0xff] }
 0x203   : > { %13102 = vmatprep.mubr.msk.f32.mxu1 %vm537_vm0, %v18269_v50  ;;  %v3541_v39 = vpop.f32.mrf.mxu0 }
 0x204   : > { %v15340_v29 = vpop.f32.mrf.mxu1  ;;  %v15344_v59 = vadd.f32 %v3541_v39, %v18271_v35  ;;  %v15346_v19 = vadd.f32 %v12857_v33, %v3773_v58  ;;  %v10395_v58 = vld [vmem:[%s13380_s11 + $0x330] sm:$0xff] }
 0x205   : > { %18270 = vst [vmem:[#allocation53_spill] sm:$0xff] %v15340_v29  ;;  %v12762_v13 = vpop.f32.mrf.mxu0  ;;  %13005 = vmatmul.mubr.msk.f32.gmra.mxu0 %vm537_vm0, %v10392_v49  ;;  %v18276_v29 = vld [vmem:[#allocation2_spill] sm:$0xff]  ;;  %v18277_v49 = vld [vmem:[#allocation37_spill] sm:$0xff] }
 0x206   : > { %18272 = vst [vmem:[#allocation54_spill] sm:$0xff] %v15344_v59  ;;  %18273 = vst [vmem:[#allocation55_spill] sm:$0xff] %v15346_v19  ;;  %v12860_v22 = vpop.f32.mrf.mxu1  ;;  %13103 = vmatmul.mubr.msk.f32.gmra.mxu1 %vm537_vm0, %v18274_v7  ;;  %v3775_v50 = vadd.f32 %v12762_v13, %v18275_v45  ;;  %13007 = vmatprep.mubr.msk.f32.mxu0 %vm537_vm0, %v10393_v52  ;;  %v18278_v52 = vld [vmem:[#allocation36_spill] sm:$0xff]  ;;  %v18279_v45 = vld [vmem:[#allocation3_spill] sm:$0xff] }
 0x207   : > { %13105 = vmatprep.mubr.msk.f32.mxu1 %vm537_vm0, %v18276_v29  ;;  %v3551_v39 = vpop.f32.mrf.mxu0  ;;  %v10396_v19 = vld [vmem:[%s13380_s11 + $0x338] sm:$0xff] }
 0x208   : > { %v15356_v33 = vpop.f32.mrf.mxu1  ;;  %v15360_v35 = vadd.f32 %v3551_v39, %v18277_v49  ;;  %v15362_v59 = vadd.f32 %v12860_v22, %v3775_v50  ;;  %v10397_v50 = vld [vmem:[%s13380_s11 + $0x348] sm:$0xff] }
 0x209   : > { %v12765_v7 = vpop.f32.mrf.mxu0  ;;  %13008 = vmatmul.mubr.msk.f32.gmra.mxu0 %vm537_vm0, %v10394_v38  ;;  %v10526_v38 = vld [vmem:[%s13380_s11 + $0x349] sm:$0xff] }
 0x20a   : > { %v12863_v13 = vpop.f32.mrf.mxu1  ;;  %13106 = vmatmul.mubr.msk.f32.gmra.mxu1 %vm537_vm0, %v18278_v52  ;;  %v3777_v29 = vadd.f32 %v12765_v7, %v18279_v45  ;;  %13010 = vmatprep.mubr.msk.f32.mxu0 %vm537_vm0, %v10395_v58  ;;  %v18282_v45 = vld [vmem:[#allocation38_spill] sm:$0xff] }
 0x20b   : > { %13108 = vmatprep.mubr.msk.f32.mxu1 %vm537_vm0, %v14907_v48  ;;  %v3561_v39 = vpop.f32.mrf.mxu0 }
 0x20c   : > { %v15372_v22 = vpop.f32.mrf.mxu1  ;;  %v15377_v49 = vadd.f32 %v3561_v39, %v14918_v60  ;;  %v15379_v52 = vadd.f32 %v12863_v13, %v3777_v29  ;;  %v10527_v60 = vld [vmem:[%s13380_s11 + $0x351] sm:$0xff] }
 0x20d   : > { %18280 = vst [vmem:[#allocation56_spill] sm:$0xff] %v15372_v22  ;;  %v12768_v7 = vpop.f32.mrf.mxu0  ;;  %13011 = vmatmul.mubr.msk.f32.gmra.mxu0 %vm537_vm0, %v10396_v19  ;;  %v10398_v22 = vld [vmem:[%s13380_s11 + $0x350] sm:$0xff] }
 0x20e   : > { %18281 = vst [vmem:[#allocation57_spill] sm:$0xff] %v15377_v49  ;;  %v12866_v58 = vpop.f32.mrf.mxu1  ;;  %13109 = vmatmul.mubr.msk.f32.gmra.mxu1 %vm537_vm0, %v14923_v41  ;;  %v3779_v48 = vadd.f32 %v12768_v7, %v18282_v45  ;;  %13013 = vmatprep.mubr.msk.f32.mxu0 %vm537_vm0, %v10397_v50  ;;  %v10593_v29 = vld [vmem:[%s13380_s11 + $0x32] sm:$0xff] }
 0x20f   : > { %13111 = vmatprep.mubr.msk.f32.mxu1 %vm537_vm0, %v10526_v38  ;;  %v3571_v39 = vpop.f32.mrf.mxu0  ;;  %v10594_v38 = vld [vmem:[%s13380_s11 + $0x3a] sm:$0xff] }
 0x210   : > { %v15389_v13 = vpop.f32.mrf.mxu1  ;;  %v15393_v19 = vadd.f32 %v3571_v39, %v14935_v56  ;;  %v15395_v49 = vadd.f32 %v12866_v58, %v3779_v48  ;;  %v10595_v56 = vld [vmem:[%s13380_s11 + $0x4a] sm:$0xff]  ;;  %v10596_v39 = vld [vmem:[%s13380_s11 + $0x52] sm:$0xff] }
 0x211   : > { %18283 = vst [vmem:[#allocation58_spill] sm:$0xff] %v15389_v13  ;;  %v12771_v41 = vpop.f32.mrf.mxu0  ;;  %13014 = vmatmul.mubr.msk.f32.gmra.mxu0 %vm537_vm0, %v10398_v22 }
 0x212   : > { %v12869_v7 = vpop.f32.mrf.mxu1  ;;  %13112 = vmatmul.mubr.msk.f32.gmra.mxu1 %vm537_vm0, %v10527_v60  ;;  %v3781_v50 = vadd.f32 %v12771_v41, %v14943_v4  ;;  %13116 = vmatprep.mubr.msk.f32.mxu0 %vm537_vm0, %v10593_v29 }
 0x213   : > { %v3581_v45 = vpop.f32.mrf.mxu0 }
 0x214   : > { %v15402_v13 = vpop.f32.mrf.mxu1  ;;  %v15406_v58 = vadd.f32 %v3581_v45, %v14949_v28  ;;  %v15408_v48 = vadd.f32 %v12869_v7, %v3781_v50  ;;  %v10598_v45 = vld [vmem:[%s13380_s11 + $0x6a] sm:$0xff] }
 0x215   : > { %18284 = vst [vmem:[#allocation59_spill] sm:$0xff] %v15402_v13  ;;  %v12774_v22 = vpop.f32.mrf.mxu0  ;;  %13117 = vmatmul.mubr.msk.f32.vlgmr.msra.gmra.mxu0 %vm537_vm0, %v10594_v38  ;;  %v10597_v13 = vld [vmem:[%s13380_s11 + $0x62] sm:$0xff] }
 0x216   : > { %v12872_v60 = vpop.f32.mrf.mxu1  ;;  %v3783_v4 = vadd.f32 %v12774_v22, %v14958_v62  ;;  %13119 = vmatprep.mubr.msk.f32.mxu0 %vm537_vm0, %v10595_v56 }
 0x217   : > { %v3591_v29 = vpop.f32.mrf.mxu0 }
 0x218   : > { %v15414_v41 = vpop.f32.mrf.mxu1  ;;  %v15418_v28 = vadd.f32 %v3591_v29, %v14964_v31  ;;  %v15420_v7 = vadd.f32 %v12872_v60, %v3783_v4 }
 0x219   : > { %18285 = vst [vmem:[#allocation60_spill] sm:$0xff] %v15414_v41  ;;  %v12777_v50 = vpop.f32.mrf.mxu0  ;;  %13120 = vmatmul.mubr.msk.f32.gmra.mxu0 %vm537_vm0, %v10596_v39  ;;  %v10599_v41 = vld [vmem:[%s13380_s11 + $0x7a] sm:$0xff] }
 0x21a   : > { %v12875_v38 = vpop.f32.mrf.mxu1  ;;  %v3785_v62 = vadd.f32 %v12777_v50, %v14972_v54  ;;  %13122 = vmatprep.mubr.msk.f32.mxu0 %vm537_vm0, %v10597_v13  ;;  %v10600_v13 = vld [vmem:[%s13380_s11 + $0x82] sm:$0xff] }
 0x21b   : > { %v3601_v56 = vpop.f32.mrf.mxu0 }
 0x21c   : > { %v15426_v22 = vpop.f32.mrf.mxu1  ;;  %v15430_v31 = vadd.f32 %v3601_v56, %v14978_v43  ;;  %v15432_v60 = vadd.f32 %v12875_v38, %v3785_v62 }
 0x21d   : > { %18286 = vst [vmem:[#allocation61_spill] sm:$0xff] %v15426_v22  ;;  %v12780_v4 = vpop.f32.mrf.mxu0  ;;  %13123 = vmatmul.mubr.msk.f32.gmra.mxu0 %vm537_vm0, %v10598_v45  ;;  %v10601_v22 = vld [vmem:[%s13380_s11 + $0x92] sm:$0xff] }
 0x21e   : > { %v12878_v39 = vpop.f32.mrf.mxu1  ;;  %v3787_v54 = vadd.f32 %v12780_v4, %v14986_v51  ;;  %13125 = vmatprep.mubr.msk.f32.mxu0 %vm537_vm0, %v10599_v41  ;;  %v10602_v41 = vld [vmem:[%s13380_s11 + $0x9a] sm:$0xff] }
 0x21f   : > { %v3611_v29 = vpop.f32.mrf.mxu0 }
 0x220   : > { %v15438_v50 = vpop.f32.mrf.mxu1  ;;  %v15442_v43 = vadd.f32 %v3611_v29, %v14992_v53  ;;  %v15444_v38 = vadd.f32 %v12878_v39, %v3787_v54 }
 0x221   : > { %18287 = vst [vmem:[#allocation62_spill] sm:$0xff] %v15438_v50  ;;  %v12783_v62 = vpop.f32.mrf.mxu0  ;;  %13126 = vmatmul.mubr.msk.f32.gmra.mxu0 %vm537_vm0, %v10600_v13  ;;  %v10603_v50 = vld [vmem:[%s13380_s11 + $0xaa] sm:$0xff] }
 0x222   : > { %v12881_v45 = vpop.f32.mrf.mxu1  ;;  %v3789_v51 = vadd.f32 %v12783_v62, %v15000_v14  ;;  %13128 = vmatprep.mubr.msk.f32.mxu0 %vm537_vm0, %v10601_v22  ;;  %v10604_v22 = vld [vmem:[%s13380_s11 + $0xb2] sm:$0xff] }
 0x223   : > { %v3621_v56 = vpop.f32.mrf.mxu0 }
 0x224   : > { %v15450_v4 = vpop.f32.mrf.mxu1  ;;  %v15454_v53 = vadd.f32 %v3621_v56, %v15006_v1  ;;  %v15456_v39 = vadd.f32 %v12881_v45, %v3789_v51 }
 0x225   : > { %18288 = vst [vmem:[#allocation64_spill] sm:$0xff] %v15450_v4  ;;  %v12786_v54 = vpop.f32.mrf.mxu0  ;;  %13129 = vmatmul.mubr.msk.f32.gmra.mxu0 %vm537_vm0, %v10602_v41  ;;  %v10605_v4 = vld [vmem:[%s13380_s11 + $0xc2] sm:$0xff] }
 0x226   : > { %v12884_v13 = vpop.f32.mrf.mxu1  ;;  %v3791_v14 = vadd.f32 %v12786_v54, %v15014_v61  ;;  %13131 = vmatprep.mubr.msk.f32.mxu0 %vm537_vm0, %v10603_v50  ;;  %v10606_v50 = vld [vmem:[%s13380_s11 + $0xca] sm:$0xff] }
 0x227   : > { %v3631_v29 = vpop.f32.mrf.mxu0 }
 0x228   : > { %v15462_v62 = vpop.f32.mrf.mxu1  ;;  %v15466_v1 = vadd.f32 %v3631_v29, %v15020_v2  ;;  %v15468_v45 = vadd.f32 %v12884_v13, %v3791_v14 }
 0x229   : > { %18289 = vst [vmem:[#allocation63_spill] sm:$0xff] %v15462_v62  ;;  %v12789_v51 = vpop.f32.mrf.mxu0  ;;  %13132 = vmatmul.mubr.msk.f32.gmra.mxu0 %vm537_vm0, %v10604_v22  ;;  %v10607_v62 = vld [vmem:[%s13380_s11 + $0xda] sm:$0xff] }
 0x22a   : > { %18290 = vst [vmem:[#allocation65_spill] sm:$0xff] %v15466_v1  ;;  %v12887_v41 = vpop.f32.mrf.mxu1  ;;  %v3793_v61 = vadd.f32 %v12789_v51, %v15028_v32  ;;  %13134 = vmatprep.mubr.msk.f32.mxu0 %vm537_vm0, %v10605_v4  ;;  %v10608_v4 = vld [vmem:[%s13380_s11 + $0xe2] sm:$0xff]  ;;  %v10639_v1 = vld [vmem:[%s13380_s11 + $0x28a] sm:$0xff] }
 0x22b   : > { %v3641_v56 = vpop.f32.mrf.mxu0 }
 0x22c   : > { %v15474_v54 = vpop.f32.mrf.mxu1  ;;  %v15478_v2 = vadd.f32 %v3641_v56, %v15034_v11  ;;  %v15480_v13 = vadd.f32 %v12887_v41, %v3793_v61 }
 0x22d   : > { %18291 = vst [vmem:[#allocation66_spill] sm:$0xff] %v15474_v54  ;;  %v12792_v14 = vpop.f32.mrf.mxu0  ;;  %13135 = vmatmul.mubr.msk.f32.gmra.mxu0 %vm537_vm0, %v10606_v50  ;;  %v10609_v54 = vld [vmem:[%s13380_s11 + $0xf2] sm:$0xff] }
 0x22e   : > { %18292 = vst [vmem:[#allocation68_spill] sm:$0xff] %v15478_v2  ;;  %v12890_v22 = vpop.f32.mrf.mxu1  ;;  %v3795_v32 = vadd.f32 %v12792_v14, %v15042_v27  ;;  %13137 = vmatprep.mubr.msk.f32.mxu0 %vm537_vm0, %v10607_v62  ;;  %v10610_v62 = vld [vmem:[%s13380_s11 + $0xfa] sm:$0xff]  ;;  %v18311_v2 = vld [vmem:[#allocation44_spill] sm:$0xff] }
 0x22f   : > { %v3651_v29 = vpop.f32.mrf.mxu0 }
 0x230   : > { %v15486_v51 = vpop.f32.mrf.mxu1  ;;  %v15490_v11 = vadd.f32 %v3651_v29, %v15048_v10  ;;  %v15492_v41 = vadd.f32 %v12890_v22, %v3795_v32 }
 0x231   : > { %18293 = vst [vmem:[#allocation67_spill] sm:$0xff] %v15486_v51  ;;  %v12795_v61 = vpop.f32.mrf.mxu0  ;;  %13138 = vmatmul.mubr.msk.f32.gmra.mxu0 %vm537_vm0, %v10608_v4  ;;  %v10611_v51 = vld [vmem:[%s13380_s11 + $0x10a] sm:$0xff] }
 0x232   : > { %18294 = vst [vmem:[#allocation69_spill] sm:$0xff] %v15490_v11  ;;  %v12893_v50 = vpop.f32.mrf.mxu1  ;;  %v3797_v27 = vadd.f32 %v12795_v61, %v15056_v57  ;;  %13140 = vmatprep.mubr.msk.f32.mxu0 %vm537_vm0, %v10609_v54  ;;  %v10612_v54 = vld [vmem:[%s13380_s11 + $0x112] sm:$0xff]  ;;  %v18307_v11 = vld [vmem:[#allocation42_spill] sm:$0xff] }
 0x233   : > { %v3661_v56 = vpop.f32.mrf.mxu0 }
 0x234   : > { %v15498_v14 = vpop.f32.mrf.mxu1  ;;  %v15502_v10 = vadd.f32 %v3661_v56, %v15062_v17  ;;  %v15504_v22 = vadd.f32 %v12893_v50, %v3797_v27 }
 0x235   : > { %18295 = vst [vmem:[#allocation70_spill] sm:$0xff] %v15498_v14  ;;  %v12798_v32 = vpop.f32.mrf.mxu0  ;;  %13141 = vmatmul.mubr.msk.f32.gmra.mxu0 %vm537_vm0, %v10610_v62  ;;  %v10613_v14 = vld [vmem:[%s13380_s11 + $0x122] sm:$0xff] }
 0x236   : > { %18296 = vst [vmem:[#allocation71_spill] sm:$0xff] %v15502_v10  ;;  %v12896_v4 = vpop.f32.mrf.mxu1  ;;  %v3799_v57 = vadd.f32 %v12798_v32, %v15070_v6  ;;  %13143 = vmatprep.mubr.msk.f32.mxu0 %vm537_vm0, %v10611_v51  ;;  %v10614_v51 = vld [vmem:[%s13380_s11 + $0x12a] sm:$0xff] }
 0x237   : > { %v3671_v29 = vpop.f32.mrf.mxu0  ;;  %v18303_v10 = vld [vmem:[#allocation39_spill] sm:$0xff] }
 0x238   : > { %v15510_v61 = vpop.f32.mrf.mxu1  ;;  %v15514_v17 = vadd.f32 %v3671_v29, %v15076_v21  ;;  %v15516_v50 = vadd.f32 %v12896_v4, %v3799_v57  ;;  %v18301_v29 = vld [vmem:[#allocation40_spill] sm:$0xff] }
 0x239   : > { %18297 = vst [vmem:[#allocation4_spill] sm:$0xff] %v15510_v61  ;;  %v12801_v27 = vpop.f32.mrf.mxu0  ;;  %13144 = vmatmul.mubr.msk.f32.gmra.mxu0 %vm537_vm0, %v10612_v54  ;;  %v10615_v61 = vld [vmem:[%s13380_s11 + $0x13a] sm:$0xff] }
 0x23a   : > { %18298 = vst [vmem:[#allocation5_spill] sm:$0xff] %v15514_v17  ;;  %v12899_v62 = vpop.f32.mrf.mxu1  ;;  %v3801_v6 = vadd.f32 %v12801_v27, %v15084_v16  ;;  %13146 = vmatprep.mubr.msk.f32.mxu0 %vm537_vm0, %v10613_v14  ;;  %v10616_v14 = vld [vmem:[%s13380_s11 + $0x142] sm:$0xff] }
 0x23b   : > { %v3681_v56 = vpop.f32.mrf.mxu0 }
 0x23c   : > { %v15522_v32 = vpop.f32.mrf.mxu1  ;;  %v15526_v21 = vadd.f32 %v3681_v56, %v15090_v25  ;;  %v15528_v4 = vadd.f32 %v12899_v62, %v3801_v6  ;;  %v18305_v56 = vld [vmem:[#allocation41_spill] sm:$0xff] }
 0x23d   : > { %18299 = vst [vmem:[#allocation72_spill] sm:$0xff] %v15522_v32  ;;  %v12804_v57 = vpop.f32.mrf.mxu0  ;;  %13147 = vmatmul.mubr.msk.f32.gmra.mxu0 %vm537_vm0, %v10614_v51  ;;  %v10617_v32 = vld [vmem:[%s13380_s11 + $0x152] sm:$0xff] }
 0x23e   : > { %18300 = vst [vmem:[#allocation73_spill] sm:$0xff] %v15526_v21  ;;  %v12902_v54 = vpop.f32.mrf.mxu1  ;;  %v3803_v16 = vadd.f32 %v12804_v57, %v18301_v29  ;;  %13149 = vmatprep.mubr.msk.f32.mxu0 %vm537_vm0, %v10615_v61  ;;  %v10618_v61 = vld [vmem:[%s13380_s11 + $0x15a] sm:$0xff] }
 0x23f   : > { %v3691_v27 = vpop.f32.mrf.mxu0 }
 0x240   : > { %v15534_v17 = vpop.f32.mrf.mxu1  ;;  %v15538_v25 = vadd.f32 %v3691_v27, %v18303_v10  ;;  %v15540_v62 = vadd.f32 %v12902_v54, %v3803_v16  ;;  %v18309_v27 = vld [vmem:[#allocation43_spill] sm:$0xff] }
 0x241   : > { %18302 = vst [vmem:[#allocation6_spill] sm:$0xff] %v15534_v17  ;;  %v12807_v6 = vpop.f32.mrf.mxu0  ;;  %13150 = vmatmul.mubr.msk.f32.gmra.mxu0 %vm537_vm0, %v10616_v14  ;;  %v10619_v17 = vld [vmem:[%s13380_s11 + $0x16a] sm:$0xff] }
 0x242   : > { %18304 = vst [vmem:[#allocation74_spill] sm:$0xff] %v15538_v25  ;;  %v12905_v51 = vpop.f32.mrf.mxu1  ;;  %v3805_v57 = vadd.f32 %v12807_v6, %v18305_v56  ;;  %13152 = vmatprep.mubr.msk.f32.mxu0 %vm537_vm0, %v10617_v32  ;;  %v10620_v32 = vld [vmem:[%s13380_s11 + $0x172] sm:$0xff] }
 0x243   : > { %v3701_v29 = vpop.f32.mrf.mxu0 }
 0x244   : > { %v15546_v21 = vpop.f32.mrf.mxu1  ;;  %v15550_v10 = vadd.f32 %v3701_v29, %v18307_v11  ;;  %v15552_v54 = vadd.f32 %v12905_v51, %v3805_v57  ;;  %v18313_v29 = vld [vmem:[#allocation45_spill] sm:$0xff] }
 0x245   : > { %18306 = vst [vmem:[#allocation75_spill] sm:$0xff] %v15546_v21  ;;  %v12810_v16 = vpop.f32.mrf.mxu0  ;;  %13153 = vmatmul.mubr.msk.f32.gmra.mxu0 %vm537_vm0, %v10618_v61  ;;  %v10621_v21 = vld [vmem:[%s13380_s11 + $0x182] sm:$0xff] }
 0x246   : > { %18308 = vst [vmem:[#allocation7_spill] sm:$0xff] %v15550_v10  ;;  %v12908_v14 = vpop.f32.mrf.mxu1  ;;  %v3807_v6 = vadd.f32 %v12810_v16, %v18309_v27  ;;  %13155 = vmatprep.mubr.msk.f32.mxu0 %vm537_vm0, %v10619_v17  ;;  %v10622_v17 = vld [vmem:[%s13380_s11 + $0x18a] sm:$0xff] }
 0x247   : > { %v3711_v56 = vpop.f32.mrf.mxu0 }
 0x248   : > { %v15558_v25 = vpop.f32.mrf.mxu1  ;;  %v15562_v11 = vadd.f32 %v3711_v56, %v18311_v2  ;;  %v15564_v51 = vadd.f32 %v12908_v14, %v3807_v6  ;;  %v18316_v56 = vld [vmem:[#allocation46_spill] sm:$0xff] }
 0x249   : > { %18310 = vst [vmem:[#allocation76_spill] sm:$0xff] %v15558_v25  ;;  %v12813_v57 = vpop.f32.mrf.mxu0  ;;  %13156 = vmatmul.mubr.msk.f32.gmra.mxu0 %vm537_vm0, %v10620_v32  ;;  %v10623_v25 = vld [vmem:[%s13380_s11 + $0x19a] sm:$0xff] }
 0x24a   : > { %18312 = vst [vmem:[#allocation9_spill] sm:$0xff] %v15562_v11  ;;  %v12911_v61 = vpop.f32.mrf.mxu1  ;;  %v3809_v16 = vadd.f32 %v12813_v57, %v18313_v29  ;;  %13158 = vmatprep.mubr.msk.f32.mxu0 %vm537_vm0, %v10621_v21  ;;  %v10624_v21 = vld [vmem:[%s13380_s11 + $0x1a2] sm:$0xff] }
 0x24b   : > { %v3721_v27 = vpop.f32.mrf.mxu0 }
 0x24c   : > { %v15570_v10 = vpop.f32.mrf.mxu1  ;;  %v15574_v2 = vadd.f32 %v3721_v27, %v15147_v30  ;;  %v15576_v14 = vadd.f32 %v12911_v61, %v3809_v16 }
 0x24d   : > { %18314 = vst [vmem:[#allocation8_spill] sm:$0xff] %v15570_v10  ;;  %v12816_v6 = vpop.f32.mrf.mxu0  ;;  %13159 = vmatmul.mubr.msk.f32.gmra.mxu0 %vm537_vm0, %v10622_v17  ;;  %v10625_v10 = vld [vmem:[%s13380_s11 + $0x1e2] sm:$0xff] }
 0x24e   : > { %18315 = vst [vmem:[#allocation10_spill] sm:$0xff] %v15574_v2  ;;  %v12914_v32 = vpop.f32.mrf.mxu1  ;;  %v3811_v57 = vadd.f32 %v12816_v6, %v18316_v56  ;;  %13161 = vmatprep.mubr.msk.f32.mxu0 %vm537_vm0, %v10623_v25  ;;  %v10626_v25 = vld [vmem:[%s13380_s11 + $0x1ea] sm:$0xff]  ;;  %v10635_v2 = vld [vmem:[%s13380_s11 + $0x25a] sm:$0xff] }
 0x24f   : > { %v3731_v29 = vpop.f32.mrf.mxu0 }
 0x250   : > { %v15582_v11 = vpop.f32.mrf.mxu1  ;;  %v15586_v30 = vadd.f32 %v3731_v29, %v15160_v12  ;;  %v15588_v61 = vadd.f32 %v12914_v32, %v3811_v57 }
 0x251   : > { %18317 = vst [vmem:[#allocation11_spill] sm:$0xff] %v15582_v11  ;;  %v12819_v16 = vpop.f32.mrf.mxu0  ;;  %13162 = vmatmul.mubr.msk.f32.gmra.mxu0 %vm537_vm0, %v10624_v21  ;;  %v10627_v11 = vld [vmem:[%s13380_s11 + $0x1fa] sm:$0xff] }
 0x252   : > { %18318 = vst [vmem:[#allocation12_spill] sm:$0xff] %v15586_v30  ;;  %v12917_v17 = vpop.f32.mrf.mxu1  ;;  %v3813_v27 = vadd.f32 %v12819_v16, %v15168_v15  ;;  %13164 = vmatprep.mubr.msk.f32.mxu0 %vm537_vm0, %v10625_v10  ;;  %v10628_v10 = vld [vmem:[%s13380_s11 + $0x202] sm:$0xff] }
 0x253   : > { %v3741_v6 = vpop.f32.mrf.mxu0  ;;  %v10633_v30 = vld [vmem:[%s13380_s11 + $0x242] sm:$0xff] }
 0x254   : > { %v15594_v56 = vpop.f32.mrf.mxu1  ;;  %v15598_v12 = vadd.f32 %v3741_v6, %v15173_v0  ;;  %v15600_v32 = vadd.f32 %v12917_v17, %v3813_v27 }
 0x255   : > { %18319 = vst [vmem:[#allocation13_spill] sm:$0xff] %v15594_v56  ;;  %v12922_v57 = vpop.f32.mrf.mxu0  ;;  %13165 = vmatmul.mubr.msk.f32.gmra.mxu0 %vm537_vm0, %v10626_v25  ;;  %v10629_v56 = vld [vmem:[%s13380_s11 + $0x212] sm:$0xff] }
 0x256   : > { %18320 = vst [vmem:[#allocation14_spill] sm:$0xff] %v15598_v12  ;;  %v13020_v21 = vpop.f32.mrf.mxu1  ;;  %v5166_v15 = vadd.f32 %v12922_v57, %v15182_v40  ;;  %13167 = vmatprep.mubr.msk.f32.mxu0 %vm537_vm0, %v10627_v11  ;;  %v10630_v11 = vld [vmem:[%s13380_s11 + $0x21a] sm:$0xff]  ;;  %v10631_v12 = vld [vmem:[%s13380_s11 + $0x22a] sm:$0xff] }
 0x257   : > { %v4846_v29 = vpop.f32.mrf.mxu0 }
 0x258   : > { %v15606_v16 = vpop.f32.mrf.mxu1  ;;  %v15610_v0 = vadd.f32 %v4846_v29, %v15188_v34  ;;  %v15612_v17 = vadd.f32 %v13020_v21, %v5166_v15 }
 0x259   : > { %v12925_v27 = vpop.f32.mrf.mxu0  ;;  %13168 = vmatmul.mubr.msk.f32.gmra.mxu0 %vm537_vm0, %v10628_v10 }
 0x25a   : > { %v13023_v25 = vpop.f32.mrf.mxu1  ;;  %v5168_v40 = vadd.f32 %v12925_v27, %v15196_v47  ;;  %13170 = vmatprep.mubr.msk.f32.mxu0 %vm537_vm0, %v10629_v56  ;;  %v10632_v56 = vld [vmem:[%s13380_s11 + $0x232] sm:$0xff] }
 0x25b   : > { %v4856_v6 = vpop.f32.mrf.mxu0 }
 0x25c   : > { %v15618_v57 = vpop.f32.mrf.mxu1  ;;  %v15622_v34 = vadd.f32 %v4856_v6, %v15202_v20  ;;  %v15624_v21 = vadd.f32 %v13023_v25, %v5168_v40 }
 0x25d   : > { %v12928_v15 = vpop.f32.mrf.mxu0  ;;  %13171 = vmatmul.mubr.msk.f32.gmra.mxu0 %vm537_vm0, %v10630_v11 }
 0x25e   : > { %v13026_v10 = vpop.f32.mrf.mxu1  ;;  %v5170_v47 = vadd.f32 %v12928_v15, %v15210_v42  ;;  %13173 = vmatprep.mubr.msk.f32.mxu0 %vm537_vm0, %v10631_v12  ;;  %v10634_v12 = vld [vmem:[%s13380_s11 + $0x24a] sm:$0xff] }
 0x25f   : > { %v4866_v29 = vpop.f32.mrf.mxu0 }
 0x260   : > { %v15630_v27 = vpop.f32.mrf.mxu1  ;;  %v15634_v20 = vadd.f32 %v4866_v29, %v15216_v23  ;;  %v15636_v25 = vadd.f32 %v13026_v10, %v5170_v47 }
 0x261   : > { %v12931_v40 = vpop.f32.mrf.mxu0  ;;  %13174 = vmatmul.mubr.msk.f32.gmra.mxu0 %vm537_vm0, %v10632_v56 }
 0x262   : > { %v13029_v11 = vpop.f32.mrf.mxu1  ;;  %v5172_v42 = vadd.f32 %v12931_v40, %v15224_v55  ;;  %13176 = vmatprep.mubr.msk.f32.mxu0 %vm537_vm0, %v10633_v30  ;;  %v10636_v30 = vld [vmem:[%s13380_s11 + $0x262] sm:$0xff] }
 0x263   : > { %v4876_v6 = vpop.f32.mrf.mxu0 }
 0x264   : > { %v15642_v15 = vpop.f32.mrf.mxu1  ;;  %v15646_v23 = vadd.f32 %v4876_v6, %v15230_v46  ;;  %v15648_v10 = vadd.f32 %v13029_v11, %v5172_v42  ;;  %v10637_v46 = vld [vmem:[%s13380_s11 + $0x272] sm:$0xff] }
 0x265   : > { %v12934_v47 = vpop.f32.mrf.mxu0  ;;  %13177 = vmatmul.mubr.msk.f32.gmra.mxu0 %vm537_vm0, %v10634_v12 }
 0x266   : > { %v15651_v56 = vpop.f32.mrf.mxu1  ;;  %v15654_v55 = vadd.f32 %v12934_v47, %v15238_v24  ;;  %13179 = vmatprep.mubr.msk.f32.mxu0 %vm537_vm0, %v10635_v2  ;;  %v10638_v2 = vld [vmem:[%s13380_s11 + $0x27a] sm:$0xff] }
 0x267   : > { %v4886_v29 = vpop.f32.mrf.mxu0 }
 0x268   : > { %v15658_v40 = vpop.f32.mrf.mxu1  ;;  %v15662_v11 = vadd.f32 %v4886_v29, %v15244_v5 }
 0x269   : > { %v12937_v42 = vpop.f32.mrf.mxu0  ;;  %13180 = vmatmul.mubr.msk.f32.gmra.mxu0 %vm537_vm0, %v10636_v30 }
 0x26a   : > { %v15665_v12 = vpop.f32.mrf.mxu1  ;;  %v15668_v24 = vadd.f32 %v12937_v42, %v15252_v44  ;;  %13182 = vmatprep.mubr.msk.f32.mxu0 %vm537_vm0, %v10637_v46  ;;  %v10640_v46 = vld [vmem:[%s13380_s11 + $0x292] sm:$0xff] }
 0x26b   : > { %18321 = vst [vmem:[#allocation15_spill] sm:$0xff] %v15665_v12  ;;  %v4896_v6 = vpop.f32.mrf.mxu0 }
 0x26c   : > { %v15672_v47 = vpop.f32.mrf.mxu1  ;;  %v15676_v5 = vadd.f32 %v4896_v6, %v15258_v63 }
 0x26d   : > { %18322 = vst [vmem:[#allocation16_spill] sm:$0xff] %v15672_v47  ;;  %v12940_v29 = vpop.f32.mrf.mxu0  ;;  %13183 = vmatmul.mubr.msk.f32.gmra.mxu0 %vm537_vm0, %v10638_v2  ;;  %v10641_v47 = vld [vmem:[%s13380_s11 + $0x2a2] sm:$0xff] }
 0x26e   : > { %v15679_v30 = vpop.f32.mrf.mxu1  ;;  %v15682_v44 = vadd.f32 %v12940_v29, %v15266_v8  ;;  %13185 = vmatprep.mubr.msk.f32.mxu0 %vm537_vm0, %v10639_v1  ;;  %v10642_v1 = vld [vmem:[%s13380_s11 + $0x2aa] sm:$0xff] }
 0x26f   : > { %18323 = vst [vmem:[#allocation17_spill] sm:$0xff] %v15679_v30  ;;  %v4906_v42 = vpop.f32.mrf.mxu0 }
 0x270   : > { %v15686_v12 = vpop.f32.mrf.mxu1  ;;  %v15690_v63 = vadd.f32 %v4906_v42, %v15272_v18 }
 0x271   : > { %18324 = vst [vmem:[#allocation18_spill] sm:$0xff] %v15686_v12  ;;  %v12943_v6 = vpop.f32.mrf.mxu0  ;;  %13186 = vmatmul.mubr.msk.f32.gmra.mxu0 %vm537_vm0, %v10640_v46  ;;  %v10643_v12 = vld [vmem:[%s13380_s11 + $0x2ba] sm:$0xff] }
 0x272   : > { %v15693_v2 = vpop.f32.mrf.mxu1  ;;  %v15696_v8 = vadd.f32 %v12943_v6, %v15280_v36  ;;  %13188 = vmatprep.mubr.msk.f32.mxu0 %vm537_vm0, %v10641_v47  ;;  %v10644_v47 = vld [vmem:[%s13380_s11 + $0x2c2] sm:$0xff] }
 0x273   : > { %18325 = vst [vmem:[#allocation19_spill] sm:$0xff] %v15693_v2  ;;  %v4916_v29 = vpop.f32.mrf.mxu0  ;;  %v10645_v2 = vld [vmem:[%s13380_s11 + $0x2d2] sm:$0xff] }
 0x274   : > { %v15700_v30 = vpop.f32.mrf.mxu1  ;;  %v15704_v18 = vadd.f32 %v4916_v29, %v15286_v3 }
 0x275   : > { %18326 = vst [vmem:[#allocation20_spill] sm:$0xff] %v15700_v30  ;;  %v12946_v42 = vpop.f32.mrf.mxu0  ;;  %13189 = vmatmul.mubr.msk.f32.gmra.mxu0 %vm537_vm0, %v10642_v1 }
 0x276   : > { %18327 = vst [vmem:[#allocation21_spill] sm:$0xff] %v15704_v18  ;;  %v15707_v46 = vpop.f32.mrf.mxu1  ;;  %v15710_v36 = vadd.f32 %v12946_v42, %v15298_v26  ;;  %13191 = vmatprep.mubr.msk.f32.mxu0 %vm537_vm0, %v10643_v12  ;;  %v10646_v26 = vld [vmem:[%s13380_s11 + $0x2da] sm:$0xff] }
 0x277   : > { %18328 = vst [vmem:[#allocation22_spill] sm:$0xff] %v15707_v46  ;;  %v15714_v6 = vpop.f32.mrf.mxu0 }
 0x278   : > { %18329 = vst [vmem:[#allocation23_spill] sm:$0xff] %v15710_v36  ;;  %v15716_v30 = vpop.f32.mrf.mxu1  ;;  %v18338_v36 = vld [vmem:[#allocation55_spill] sm:$0xff] }
 0x279   : > { %18330 = vst [vmem:[#allocation24_spill] sm:$0xff] %v15716_v30  ;;  %v12949_v3 = vpop.f32.mrf.mxu0  ;;  %13192 = vmatmul.mubr.msk.f32.gmra.mxu0 %vm537_vm0, %v10644_v47  ;;  %v10647_v30 = vld [vmem:[%s13380_s11 + $0x2ea] sm:$0xff] }
 0x27a   : > { %v15720_v1 = vpop.f32.mrf.mxu1  ;;  %v15723_v29 = vadd.f32 %v12949_v3, %v15314_v9  ;;  %13194 = vmatprep.mubr.msk.f32.mxu0 %vm537_vm0, %v10645_v2  ;;  %v10648_v9 = vld [vmem:[%s13380_s11 + $0x2f2] sm:$0xff] }
 0x27b   : > { %18331 = vst [vmem:[#allocation25_spill] sm:$0xff] %v15720_v1  ;;  %v15727_v12 = vpop.f32.mrf.mxu0 }
 0x27c   : > { %18332 = vst [vmem:[#allocation26_spill] sm:$0xff] %v15723_v29  ;;  %v15729_v42 = vpop.f32.mrf.mxu1 }
 0x27d   : > { %18333 = vst [vmem:[#allocation27_spill] sm:$0xff] %v15729_v42  ;;  %v12952_v46 = vpop.f32.mrf.mxu0  ;;  %13195 = vmatmul.mubr.msk.f32.gmra.mxu0 %vm537_vm0, %v10646_v26  ;;  %v10649_v42 = vld [vmem:[%s13380_s11 + $0x302] sm:$0xff] }
 0x27e   : > { %v15733_v47 = vpop.f32.mrf.mxu1  ;;  %v15736_v1 = vadd.f32 %v12952_v46, %v15330_v37  ;;  %13197 = vmatprep.mubr.msk.f32.mxu0 %vm537_vm0, %v10647_v30  ;;  %v10650_v37 = vld [vmem:[%s13380_s11 + $0x30a] sm:$0xff] }
 0x27f   : > { %18334 = vst [vmem:[#allocation28_spill] sm:$0xff] %v15733_v47  ;;  %v15740_v2 = vpop.f32.mrf.mxu0 }
 0x280   : > { %18335 = vst [vmem:[#allocation30_spill] sm:$0xff] %v15736_v1  ;;  %v15742_v3 = vpop.f32.mrf.mxu1 }
 0x281   : > { %18336 = vst [vmem:[#allocation29_spill] sm:$0xff] %v15742_v3  ;;  %v12955_v29 = vpop.f32.mrf.mxu0  ;;  %13198 = vmatmul.mubr.msk.f32.gmra.mxu0 %vm537_vm0, %v10648_v9  ;;  %v10651_v3 = vld [vmem:[%s13380_s11 + $0x31a] sm:$0xff] }
 0x282   : > { %v15746_v26 = vpop.f32.mrf.mxu1  ;;  %v15749_v47 = vadd.f32 %v12955_v29, %v18338_v36  ;;  %13200 = vmatprep.mubr.msk.f32.mxu0 %vm537_vm0, %v10649_v42  ;;  %v10652_v36 = vld [vmem:[%s13380_s11 + $0x322] sm:$0xff] }
 0x283   : > { %18337 = vst [vmem:[#allocation31_spill] sm:$0xff] %v15746_v26  ;;  %v15753_v30 = vpop.f32.mrf.mxu0 }
 0x284   : > { %18339 = vst [vmem:[#allocation77_spill] sm:$0xff] %v15749_v47  ;;  %v15755_v46 = vpop.f32.mrf.mxu1 }
 0x285   : > { %18340 = vst [vmem:[#allocation32_spill] sm:$0xff] %v15755_v46  ;;  %v12958_v1 = vpop.f32.mrf.mxu0  ;;  %13201 = vmatmul.mubr.msk.f32.gmra.mxu0 %vm537_vm0, %v10650_v37  ;;  %v10653_v46 = vld [vmem:[%s13380_s11 + $0x332] sm:$0xff] }
 0x286   : > { %v15759_v9 = vpop.f32.mrf.mxu1  ;;  %v15762_v26 = vadd.f32 %v12958_v1, %v15362_v59  ;;  %13203 = vmatprep.mubr.msk.f32.mxu0 %vm537_vm0, %v10651_v3  ;;  %v10654_v59 = vld [vmem:[%s13380_s11 + $0x33a] sm:$0xff] }
 0x287   : > { %18341 = vst [vmem:[#allocation78_spill] sm:$0xff] %v15759_v9  ;;  %v15766_v29 = vpop.f32.mrf.mxu0  ;;  %v10655_v9 = vld [vmem:[%s13380_s11 + $0x34a] sm:$0xff] }
 0x288   : > { %18342 = vst [vmem:[#allocation34_spill] sm:$0xff] %v15762_v26  ;;  %v15768_v42 = vpop.f32.mrf.mxu1 }
 0x289   : > { %18343 = vst [vmem:[#allocation33_spill] sm:$0xff] %v15768_v42  ;;  %v12961_v47 = vpop.f32.mrf.mxu0  ;;  %13204 = vmatmul.mubr.msk.f32.gmra.mxu0 %vm537_vm0, %v10652_v36 }
 0x28a   : > { %v15772_v18 = vpop.f32.mrf.mxu1  ;;  %v15775_v37 = vadd.f32 %v12961_v47, %v15379_v52  ;;  %13206 = vmatprep.mubr.msk.f32.mxu0 %vm537_vm0, %v10653_v46  ;;  %v10656_v52 = vld [vmem:[%s13380_s11 + $0x352] sm:$0xff] }
 0x28b   : > { %18344 = vst [vmem:[#allocation35_spill] sm:$0xff] %v15772_v18  ;;  %v15779_v1 = vpop.f32.mrf.mxu0 }
 0x28c   : > { %18345 = vst [vmem:[#allocation2_spill] sm:$0xff] %v15775_v37  ;;  %18346 = vst [vmem:[#allocation37_spill] sm:$0xff] %v15779_v1  ;;  %v15781_v3 = vpop.f32.mrf.mxu1 }
 0x28d   : > { %18347 = vst [vmem:[#allocation36_spill] sm:$0xff] %v15781_v3  ;;  %v12964_v26 = vpop.f32.mrf.mxu0  ;;  %13207 = vmatmul.mubr.msk.f32.gmra.mxu0 %vm537_vm0, %v10654_v59 }
 0x28e   : > { %v15785_v42 = vpop.f32.mrf.mxu1  ;;  %v15788_v36 = vadd.f32 %v12964_v26, %v15395_v49  ;;  %13209 = vmatprep.mubr.msk.f32.mxu0 %vm537_vm0, %v10655_v9 }
 0x28f   : > { %18348 = vst [vmem:[#allocation3_spill] sm:$0xff] %v15785_v42  ;;  %v15792_v47 = vpop.f32.mrf.mxu0 }
 0x290   : > { %18349 = vst [vmem:[#allocation38_spill] sm:$0xff] %v15788_v36  ;;  %18350 = vst [vmem:[#allocation40_spill] sm:$0xff] %v15792_v47  ;;  %v15794_v46 = vpop.f32.mrf.mxu1 }
 0x291   : > { %18351 = vst [vmem:[#allocation39_spill] sm:$0xff] %v15794_v46  ;;  %v12967_v18 = vpop.f32.mrf.mxu0  ;;  %13210 = vmatmul.mubr.msk.f32.gmra.mxu0 %vm537_vm0, %v10656_v52 }
 0x292   : > { %v15797_v3 = vpop.f32.mrf.mxu1  ;;  %v15800_v37 = vadd.f32 %v12967_v18, %v15408_v48 }
 0x293   : > { %18352 = vst [vmem:[#allocation41_spill] sm:$0xff] %v15797_v3  ;;  %v15802_v59 = vpop.f32.mrf.mxu0 }
 0x294   : > { %18353 = vst [vmem:[#allocation42_spill] sm:$0xff] %v15800_v37  ;;  %18354 = vst [vmem:[#allocation43_spill] sm:$0xff] %v15802_v59  ;;  %v15804_v42 = vpop.f32.mrf.mxu1 }
 0x295   : > { %18355 = vst [vmem:[#allocation44_spill] sm:$0xff] %v15804_v42  ;;  %v12970_v49 = vpop.f32.mrf.mxu0 }
 0x296   : > { %v13068_v26 = vpop.f32.mrf.mxu1  ;;  %v5198_v9 = vadd.f32 %v12970_v49, %v15420_v7 }
 0x297   : > { %v15807_v36 = vpop.f32.mrf.mxu0 }
 0x298   : > { %18356 = vst [vmem:[#allocation45_spill] sm:$0xff] %v15807_v36  ;;  %v15809_v47 = vpop.f32.mrf.mxu1  ;;  %v15811_v46 = vadd.f32 %v13068_v26, %v5198_v9 }
 0x299   : > { %18357 = vst [vmem:[#allocation46_spill] sm:$0xff] %v15809_v47  ;;  %v12973_v52 = vpop.f32.mrf.mxu0 }
 0x29a   : > { %18358 = vst [vmem:[#allocation55_spill] sm:$0xff] %v15811_v46  ;;  %v13071_v1 = vpop.f32.mrf.mxu1  ;;  %v5200_v3 = vadd.f32 %v12973_v52, %v15432_v60 }
 0x29b   : > { %v15814_v48 = vpop.f32.mrf.mxu0 }
 0x29c   : > { %v15816_v18 = vpop.f32.mrf.mxu1  ;;  %v15818_v37 = vadd.f32 %v13071_v1, %v5200_v3 }
 0x29d   : > { %v12976_v42 = vpop.f32.mrf.mxu0 }
 0x29e   : > { %18359 = vst [vmem:[#allocation79_spill] sm:$0xff] %v15818_v37  ;;  %v13074_v59 = vpop.f32.mrf.mxu1  ;;  %v5202_v7 = vadd.f32 %v12976_v42, %v15444_v38 }
 0x29f   : > { %v15821_v49 = vpop.f32.mrf.mxu0 }
 0x2a0   : > { %v15823_v36 = vpop.f32.mrf.mxu1  ;;  %v15825_v26 = vadd.f32 %v13074_v59, %v5202_v7 }
 0x2a1   : > { %v12979_v9 = vpop.f32.mrf.mxu0 }
 0x2a2   : > { %18360 = vst [vmem:[#allocation80_spill] sm:$0xff] %v15825_v26  ;;  %v13077_v46 = vpop.f32.mrf.mxu1  ;;  %v5204_v60 = vadd.f32 %v12979_v9, %v15456_v39 }
 0x2a3   : > { %v15828_v52 = vpop.f32.mrf.mxu0 }
 0x2a4   : > { %v15830_v47 = vadd.f32 %v13077_v46, %v5204_v60 }
 0x2a5   : > { %v12982_v1 = vpop.f32.mrf.mxu0 }
 0x2a6   : > { %18361 = vst [vmem:[#allocation81_spill] sm:$0xff] %v15830_v47  ;;  %v15833_v3 = vadd.f32 %v12982_v1, %v15468_v45  ;;  %v18404_v47 = vld [vmem:[#allocation49_spill] sm:$0xff] }
 0x2a7   : > { %v15835_v37 = vpop.f32.mrf.mxu0 }
 0x2a8   : > { %18362 = vst [vmem:[#allocation82_spill] sm:$0xff] %v15833_v3  ;;  %18363 = vst [vmem:[#allocation83_spill] sm:$0xff] %v15835_v37 }
 0x2a9   : > { %v12985_v38 = vpop.f32.mrf.mxu0 }
 0x2aa   : > { %v15838_v42 = vadd.f32 %v12985_v38, %v15480_v13 }
 0x2ab   : > { %v15840_v59 = vpop.f32.mrf.mxu0 }
 0x2ac   : > { %18364 = vst [vmem:[#allocation84_spill] sm:$0xff] %v15838_v42  ;;  %18365 = vst [vmem:[#allocation85_spill] sm:$0xff] %v15840_v59  ;;  %v18402_v59 = vld [vmem:[#allocation47_spill] sm:$0xff] }
 0x2ad   : > { %v12988_v7 = vpop.f32.mrf.mxu0 }
 0x2ae   : > { %v15843_v26 = vadd.f32 %v12988_v7, %v15492_v41  ;;  %v10749_v41 = vld [vmem:[%s17856_s7 + $0x108] sm:$0xff] }
 0x2af   : > { %v15845_v39 = vpop.f32.mrf.mxu0  ;;  %7557 = vmatprep.mubr.f32.mxu0 %v10749_v41 }
 0x2b0   : > { %18366 = vst [vmem:[#allocation86_spill] sm:$0xff] %v15843_v26  ;;  %18367 = vst [vmem:[#allocation87_spill] sm:$0xff] %v15845_v39 }
 0x2b1   : > { %v12991_v46 = vpop.f32.mrf.mxu0 }
 0x2b2   : > { %v15848_v9 = vadd.f32 %v12991_v46, %v15504_v22 }
 0x2b3   : > { %v15850_v45 = vpop.f32.mrf.mxu0 }
 0x2b4   : > { %18368 = vst [vmem:[#allocation88_spill] sm:$0xff] %v15848_v9  ;;  %18369 = vst [vmem:[#allocation89_spill] sm:$0xff] %v15850_v45 }
 0x2b5   : > { %v12994_v60 = vpop.f32.mrf.mxu0 }
 0x2b6   : > { %v15853_v1 = vadd.f32 %v12994_v60, %v15516_v50 }
 0x2b7   : > { %v15855_v13 = vpop.f32.mrf.mxu0 }
 0x2b8   : > { %18370 = vst [vmem:[#allocation90_spill] sm:$0xff] %v15853_v1  ;;  %18371 = vst [vmem:[#allocation91_spill] sm:$0xff] %v15855_v13 }
 0x2b9   : > { %v12997_v38 = vpop.f32.mrf.mxu0 }
 0x2ba   : > { %v15861_v7 = vadd.f32 %v12997_v38, %v15528_v4 }
 0x2bb   : > { %v15863_v26 = vpop.f32.mrf.mxu0 }
 0x2bc   : > { %18372 = vst [vmem:[#allocation92_spill] sm:$0xff] %v15861_v7  ;;  %18373 = vst [vmem:[#allocation93_spill] sm:$0xff] %v15863_v26  ;;  %v15926_v7 = vpop.f32.mrf.mxu1 }
 0x2bd   : > { %v13000_v22 = vpop.f32.mrf.mxu0 }
 0x2be   : > { %v15866_v46 = vadd.f32 %v13000_v22, %v15540_v62 }
 0x2bf   : > { %v15868_v9 = vpop.f32.mrf.mxu0 }
 0x2c0   : > { %18374 = vst [vmem:[#allocation94_spill] sm:$0xff] %v15866_v46  ;;  %18375 = vst [vmem:[#allocation95_spill] sm:$0xff] %v15868_v9 }
 0x2c1   : > { %v13003_v50 = vpop.f32.mrf.mxu0 }
 0x2c2   : > { %v15871_v60 = vadd.f32 %v13003_v50, %v15552_v54 }
 0x2c3   : > { %v15873_v1 = vpop.f32.mrf.mxu0 }
 0x2c4   : > { %18376 = vst [vmem:[#allocation96_spill] sm:$0xff] %v15871_v60  ;;  %18377 = vst [vmem:[#allocation97_spill] sm:$0xff] %v15873_v1 }
 0x2c5   : > { %v13006_v42 = vpop.f32.mrf.mxu0 }
 0x2c6   : > { %v15876_v13 = vadd.f32 %v13006_v42, %v15564_v51 }
 0x2c7   : > { %v15878_v4 = vpop.f32.mrf.mxu0 }
 0x2c8   : > { %18378 = vst [vmem:[#allocation98_spill] sm:$0xff] %v15876_v13  ;;  %18379 = vst [vmem:[#allocation99_spill] sm:$0xff] %v15878_v4 }
 0x2c9   : > { %v13009_v38 = vpop.f32.mrf.mxu0 }
 0x2ca   : > { %v15881_v41 = vadd.f32 %v13009_v38, %v15576_v14  ;;  %v6907_v38 = vld [vmem:[%s17856_s7 + $0x8] sm:$0xff] }
 0x2cb   : > { %v15883_v62 = vpop.f32.mrf.mxu0  ;;  %6986 = vmatprep.mubr.f32.mxu1 %v6907_v38 }
 0x2cc   : > { %18380 = vst [vmem:[#allocation100_spill] sm:$0xff] %v15881_v41  ;;  %18381 = vst [vmem:[#allocation101_spill] sm:$0xff] %v15883_v62 }
 0x2cd   : > { %v13012_v22 = vpop.f32.mrf.mxu0 }
 0x2ce   : > { %v15886_v46 = vadd.f32 %v13012_v22, %v15588_v61 }
 0x2cf   : > { %v15888_v54 = vpop.f32.mrf.mxu0 }
 0x2d0   : > { %18382 = vst [vmem:[#allocation102_spill] sm:$0xff] %v15886_v46  ;;  %18383 = vst [vmem:[#allocation103_spill] sm:$0xff] %v15888_v54  ;;  %v15932_v54 = vpop.f32.mrf.mxu1 }
 0x2d1   : > { %v13015_v50 = vpop.f32.mrf.mxu0  ;;  %18391 = vst [vmem:[#allocation111_spill] sm:$0xff] %v15932_v54  ;;  %v18401_v54 = vld [vmem:[#allocation48_spill] sm:$0xff] }
 0x2d2   : > { %v15891_v60 = vadd.f32 %v13015_v50, %v15600_v32  ;;  %v15938_v62 = vpop.f32.mrf.mxu1  ;;  %v4473_v37 = vadd.f32 %v18402_v59, %v18401_v54  ;;  %v18413_v54 = vld [vmem:[#allocation59_spill] sm:$0xff] }
 0x2d3   : > { %v15893_v51 = vpop.f32.mrf.mxu0  ;;  %18393 = vst [vmem:[#allocation113_spill] sm:$0xff] %v15938_v62 }
 0x2d4   : > { %18384 = vst [vmem:[#allocation104_spill] sm:$0xff] %v15891_v60  ;;  %18385 = vst [vmem:[#allocation105_spill] sm:$0xff] %v15893_v51  ;;  %v15944_v9 = vpop.f32.mrf.mxu1 }
 0x2d5   : > { %v13118_v42 = vpop.f32.mrf.mxu0  ;;  %18396 = vst [vmem:[#allocation116_spill] sm:$0xff] %v15944_v9 }
 0x2d6   : > { %v15896_v13 = vadd.f32 %v13118_v42, %v15612_v17  ;;  %v15950_v45 = vpop.f32.mrf.mxu1 }
 0x2d7   : > { %v15898_v14 = vpop.f32.mrf.mxu0  ;;  %18399 = vst [vmem:[#allocation119_spill] sm:$0xff] %v15950_v45  ;;  %v18410_v45 = vld [vmem:[#allocation57_spill] sm:$0xff] }
 0x2d8   : > { %18386 = vst [vmem:[#allocation106_spill] sm:$0xff] %v15896_v13  ;;  %v18403_v13 = vld [vmem:[#allocation50_spill] sm:$0xff] }
 0x2d9   : > { %v13121_v61 = vpop.f32.mrf.mxu0  ;;  %v4475_v62 = vadd.f32 %v18404_v47, %v18403_v13  ;;  %v4487_v47 = vadd.f32 %v18413_v54, %v15406_v58  ;;  %v18414_v13 = vld [vmem:[#allocation60_spill] sm:$0xff]  ;;  %v15988_v58 = vadd.f32 %v15618_v57, %v15622_v34  ;;  %v18419_v34 = vld [vmem:[#allocation15_spill] sm:$0xff]  ;;  %v18427_v54 = vld [vmem:[#allocation22_spill] sm:$0xff] }
 0x2da   : > { %v15904_v22 = vadd.f32 %v13121_v61, %v15624_v21 }
 0x2db   : > { %v15906_v46 = vpop.f32.mrf.mxu0 }
 0x2dd   : > { %v13124_v32 = vpop.f32.mrf.mxu0 }
 0x2de   : > { %v15909_v50 = vadd.f32 %v13124_v32, %v15636_v25 }
 0x2df   : > { %v15911_v60 = vpop.f32.mrf.mxu0 }
 0x2e0   : > { %18387 = vst [vmem:[#allocation107_spill] sm:$0xff] %v15909_v50  ;;  %v18411_v50 = vld [vmem:[#allocation56_spill] sm:$0xff] }
 0x2e1   : > { %v13127_v17 = vpop.f32.mrf.mxu0 }
 0x2e2   : > { %v15914_v42 = vadd.f32 %v13127_v17, %v15648_v10 }
 0x2e3   : > { %v15916_v41 = vpop.f32.mrf.mxu0 }
 0x2e4   : > { %18388 = vst [vmem:[#allocation108_spill] sm:$0xff] %v15914_v42 }
 0x2e5   : > { %v15918_v51 = vpop.f32.mrf.mxu0 }
 0x2e7   : > { %v15920_v38 = vpop.f32.mrf.mxu0 }
 0x2e9   : > { %v15922_v21 = vpop.f32.mrf.mxu0 }
 0x2eb   : > { %v15924_v61 = vpop.f32.mrf.mxu0 }
 0x2ec   : > { %18389 = vst [vmem:[#allocation109_spill] sm:$0xff] %v15924_v61  ;;  %v18408_v61 = vld [vmem:[#allocation53_spill] sm:$0xff] }
 0x2ed   : > { %v15928_v25 = vpop.f32.mrf.mxu0 }
 0x2ef   : > { %v15930_v32 = vpop.f32.mrf.mxu0 }
 0x2f0   : > { %18390 = vst [vmem:[#allocation110_spill] sm:$0xff] %v15930_v32  ;;  %v18405_v32 = vld [vmem:[#allocation52_spill] sm:$0xff] }
 0x2f1   : > { %v15934_v10 = vpop.f32.mrf.mxu0 }
 0x2f3   : > { %v15936_v17 = vpop.f32.mrf.mxu0 }
 0x2f4   : > { %18392 = vst [vmem:[#allocation112_spill] sm:$0xff] %v15936_v17  ;;  %v18412_v17 = vld [vmem:[#allocation58_spill] sm:$0xff] }
 0x2f5   : > { %v15940_v4 = vpop.f32.mrf.mxu0  ;;  %v4485_v59 = vadd.f32 %v18412_v17, %v15393_v19 }
 0x2f6   : > { %18394 = vst [vmem:[#allocation114_spill] sm:$0xff] %v15940_v4  ;;  %v18406_v4 = vld [vmem:[#allocation51_spill] sm:$0xff] }
 0x2f7   : > { %v15942_v1 = vpop.f32.mrf.mxu0  ;;  %v4477_v42 = vadd.f32 %v18406_v4, %v18405_v32  ;;  %v4489_v4 = vadd.f32 %v18414_v13, %v15418_v28  ;;  %v18415_v32 = vld [vmem:[#allocation61_spill] sm:$0xff]  ;;  %v5876_v28 = vadd.f32 %v15630_v27, %v15634_v20  ;;  %v5883_v27 = vadd.f32 %v18419_v34, %v15668_v24  ;;  %v18420_v20 = vld [vmem:[#allocation16_spill] sm:$0xff]  ;;  %v18436_v34 = vld [vmem:[#allocation30_spill] sm:$0xff] }
 0x2f8   : > { %18395 = vst [vmem:[#allocation115_spill] sm:$0xff] %v15942_v1  ;;  %v18407_v1 = vld [vmem:[#allocation54_spill] sm:$0xff] }
 0x2f9   : > { %v15946_v26 = vpop.f32.mrf.mxu0  ;;  %v4479_v9 = vadd.f32 %v18408_v61, %v18407_v1  ;;  %v4491_v1 = vadd.f32 %v18415_v32, %v15430_v31  ;;  %v18416_v61 = vld [vmem:[#allocation62_spill] sm:$0xff]  ;;  %v5181_v31 = vadd.f32 %v15714_v6, %v4473_v37  ;;  %v5185_v17 = vadd.f32 %v15740_v2, %v4477_v42  ;;  %v18425_v2 = vld [vmem:[#allocation20_spill] sm:$0xff]  ;;  %v18426_v42 = vld [vmem:[#allocation23_spill] sm:$0xff] }
 0x2fa   : > { %18397 = vst [vmem:[#allocation117_spill] sm:$0xff] %v15946_v26  ;;  %v4481_v26 = vadd.f32 %v15356_v33, %v15360_v35  ;;  %v4493_v33 = vadd.f32 %v18416_v61, %v15442_v43  ;;  %v18417_v35 = vld [vmem:[#allocation64_spill] sm:$0xff]  ;;  %v5183_v43 = vadd.f32 %v15727_v12, %v4475_v62  ;;  %v5882_v6 = vadd.f32 %v18420_v20, %v15676_v5  ;;  %v18421_v12 = vld [vmem:[#allocation17_spill] sm:$0xff]  ;;  %v18434_v61 = vld [vmem:[#allocation27_spill] sm:$0xff] }
 0x2fb   : > { %v15948_v3 = vpop.f32.mrf.mxu0  ;;  %v5885_v37 = vadd.f32 %v18421_v12, %v15682_v44  ;;  %v16018_v24 = vadd.f32 %v18427_v54, %v18426_v42  ;;  %v18430_v44 = vld [vmem:[#allocation24_spill] sm:$0xff] }
 0x2fc   : > { %18398 = vst [vmem:[#allocation118_spill] sm:$0xff] %v15948_v3  ;;  %v16025_v32 = vadd.f32 %v18430_v44, %v5181_v31  ;;  %v18437_v20 = vld [vmem:[#allocation28_spill] sm:$0xff]  ;;  %v18441_v44 = vld [vmem:[#allocation77_spill] sm:$0xff] }
 0x2fd   : > { %v15952_v39 = vpop.f32.mrf.mxu0  ;;  %18428 = vst [vmem:[#allocation50_spill] sm:$0xff] %v16018_v24  ;;  %v16037_v12 = vadd.f32 %v18437_v20, %v18436_v34  ;;  %v18445_v34 = vld [vmem:[#allocation45_spill] sm:$0xff]  ;;  %v18459_v24 = vld [vmem:[#allocation46_spill] sm:$0xff] }
 0x2fe   : > { %18400 = vst [vmem:[#allocation120_spill] sm:$0xff] %v15952_v39  ;;  %v4483_v39 = vadd.f32 %v18411_v50, %v18410_v45  ;;  %v5872_v45 = vadd.f32 %v15606_v16, %v15610_v0  ;;  %v15982_v50 = vpop.f32.mrf.mxu1  ;;  %v5881_v16 = vadd.f32 %v15651_v56, %v15654_v55  ;;  %v5880_v0 = vadd.f32 %v15658_v40, %v15662_v11  ;;  %v18423_v55 = vld [vmem:[#allocation19_spill] sm:$0xff]  ;;  %v18424_v11 = vld [vmem:[#allocation21_spill] sm:$0xff] }
 0x2ff   : > { %v15964_v3 = vpop.f32.mrf.mxu0  ;;  %18418 = vst [vmem:[#allocation47_spill] sm:$0xff] %v15982_v50  ;;  %v5887_v40 = vadd.f32 %v18423_v55, %v15696_v8  ;;  %v5886_v62 = vadd.f32 %v18425_v2, %v18424_v11  ;;  %18431 = vst [vmem:[#allocation52_spill] sm:$0xff] %v16025_v32  ;;  %v16032_v8 = vadd.f32 %v18434_v61, %v5183_v43  ;;  %v18439_v11 = vld [vmem:[#allocation37_spill] sm:$0xff]  ;;  %v18440_v2 = vld [vmem:[#allocation40_spill] sm:$0xff] }
 0x300   : > { %18409 = vst [vmem:[#allocation48_spill] sm:$0xff] %v15964_v3  ;;  %v4495_v3 = vadd.f32 %v18417_v35, %v15454_v53  ;;  %v5878_v53 = vadd.f32 %v15642_v15, %v15646_v23  ;;  %v5187_v15 = vadd.f32 %v15753_v30, %v4479_v9  ;;  %v18422_v23 = vld [vmem:[#allocation18_spill] sm:$0xff]  ;;  %v16020_v13 = vpop.f32.mrf.mxu1  ;;  %v18433_v9 = vld [vmem:[#allocation25_spill] sm:$0xff]  ;;  %v5189_v35 = vadd.f32 %v15766_v29, %v4481_v26  ;;  %v18444_v26 = vld [vmem:[#allocation43_spill] sm:$0xff] }
 0x301   : > { %v15984_v19 = vpop.f32.mrf.mxu0  ;;  %v5884_v56 = vadd.f32 %v18422_v23, %v15690_v63  ;;  %18429 = vst [vmem:[#allocation49_spill] sm:$0xff] %v16020_v13  ;;  %v18432_v30 = vld [vmem:[#allocation26_spill] sm:$0xff]  ;;  %18435 = vst [vmem:[#allocation51_spill] sm:$0xff] %v16032_v8  ;;  %v18438_v23 = vld [vmem:[#allocation29_spill] sm:$0xff]  ;;  %v5191_v31 = vadd.f32 %v18439_v11, %v4483_v39  ;;  %v5193_v42 = vadd.f32 %v18440_v2, %v4485_v59 }
 0x302   : > { %v16029_v63 = vadd.f32 %v18433_v9, %v18432_v30  ;;  %v16040_v55 = vadd.f32 %v18438_v23, %v5185_v17  ;;  %v18442_v30 = vld [vmem:[#allocation31_spill] sm:$0xff]  ;;  %v18443_v9 = vld [vmem:[#allocation32_spill] sm:$0xff]  ;;  %v5195_v61 = vadd.f32 %v18444_v26, %v4487_v47  ;;  %v5197_v20 = vadd.f32 %v18445_v34, %v4489_v4  ;;  %v18446_v13 = vld [vmem:[#allocation34_spill] sm:$0xff]  ;;  %v16062_v2 = vpop.f32.mrf.mxu1 }
 0x303   : > { %v16001_v57 = vpop.f32.mrf.mxu0  ;;  %v16048_v43 = vadd.f32 %v18442_v30, %v18441_v44  ;;  %v16051_v29 = vadd.f32 %v18443_v9, %v5187_v15  ;;  %v18447_v17 = vld [vmem:[#allocation78_spill] sm:$0xff]  ;;  %v5199_v39 = vadd.f32 %v15814_v48, %v4491_v1  ;;  %v5201_v59 = vadd.f32 %v15821_v49, %v4493_v33  ;;  %18448 = vst [vmem:[#allocation54_spill] sm:$0xff] %v16062_v2  ;;  %v18449_v47 = vld [vmem:[#allocation33_spill] sm:$0xff]  ;;  %v18451_v30 = vld [vmem:[#allocation35_spill] sm:$0xff] }
 0x304   : > { %v16057_v23 = vadd.f32 %v18447_v17, %v18446_v13  ;;  %v5203_v11 = vadd.f32 %v15828_v52, %v4495_v3  ;;  %v16069_v15 = vadd.f32 %v18449_v47, %v5189_v35  ;;  %v18450_v4 = vld [vmem:[#allocation2_spill] sm:$0xff]  ;;  %v6588_v9 = vadd.f32 %v15918_v51, %v5881_v16  ;;  %v18452_v49 = vld [vmem:[#allocation36_spill] sm:$0xff]  ;;  %v18454_v3 = vld [vmem:[#allocation3_spill] sm:$0xff] }
 0x305   : > { %v16022_v5 = vpop.f32.mrf.mxu0  ;;  %v5899_v13 = vadd.f32 %v18451_v30, %v18450_v4  ;;  %v6594_v48 = vadd.f32 %v15934_v10, %v5887_v40  ;;  %v5898_v1 = vadd.f32 %v18452_v49, %v5191_v31  ;;  %v18453_v52 = vld [vmem:[#allocation38_spill] sm:$0xff]  ;;  %v18455_v26 = vld [vmem:[#allocation39_spill] sm:$0xff]  ;;  %v18457_v2 = vld [vmem:[#allocation41_spill] sm:$0xff]  ;;  %v5904_v8 = vadd.f32 %v18459_v24, %v5197_v20 }
 0x306   : > { %v5901_v33 = vadd.f32 %v18454_v3, %v18453_v52  ;;  %v5900_v34 = vadd.f32 %v18455_v26, %v5193_v42  ;;  %v18456_v17 = vld [vmem:[#allocation42_spill] sm:$0xff]  ;;  %v18458_v35 = vld [vmem:[#allocation44_spill] sm:$0xff]  ;;  %v6590_v4 = vadd.f32 %v15922_v21, %v5883_v27  ;;  %v6592_v51 = vadd.f32 %v15928_v25, %v5885_v37  ;;  %v16096_v42 = vpop.f32.mrf.mxu1  ;;  %v18461_v37 = vld [vmem:[#allocation107_spill] sm:$0xff] }
 0x307   : > { %v16044_v54 = vpop.f32.mrf.mxu0  ;;  %v5903_v50 = vadd.f32 %v18457_v2, %v18456_v17  ;;  %v5902_v47 = vadd.f32 %v18458_v35, %v5195_v61  ;;  %v16085_v10 = vld [vmem:[%s385_s21] ss:$0 sm:$0xff]  ;;  %v16088_v16 = vadd.f32 %v15816_v18, %v5199_v39  ;;  %v16091_v40 = vadd.f32 %v15823_v36, %v5201_v59  ;;  %v18462_v20 = vld [vmem:[#allocation109_spill] sm:$0xff] }
 0x308   : > { %v16094_v31 = vadd.f32 %v15926_v7, %v5203_v11  ;;  %v6583_v61 = vadd.f32 %v15911_v60, %v5876_v28  ;;  %v16100_v21 = vadd.f32 %v15898_v14, %v5872_v45  ;;  %v6585_v25 = vadd.f32 %v15916_v41, %v5878_v53  ;;  %v18460_v28 = vld [vmem:[#allocation112_spill] sm:$0xff]  ;;  %v16128_v59 = vpop.f32.mrf.mxu1 }
 0x309   : > { %v13157_v44 = vpop.f32.mrf.mxu0  ;;  %v16104_v27 = vadd.f32 %v16085_v10, %v6588_v9  ;;  %v6665_v18 = vadd.f32 %v16085_v10, %v6594_v48  ;;  %v16109_v36 = vadd.f32 %v16085_v10, %v15904_v22  ;;  %v16113_v7 = vadd.f32 %v15906_v46, %v15988_v58 }
 0x30a   : > { %v6587_v60 = vadd.f32 %v15920_v38, %v5880_v0  ;;  %v6593_v14 = vadd.f32 %v18460_v28, %v5886_v62  ;;  %v16119_v41 = vadd.f32 %v16085_v10, %v18461_v37  ;;  %v16122_v53 = vadd.f32 %v16085_v10, %v6590_v4  ;;  %v18463_v38 = vld [vmem:[#allocation108_spill] sm:$0xff]  ;;  %v18464_v0 = vld [vmem:[#allocation110_spill] sm:$0xff]  ;;  %v16156_v35 = vpop.f32.mrf.mxu1 }
 0x30b   : > { %v6390_v32 = vpop.f32.mrf.mxu0  ;;  %v6589_v39 = vadd.f32 %v18462_v20, %v5882_v6  ;;  %v16126_v22 = vadd.f32 %v16085_v10, %v6592_v51  ;;  %v16131_v46 = vadd.f32 %v16085_v10, %v6583_v61  ;;  %v16135_v58 = vadd.f32 %v16085_v10, %v18463_v38 }
 0x30c   : > { %v6591_v62 = vadd.f32 %v18464_v0, %v5884_v56  ;;  %v16139_v30 = vadd.f32 %v16085_v10, %v6585_v25  ;;  %v16142_v6 = vmul.f32 0.01, %v16104_v27  ;;  %v6793_v9 = vmul.f32 0.01, %v6665_v18 }
 0x30d   : > { %v13160_v24 = vpop.f32.mrf.mxu0  ;;  %v16145_v49 = vadd.f32 %v16085_v10, %v6587_v60  ;;  %vm6729_vm1 = vcmp.ge.f32.partialorder %v6665_v18, 0.0  ;;  %v6664_v52 = vadd.f32 %v16085_v10, %v6593_v14  ;;  %v16149_v56 = vmul.f32 0.01, %v16122_v53  ;;  %v18466_v60 = vld [vmem:[#allocation55_spill] sm:$0xff] }
 0x30e   : > { %v6608_v11 = vadd.f32 %v13160_v24, %v5901_v33  ;;  %v16152_v33 = vadd.f32 %v16085_v10, %v6589_v39  ;;  %vm6727_vm2 = vcmp.ge.f32.partialorder %v16126_v22, 0.0  ;;  %v6606_v4 = vadd.f32 %v13157_v44, %v5899_v13  ;;  %v16176_v39 = vpop.f32.mrf.mxu1 }
 0x30f   : > { %v6400_v45 = vpop.f32.mrf.mxu0  ;;  %v16162_v24 = vsel %vm6729_vm1, %v6665_v18, %v6793_v9  ;;  %vm6725_vm4 = vcmp.ge.f32.partialorder %v16122_v53, 0.0  ;;  %vm6728_vm5 = vcmp.ge.f32.partialorder %v6664_v52, 0.0  ;;  %v6605_v14 = vadd.f32 %v6390_v32, %v5898_v1 }
 0x310   : > { %v6607_v3 = vadd.f32 %v6400_v45, %v5900_v34  ;;  %v6679_v51 = vadd.f32 %v16085_v10, %v6608_v11  ;;  %18465 = vst [vmem:[#allocation53_spill] sm:$0xff] %v16162_v24  ;;  %v6792_v13 = vmul.f32 0.01, %v6664_v52  ;;  %v6677_v38 = vadd.f32 %v16085_v10, %v6606_v4 }
 0x311   : > { %v13163_v2 = vpop.f32.mrf.mxu0  ;;  %vm6723_vm9 = vcmp.ge.f32.partialorder %v16104_v27, 0.0  ;;  %v6676_v11 = vadd.f32 %v16085_v10, %v6605_v14  ;;  %vm6724_vm11 = vcmp.ge.f32.partialorder %v16152_v33, 0.0  ;;  %vm6722_vm14 = vcmp.ge.f32.partialorder %v16145_v49, 0.0 }
 0x312   : > { %v6610_v48 = vadd.f32 %v13163_v2, %v5903_v50  ;;  %v16159_v50 = vadd.f32 %v16085_v10, %v6591_v62  ;;  %v6678_v45 = vadd.f32 %v16085_v10, %v6607_v3  ;;  %v6807_v0 = vmul.f32 0.01, %v6679_v51 }
 0x313   : > { %v6410_v26 = vpop.f32.mrf.mxu0  ;;  %v6791_v62 = vmul.f32 0.01, %v16126_v22  ;;  %vm6743_vm8 = vcmp.ge.f32.partialorder %v6679_v51, 0.0  ;;  %v6805_v4 = vmul.f32 0.01, %v6677_v38  ;;  %vm6741_vm12 = vcmp.ge.f32.partialorder %v6677_v38, 0.0 }
 0x314   : > { %v6681_v17 = vadd.f32 %v16085_v10, %v6610_v48  ;;  %v6609_v34 = vadd.f32 %v6410_v26, %v5902_v47  ;;  %v6604_v47 = vadd.f32 %v16022_v5, %v16057_v23  ;;  %vm6726_vm7 = vcmp.ge.f32.partialorder %v16159_v50, 0.0  ;;  %v18470_v5 = vld [vmem:[#allocation79_spill] sm:$0xff] }
 0x315   : > { %v13166_v61 = vpop.f32.mrf.mxu0  ;;  %v6603_v23 = vadd.f32 %v16044_v54, %v16069_v15  ;;  %v6806_v2 = vmul.f32 0.01, %v6678_v45  ;;  %v6790_v3 = vmul.f32 0.01, %v16159_v50  ;;  %v16196_v26 = vsel %vm6728_vm5, %v6664_v52, %v6792_v13  ;;  %v16202_v54 = vpop.f32.mrf.mxu1  ;;  %v18476_v52 = vld [vmem:[#allocation80_spill] sm:$0xff] }
 0x316   : > { %vm6745_vm3 = vcmp.ge.f32.partialorder %v6681_v17, 0.0  ;;  %v6809_v25 = vmul.f32 0.01, %v6681_v17  ;;  %v16165_v28 = vadd.f32 %v13166_v61, %v18466_v60  ;;  %v6680_v37 = vadd.f32 %v16085_v10, %v6609_v34  ;;  %18472 = vst [vmem:[#allocation60_spill] sm:$0xff] %v16196_v26 }
 0x317   : > { %v6420_v44 = vpop.f32.mrf.mxu0  ;;  %vm6742_vm10 = vcmp.ge.f32.partialorder %v6678_v45, 0.0  ;;  %v6675_v15 = vadd.f32 %v16085_v10, %v6604_v47  ;;  %v16206_v34 = vsel %vm6743_vm8, %v6679_v51, %v6807_v0  ;;  %v6674_v51 = vadd.f32 %v16085_v10, %v6603_v23 }
 0x318   : > { %18467 = vst [vmem:[#allocation57_spill] sm:$0xff] %v16165_v28  ;;  %v16172_v18 = vsel %vm6745_vm3, %v6681_v17, %v6809_v25  ;;  %v16174_v20 = vadd.f32 %v6420_v44, %v5904_v8  ;;  %vm6744_vm6 = vcmp.ge.f32.partialorder %v6680_v37, 0.0  ;;  %v6808_v32 = vmul.f32 0.01, %v6680_v37  ;;  %18473 = vst [vmem:[#allocation61_spill] sm:$0xff] %v16206_v34  ;;  %v18550_v28 = vld [vmem:[#allocation13_spill] sm:$0xff] }
 0x319   : > { %18468 = vst [vmem:[#allocation56_spill] sm:$0xff] %v16172_v18  ;;  %v13169_v1 = vpop.f32.mrf.mxu0  ;;  %11488 = vmatprep.subr.mxu1 %v16172_v18  ;;  %11674 = vmatprep.subr.mxu0 %v16172_v18  ;;  %v6602_v17 = vadd.f32 %v15984_v19, %v16048_v43  ;;  %v16217_v43 = vsel %vm6727_vm2, %v16126_v22, %v6791_v62  ;;  %v6804_v60 = vmul.f32 0.01, %v6676_v11  ;;  %vm6740_vm13 = vcmp.ge.f32.partialorder %v6676_v11, 0.0 }
 0x31a   : > { %18469 = vst [vmem:[#allocation58_spill] sm:$0xff] %v16174_v20  ;;  %v16184_v8 = vadd.f32 %v13169_v1, %v18470_v5  ;;  %11489 = vmatpush3.msra.mxu1 %v16162_v24  ;;  %11675 = vmatpush3.msra.mxu0 %v16162_v24  ;;  %v16192_v9 = vsel %vm6744_vm6, %v6680_v37, %v6808_v32  ;;  %18475 = vst [vmem:[#allocation64_spill] sm:$0xff] %v16217_v43  ;;  %v6788_v37 = vmul.f32 0.01, %v16152_v33  ;;  %v18548_v20 = vld [vmem:[#allocation89_spill] sm:$0xff] }
 0x31b   : > { %18471 = vst [vmem:[#allocation59_spill] sm:$0xff] %v16192_v9  ;;  %v6430_v48 = vpop.f32.mrf.mxu0  ;;  %11490 = vmatprep.subr.mxu1 %v16192_v9  ;;  %11676 = vmatprep.subr.mxu0 %v16192_v9  ;;  %v16228_v14 = vsel %vm6742_vm10, %v6678_v45, %v6806_v2  ;;  %v16236_v44 = vsel %vm6726_vm7, %v16159_v50, %v6790_v3  ;;  %v18479_v45 = vld [vmem:[#allocation120_spill] sm:$0xff]  ;;  %v6803_v0 = vmul.f32 0.01, %v6675_v15  ;;  %vm6739_vm15 = vcmp.ge.f32.partialorder %v6675_v15, 0.0 }
 0x31c   : > { %v16209_v61 = vadd.f32 %v6430_v48, %v16088_v16  ;;  %11491 = vmatpush3.msra.mxu1 %v16196_v26  ;;  %11677 = vmatpush3.msra.mxu0 %v16196_v26  ;;  %v6601_v16 = vadd.f32 %v16001_v57, %v16051_v29  ;;  %18477 = vst [vmem:[#allocation15_spill] sm:$0xff] %v16228_v14  ;;  %18478 = vst [vmem:[#allocation16_spill] sm:$0xff] %v16236_v44  ;;  %v16243_v29 = vpop.f32.mrf.mxu1  ;;  %v6802_v23 = vmul.f32 0.01, %v6674_v51 }
 0x31d   : > { %v13172_v19 = vpop.f32.mrf.mxu0  ;;  %11492 = vmatprep.subr.mxu1 %v16206_v34  ;;  %11678 = vmatprep.subr.mxu0 %v16206_v34  ;;  %v6600_v13 = vadd.f32 %v18479_v45, %v16037_v12  ;;  %v6673_v47 = vadd.f32 %v16085_v10, %v6602_v17  ;;  %v16249_v32 = vsel %vm6741_vm12, %v6677_v38, %v6805_v4  ;;  %v18482_v12 = vld [vmem:[#allocation81_spill] sm:$0xff]  ;;  %v18483_v38 = vld [vmem:[#allocation48_spill] sm:$0xff]  ;;  %vm6738_vm1 = vcmp.ge.f32.partialorder %v6674_v51, 0.0 }
 0x31e   : > { %18474 = vst [vmem:[#allocation62_spill] sm:$0xff] %v16209_v61  ;;  %v16220_v25 = vadd.f32 %v13172_v19, %v18476_v52  ;;  %11493 = vmatpush3.msra.mxu1 %v16217_v43  ;;  %11679 = vmatpush3.msra.mxu0 %v16217_v43  ;;  %18480 = vst [vmem:[#allocation17_spill] sm:$0xff] %v16249_v32  ;;  %v16258_v50 = vsel %vm6725_vm4, %v16122_v53, %v16149_v56  ;;  %v6786_v56 = vmul.f32 0.01, %v16145_v49  ;;  %v18537_v43 = vld [vmem:[#allocation6_spill] sm:$0xff]  ;;  %v18552_v61 = vld [vmem:[#allocation111_spill] sm:$0xff] }
 0x31f   : > { %v6440_v22 = vpop.f32.mrf.mxu0  ;;  %11494 = vmatprep.subr.mxu1 %v16228_v14  ;;  %11680 = vmatprep.subr.mxu0 %v16228_v14  ;;  %18481 = vst [vmem:[#allocation18_spill] sm:$0xff] %v16258_v50  ;;  %v6599_v62 = vadd.f32 %v18483_v38, %v16040_v55  ;;  %v6672_v5 = vadd.f32 %v16085_v10, %v6601_v16  ;;  %v18486_v55 = vld [vmem:[#allocation117_spill] sm:$0xff]  ;;  %v6801_v4 = vmul.f32 0.01, %v6673_v47  ;;  %vm6721_vm2 = vcmp.ge.f32.partialorder %v16135_v58, 0.0 }
 0x320   : > { %v16239_v57 = vadd.f32 %v6440_v22, %v16091_v40  ;;  %11495 = vmatpush3.msra.mxu1 %v16236_v44  ;;  %11681 = vmatpush3.msra.mxu0 %v16236_v44  ;;  %v16269_v2 = vsel %vm6740_vm13, %v6676_v11, %v6804_v60  ;;  %v16277_v48 = vsel %vm6724_vm11, %v16152_v33, %v6788_v37  ;;  %v16283_v11 = vpop.f32.mrf.mxu1  ;;  %v6785_v33 = vmul.f32 0.01, %v16135_v58  ;;  %v18533_v44 = vld [vmem:[#allocation85_spill] sm:$0xff] }
 0x321   : > { %v13175_v40 = vpop.f32.mrf.mxu0  ;;  %11496 = vmatprep.subr.mxu1 %v16249_v32  ;;  %11682 = vmatprep.subr.mxu0 %v16249_v32  ;;  %18484 = vst [vmem:[#allocation19_spill] sm:$0xff] %v16269_v2  ;;  %18485 = vst [vmem:[#allocation21_spill] sm:$0xff] %v16277_v48  ;;  %v6598_v3 = vadd.f32 %v18486_v55, %v16029_v63  ;;  %v6671_v17 = vadd.f32 %v16085_v10, %v6600_v13  ;;  %vm6737_vm3 = vcmp.ge.f32.partialorder %v6673_v47, 0.0  ;;  %v18498_v55 = vld [vmem:[#allocation115_spill] sm:$0xff] }
 0x322   : > { %v16261_v1 = vadd.f32 %v13175_v40, %v18482_v12  ;;  %11497 = vmatpush3.msra.mxu1 %v16258_v50  ;;  %11683 = vmatpush3.msra.mxu0 %v16258_v50  ;;  %v16287_v19 = vsel %vm6739_vm15, %v6675_v15, %v6803_v0  ;;  %v16302_v16 = vsel %vm6723_vm9, %v16104_v27, %v16142_v6  ;;  %v18490_v15 = vld [vmem:[#allocation118_spill] sm:$0xff]  ;;  %v6800_v37 = vmul.f32 0.01, %v6672_v5  ;;  %v18532_v50 = vld [vmem:[#allocation4_spill] sm:$0xff] }
 0x323   : > { %v6450_v53 = vpop.f32.mrf.mxu0  ;;  %11498 = vmatprep.subr.mxu1 %v16269_v2  ;;  %11684 = vmatprep.subr.mxu0 %v16269_v2  ;;  %18487 = vst [vmem:[#allocation20_spill] sm:$0xff] %v16287_v19  ;;  %18488 = vst [vmem:[#allocation23_spill] sm:$0xff] %v16302_v16  ;;  %v6670_v22 = vadd.f32 %v16085_v10, %v6599_v62  ;;  %v16310_v45 = vsel %vm6738_vm1, %v6674_v51, %v6802_v23  ;;  %vm6720_vm4 = vcmp.ge.f32.partialorder %v16139_v30, 0.0  ;;  %v16325_v51 = vpop.f32.mrf.mxu1  ;;  %v18493_v0 = vld [vmem:[#allocation50_spill] sm:$0xff]  ;;  %v18531_v2 = vld [vmem:[#allocation5_spill] sm:$0xff] }
 0x324   : > { %v16290_v52 = vadd.f32 %v6450_v53, %v16094_v31  ;;  %11499 = vmatpush3.msra.mxu1 %v16277_v48  ;;  %11685 = vmatpush3.msra.mxu0 %v16277_v48  ;;  %v18489_v31 = vld [vmem:[#allocation51_spill] sm:$0xff]  ;;  %18491 = vst [vmem:[#allocation22_spill] sm:$0xff] %v16310_v45  ;;  %v6784_v6 = vmul.f32 0.01, %v16139_v30  ;;  %v16321_v13 = vsel %vm6722_vm14, %v16145_v49, %v6786_v56  ;;  %vm6736_vm5 = vcmp.ge.f32.partialorder %v6672_v5, 0.0  ;;  %v18494_v40 = vld [vmem:[#allocation114_spill] sm:$0xff] }
 0x325   : > { %v16294_v63 = vpop.f32.mrf.mxu0  ;;  %11500 = vmatprep.subr.mxu1 %v16287_v19  ;;  %11686 = vmatprep.subr.mxu0 %v16287_v19  ;;  %v6597_v60 = vadd.f32 %v18490_v15, %v18489_v31  ;;  %18492 = vst [vmem:[#allocation24_spill] sm:$0xff] %v16321_v13  ;;  %v6596_v12 = vadd.f32 %v18494_v40, %v18493_v0  ;;  %v6799_v62 = vmul.f32 0.01, %v6671_v17  ;;  %vm6719_vm6 = vcmp.ge.f32.partialorder %v16119_v41, 0.0  ;;  %v18529_v48 = vld [vmem:[#allocation71_spill] sm:$0xff] }
 0x326   : > { %11501 = vmatpush3.msra.mxu1 %v16302_v16  ;;  %11687 = vmatpush3.msra.mxu0 %v16302_v16  ;;  %v6669_v38 = vadd.f32 %v16085_v10, %v6598_v3  ;;  %v16331_v23 = vsel %vm6737_vm3, %v6673_v47, %v6801_v4  ;;  %v6783_v53 = vmul.f32 0.01, %v16119_v41  ;;  %v16342_v56 = vsel %vm6721_vm2, %v16135_v58, %v6785_v33  ;;  %v18497_v47 = vld [vmem:[#allocation52_spill] sm:$0xff]  ;;  %v18528_v16 = vld [vmem:[#allocation67_spill] sm:$0xff] }
 0x327   : > { %v16314_v27 = vpop.f32.mrf.mxu0  ;;  %11502 = vmatprep.subr.mxu1 %v16310_v45  ;;  %11688 = vmatprep.subr.mxu0 %v16310_v45  ;;  %18495 = vst [vmem:[#allocation26_spill] sm:$0xff] %v16331_v23  ;;  %18496 = vst [vmem:[#allocation25_spill] sm:$0xff] %v16342_v56  ;;  %vm6735_vm7 = vcmp.ge.f32.partialorder %v6671_v17, 0.0  ;;  %v6595_v3 = vadd.f32 %v18498_v55, %v18497_v47  ;;  %v6668_v4 = vadd.f32 %v16085_v10, %v6597_v60  ;;  %v18527_v45 = vld [vmem:[#allocation69_spill] sm:$0xff] }
 0x328   : > { %11503 = vmatpush3.msra.mxu1 %v16321_v13  ;;  %11689 = vmatpush3.msra.mxu0 %v16321_v13  ;;  %v6798_v31 = vmul.f32 0.01, %v6670_v22  ;;  %v16350_v15 = vsel %vm6736_vm5, %v6672_v5, %v6800_v37  ;;  %v6652_v33 = vadd.f32 %v16085_v10, %v16113_v7  ;;  %v6782_v0 = vmul.f32 0.01, %v16131_v46  ;;  %v16366_v5 = vpop.f32.mrf.mxu1  ;;  %v18525_v13 = vld [vmem:[#allocation83_spill] sm:$0xff] }
 0x329   : > { %v16335_v49 = vpop.f32.mrf.mxu0  ;;  %11504 = vmatprep.subr.mxu1 %v16331_v23  ;;  %11690 = vmatprep.subr.mxu0 %v16331_v23  ;;  %18499 = vst [vmem:[#allocation27_spill] sm:$0xff] %v16350_v15  ;;  %v16362_v40 = vsel %vm6720_vm4, %v16139_v30, %v6784_v6  ;;  %vm6734_vm8 = vcmp.ge.f32.partialorder %v6670_v22, 0.0  ;;  %vm6718_vm9 = vcmp.ge.f32.partialorder %v16131_v46, 0.0  ;;  %v6667_v60 = vadd.f32 %v16085_v10, %v6596_v12  ;;  %v18502_v6 = vld [vmem:[#allocation106_spill] sm:$0xff] }
 0x32a   : > { %11505 = vmatpush3.msra.mxu1 %v16342_v56  ;;  %11691 = vmatpush3.msra.mxu0 %v16342_v56  ;;  %18500 = vst [vmem:[#allocation30_spill] sm:$0xff] %v16362_v40  ;;  %v6797_v37 = vmul.f32 0.01, %v6669_v38  ;;  %v16371_v7 = vsel %vm6735_vm7, %v6671_v17, %v6799_v62  ;;  %v6651_v47 = vadd.f32 %v16085_v10, %v18502_v6  ;;  %v6781_v55 = vmul.f32 0.01, %v16109_v36  ;;  %v18524_v56 = vld [vmem:[#allocation66_spill] sm:$0xff] }
 0x32b   : > { %v16354_v58 = vpop.f32.mrf.mxu0  ;;  %11506 = vmatprep.subr.mxu1 %v16350_v15  ;;  %11692 = vmatprep.subr.mxu0 %v16350_v15  ;;  %18501 = vst [vmem:[#allocation28_spill] sm:$0xff] %v16371_v7  ;;  %v16383_v15 = vsel %vm6719_vm6, %v16119_v41, %v6783_v53  ;;  %vm6733_vm10 = vcmp.ge.f32.partialorder %v6669_v38, 0.0  ;;  %vm6717_vm11 = vcmp.ge.f32.partialorder %v16109_v36, 0.0  ;;  %v6666_v17 = vadd.f32 %v16085_v10, %v6595_v3 }
 0x32c   : > { %11507 = vmatpush3.msra.mxu1 %v16362_v40  ;;  %11693 = vmatpush3.msra.mxu0 %v16362_v40  ;;  %18503 = vst [vmem:[#allocation29_spill] sm:$0xff] %v16383_v15  ;;  %v6796_v12 = vmul.f32 0.01, %v6668_v4  ;;  %v16390_v62 = vsel %vm6734_vm8, %v6670_v22, %v6798_v31  ;;  %v6650_v41 = vadd.f32 %v16085_v10, %v16100_v21  ;;  %v6780_v53 = vmul.f32 0.01, %v6652_v33  ;;  %v16405_v22 = vpop.f32.mrf.mxu1  ;;  %v18523_v40 = vld [vmem:[#allocation68_spill] sm:$0xff] }
 0x32d   : > { %v16375_v30 = vpop.f32.mrf.mxu0  ;;  %11508 = vmatprep.subr.mxu1 %v16371_v7  ;;  %11694 = vmatprep.subr.mxu0 %v16371_v7  ;;  %18504 = vst [vmem:[#allocation37_spill] sm:$0xff] %v16390_v62  ;;  %v16401_v7 = vsel %vm6718_vm9, %v16131_v46, %v6782_v0  ;;  %vm6732_vm12 = vcmp.ge.f32.partialorder %v6668_v4, 0.0  ;;  %vm6716_vm13 = vcmp.ge.f32.partialorder %v6652_v33, 0.0  ;;  %v6795_v3 = vmul.f32 0.01, %v6667_v60 }
 0x32e   : > { %11509 = vmatpush3.msra.mxu1 %v16383_v15  ;;  %11695 = vmatpush3.msra.mxu0 %v16383_v15  ;;  %18505 = vst [vmem:[#allocation40_spill] sm:$0xff] %v16401_v7  ;;  %v16408_v31 = vsel %vm6733_vm10, %v6669_v38, %v6797_v37  ;;  %v6779_v46 = vmul.f32 0.01, %v6651_v47  ;;  %v16417_v0 = vsel %vm6717_vm11, %v16109_v36, %v6781_v55  ;;  %vm6731_vm14 = vcmp.ge.f32.partialorder %v6667_v60, 0.0  ;;  %v6919_v15 = vld [vmem:[%s17856_s7 + $0x68] sm:$0xff] }
 0x32f   : > { %v16394_v6 = vpop.f32.mrf.mxu0  ;;  %11510 = vmatprep.subr.mxu1 %v16390_v62  ;;  %11696 = vmatprep.subr.mxu0 %v16390_v62  ;;  %18506 = vst [vmem:[#allocation77_spill] sm:$0xff] %v16408_v31  ;;  %18507 = vst [vmem:[#allocation31_spill] sm:$0xff] %v16417_v0  ;;  %vm6715_vm15 = vcmp.ge.f32.partialorder %v6651_v47, 0.0  ;;  %v6794_v38 = vmul.f32 0.01, %v6666_v17  ;;  %v16422_v37 = vsel %vm6732_vm12, %v6668_v4, %v6796_v12  ;;  %vm6730_vm1 = vcmp.ge.f32.partialorder %v6666_v17, 0.0  ;;  %v16440_v4 = vpop.f32.mrf.mxu1 }
 0x330   : > { %11511 = vmatpush3.msra.mxu1 %v16401_v7  ;;  %11697 = vmatpush3.msra.mxu0 %v16401_v7  ;;  %18508 = vst [vmem:[#allocation32_spill] sm:$0xff] %v16422_v37  ;;  %v6778_v62 = vmul.f32 0.01, %v6650_v41  ;;  %v16429_v36 = vsel %vm6716_vm13, %v6652_v33, %v6780_v53  ;;  %vm6714_vm2 = vcmp.ge.f32.partialorder %v6650_v41, 0.0  ;;  %v16443_v55 = vsel %vm6731_vm14, %v6667_v60, %v6795_v3  ;;  %v10764_v3 = vld [vmem:[%s16438_s24 + $0x10] sm:$0xff] }
 0x331   : > { %v16412_v21 = vpop.f32.mrf.mxu0  ;;  %11512 = vmatprep.subr.mxu1 %v16408_v31  ;;  %11698 = vmatprep.subr.mxu0 %v16408_v31  ;;  %18509 = vst [vmem:[#allocation43_spill] sm:$0xff] %v16429_v36  ;;  %18510 = vst [vmem:[#allocation45_spill] sm:$0xff] %v16443_v55  ;;  %v16450_v12 = vsel %vm6715_vm15, %v6651_v47, %v6779_v46  ;;  %v16454_v53 = vsel %vm6730_vm1, %v6666_v17, %v6794_v38  ;;  %v6906_v47 = vld [vmem:[%s17856_s7] sm:$0xff]  ;;  %v16471_v17 = vpop.f32.mrf.mxu1 }
 0x332   : > { %11513 = vmatpush3.msra.mxu1 %v16417_v0  ;;  %11699 = vmatpush3.msra.mxu0 %v16417_v0  ;;  %18512 = vst [vmem:[#allocation78_spill] sm:$0xff] %v16450_v12  ;;  %18513 = vst [vmem:[#allocation33_spill] sm:$0xff] %v16454_v53  ;;  %v6910_v38 = vld [vmem:[%s17856_s7 + $0x20] sm:$0xff]  ;;  %v4499_v23 = vadd.f32 %v18524_v56, %v18523_v40  ;;  %v4501_v19 = vadd.f32 %v18528_v16, %v18527_v45  ;;  %v18535_v40 = vld [vmem:[#allocation72_spill] sm:$0xff] }
 0x333   : > { %v16426_v7 = vpop.f32.mrf.mxu0  ;;  %11514 = vmatprep.subr.mxu1 %v16422_v37  ;;  %11700 = vmatprep.subr.mxu0 %v16422_v37  ;;  %v16464_v37 = vsel %vm6714_vm2, %v6650_v41, %v6778_v62  ;;  %v6911_v62 = vld [vmem:[%s17856_s7 + $0x28] sm:$0xff]  ;;  %v4505_v32 = vadd.f32 %v18532_v50, %v18531_v2  ;;  %v6918_v56 = vld [vmem:[%s17856_s7 + $0x60] sm:$0xff] }
 0x334   : > { %11515 = vmatpush3.msra.mxu1 %v16429_v36  ;;  %11701 = vmatpush3.msra.mxu0 %v16429_v36  ;;  %v10748_v36 = vld [vmem:[%s17856_s7 + $0x100] sm:$0xff]  ;;  %18515 = vst [vmem:[#allocation35_spill] sm:$0xff] %v16464_v37  ;;  %v5207_v14 = vadd.f32 %v18533_v44, %v4499_v23  ;;  %v18538_v16 = vld [vmem:[#allocation7_spill] sm:$0xff]  ;;  %v6909_v44 = vld [vmem:[%s17856_s7 + $0x18] sm:$0xff] }
 0x335   : > { %v16447_v33 = vpop.f32.mrf.mxu0  ;;  %11516 = vmatprep.subr.mxu1 %v16443_v55  ;;  %11702 = vmatprep.subr.mxu0 %v16443_v55  ;;  %v18539_v45 = vld [vmem:[#allocation75_spill] sm:$0xff]  ;;  %v18543_v23 = vld [vmem:[#allocation10_spill] sm:$0xff] }
 0x336   : > { %18511 = vst [vmem:[#allocation34_spill] sm:$0xff] %v16447_v33  ;;  %11517 = vmatpush3.msra.mxu1 %v16450_v12  ;;  %11703 = vmatpush3.msra.mxu0 %v16450_v12  ;;  %v6915_v12 = vld [vmem:[%s17856_s7 + $0x48] sm:$0xff]  ;;  %v4511_v26 = vadd.f32 %v18539_v45, %v18538_v16  ;;  %v18549_v45 = vld [vmem:[#allocation14_spill] sm:$0xff]  ;;  %v18553_v33 = vld [vmem:[#allocation113_spill] sm:$0xff] }
 0x337   : > { %v16458_v60 = vpop.f32.mrf.mxu0  ;;  %11518 = vmatprep.subr.mxu1 %v16454_v53  ;;  %11704 = vmatprep.subr.mxu0 %v16454_v53 }
 0x338   : > { %18514 = vst [vmem:[#allocation2_spill] sm:$0xff] %v16458_v60  ;;  %11519 = vmatpush3.msra.mxu1 %v16464_v37  ;;  %11705 = vmatpush3.msra.mxu0 %v16464_v37  ;;  %v16486_v37 = vpop.f32.mrf.mxu1 }
 0x339   : > { %v16475_v46 = vpop.f32.mrf.mxu0  ;;  %13228 = vmatprep.subr.mxu0 %v10764_v3  ;;  %7558 = vmatmul.mubr.f32.vlgmr.msra.gmra.mxu0 %v10748_v36 }
 0x33a   : > { %18516 = vst [vmem:[#allocation36_spill] sm:$0xff] %v16475_v46  ;;  %13229 = vmatpush3.msra.mxu0 %v10764_v3  ;;  %6987 = vmatmul.mubr.f32.vlgmr.msra.gmra.mxu1 %v6906_v47  ;;  %v6914_v3 = vld [vmem:[%s17856_s7 + $0x40] sm:$0xff]  ;;  %v18520_v47 = vld [vmem:[#allocation65_spill] sm:$0xff]  ;;  %v13110_v0 = vpop.f32.mrf.mxu1  ;;  %v18554_v46 = vld [vmem:[#allocation91_spill] sm:$0xff] }
 0x33b   : > { %v16480_v41 = vpop.f32.mrf.mxu0  ;;  %11767 = vmatprep.subr.mxu0 %v16172_v18  ;;  %6991 = vmatprep.mubr.f32.mxu1 %v6911_v62  ;;  %v18521_v62 = vld [vmem:[#allocation63_spill] sm:$0xff] }
 0x33c   : > { %18517 = vst [vmem:[#allocation38_spill] sm:$0xff] %v16480_v41  ;;  %v4497_v55 = vadd.f32 %v18521_v62, %v18520_v47  ;;  %v18530_v47 = vld [vmem:[#allocation70_spill] sm:$0xff]  ;;  %v5853_v50 = vpop.f32.mrf.mxu1 }
 0x33d   : > { %v16488_v53 = vpop.f32.mrf.mxu0  ;;  %v4503_v62 = vadd.f32 %v18530_v47, %v18529_v48  ;;  %v18540_v48 = vld [vmem:[#allocation9_spill] sm:$0xff]  ;;  %v18541_v47 = vld [vmem:[#allocation76_spill] sm:$0xff] }
 0x33e   : > { %18518 = vst [vmem:[#allocation3_spill] sm:$0xff] %v16488_v53  ;;  %6992 = vmatmul.mubr.f32.gmra.mxu1 %v6910_v38  ;;  %v5205_v38 = vadd.f32 %v18525_v13, %v4497_v55  ;;  %v18534_v13 = vld [vmem:[#allocation73_spill] sm:$0xff]  ;;  %v4513_v9 = vadd.f32 %v18541_v47, %v18540_v48  ;;  %v4519_v48 = vadd.f32 %v18550_v28, %v18549_v45  ;;  %v18551_v47 = vld [vmem:[#allocation82_spill] sm:$0xff]  ;;  %v18562_v45 = vld [vmem:[#allocation47_spill] sm:$0xff] }
 0x33f   : > { %v16493_v36 = vpop.f32.mrf.mxu0  ;;  %6996 = vmatprep.mubr.f32.mxu1 %v6915_v12  ;;  %v4507_v55 = vadd.f32 %v18535_v40, %v18534_v13  ;;  %v18545_v13 = vld [vmem:[#allocation12_spill] sm:$0xff]  ;;  %v18546_v40 = vld [vmem:[#allocation11_spill] sm:$0xff]  ;;  %v5211_v16 = vadd.f32 %v18548_v20, %v4503_v62  ;;  %v5913_v60 = vadd.f32 %v18552_v61, %v18551_v47  ;;  %v18561_v28 = vld [vmem:[#allocation86_spill] sm:$0xff] }
 0x340   : > { %18519 = vst [vmem:[#allocation39_spill] sm:$0xff] %v16493_v36  ;;  %v4517_v18 = vadd.f32 %v18546_v40, %v18545_v13  ;;  %v5912_v41 = vadd.f32 %v18553_v33, %v5205_v38  ;;  %v5213_v36 = vadd.f32 %v18554_v46, %v4505_v32  ;;  %v18558_v40 = vld [vmem:[#allocation119_spill] sm:$0xff]  ;;  %v5917_v61 = vadd.f32 %v18562_v45, %v18561_v28  ;;  %v18563_v47 = vld [vmem:[#allocation88_spill] sm:$0xff]  ;;  %v18564_v33 = vld [vmem:[#allocation54_spill] sm:$0xff] }
 0x341   : > { %v16500_v31 = vpop.f32.mrf.mxu0  ;;  %v18560_v62 = vld [vmem:[#allocation95_spill] sm:$0xff]  ;;  %v5919_v38 = vadd.f32 %v18564_v33, %v18563_v47  ;;  %v18565_v32 = vld [vmem:[#allocation97_spill] sm:$0xff]  ;;  %v18576_v33 = vld [vmem:[#allocation100_spill] sm:$0xff] }
 0x342   : > { %18522 = vst [vmem:[#allocation42_spill] sm:$0xff] %v16500_v31  ;;  %6997 = vmatmul.mubr.f32.gmra.mxu1 %v6914_v3  ;;  %v18536_v3 = vld [vmem:[#allocation74_spill] sm:$0xff]  ;;  %v5219_v46 = vadd.f32 %v18565_v32, %v4511_v26  ;;  %v18566_v31 = vld [vmem:[#allocation99_spill] sm:$0xff]  ;;  %v16567_v28 = vadd.f32 %v16156_v35, %v5213_v36  ;;  %v18571_v26 = vld [vmem:[#allocation92_spill] sm:$0xff] }
 0x343   : > { %v16508_v12 = vpop.f32.mrf.mxu0  ;;  %7001 = vmatprep.mubr.f32.mxu1 %v6919_v15  ;;  %v4509_v34 = vadd.f32 %v18537_v43, %v18536_v3  ;;  %v18544_v15 = vld [vmem:[#allocation8_spill] sm:$0xff]  ;;  %v18547_v43 = vld [vmem:[#allocation87_spill] sm:$0xff] }
 0x344   : > { %18526 = vst [vmem:[#allocation41_spill] sm:$0xff] %v16508_v12  ;;  %v4515_v24 = vadd.f32 %v18544_v15, %v18543_v23  ;;  %v5209_v3 = vadd.f32 %v18547_v43, %v4501_v19  ;;  %v18556_v23 = vld [vmem:[#allocation84_spill] sm:$0xff]  ;;  %v5914_v19 = vadd.f32 %v18558_v40, %v5207_v14  ;;  %v18559_v43 = vld [vmem:[#allocation93_spill] sm:$0xff]  ;;  %v5918_v14 = vadd.f32 %v16096_v42, %v5211_v16 }
 0x345   : > { %v16528_v2 = vpop.f32.mrf.mxu0  ;;  %v18557_v15 = vld [vmem:[#allocation116_spill] sm:$0xff]  ;;  %v5215_v20 = vadd.f32 %v18559_v43, %v4507_v55  ;;  %v5217_v12 = vadd.f32 %v18560_v62, %v4509_v34  ;;  %v18568_v55 = vld [vmem:[#allocation101_spill] sm:$0xff]  ;;  %v18569_v34 = vld [vmem:[#allocation103_spill] sm:$0xff] }
 0x346   : > { %18542 = vst [vmem:[#allocation44_spill] sm:$0xff] %v16528_v2  ;;  %7002 = vmatmul.mubr.f32.gmra.mxu1 %v6918_v56  ;;  %v5915_v13 = vadd.f32 %v18557_v15, %v18556_v23  ;;  %v5221_v56 = vadd.f32 %v18566_v31, %v4513_v9  ;;  %v18567_v23 = vld [vmem:[#allocation49_spill] sm:$0xff]  ;;  %v5223_v40 = vadd.f32 %v18568_v55, %v4515_v24  ;;  %v18570_v43 = vld [vmem:[#allocation90_spill] sm:$0xff]  ;;  %v18574_v36 = vld [vmem:[#allocation96_spill] sm:$0xff] }
 0x347   : > { %v16545_v53 = vpop.f32.mrf.mxu0  ;;  %7071 = vmatprep.mubr.f32.mxu1 %v6909_v44  ;;  %v5916_v15 = vadd.f32 %v18567_v23, %v5209_v3  ;;  %v5225_v44 = vadd.f32 %v18569_v34, %v4517_v18  ;;  %v16564_v62 = vadd.f32 %v16128_v59, %v18570_v43  ;;  %v16571_v9 = vadd.f32 %v16176_v39, %v18571_v26  ;;  %v18572_v24 = vld [vmem:[#allocation94_spill] sm:$0xff]  ;;  %v18573_v16 = vld [vmem:[#allocation105_spill] sm:$0xff] }
 0x348   : > { %18555 = vst [vmem:[#allocation46_spill] sm:$0xff] %v16545_v53  ;;  %v13113_v53 = vpop.f32.mrf.mxu1  ;;  %v6626_v31 = vadd.f32 %v16412_v21, %v5919_v38  ;;  %v16575_v42 = vadd.f32 %v16202_v54, %v5215_v20  ;;  %v16579_v18 = vadd.f32 %v16243_v29, %v18572_v24  ;;  %v16582_v59 = vadd.f32 %v16283_v11, %v5217_v12  ;;  %v18575_v21 = vld [vmem:[#allocation98_spill] sm:$0xff] }
 0x349   : > { %v13205_v2 = vpop.f32.mrf.mxu0  ;;  %v5227_v35 = vadd.f32 %v18573_v16, %v4519_v48  ;;  %v16587_v45 = vadd.f32 %v16325_v51, %v18574_v36  ;;  %v16590_v39 = vadd.f32 %v16366_v5, %v5219_v46  ;;  %v5929_v54 = vadd.f32 %v16405_v22, %v18575_v21  ;;  %v18577_v48 = vld [vmem:[#allocation102_spill] sm:$0xff]  ;;  %v18578_v51 = vld [vmem:[#allocation104_spill] sm:$0xff] }
 0x34a   : > { %v5928_v20 = vadd.f32 %v16440_v4, %v5221_v56  ;;  %v5863_v47 = vpop.f32.mrf.mxu1  ;;  %v5931_v11 = vadd.f32 %v16471_v17, %v18576_v33  ;;  %v5930_v12 = vadd.f32 %v16486_v37, %v5223_v40  ;;  %v5933_v38 = vadd.f32 %v13110_v0, %v18577_v48 }
 0x34b   : > { %v6550_v3 = vpop.f32.mrf.mxu0  ;;  %v5932_v32 = vadd.f32 %v5853_v50, %v5225_v44  ;;  %v5935_v23 = vadd.f32 %v13113_v53, %v18578_v51  ;;  %v6620_v5 = vadd.f32 %v16294_v63, %v5913_v60  ;;  %v6619_v46 = vadd.f32 %v16314_v27, %v5912_v41  ;;  %v18582_v51 = vld [vmem:[#allocation42_spill] sm:$0xff] }
 0x34c   : > { %v6697_v22 = vadd.f32 %v16085_v10, %v6626_v31  ;;  %v5934_v4 = vadd.f32 %v5863_v47, %v5227_v35  ;;  %v16605_v56 = vadd.f32 %v16085_v10, %v16184_v8  ;;  %v6622_v17 = vadd.f32 %v16335_v49, %v5915_v13 }
 0x34d   : > { %v13208_v29 = vpop.f32.mrf.mxu0  ;;  %v6625_v37 = vadd.f32 %v16426_v7, %v5918_v14  ;;  %v16611_v0 = vadd.f32 %v16085_v10, %v16220_v25  ;;  %v16615_v63 = vadd.f32 %v16085_v10, %v16239_v57  ;;  %v16619_v27 = vadd.f32 %v16085_v10, %v16261_v1 }
 0x34e   : > { %v6640_v53 = vadd.f32 %v13208_v29, %v5933_v38  ;;  %v16623_v8 = vadd.f32 %v16085_v10, %v16290_v52  ;;  %v6624_v49 = vadd.f32 %v16375_v30, %v5917_v61  ;;  %v6623_v7 = vadd.f32 %v16394_v6, %v5916_v15 }
 0x34f   : > { %v6560_v55 = vpop.f32.mrf.mxu0  ;;  %v16628_v41 = vadd.f32 %v16085_v10, %v6620_v5  ;;  %v16631_v57 = vadd.f32 %v16085_v10, %v6619_v46  ;;  %v6825_v50 = vmul.f32 0.01, %v6697_v22  ;;  %v16634_v14 = vadd.f32 %v16085_v10, %v6622_v17  ;;  %v18581_v33 = vld [vmem:[#allocation46_spill] sm:$0xff] }
 0x350   : > { %v6639_v1 = vadd.f32 %v6560_v55, %v5932_v32  ;;  %vm6761_vm3 = vcmp.ge.f32.partialorder %v6697_v22, 0.0  ;;  %v6696_v52 = vadd.f32 %v16085_v10, %v6625_v37  ;;  %v6621_v6 = vadd.f32 %v16354_v58, %v5914_v19  ;;  %v18579_v58 = vld [vmem:[#allocation44_spill] sm:$0xff] }
 0x351   : > { %v13211_v60 = vpop.f32.mrf.mxu0  ;;  %v6638_v61 = vadd.f32 %v13205_v2, %v5931_v11  ;;  %v6711_v15 = vadd.f32 %v16085_v10, %v6640_v53  ;;  %v6695_v34 = vadd.f32 %v16085_v10, %v6624_v49  ;;  %v6694_v44 = vadd.f32 %v16085_v10, %v6623_v7  ;;  %v18585_v7 = vld [vmem:[#allocation3_spill] sm:$0xff] }
 0x352   : > { %v6642_v25 = vadd.f32 %v13211_v60, %v5935_v23  ;;  %v16642_v26 = vsel %vm6761_vm3, %v6697_v22, %v6825_v50  ;;  %v6637_v31 = vadd.f32 %v6550_v3, %v5930_v12  ;;  %v6710_v24 = vadd.f32 %v16085_v10, %v6639_v1 }
 0x353   : > { %v6570_v13 = vpop.f32.mrf.mxu0  ;;  %vm6760_vm5 = vcmp.ge.f32.partialorder %v6696_v52, 0.0  ;;  %v6824_v35 = vmul.f32 0.01, %v6696_v52  ;;  %v6636_v2 = vadd.f32 %v18579_v58, %v5929_v54  ;;  %v6709_v36 = vadd.f32 %v16085_v10, %v6638_v61 }
 0x354   : > { %v6713_v30 = vadd.f32 %v16085_v10, %v6642_v25  ;;  %v6641_v40 = vadd.f32 %v6570_v13, %v5934_v4  ;;  %v6839_v21 = vmul.f32 0.01, %v6711_v15  ;;  %v6692_v29 = vadd.f32 %v16085_v10, %v6621_v6  ;;  %v18583_v4 = vld [vmem:[#allocation41_spill] sm:$0xff] }
 0x355   : > { %vm6759_vm7 = vcmp.ge.f32.partialorder %v6695_v34, 0.0  ;;  %v6823_v3 = vmul.f32 0.01, %v6695_v34  ;;  %vm6775_vm8 = vcmp.ge.f32.partialorder %v6711_v15, 0.0  ;;  %v6635_v11 = vadd.f32 %v18581_v33, %v5928_v20 }
 0x356   : > { %vm6777_vm4 = vcmp.ge.f32.partialorder %v6713_v30, 0.0  ;;  %v6841_v43 = vmul.f32 0.01, %v6713_v30  ;;  %v6712_v16 = vadd.f32 %v16085_v10, %v6641_v40  ;;  %v6708_v54 = vadd.f32 %v16085_v10, %v6637_v31 }
 0x357   : > { %v6838_v12 = vmul.f32 0.01, %v6710_v24  ;;  %vm6758_vm9 = vcmp.ge.f32.partialorder %v6694_v44, 0.0  ;;  %v6822_v38 = vmul.f32 0.01, %v6694_v44  ;;  %v16658_v32 = vsel %vm6760_vm5, %v6696_v52, %v6824_v35 }
 0x358   : > { %v16647_v19 = vsel %vm6777_vm4, %v6713_v30, %v6841_v43  ;;  %vm6776_vm6 = vcmp.ge.f32.partialorder %v6712_v16, 0.0  ;;  %v6840_v47 = vmul.f32 0.01, %v6712_v16  ;;  %vm6774_vm10 = vcmp.ge.f32.partialorder %v6710_v24, 0.0 }
 0x359   : > { %18580 = vst [vmem:[#allocation112_spill] sm:$0xff] %v16647_v19  ;;  %11532 = vmatprep.subr.mxu1 %v16647_v19  ;;  %v6634_v23 = vadd.f32 %v18582_v51, %v16587_v45  ;;  %v6707_v5 = vadd.f32 %v16085_v10, %v6636_v2  ;;  %v6837_v46 = vmul.f32 0.01, %v6709_v36  ;;  %v16664_v20 = vsel %vm6775_vm8, %v6711_v15, %v6839_v21 }
 0x35a   : > { %11533 = vmatpush3.msra.mxu1 %v16642_v26  ;;  %v16655_v48 = vsel %vm6776_vm6, %v6712_v16, %v6840_v47  ;;  %vm6757_vm11 = vcmp.ge.f32.partialorder %v16634_v14, 0.0  ;;  %v6821_v22 = vmul.f32 0.01, %v16634_v14  ;;  %v16670_v55 = vsel %vm6759_vm7, %v6695_v34, %v6823_v3  ;;  %v18591_v34 = vld [vmem:[#allocation36_spill] sm:$0xff] }
 0x35b   : > { %11534 = vmatprep.subr.mxu1 %v16655_v48  ;;  %vm6773_vm12 = vcmp.ge.f32.partialorder %v6709_v36, 0.0  ;;  %v6633_v45 = vadd.f32 %v18583_v4, %v16590_v39  ;;  %v6706_v17 = vadd.f32 %v16085_v10, %v6635_v11  ;;  %v6836_v37 = vmul.f32 0.01, %v6708_v54 }
 0x35c   : > { %11535 = vmatpush3.msra.mxu1 %v16658_v32  ;;  %v16676_v53 = vsel %vm6774_vm10, %v6710_v24, %v6838_v12  ;;  %vm6756_vm13 = vcmp.ge.f32.partialorder %v6692_v29, 0.0  ;;  %v6820_v60 = vmul.f32 0.01, %v6692_v29  ;;  %v16680_v49 = vsel %vm6758_vm9, %v6694_v44, %v6822_v38 }
 0x35d   : > { %11536 = vmatprep.subr.mxu1 %v16664_v20  ;;  %18584 = vst [vmem:[#allocation107_spill] sm:$0xff] %v16680_v49  ;;  %vm6772_vm14 = vcmp.ge.f32.partialorder %v6708_v54, 0.0  ;;  %v6632_v25 = vadd.f32 %v18585_v7, %v16579_v18  ;;  %v6705_v39 = vadd.f32 %v16085_v10, %v6634_v23  ;;  %v6835_v50 = vmul.f32 0.01, %v6707_v5  ;;  %v18588_v18 = vld [vmem:[#allocation39_spill] sm:$0xff]  ;;  %v18602_v23 = vld [vmem:[#allocation62_spill] sm:$0xff] }
 0x35e   : > { %11537 = vmatpush3.msra.mxu1 %v16670_v55  ;;  %v16686_v1 = vsel %vm6773_vm12, %v6709_v36, %v6837_v46  ;;  %vm6755_vm15 = vcmp.ge.f32.partialorder %v16628_v41, 0.0  ;;  %v6819_v13 = vmul.f32 0.01, %v16628_v41  ;;  %v16694_v52 = vsel %vm6757_vm11, %v16634_v14, %v6821_v22 }
 0x35f   : > { %11538 = vmatprep.subr.mxu1 %v16676_v53  ;;  %18586 = vst [vmem:[#allocation109_spill] sm:$0xff] %v16686_v1  ;;  %18587 = vst [vmem:[#allocation108_spill] sm:$0xff] %v16694_v52  ;;  %vm6771_vm1 = vcmp.ge.f32.partialorder %v6707_v5, 0.0  ;;  %v6631_v30 = vadd.f32 %v18588_v18, %v16582_v59  ;;  %v6704_v6 = vadd.f32 %v16085_v10, %v6633_v45  ;;  %v6834_v61 = vmul.f32 0.01, %v6706_v17  ;;  %v18605_v45 = vld [vmem:[#allocation57_spill] sm:$0xff] }
 0x360   : > { %11539 = vmatpush3.msra.mxu1 %v16680_v49  ;;  %v16700_v15 = vsel %vm6772_vm14, %v6708_v54, %v6836_v37  ;;  %vm6754_vm2 = vcmp.ge.f32.partialorder %v16631_v57, 0.0  ;;  %v6818_v40 = vmul.f32 0.01, %v16631_v57  ;;  %v16706_v14 = vsel %vm6756_vm13, %v6692_v29, %v6820_v60 }
 0x361   : > { %11540 = vmatprep.subr.mxu1 %v16686_v1  ;;  %18589 = vst [vmem:[#allocation110_spill] sm:$0xff] %v16700_v15  ;;  %18590 = vst [vmem:[#allocation55_spill] sm:$0xff] %v16706_v14  ;;  %vm6770_vm3 = vcmp.ge.f32.partialorder %v6706_v17, 0.0  ;;  %v6630_v59 = vadd.f32 %v18591_v34, %v16571_v9  ;;  %v6703_v44 = vadd.f32 %v16085_v10, %v6632_v25  ;;  %v6833_v43 = vmul.f32 0.01, %v6705_v39  ;;  %v18594_v9 = vld [vmem:[#allocation38_spill] sm:$0xff] }
 0x362   : > { %11541 = vmatpush3.msra.mxu1 %v16694_v52  ;;  %v16712_v31 = vsel %vm6771_vm1, %v6707_v5, %v6835_v50  ;;  %vm6753_vm4 = vcmp.ge.f32.partialorder %v16619_v27, 0.0  ;;  %v6817_v24 = vmul.f32 0.01, %v16619_v27  ;;  %v16720_v16 = vsel %vm6755_vm15, %v16628_v41, %v6819_v13 }
 0x363   : > { %11542 = vmatprep.subr.mxu1 %v16700_v15  ;;  %18592 = vst [vmem:[#allocation79_spill] sm:$0xff] %v16712_v31  ;;  %18593 = vst [vmem:[#allocation80_spill] sm:$0xff] %v16720_v16  ;;  %vm6769_vm5 = vcmp.ge.f32.partialorder %v6705_v39, 0.0  ;;  %v6629_v35 = vadd.f32 %v18594_v9, %v16575_v42  ;;  %v6702_v58 = vadd.f32 %v16085_v10, %v6631_v30  ;;  %v6832_v2 = vmul.f32 0.01, %v6704_v6  ;;  %v18597_v42 = vld [vmem:[#allocation34_spill] sm:$0xff] }
 0x364   : > { %11543 = vmatpush3.msra.mxu1 %v16706_v14  ;;  %v16726_v36 = vsel %vm6770_vm3, %v6706_v17, %v6834_v61  ;;  %vm6752_vm6 = vcmp.ge.f32.partialorder %v16623_v8, 0.0  ;;  %v6816_v21 = vmul.f32 0.01, %v16623_v8  ;;  %v16734_v41 = vsel %vm6754_vm2, %v16631_v57, %v6818_v40  ;;  %v6913_v9 = vld [vmem:[%s17856_s7 + $0x38] sm:$0xff] }
 0x365   : > { %11544 = vmatprep.subr.mxu1 %v16712_v31  ;;  %18595 = vst [vmem:[#allocation120_spill] sm:$0xff] %v16726_v36  ;;  %18596 = vst [vmem:[#allocation81_spill] sm:$0xff] %v16734_v41  ;;  %vm6768_vm7 = vcmp.ge.f32.partialorder %v6704_v6, 0.0  ;;  %v6628_v47 = vadd.f32 %v18597_v42, %v16564_v62  ;;  %v6701_v29 = vadd.f32 %v16085_v10, %v6630_v59  ;;  %v6831_v3 = vmul.f32 0.01, %v6703_v44  ;;  %v18600_v62 = vld [vmem:[#allocation2_spill] sm:$0xff] }
 0x366   : > { %11545 = vmatpush3.msra.mxu1 %v16720_v16  ;;  %v16740_v33 = vsel %vm6769_vm5, %v6705_v39, %v6833_v43  ;;  %vm6751_vm8 = vcmp.ge.f32.partialorder %v16611_v0, 0.0  ;;  %v6815_v11 = vmul.f32 0.01, %v16611_v0  ;;  %v16748_v57 = vsel %vm6753_vm4, %v16619_v27, %v6817_v24  ;;  %v18608_v39 = vld [vmem:[#allocation58_spill] sm:$0xff]  ;;  %v6908_v43 = vld [vmem:[%s17856_s7 + $0x10] sm:$0xff]  ;;  %v6917_v42 = vld [vmem:[%s17856_s7 + $0x58] sm:$0xff] }
 0x367   : > { %11546 = vmatprep.subr.mxu1 %v16726_v36  ;;  %18598 = vst [vmem:[#allocation48_spill] sm:$0xff] %v16740_v33  ;;  %18599 = vst [vmem:[#allocation117_spill] sm:$0xff] %v16748_v57  ;;  %vm6767_vm9 = vcmp.ge.f32.partialorder %v6703_v44, 0.0  ;;  %v6627_v54 = vadd.f32 %v18600_v62, %v16567_v28  ;;  %v6700_v12 = vadd.f32 %v16085_v10, %v6629_v35  ;;  %v6830_v38 = vmul.f32 0.01, %v6702_v58  ;;  %v18618_v35 = vld [vmem:[#allocation56_spill] sm:$0xff] }
 0x368   : > { %11547 = vmatpush3.msra.mxu1 %v16734_v41  ;;  %v16754_v51 = vsel %vm6768_vm7, %v6704_v6, %v6832_v2  ;;  %v6684_v5 = vadd.f32 %v16085_v10, %v18602_v23  ;;  %v6814_v46 = vmul.f32 0.01, %v16615_v63  ;;  %v16763_v27 = vsel %vm6752_vm6, %v16623_v8, %v6816_v21  ;;  %v6912_v2 = vld [vmem:[%s17856_s7 + $0x30] sm:$0xff]  ;;  %v18620_v21 = vld [vmem:[#allocation59_spill] sm:$0xff]  ;;  %v18627_v23 = vld [vmem:[#allocation18_spill] sm:$0xff] }
 0x369   : > { %11548 = vmatprep.subr.mxu1 %v16740_v33  ;;  %18601 = vst [vmem:[#allocation51_spill] sm:$0xff] %v16754_v51  ;;  %18603 = vst [vmem:[#allocation118_spill] sm:$0xff] %v16763_v27  ;;  %vm6766_vm10 = vcmp.ge.f32.partialorder %v6702_v58, 0.0  ;;  %vm6750_vm11 = vcmp.ge.f32.partialorder %v16615_v63, 0.0  ;;  %v6699_v28 = vadd.f32 %v16085_v10, %v6628_v47  ;;  %v6829_v22 = vmul.f32 0.01, %v6701_v29 }
 0x36a   : > { %11549 = vmatpush3.msra.mxu1 %v16748_v57  ;;  %v16768_v4 = vsel %vm6767_vm9, %v6703_v44, %v6831_v3  ;;  %v6683_v17 = vadd.f32 %v16085_v10, %v18605_v45  ;;  %v6813_v37 = vmul.f32 0.01, %v16605_v56  ;;  %v16777_v8 = vsel %vm6751_vm8, %v16611_v0, %v6815_v11  ;;  %v18621_v47 = vld [vmem:[#allocation60_spill] sm:$0xff]  ;;  %v18624_v62 = vld [vmem:[#allocation15_spill] sm:$0xff] }
 0x36b   : > { %11550 = vmatprep.subr.mxu1 %v16754_v51  ;;  %18604 = vst [vmem:[#allocation50_spill] sm:$0xff] %v16768_v4  ;;  %18606 = vst [vmem:[#allocation114_spill] sm:$0xff] %v16777_v8  ;;  %vm6765_vm12 = vcmp.ge.f32.partialorder %v6701_v29, 0.0  ;;  %vm6749_vm13 = vcmp.ge.f32.partialorder %v16605_v56, 0.0  ;;  %v6698_v60 = vadd.f32 %v16085_v10, %v6627_v54  ;;  %v6828_v7 = vmul.f32 0.01, %v6700_v12 }
 0x36c   : > { %11551 = vmatpush3.msra.mxu1 %v16763_v27  ;;  %v16782_v25 = vsel %vm6766_vm10, %v6702_v58, %v6830_v38  ;;  %v6682_v50 = vadd.f32 %v16085_v10, %v18608_v39  ;;  %v6812_v13 = vmul.f32 0.01, %v6684_v5  ;;  %v16790_v0 = vsel %vm6750_vm11, %v16615_v63, %v6814_v46  ;;  %v18619_v58 = vld [vmem:[#allocation53_spill] sm:$0xff]  ;;  %v18623_v3 = vld [vmem:[#allocation64_spill] sm:$0xff]  ;;  %v18628_v46 = vld [vmem:[#allocation19_spill] sm:$0xff] }
 0x36d   : > { %11552 = vmatprep.subr.mxu1 %v16768_v4  ;;  %18607 = vst [vmem:[#allocation52_spill] sm:$0xff] %v16782_v25  ;;  %18609 = vst [vmem:[#allocation115_spill] sm:$0xff] %v16790_v0  ;;  %vm6764_vm14 = vcmp.ge.f32.partialorder %v6700_v12, 0.0  ;;  %vm6748_vm15 = vcmp.ge.f32.partialorder %v6684_v5, 0.0  ;;  %v6827_v18 = vmul.f32 0.01, %v6699_v28  ;;  %v16793_v30 = vsel %vm6765_vm12, %v6701_v29, %v6829_v22 }
 0x36e   : > { %11553 = vmatpush3.msra.mxu1 %v16777_v8  ;;  %18610 = vst [vmem:[#allocation106_spill] sm:$0xff] %v16793_v30  ;;  %v6811_v6 = vmul.f32 0.01, %v6683_v17  ;;  %v16797_v61 = vsel %vm6749_vm13, %v16605_v56, %v6813_v37  ;;  %vm6763_vm1 = vcmp.ge.f32.partialorder %v6699_v28, 0.0  ;;  %vm6747_vm2 = vcmp.ge.f32.partialorder %v6683_v17, 0.0  ;;  %v18622_v29 = vld [vmem:[#allocation61_spill] sm:$0xff] }
 0x36f   : > { %11554 = vmatprep.subr.mxu1 %v16782_v25  ;;  %18611 = vst [vmem:[#allocation65_spill] sm:$0xff] %v16797_v61  ;;  %v6826_v10 = vmul.f32 0.01, %v6698_v60  ;;  %v16800_v63 = vsel %vm6764_vm14, %v6700_v12, %v6828_v7  ;;  %v6810_v40 = vmul.f32 0.01, %v6682_v50  ;;  %v16803_v34 = vsel %vm6748_vm15, %v6684_v5, %v6812_v13  ;;  %v6916_v11 = vld [vmem:[%s17856_s7 + $0x50] sm:$0xff] }
 0x370   : > { %11555 = vmatpush3.msra.mxu1 %v16790_v0  ;;  %18612 = vst [vmem:[#allocation63_spill] sm:$0xff] %v16800_v63  ;;  %18613 = vst [vmem:[#allocation68_spill] sm:$0xff] %v16803_v34  ;;  %vm6762_vm3 = vcmp.ge.f32.partialorder %v6698_v60, 0.0  ;;  %vm6746_vm4 = vcmp.ge.f32.partialorder %v6682_v50, 0.0  ;;  %v16806_v59 = vsel %vm6763_vm1, %v6699_v28, %v6827_v18  ;;  %v16809_v56 = vsel %vm6747_vm2, %v6683_v17, %v6811_v6  ;;  %v6921_v54 = vld [vmem:[%s17856_s7 + $0x78] sm:$0xff]  ;;  %v18625_v12 = vld [vmem:[#allocation16_spill] sm:$0xff] }
 0x371   : > { %11556 = vmatprep.subr.mxu1 %v16793_v30  ;;  %18614 = vst [vmem:[#allocation66_spill] sm:$0xff] %v16806_v59  ;;  %18615 = vst [vmem:[#allocation83_spill] sm:$0xff] %v16809_v56  ;;  %v16812_v44 = vsel %vm6762_vm3, %v6698_v60, %v6826_v10  ;;  %v16818_v24 = vsel %vm6746_vm4, %v6682_v50, %v6810_v40  ;;  %v18626_v38 = vld [vmem:[#allocation17_spill] sm:$0xff]  ;;  %v6920_v5 = vld [vmem:[%s17856_s7 + $0x70] sm:$0xff]  ;;  %vm13318_vm5 = vmmov 0   ;;  %vm9536_vm6 = vcmask 130048  }
 0x372   : > { %11557 = vmatpush3.msra.mxu1 %v16797_v61  ;;  %18616 = vst [vmem:[#allocation69_spill] sm:$0xff] %v16812_v44  ;;  %18617 = vst [vmem:[#allocation67_spill] sm:$0xff] %v16818_v24  ;;  %v10724_v28 = vld [vmem:[%s17856_s7 + $0x88] sm:$0xff]  ;;  %v18629_v22 = vld [vmem:[#allocation21_spill] sm:$0xff]  ;;  %vm9622_vm10 = vcmask 261120  }
 0x373   : > { %11558 = vmatprep.subr.mxu1 %v16800_v63  ;;  %v18630_v45 = vld [vmem:[#allocation20_spill] sm:$0xff]  ;;  %v18631_v17 = vld [vmem:[#allocation23_spill] sm:$0xff]  ;;  %v18632_v37 = vld [vmem:[#allocation22_spill] sm:$0xff] }
 0x374   : > { %11559 = vmatpush3.msra.mxu1 %v16803_v34  ;;  %v18633_v60 = vld [vmem:[#allocation24_spill] sm:$0xff]  ;;  %v18634_v7 = vld [vmem:[#allocation26_spill] sm:$0xff]  ;;  %v18635_v39 = vld [vmem:[#allocation25_spill] sm:$0xff] }
 0x375   : > { %11560 = vmatprep.subr.mxu1 %v16806_v59  ;;  %v18636_v50 = vld [vmem:[#allocation27_spill] sm:$0xff]  ;;  %v18637_v13 = vld [vmem:[#allocation30_spill] sm:$0xff]  ;;  %v18638_v18 = vld [vmem:[#allocation28_spill] sm:$0xff] }
 0x376   : > { %11561 = vmatpush3.msra.mxu1 %v16809_v56  ;;  %v18639_v6 = vld [vmem:[#allocation29_spill] sm:$0xff]  ;;  %v18641_v40 = vld [vmem:[#allocation40_spill] sm:$0xff] }
 0x377   : > { %11562 = vmatprep.subr.mxu1 %v16812_v44  ;;  %v18640_v10 = vld [vmem:[#allocation37_spill] sm:$0xff] }
 0x378   : > { %11563 = vmatpush3.msra.mxu1 %v16818_v24 }
 0x379   : > { %11576 = vmatprep.subr.mxu1 %v18618_v35  ;;  %7072 = vmatmul.mubr.f32.vlgmr.msra.gmra.mxu1 %v6908_v43  ;;  %v18642_v43 = vld [vmem:[#allocation77_spill] sm:$0xff] }
 0x37a   : > { %11577 = vmatpush3.msra.mxu1 %v18619_v58  ;;  %7076 = vmatprep.mubr.f32.mxu1 %v6913_v9  ;;  %v18643_v9 = vld [vmem:[#allocation31_spill] sm:$0xff] }
 0x37b   : > { %11578 = vmatprep.subr.mxu1 %v18620_v21 }
 0x37c   : > { %11579 = vmatpush3.msra.mxu1 %v18621_v47 }
 0x37d   : > { %11580 = vmatprep.subr.mxu1 %v18622_v29  ;;  %7077 = vmatmul.mubr.f32.gmra.mxu1 %v6912_v2  ;;  %v18644_v2 = vld [vmem:[#allocation32_spill] sm:$0xff] }
 0x37e   : > { %11581 = vmatpush3.msra.mxu1 %v18623_v3  ;;  %7081 = vmatprep.mubr.f32.mxu1 %v6917_v42  ;;  %v18645_v42 = vld [vmem:[#allocation43_spill] sm:$0xff] }
 0x37f   : > { %11582 = vmatprep.subr.mxu1 %v18624_v62 }
 0x380   : > { %11583 = vmatpush3.msra.mxu1 %v18625_v12 }
 0x381   : > { %11584 = vmatprep.subr.mxu1 %v18626_v38  ;;  %7082 = vmatmul.mubr.f32.gmra.mxu1 %v6916_v11  ;;  %v18646_v11 = vld [vmem:[#allocation45_spill] sm:$0xff] }
 0x382   : > { %11585 = vmatpush3.msra.mxu1 %v18627_v23  ;;  %7086 = vmatprep.mubr.f32.mxu1 %v6921_v54  ;;  %v18647_v54 = vld [vmem:[#allocation78_spill] sm:$0xff] }
 0x383   : > { %11586 = vmatprep.subr.mxu1 %v18628_v46 }
 0x384   : > { %11587 = vmatpush3.msra.mxu1 %v18629_v22 }
 0x385   : > { %11588 = vmatprep.subr.mxu1 %v18630_v45  ;;  %7087 = vmatmul.mubr.f32.gmra.mxu1 %v6920_v5  ;;  %v10723_v5 = vld [vmem:[%s17856_s7 + $0x80] sm:$0xff] }
 0x386   : > { %11589 = vmatpush3.msra.mxu1 %v18631_v17  ;;  %7174 = vmatprep.mubr.f32.mxu1 %v10724_v28  ;;  %v18648_v28 = vld [vmem:[#allocation33_spill] sm:$0xff] }
 0x387   : > { %11590 = vmatprep.subr.mxu1 %v18632_v37 }
 0x388   : > { %11591 = vmatpush3.msra.mxu1 %v18633_v60 }
 0x389   : > { %11592 = vmatprep.subr.mxu1 %v18634_v7 }
 0x38a   : > { %11593 = vmatpush3.msra.mxu1 %v18635_v39 }
 0x38b   : > { %11594 = vmatprep.subr.mxu1 %v18636_v50 }
 0x38c   : > { %11595 = vmatpush3.msra.mxu1 %v18637_v13 }
 0x38d   : > { %11596 = vmatprep.subr.mxu1 %v18638_v18  ;;  %v10756_v18 = vld [vmem:[%s17856_s7 + $0x140] sm:$0xff] }
 0x38e   : > { %11597 = vmatpush3.msra.mxu1 %v18639_v6 }
 0x38f   : > { %11598 = vmatprep.subr.mxu1 %v18640_v10 }
 0x390   : > { %11599 = vmatpush3.msra.mxu1 %v18641_v40  ;;  %v18649_v40 = vld [vmem:[#allocation35_spill] sm:$0xff] }
 0x391   : > { %11600 = vmatprep.subr.mxu1 %v18642_v43  ;;  %v10728_v43 = vld [vmem:[%s17856_s7 + $0xa8] sm:$0xff] }
 0x392   : > { %11601 = vmatpush3.msra.mxu1 %v18643_v9 }
 0x393   : > { %11602 = vmatprep.subr.mxu1 %v18644_v2 }
 0x394   : > { %11603 = vmatpush3.msra.mxu1 %v18645_v42 }
 0x395   : > { %11604 = vmatprep.subr.mxu1 %v18646_v11  ;;  %v10738_v11 = vld [vmem:[%s17856_s7 + $0xf8] sm:$0xff] }
 0x396   : > { %11605 = vmatpush3.msra.mxu1 %v18647_v54  ;;  %v10727_v54 = vld [vmem:[%s17856_s7 + $0xa0] sm:$0xff] }
 0x397   : > { %11606 = vmatprep.subr.mxu1 %v18648_v28  ;;  %v10732_v28 = vld [vmem:[%s17856_s7 + $0xc8] sm:$0xff] }
 0x398   : > { %11607 = vmatpush3.msra.mxu1 %v18649_v40  ;;  %v10733_v40 = vld [vmem:[%s17856_s7 + $0xd0] sm:$0xff] }
 0x399   : > { %11620 = vmatprep.subr.mxu1 %v16647_v19  ;;  %7175 = vmatmul.mubr.f32.vlgmr.msra.gmra.mxu1 %v10723_v5  ;;  %v10736_v5 = vld [vmem:[%s17856_s7 + $0xe8] sm:$0xff] }
 0x39a   : > { %11621 = vmatpush3.msra.mxu1 %v16642_v26  ;;  %7179 = vmatprep.mubr.f32.mxu1 %v10728_v43  ;;  %v10731_v43 = vld [vmem:[%s17856_s7 + $0xc0] sm:$0xff] }
 0x39b   : > { %11622 = vmatprep.subr.mxu1 %v16655_v48 }
 0x39c   : > { %11623 = vmatpush3.msra.mxu1 %v16658_v32 }
 0x39d   : > { %11624 = vmatprep.subr.mxu1 %v16664_v20  ;;  %7180 = vmatmul.mubr.f32.gmra.mxu1 %v10727_v54  ;;  %v10735_v54 = vld [vmem:[%s17856_s7 + $0xe0] sm:$0xff] }
 0x39e   : > { %11625 = vmatpush3.msra.mxu1 %v16670_v55  ;;  %7184 = vmatprep.mubr.f32.mxu1 %v10732_v28  ;;  %v10726_v28 = vld [vmem:[%s17856_s7 + $0x98] sm:$0xff] }
 0x39f   : > { %11626 = vmatprep.subr.mxu1 %v16676_v53 }
 0x3a0   : > { %11627 = vmatpush3.msra.mxu1 %v16680_v49 }
 0x3a1   : > { %11628 = vmatprep.subr.mxu1 %v16686_v1  ;;  %7185 = vmatmul.mubr.f32.gmra.mxu1 %v10731_v43  ;;  %v10725_v43 = vld [vmem:[%s17856_s7 + $0x90] sm:$0xff] }
 0x3a2   : > { %11629 = vmatpush3.msra.mxu1 %v16694_v52  ;;  %7189 = vmatprep.mubr.f32.mxu1 %v10736_v5  ;;  %v10730_v5 = vld [vmem:[%s17856_s7 + $0xb8] sm:$0xff] }
 0x3a3   : > { %11630 = vmatprep.subr.mxu1 %v16700_v15 }
 0x3a4   : > { %11631 = vmatpush3.msra.mxu1 %v16706_v14 }
 0x3a5   : > { %11632 = vmatprep.subr.mxu1 %v16712_v31  ;;  %7190 = vmatmul.mubr.f32.gmra.mxu1 %v10735_v54  ;;  %v10729_v54 = vld [vmem:[%s17856_s7 + $0xb0] sm:$0xff] }
 0x3a6   : > { %11633 = vmatpush3.msra.mxu1 %v16720_v16  ;;  %7259 = vmatprep.mubr.f32.mxu1 %v10726_v28  ;;  %v10734_v28 = vld [vmem:[%s17856_s7 + $0xd8] sm:$0xff] }
 0x3a7   : > { %11634 = vmatprep.subr.mxu1 %v16726_v36 }
 0x3a8   : > { %11635 = vmatpush3.msra.mxu1 %v16734_v41 }
 0x3a9   : > { %11636 = vmatprep.subr.mxu1 %v16740_v33 }
 0x3aa   : > { %11637 = vmatpush3.msra.mxu1 %v16748_v57 }
 0x3ab   : > { %11638 = vmatprep.subr.mxu1 %v16754_v51 }
 0x3ac   : > { %11639 = vmatpush3.msra.mxu1 %v16763_v27 }
 0x3ad   : > { %11640 = vmatprep.subr.mxu1 %v16768_v4 }
 0x3ae   : > { %11641 = vmatpush3.msra.mxu1 %v16777_v8 }
 0x3af   : > { %11642 = vmatprep.subr.mxu1 %v16782_v25 }
 0x3b0   : > { %11643 = vmatpush3.msra.mxu1 %v16790_v0 }
 0x3b1   : > { %11644 = vmatprep.subr.mxu1 %v16793_v30 }
 0x3b2   : > { %11645 = vmatpush3.msra.mxu1 %v16797_v61 }
 0x3b3   : > { %11646 = vmatprep.subr.mxu1 %v16800_v63 }
 0x3b4   : > { %11647 = vmatpush3.msra.mxu1 %v16803_v34 }
 0x3b5   : > { %11648 = vmatprep.subr.mxu1 %v16806_v59 }
 0x3b6   : > { %11649 = vmatpush3.msra.mxu1 %v16809_v56 }
 0x3b7   : > { %11650 = vmatprep.subr.mxu1 %v16812_v44 }
 0x3b8   : > { %11651 = vmatpush3.msra.mxu1 %v16818_v24 }
 0x3b9   : > { %7260 = vmatmul.mubr.f32.vlgmr.msra.gmra.mxu1 %v10725_v43  ;;  %v10737_v43 = vld [vmem:[%s17856_s7 + $0xf0] sm:$0xff] }
 0x3ba   : > { %7264 = vmatprep.mubr.f32.mxu1 %v10730_v5  ;;  %v10739_v5 = vld [vmem:[%s16438_s24 + $0x8] sm:$0xff] }
 0x3bb   : > { %13212 = vmatprep.subr.mxu1 %v10739_v5 }
 0x3bc   : > { %13213 = vmatpush3.msra.mxu1 %v10739_v5  ;;  %v10757_v5 = vld [vmem:[%s17856_s7 + $0x148] sm:$0xff] }
 0x3bd   : > { %7265 = vmatmul.mubr.f32.gmra.mxu1 %v10729_v54  ;;  %v7092_v54 = vld [vmem:[%s16438_s24] sm:$0xff] }
 0x3be   : > { %7269 = vmatprep.mubr.f32.mxu1 %v10734_v28  ;;  %13220 = vmatprep.subr.mxu1 %v7092_v54 }
 0x3c1   : > { %7270 = vmatmul.mubr.f32.gmra.mxu1 %v10733_v40  ;;  %v10753_v40 = vld [vmem:[%s17856_s7 + $0x128] sm:$0xff] }
 0x3c2   : > { %7274 = vmatprep.mubr.f32.mxu1 %v10738_v11  ;;  %7562 = vmatprep.mubr.f32.mxu0 %v10753_v40  ;;  %v10752_v11 = vld [vmem:[%s17856_s7 + $0x120] sm:$0xff]  ;;  %v10761_v40 = vld [vmem:[%s17856_s7 + $0x168] sm:$0xff] }
 0x3c3   : > { %7563 = vmatmul.mubr.f32.gmra.mxu0 %v10752_v11  ;;  %v10760_v11 = vld [vmem:[%s17856_s7 + $0x160] sm:$0xff] }
 0x3c4   : > { %7567 = vmatprep.mubr.f32.mxu0 %v10757_v5 }
 0x3c5   : > { %7275 = vmatmul.mubr.f32.gmra.mxu1 %v10737_v43 }
 0x3c7   : > { %7568 = vmatmul.mubr.f32.gmra.mxu0 %v10756_v18 }
 0x3c8   : > { %7572 = vmatprep.mubr.f32.mxu0 %v10761_v40 }
 0x3cb   : > { %7573 = vmatmul.mubr.f32.gmra.mxu0 %v10760_v11 }
 0x3fa   : > { %v11520_v28 = vpop.f32.mrf.mxu1 }
 0x3fc   : > { %v11521_v42 = vpop.f32.mrf.mxu1 }
 0x3fe   : > { %v16954_v2 = vpop.f32.mrf.mxu1 }
 0x400   : > { %v16956_v9 = vpop.f32.mrf.mxu1 }
 0x402   : > { %v16958_v10 = vpop.f32.mrf.mxu1 }
 0x404   : > { %v11527_v43 = vpop.f32.mrf.mxu1 }
 0x406   : > { %v11529_v6 = vpop.f32.mrf.mxu1 }
 0x408   : > { %v11530_v13 = vpop.f32.mrf.mxu1 }
 0x439   : > { %v11564_v50 = vpop.f32.mrf.mxu1 }
 0x43b   : > { %v11565_v39 = vpop.f32.mrf.mxu1 }
 0x43d   : > { %v11567_v7 = vpop.f32.mrf.mxu1 }
 0x43f   : > { %v11568_v5 = vpop.f32.mrf.mxu1 }
 0x441   : > { %v11570_v60 = vpop.f32.mrf.mxu1 }
 0x443   : > { %v11571_v37 = vpop.f32.mrf.mxu1 }
 0x445   : > { %v11573_v17 = vpop.f32.mrf.mxu1 }
 0x447   : > { %v11574_v45 = vpop.f32.mrf.mxu1 }
 0x459   : > { %v11608_v18 = vpop.f32.mrf.mxu1 }
 0x45b   : > { %v11609_v22 = vpop.f32.mrf.mxu1 }
 0x45c   : > { %v11610_v47 = vadd.f32 %v11609_v22, %v11608_v18  ;;  %v10775_v18 = vld [vmem:[%s17856_s7 + $0x1b0] sm:$0xff] }
 0x45d   : > { %v11611_v46 = vpop.f32.mrf.mxu1 }
 0x45f   : > { %v11612_v23 = vpop.f32.mrf.mxu1 }
 0x460   : > { %v11613_v24 = vadd.f32 %v11612_v23, %v11611_v46  ;;  %v18652_v23 = vld [vmem:[#allocation65_spill] sm:$0xff]  ;;  %v18653_v46 = vld [vmem:[#allocation63_spill] sm:$0xff] }
 0x461   : > { %v11614_v38 = vpop.f32.mrf.mxu1 }
 0x463   : > { %v11615_v12 = vpop.f32.mrf.mxu1 }
 0x464   : > { %v11616_v63 = vadd.f32 %v11615_v12, %v11614_v38  ;;  %v18650_v12 = vld [vmem:[#allocation115_spill] sm:$0xff]  ;;  %v18651_v38 = vld [vmem:[#allocation106_spill] sm:$0xff] }
 0x465   : > { %v11617_v40 = vpop.f32.mrf.mxu1 }
 0x467   : > { %v11618_v62 = vpop.f32.mrf.mxu1 }
 0x479   : > { %v11652_v3 = vpop.f32.mrf.mxu1 }
 0x47b   : > { %v11653_v29 = vpop.f32.mrf.mxu1 }
 0x47c   : > { %v11654_v11 = vadd.f32 %v11653_v29, %v11652_v3  ;;  %v11566_v29 = vadd.f32 %v11565_v39, %v11564_v50  ;;  %v10755_v39 = vld [vmem:[%s17856_s7 + $0x138] sm:$0xff]  ;;  %v18658_v50 = vld [vmem:[#allocation67_spill] sm:$0xff] }
 0x47d   : > { %v11655_v21 = vpop.f32.mrf.mxu1 }
 0x47e   : > { %v7262_v58 = vadd.f32 %v11654_v11, %v11610_v47  ;;  %v11619_v47 = vadd.f32 %v11618_v62, %v11617_v40  ;;  %v10751_v62 = vld [vmem:[%s17856_s7 + $0x118] sm:$0xff]  ;;  %v18661_v40 = vld [vmem:[#allocation59_spill] sm:$0xff] }
 0x47f   : > { %v11656_v35 = vpop.f32.mrf.mxu1  ;;  %v10780_v11 = vld [vmem:[%s17856_s7 + $0x1d8] sm:$0xff] }
 0x480   : > { %v11657_v44 = vadd.f32 %v11656_v35, %v11655_v21  ;;  %13214 = vmatprep.mubr.msk.f32.mxu1 %vm537_vm0, %v7262_v58  ;;  %v11522_v35 = vadd.f32 %v11521_v42, %v11520_v28  ;;  %v11569_v58 = vadd.f32 %v11568_v5, %v11567_v7  ;;  %v18657_v7 = vld [vmem:[#allocation69_spill] sm:$0xff] }
 0x481   : > { %v11658_v56 = vpop.f32.mrf.mxu1  ;;  %v10772_v42 = vld [vmem:[%s17856_s7 + $0x198] sm:$0xff] }
 0x482   : > { %v7267_v59 = vadd.f32 %v11657_v44, %v11613_v24  ;;  %v7074_v44 = vadd.f32 %v11566_v29, %v11522_v35  ;;  %v11572_v24 = vadd.f32 %v11571_v37, %v11570_v60  ;;  %v18656_v37 = vld [vmem:[#allocation83_spill] sm:$0xff]  ;;  %v10750_v60 = vld [vmem:[%s17856_s7 + $0x110] sm:$0xff]  ;;  %v10776_v28 = vld [vmem:[%s17856_s7 + $0x1b8] sm:$0xff] }
 0x483   : > { %v11659_v34 = vpop.f32.mrf.mxu1  ;;  %v18660_v5 = vld [vmem:[#allocation53_spill] sm:$0xff]  ;;  %v18662_v29 = vld [vmem:[#allocation60_spill] sm:$0xff]  ;;  %v18665_v35 = vld [vmem:[#allocation15_spill] sm:$0xff] }
 0x484   : > { %v11660_v61 = vadd.f32 %v11659_v34, %v11658_v56  ;;  %13215 = vmatmul.mubr.msk.f32.vlgmr.msra.gmra.mxu1 %vm537_vm0, %v7267_v59  ;;  %v11525_v34 = vadd.f32 %v16956_v9, %v16954_v2  ;;  %v11575_v59 = vadd.f32 %v11574_v45, %v11573_v17  ;;  %v18654_v45 = vld [vmem:[#allocation68_spill] sm:$0xff]  ;;  %v18655_v17 = vld [vmem:[#allocation66_spill] sm:$0xff]  ;;  %v10763_v9 = vld [vmem:[%s17856_s7 + $0x178] sm:$0xff] }
 0x485   : > { %13221 = vmatpush3.msra.mxu1 %v7092_v54  ;;  %v11661_v30 = vpop.f32.mrf.mxu1  ;;  %v10762_v2 = vld [vmem:[%s17856_s7 + $0x170] sm:$0xff] }
 0x486   : > { %v7272_v0 = vadd.f32 %v11660_v61, %v11616_v63  ;;  %11718 = vmatprep.subr.mxu1 %v16647_v19  ;;  %v11528_v61 = vadd.f32 %v11527_v43, %v16958_v10  ;;  %v7079_v63 = vadd.f32 %v11569_v58, %v11525_v34  ;;  %v10758_v10 = vld [vmem:[%s17856_s7 + $0x150] sm:$0xff]  ;;  %v10784_v58 = vld [vmem:[%s17856_s7 + $0x1f8] sm:$0xff] }
 0x487   : > { %v11662_v3 = vpop.f32.mrf.mxu1  ;;  %v10771_v54 = vld [vmem:[%s17856_s7 + $0x190] sm:$0xff] }
 0x488   : > { %v11663_v22 = vadd.f32 %v11662_v3, %v11661_v30  ;;  %13217 = vmatprep.mubr.msk.f32.mxu1 %vm537_vm0, %v7272_v0  ;;  %v7084_v56 = vadd.f32 %v11572_v24, %v11528_v61  ;;  %v11531_v30 = vadd.f32 %v11530_v13, %v11529_v6  ;;  %v10754_v13 = vld [vmem:[%s17856_s7 + $0x130] sm:$0xff]  ;;  %v10759_v6 = vld [vmem:[%s17856_s7 + $0x158] sm:$0xff]  ;;  %v18668_v24 = vld [vmem:[#allocation18_spill] sm:$0xff] }
 0x489   : > { %v18659_v43 = vld [vmem:[#allocation56_spill] sm:$0xff]  ;;  %v18663_v3 = vld [vmem:[#allocation61_spill] sm:$0xff]  ;;  %v18669_v61 = vld [vmem:[#allocation19_spill] sm:$0xff] }
 0x48a   : > { %v7277_v21 = vadd.f32 %v11663_v22, %v11619_v47  ;;  %v7089_v0 = vadd.f32 %v11575_v59, %v11531_v30  ;;  %v18664_v47 = vld [vmem:[#allocation64_spill] sm:$0xff]  ;;  %v18670_v59 = vld [vmem:[#allocation21_spill] sm:$0xff]  ;;  %v18672_v30 = vld [vmem:[#allocation23_spill] sm:$0xff] }
 0x48b   : > { %v10779_v22 = vld [vmem:[%s17856_s7 + $0x1d0] sm:$0xff] }
 0x48c   : > { %13218 = vmatmul.mubr.msk.f32.gmra.mxu1 %vm537_vm0, %v7277_v21  ;;  %v18666_v21 = vld [vmem:[#allocation16_spill] sm:$0xff] }
 0x48d   : > { %13222 = vmatprep.mubr.msk.f32.mxu1 %vm537_vm0, %v7074_v44  ;;  %v18667_v44 = vld [vmem:[#allocation17_spill] sm:$0xff]  ;;  %v10783_v34 = vld [vmem:[%s17856_s7 + $0x1f0] sm:$0xff] }
 0x490   : > { %13223 = vmatmul.mubr.msk.f32.vlgmr.msra.gmra.mxu1 %vm537_vm0, %v7079_v63  ;;  %v10791_v63 = vld [vmem:[%s17856_s7 + $0x208] sm:$0xff] }
 0x491   : > { %11719 = vmatpush3.msra.mxu1 %v16642_v26  ;;  %13225 = vmatprep.mubr.msk.f32.mxu1 %vm537_vm0, %v7084_v56  ;;  %v18671_v56 = vld [vmem:[#allocation20_spill] sm:$0xff] }
 0x492   : > { %11720 = vmatprep.subr.mxu1 %v16655_v48 }
 0x493   : > { %11721 = vmatpush3.msra.mxu1 %v16658_v32 }
 0x494   : > { %11722 = vmatprep.subr.mxu1 %v16664_v20  ;;  %13226 = vmatmul.mubr.msk.f32.gmra.mxu1 %vm537_vm0, %v7089_v0  ;;  %v18673_v0 = vld [vmem:[#allocation22_spill] sm:$0xff] }
 0x495   : > { %11723 = vmatpush3.msra.mxu1 %v16670_v55  ;;  %7642 = vmatprep.mubr.f32.mxu1 %v10751_v62  ;;  %v18674_v62 = vld [vmem:[#allocation24_spill] sm:$0xff] }
 0x496   : > { %11724 = vmatprep.subr.mxu1 %v16676_v53 }
 0x497   : > { %11725 = vmatpush3.msra.mxu1 %v16680_v49 }
 0x498   : > { %11726 = vmatprep.subr.mxu1 %v16686_v1 }
 0x499   : > { %11727 = vmatpush3.msra.mxu1 %v16694_v52 }
 0x49a   : > { %11728 = vmatprep.subr.mxu1 %v16700_v15 }
 0x49b   : > { %11729 = vmatpush3.msra.mxu1 %v16706_v14 }
 0x49c   : > { %11730 = vmatprep.subr.mxu1 %v16712_v31 }
 0x49d   : > { %11731 = vmatpush3.msra.mxu1 %v16720_v16 }
 0x49e   : > { %11732 = vmatprep.subr.mxu1 %v16726_v36 }
 0x49f   : > { %11733 = vmatpush3.msra.mxu1 %v16734_v41 }
 0x4a0   : > { %11734 = vmatprep.subr.mxu1 %v16740_v33 }
 0x4a1   : > { %11735 = vmatpush3.msra.mxu1 %v16748_v57 }
 0x4a2   : > { %11736 = vmatprep.subr.mxu1 %v16754_v51 }
 0x4a3   : > { %11737 = vmatpush3.msra.mxu1 %v16763_v27 }
 0x4a4   : > { %11738 = vmatprep.subr.mxu1 %v16768_v4 }
 0x4a5   : > { %11739 = vmatpush3.msra.mxu1 %v16777_v8 }
 0x4a6   : > { %11740 = vmatprep.subr.mxu1 %v16782_v25 }
 0x4a7   : > { %11741 = vmatpush3.msra.mxu1 %v18650_v12 }
 0x4a8   : > { %11742 = vmatprep.subr.mxu1 %v18651_v38 }
 0x4a9   : > { %11743 = vmatpush3.msra.mxu1 %v18652_v23 }
 0x4aa   : > { %11744 = vmatprep.subr.mxu1 %v18653_v46 }
 0x4ab   : > { %11745 = vmatpush3.msra.mxu1 %v18654_v45 }
 0x4ac   : > { %11746 = vmatprep.subr.mxu1 %v18655_v17 }
 0x4ad   : > { %11747 = vmatpush3.msra.mxu1 %v18656_v37 }
 0x4ae   : > { %11748 = vmatprep.subr.mxu1 %v18657_v7 }
 0x4af   : > { %11749 = vmatpush3.msra.mxu1 %v18658_v50 }
 0x4b0   : > { %7643 = vmatmul.mubr.f32.vlgmr.msra.gmra.mxu1 %v10750_v60  ;;  %11811 = vmatprep.subr.mxu1 %v16647_v19  ;;  %v18675_v60 = vld [vmem:[#allocation26_spill] sm:$0xff] }
 0x4b1   : > { %11812 = vmatpush3.msra.mxu1 %v16642_v26  ;;  %7647 = vmatprep.mubr.f32.mxu1 %v10755_v39  ;;  %v18676_v39 = vld [vmem:[#allocation25_spill] sm:$0xff] }
 0x4b2   : > { %11813 = vmatprep.subr.mxu1 %v16655_v48 }
 0x4b3   : > { %11814 = vmatpush3.msra.mxu1 %v16658_v32 }
 0x4b4   : > { %7648 = vmatmul.mubr.f32.gmra.mxu1 %v10754_v13  ;;  %11815 = vmatprep.subr.mxu1 %v16664_v20  ;;  %v18677_v13 = vld [vmem:[#allocation27_spill] sm:$0xff] }
 0x4b5   : > { %11816 = vmatpush3.msra.mxu1 %v16670_v55  ;;  %7652 = vmatprep.mubr.f32.mxu1 %v10759_v6  ;;  %v18678_v6 = vld [vmem:[#allocation30_spill] sm:$0xff] }
 0x4b6   : > { %11817 = vmatprep.subr.mxu1 %v16676_v53 }
 0x4b7   : > { %11818 = vmatpush3.msra.mxu1 %v16680_v49 }
 0x4b8   : > { %7653 = vmatmul.mubr.f32.gmra.mxu1 %v10758_v10  ;;  %11819 = vmatprep.subr.mxu1 %v16686_v1  ;;  %v18679_v10 = vld [vmem:[#allocation28_spill] sm:$0xff] }
 0x4b9   : > { %11820 = vmatpush3.msra.mxu1 %v16694_v52  ;;  %7657 = vmatprep.mubr.f32.mxu1 %v10763_v9  ;;  %v18680_v9 = vld [vmem:[#allocation29_spill] sm:$0xff] }
 0x4ba   : > { %11821 = vmatprep.subr.mxu1 %v16700_v15 }
 0x4bb   : > { %11822 = vmatpush3.msra.mxu1 %v16706_v14 }
 0x4bc   : > { %7658 = vmatmul.mubr.f32.gmra.mxu1 %v10762_v2  ;;  %11823 = vmatprep.subr.mxu1 %v16712_v31  ;;  %v18681_v2 = vld [vmem:[#allocation37_spill] sm:$0xff] }
 0x4bd   : > { %11824 = vmatpush3.msra.mxu1 %v16720_v16  ;;  %7932 = vmatprep.mubr.f32.mxu1 %v10772_v42  ;;  %v18682_v42 = vld [vmem:[#allocation40_spill] sm:$0xff] }
 0x4be   : > { %11825 = vmatprep.subr.mxu1 %v16726_v36 }
 0x4bf   : > { %11826 = vmatpush3.msra.mxu1 %v16734_v41 }
 0x4c0   : > { %11827 = vmatprep.subr.mxu1 %v16740_v33 }
 0x4c1   : > { %11828 = vmatpush3.msra.mxu1 %v16748_v57 }
 0x4c2   : > { %11829 = vmatprep.subr.mxu1 %v16754_v51 }
 0x4c3   : > { %11830 = vmatpush3.msra.mxu1 %v16763_v27 }
 0x4c4   : > { %11831 = vmatprep.subr.mxu1 %v16768_v4 }
 0x4c5   : > { %11832 = vmatpush3.msra.mxu1 %v16777_v8 }
 0x4c6   : > { %11833 = vmatprep.subr.mxu1 %v16782_v25 }
 0x4c7   : > { %11834 = vmatpush3.msra.mxu1 %v18650_v12 }
 0x4c8   : > { %11835 = vmatprep.subr.mxu1 %v18651_v38 }
 0x4c9   : > { %11836 = vmatpush3.msra.mxu1 %v18652_v23 }
 0x4ca   : > { %11837 = vmatprep.subr.mxu1 %v18653_v46 }
 0x4cb   : > { %11838 = vmatpush3.msra.mxu1 %v18654_v45 }
 0x4cc   : > { %11839 = vmatprep.subr.mxu1 %v18655_v17 }
 0x4cd   : > { %11840 = vmatpush3.msra.mxu1 %v18656_v37 }
 0x4ce   : > { %11841 = vmatprep.subr.mxu1 %v18657_v7 }
 0x4cf   : > { %11842 = vmatpush3.msra.mxu1 %v18658_v50  ;;  %v18690_v50 = vld [vmem:[#allocation35_spill] sm:$0xff] }
 0x4d0   : > { %11860 = vmatprep.subr.mxu1 %v18659_v43  ;;  %7933 = vmatmul.mubr.f32.vlgmr.msra.gmra.mxu1 %v10771_v54  ;;  %v18683_v54 = vld [vmem:[#allocation77_spill] sm:$0xff] }
 0x4d1   : > { %11861 = vmatpush3.msra.mxu1 %v18660_v5  ;;  %7937 = vmatprep.mubr.f32.mxu1 %v10776_v28  ;;  %v18684_v28 = vld [vmem:[#allocation31_spill] sm:$0xff]  ;;  %v18689_v43 = vld [vmem:[#allocation33_spill] sm:$0xff] }
 0x4d2   : > { %11862 = vmatprep.subr.mxu1 %v18661_v40 }
 0x4d3   : > { %11863 = vmatpush3.msra.mxu1 %v18662_v29 }
 0x4d4   : > { %11864 = vmatprep.subr.mxu1 %v18663_v3  ;;  %7938 = vmatmul.mubr.f32.gmra.mxu1 %v10775_v18  ;;  %v18685_v18 = vld [vmem:[#allocation32_spill] sm:$0xff] }
 0x4d5   : > { %11865 = vmatpush3.msra.mxu1 %v18664_v47  ;;  %7942 = vmatprep.mubr.f32.mxu1 %v10780_v11  ;;  %v18686_v11 = vld [vmem:[#allocation43_spill] sm:$0xff] }
 0x4d6   : > { %11866 = vmatprep.subr.mxu1 %v18665_v35 }
 0x4d7   : > { %11867 = vmatpush3.msra.mxu1 %v18666_v21 }
 0x4d8   : > { %11868 = vmatprep.subr.mxu1 %v18667_v44  ;;  %7943 = vmatmul.mubr.f32.gmra.mxu1 %v10779_v22  ;;  %v18687_v22 = vld [vmem:[#allocation45_spill] sm:$0xff] }
 0x4d9   : > { %11869 = vmatpush3.msra.mxu1 %v18668_v24  ;;  %7947 = vmatprep.mubr.f32.mxu1 %v10784_v58  ;;  %v18688_v58 = vld [vmem:[#allocation78_spill] sm:$0xff] }
 0x4da   : > { %11870 = vmatprep.subr.mxu1 %v18669_v61 }
 0x4db   : > { %11871 = vmatpush3.msra.mxu1 %v18670_v59 }
 0x4dc   : > { %11872 = vmatprep.subr.mxu1 %v18671_v56  ;;  %7948 = vmatmul.mubr.f32.gmra.mxu1 %v10783_v34  ;;  %v10806_v34 = vld [vmem:[%s16438_s24 + $0x20] sm:$0xff] }
 0x4dd   : > { %11873 = vmatpush3.msra.mxu1 %v18672_v30  ;;  %8137 = vmatprep.mubr.f32.mxu1 %v10791_v63  ;;  %v10790_v63 = vld [vmem:[%s17856_s7 + $0x200] sm:$0xff] }
 0x4de   : > { %11874 = vmatprep.subr.mxu1 %v18673_v0 }
 0x4df   : > { %11875 = vmatpush3.msra.mxu1 %v18674_v62 }
 0x4e0   : > { %11876 = vmatprep.subr.mxu1 %v18675_v60 }
 0x4e1   : > { %11877 = vmatpush3.msra.mxu1 %v18676_v39 }
 0x4e2   : > { %11878 = vmatprep.subr.mxu1 %v18677_v13 }
 0x4e3   : > { %11879 = vmatpush3.msra.mxu1 %v18678_v6 }
 0x4e4   : > { %11880 = vmatprep.subr.mxu1 %v18679_v10 }
 0x4e5   : > { %11881 = vmatpush3.msra.mxu1 %v18680_v9 }
 0x4e6   : > { %11882 = vmatprep.subr.mxu1 %v18681_v2 }
 0x4e7   : > { %11883 = vmatpush3.msra.mxu1 %v18682_v42 }
 0x4e8   : > { %11884 = vmatprep.subr.mxu1 %v18683_v54 }
 0x4e9   : > { %11885 = vmatpush3.msra.mxu1 %v18684_v28 }
 0x4ea   : > { %11886 = vmatprep.subr.mxu1 %v18685_v18 }
 0x4eb   : > { %11887 = vmatpush3.msra.mxu1 %v18686_v11 }
 0x4ec   : > { %11888 = vmatprep.subr.mxu1 %v18687_v22 }
 0x4ed   : > { %11889 = vmatpush3.msra.mxu1 %v18688_v58 }
 0x4ee   : > { %11890 = vmatprep.subr.mxu1 %v18689_v43 }
 0x4ef   : > { %11891 = vmatpush3.msra.mxu1 %v18690_v50 }
 0x4f0   : > { %13244 = vmatprep.subr.mxu1 %v10806_v34  ;;  %8138 = vmatmul.mubr.f32.vlgmr.msra.gmra.mxu1 %v10790_v63  ;;  %v11706_v63 = vpop.f32.mrf.mxu0 }
 0x4f1   : > { %13245 = vmatpush3.msra.mxu1 %v10806_v34 }
 0x4f2   : > { %11997 = vmatprep.subr.mxu1 %v16647_v19  ;;  %v11707_v34 = vpop.f32.mrf.mxu0 }
 0x4f3   : > { %v11708_v31 = vadd.f32 %v11707_v34, %v11706_v63  ;;  %v10782_v34 = vld [vmem:[%s17856_s7 + $0x1e8] sm:$0xff] }
 0x4f4   : > { %v11709_v51 = vpop.f32.mrf.mxu0 }
 0x4f6   : > { %v11710_v57 = vpop.f32.mrf.mxu0 }
 0x4f7   : > { %v11711_v15 = vadd.f32 %v11710_v57, %v11709_v51  ;;  %v10777_v51 = vld [vmem:[%s17856_s7 + $0x1c0] sm:$0xff] }
 0x4f8   : > { %v11712_v33 = vpop.f32.mrf.mxu0 }
 0x4fa   : > { %v11713_v16 = vpop.f32.mrf.mxu0 }
 0x544   : > { %v13216_v7 = vpop.f32.mrf.mxu1 }
 0x546   : > { %v7360_v37 = vpop.f32.mrf.mxu1 }
 0x54c   : > { %v13219_v17 = vpop.f32.mrf.mxu1 }
 0x54e   : > { %v7370_v45 = vpop.f32.mrf.mxu1 }
 0x550   : > { %v13224_v46 = vpop.f32.mrf.mxu1 }
 0x551   : > { %v17141_v23 = vadd.f32 %v13224_v46, %v13216_v7 }
 0x552   : > { %v7457_v38 = vpop.f32.mrf.mxu1 }
 0x553   : > { %v17143_v12 = vadd.f32 %v7457_v38, %v7360_v37  ;;  %v11715_v37 = vpop.f32.mrf.mxu0 }
 0x554   : > { %v13227_v25 = vpop.f32.mrf.mxu1 }
 0x555   : > { %v17145_v8 = vadd.f32 %v13227_v25, %v13219_v17  ;;  %v11714_v17 = vadd.f32 %v11713_v16, %v11712_v33  ;;  %v11716_v1 = vpop.f32.mrf.mxu0  ;;  %v10773_v16 = vld [vmem:[%s17856_s7 + $0x1a0] sm:$0xff]  ;;  %v10778_v33 = vld [vmem:[%s17856_s7 + $0x1c8] sm:$0xff] }
 0x556   : > { %v7467_v4 = vpop.f32.mrf.mxu1 }
 0x557   : > { %v17147_v27 = vadd.f32 %v7467_v4, %v7370_v45 }
 0x570   : > { %v11750_v41 = vpop.f32.mrf.mxu1 }
 0x572   : > { %v11751_v36 = vpop.f32.mrf.mxu1 }
 0x573   : > { %v11752_v46 = vadd.f32 %v11751_v36, %v11750_v41 }
 0x574   : > { %v11753_v7 = vpop.f32.mrf.mxu1 }
 0x575   : > { %v7645_v14 = vadd.f32 %v11752_v46, %v11708_v31  ;;  %v11717_v31 = vadd.f32 %v11716_v1, %v11715_v37  ;;  %v10769_v1 = vld [vmem:[%s17856_s7 + $0x180] sm:$0xff]  ;;  %v10799_v37 = vld [vmem:[%s17856_s7 + $0x248] sm:$0xff] }
 0x576   : > { %v11754_v38 = vpop.f32.mrf.mxu1  ;;  %v10781_v46 = vld [vmem:[%s17856_s7 + $0x1e0] sm:$0xff] }
 0x577   : > { %v11755_v25 = vadd.f32 %v11754_v38, %v11753_v7  ;;  %13230 = vmatprep.mubr.msk.f32.mxu0 %vm537_vm0, %v7645_v14  ;;  %v10774_v14 = vld [vmem:[%s17856_s7 + $0x1a8] sm:$0xff]  ;;  %v10794_v38 = vld [vmem:[%s17856_s7 + $0x220] sm:$0xff] }
 0x578   : > { %v11756_v4 = vpop.f32.mrf.mxu1  ;;  %v10795_v7 = vld [vmem:[%s17856_s7 + $0x228] sm:$0xff] }
 0x579   : > { %v7650_v45 = vadd.f32 %v11755_v25, %v11711_v15  ;;  %v10785_v15 = vld [vmem:[%s16438_s24 + $0x18] sm:$0xff]  ;;  %8142 = vmatprep.mubr.f32.mxu1 %v10795_v7  ;;  %v10798_v25 = vld [vmem:[%s17856_s7 + $0x240] sm:$0xff] }
 0x57a   : > { %v11757_v52 = vpop.f32.mrf.mxu1  ;;  %8143 = vmatmul.mubr.f32.gmra.mxu1 %v10794_v38 }
 0x57b   : > { %v11758_v49 = vadd.f32 %v11757_v52, %v11756_v4  ;;  %13231 = vmatmul.mubr.msk.f32.vlgmr.msra.gmra.mxu0 %vm537_vm0, %v7650_v45  ;;  %8147 = vmatprep.mubr.f32.mxu1 %v10799_v37  ;;  %v10803_v4 = vld [vmem:[%s17856_s7 + $0x268] sm:$0xff]  ;;  %v10802_v45 = vld [vmem:[%s17856_s7 + $0x260] sm:$0xff] }
 0x57c   : > { %11768 = vmatpush3.msra.mxu0 %v18660_v5  ;;  %v11759_v63 = vpop.f32.mrf.mxu1 }
 0x57d   : > { %v7655_v36 = vadd.f32 %v11758_v49, %v11714_v17  ;;  %11769 = vmatprep.subr.mxu0 %v18661_v40  ;;  %v10770_v49 = vld [vmem:[%s17856_s7 + $0x188] sm:$0xff] }
 0x57e   : > { %11770 = vmatpush3.msra.mxu0 %v18662_v29  ;;  %v11760_v41 = vpop.f32.mrf.mxu1  ;;  %8148 = vmatmul.mubr.f32.gmra.mxu1 %v10798_v25 }
 0x57f   : > { %v11761_v57 = vadd.f32 %v11760_v41, %v11759_v63  ;;  %11771 = vmatprep.subr.mxu0 %v18663_v3  ;;  %13233 = vmatprep.mubr.msk.f32.mxu0 %vm537_vm0, %v7655_v36 }
 0x580   : > { %11772 = vmatpush3.msra.mxu0 %v18664_v47  ;;  %8152 = vmatprep.mubr.f32.mxu1 %v10803_v4 }
 0x581   : > { %v7660_v52 = vadd.f32 %v11761_v57, %v11717_v31  ;;  %11773 = vmatprep.subr.mxu0 %v18665_v35 }
 0x582   : > { %11774 = vmatpush3.msra.mxu0 %v18666_v21  ;;  %8153 = vmatmul.mubr.f32.gmra.mxu1 %v10802_v45 }
 0x583   : > { %11775 = vmatprep.subr.mxu0 %v18667_v44  ;;  %13234 = vmatmul.mubr.msk.f32.gmra.mxu0 %vm537_vm0, %v7660_v52 }
 0x584   : > { %11776 = vmatpush3.msra.mxu0 %v18668_v24  ;;  %7847 = vmatprep.mubr.f32.mxu0 %v10770_v49 }
 0x585   : > { %11777 = vmatprep.subr.mxu0 %v18669_v61 }
 0x586   : > { %11778 = vmatpush3.msra.mxu0 %v18670_v59 }
 0x587   : > { %11779 = vmatprep.subr.mxu0 %v18671_v56 }
 0x588   : > { %11780 = vmatpush3.msra.mxu0 %v18672_v30 }
 0x589   : > { %11781 = vmatprep.subr.mxu0 %v18673_v0 }
 0x58a   : > { %11782 = vmatpush3.msra.mxu0 %v18674_v62 }
 0x58b   : > { %11783 = vmatprep.subr.mxu0 %v18675_v60 }
 0x58c   : > { %11784 = vmatpush3.msra.mxu0 %v18676_v39 }
 0x58d   : > { %11785 = vmatprep.subr.mxu0 %v18677_v13 }
 0x58e   : > { %11786 = vmatpush3.msra.mxu0 %v18678_v6 }
 0x58f   : > { %11787 = vmatprep.subr.mxu0 %v18679_v10 }
 0x590   : > { %11788 = vmatpush3.msra.mxu0 %v18680_v9 }
 0x591   : > { %11789 = vmatprep.subr.mxu0 %v18681_v2 }
 0x592   : > { %11790 = vmatpush3.msra.mxu0 %v18682_v42 }
 0x593   : > { %11791 = vmatprep.subr.mxu0 %v18683_v54 }
 0x594   : > { %11792 = vmatpush3.msra.mxu0 %v18684_v28 }
 0x595   : > { %11793 = vmatprep.subr.mxu0 %v18685_v18 }
 0x596   : > { %11794 = vmatpush3.msra.mxu0 %v18686_v11 }
 0x597   : > { %11795 = vmatprep.subr.mxu0 %v18687_v22 }
 0x598   : > { %11796 = vmatpush3.msra.mxu0 %v18688_v58 }
 0x599   : > { %11797 = vmatprep.subr.mxu0 %v18689_v43 }
 0x59a   : > { %11798 = vmatpush3.msra.mxu0 %v18690_v50 }
 0x59b   : > { %7848 = vmatmul.mubr.f32.vlgmr.msra.gmra.mxu0 %v10769_v1  ;;  %13236 = vmatprep.subr.mxu0 %v10785_v15  ;;  %v11843_v1 = vpop.f32.mrf.mxu1 }
 0x59c   : > { %13237 = vmatpush3.msra.mxu0 %v10785_v15  ;;  %7852 = vmatprep.mubr.f32.mxu0 %v10774_v14 }
 0x59d   : > { %11904 = vmatprep.subr.mxu0 %v16647_v19  ;;  %v11844_v15 = vpop.f32.mrf.mxu1 }
 0x59e   : > { %v11845_v7 = vadd.f32 %v11844_v15, %v11843_v1 }
 0x59f   : > { %7853 = vmatmul.mubr.f32.gmra.mxu0 %v10773_v16  ;;  %v11846_v14 = vpop.f32.mrf.mxu1 }
 0x5a0   : > { %7857 = vmatprep.mubr.f32.mxu0 %v10778_v33 }
 0x5a1   : > { %v11847_v16 = vpop.f32.mrf.mxu1 }
 0x5a2   : > { %v11848_v4 = vadd.f32 %v11847_v16, %v11846_v14 }
 0x5a3   : > { %7858 = vmatmul.mubr.f32.gmra.mxu0 %v10777_v51  ;;  %v11849_v33 = vpop.f32.mrf.mxu1 }
 0x5a4   : > { %7862 = vmatprep.mubr.f32.mxu0 %v10782_v34 }
 0x5a5   : > { %v11850_v34 = vpop.f32.mrf.mxu1 }
 0x5a7   : > { %7863 = vmatmul.mubr.f32.gmra.mxu0 %v10781_v46  ;;  %v11852_v25 = vpop.f32.mrf.mxu1 }
 0x63b   : > { %v13232_v17 = vpop.f32.mrf.mxu0 }
 0x63c   : > { %v17229_v63 = vadd.f32 %v13232_v17, %v17141_v23  ;;  %v11851_v17 = vadd.f32 %v11850_v34, %v11849_v33  ;;  %v18691_v34 = vld [vmem:[#allocation107_spill] sm:$0xff] }
 0x63d   : > { %v7743_v36 = vpop.f32.mrf.mxu0 }
 0x63e   : > { %v17232_v31 = vadd.f32 %v7743_v36, %v17143_v12 }
 0x643   : > { %v13235_v41 = vpop.f32.mrf.mxu0 }
 0x644   : > { %v17235_v57 = vadd.f32 %v13235_v41, %v17145_v8  ;;  %v11853_v41 = vpop.f32.mrf.mxu1 }
 0x645   : > { %v7753_v52 = vpop.f32.mrf.mxu0  ;;  %v11854_v15 = vadd.f32 %v11853_v41, %v11852_v25  ;;  %v18697_v25 = vld [vmem:[#allocation80_spill] sm:$0xff]  ;;  %v18704_v41 = vld [vmem:[#allocation50_spill] sm:$0xff] }
 0x646   : > { %v17238_v49 = vadd.f32 %v7753_v52, %v17147_v27 }
 0x65b   : > { %v11799_v51 = vpop.f32.mrf.mxu0 }
 0x65d   : > { %v11800_v23 = vpop.f32.mrf.mxu0 }
 0x65e   : > { %v11801_v46 = vadd.f32 %v11800_v23, %v11799_v51  ;;  %v10793_v23 = vld [vmem:[%s17856_s7 + $0x218] sm:$0xff] }
 0x65f   : > { %v11802_v12 = vpop.f32.mrf.mxu0 }
 0x660   : > { %v7935_v38 = vadd.f32 %v11845_v7, %v11801_v46  ;;  %v18692_v46 = vld [vmem:[#allocation109_spill] sm:$0xff]  ;;  %v18693_v7 = vld [vmem:[#allocation108_spill] sm:$0xff] }
 0x661   : > { %v11803_v37 = vpop.f32.mrf.mxu0 }
 0x662   : > { %v11804_v8 = vadd.f32 %v11803_v37, %v11802_v12  ;;  %13238 = vmatprep.mubr.msk.f32.mxu0 %vm537_vm0, %v7935_v38  ;;  %v18694_v12 = vld [vmem:[#allocation110_spill] sm:$0xff]  ;;  %v18695_v38 = vld [vmem:[#allocation55_spill] sm:$0xff] }
 0x663   : > { %v11805_v27 = vpop.f32.mrf.mxu0  ;;  %v18696_v37 = vld [vmem:[#allocation79_spill] sm:$0xff] }
 0x664   : > { %v7940_v45 = vadd.f32 %v11848_v4, %v11804_v8  ;;  %v18698_v8 = vld [vmem:[#allocation120_spill] sm:$0xff]  ;;  %v18699_v4 = vld [vmem:[#allocation81_spill] sm:$0xff] }
 0x665   : > { %v11806_v36 = vpop.f32.mrf.mxu0 }
 0x666   : > { %v11807_v52 = vadd.f32 %v11806_v36, %v11805_v27  ;;  %13239 = vmatmul.mubr.msk.f32.vlgmr.msra.gmra.mxu0 %vm537_vm0, %v7940_v45  ;;  %v18700_v27 = vld [vmem:[#allocation48_spill] sm:$0xff]  ;;  %v18701_v45 = vld [vmem:[#allocation117_spill] sm:$0xff]  ;;  %v18703_v36 = vld [vmem:[#allocation118_spill] sm:$0xff] }
 0x667   : > { %11905 = vmatpush3.msra.mxu0 %v16642_v26  ;;  %v11808_v51 = vpop.f32.mrf.mxu0 }
 0x668   : > { %v7945_v1 = vadd.f32 %v11851_v17, %v11807_v52  ;;  %11906 = vmatprep.subr.mxu0 %v16655_v48  ;;  %v18702_v17 = vld [vmem:[#allocation51_spill] sm:$0xff]  ;;  %v18705_v52 = vld [vmem:[#allocation114_spill] sm:$0xff] }
 0x669   : > { %11907 = vmatpush3.msra.mxu0 %v16658_v32  ;;  %v11809_v14 = vpop.f32.mrf.mxu0 }
 0x66a   : > { %v11810_v16 = vadd.f32 %v11809_v14, %v11808_v51  ;;  %11908 = vmatprep.subr.mxu0 %v16664_v20  ;;  %13241 = vmatprep.mubr.msk.f32.mxu0 %vm537_vm0, %v7945_v1  ;;  %v18706_v51 = vld [vmem:[#allocation52_spill] sm:$0xff]  ;;  %v18707_v1 = vld [vmem:[#allocation115_spill] sm:$0xff]  ;;  %v18709_v14 = vld [vmem:[#allocation65_spill] sm:$0xff] }
 0x66b   : > { %11909 = vmatpush3.msra.mxu0 %v16670_v55 }
 0x66c   : > { %v7950_v33 = vadd.f32 %v11854_v15, %v11810_v16  ;;  %11910 = vmatprep.subr.mxu0 %v16676_v53  ;;  %v18708_v15 = vld [vmem:[#allocation106_spill] sm:$0xff]  ;;  %v18710_v16 = vld [vmem:[#allocation63_spill] sm:$0xff] }
 0x66d   : > { %11911 = vmatpush3.msra.mxu0 %v18691_v34 }
 0x66e   : > { %11912 = vmatprep.subr.mxu0 %v18692_v46  ;;  %13242 = vmatmul.mubr.msk.f32.gmra.mxu0 %vm537_vm0, %v7950_v33  ;;  %v18711_v33 = vld [vmem:[#allocation68_spill] sm:$0xff] }
 0x66f   : > { %11913 = vmatpush3.msra.mxu0 %v18693_v7  ;;  %8222 = vmatprep.mubr.f32.mxu0 %v10793_v23  ;;  %v18712_v23 = vld [vmem:[#allocation66_spill] sm:$0xff] }
 0x670   : > { %11914 = vmatprep.subr.mxu0 %v18694_v12 }
 0x671   : > { %11915 = vmatpush3.msra.mxu0 %v18695_v38 }
 0x672   : > { %11916 = vmatprep.subr.mxu0 %v18696_v37 }
 0x673   : > { %11917 = vmatpush3.msra.mxu0 %v18697_v25 }
 0x674   : > { %11918 = vmatprep.subr.mxu0 %v18698_v8 }
 0x675   : > { %11919 = vmatpush3.msra.mxu0 %v18699_v4 }
 0x676   : > { %11920 = vmatprep.subr.mxu0 %v18700_v27 }
 0x677   : > { %11921 = vmatpush3.msra.mxu0 %v18701_v45 }
 0x678   : > { %11922 = vmatprep.subr.mxu0 %v18702_v17  ;;  %v18713_v17 = vld [vmem:[#allocation83_spill] sm:$0xff] }
 0x679   : > { %11923 = vmatpush3.msra.mxu0 %v18703_v36 }
 0x67a   : > { %11924 = vmatprep.subr.mxu0 %v18704_v41  ;;  %v18714_v41 = vld [vmem:[#allocation69_spill] sm:$0xff] }
 0x67b   : > { %11925 = vmatpush3.msra.mxu0 %v18705_v52  ;;  %v10792_v52 = vld [vmem:[%s17856_s7 + $0x210] sm:$0xff] }
 0x67c   : > { %11926 = vmatprep.subr.mxu0 %v18706_v51 }
 0x67d   : > { %11927 = vmatpush3.msra.mxu0 %v18707_v1  ;;  %v18715_v1 = vld [vmem:[#allocation67_spill] sm:$0xff] }
 0x67e   : > { %11928 = vmatprep.subr.mxu0 %v18708_v15  ;;  %v10797_v15 = vld [vmem:[%s17856_s7 + $0x238] sm:$0xff] }
 0x67f   : > { %11929 = vmatpush3.msra.mxu0 %v18709_v14 }
 0x680   : > { %11930 = vmatprep.subr.mxu0 %v18710_v16  ;;  %v18716_v16 = vld [vmem:[#allocation56_spill] sm:$0xff] }
 0x681   : > { %11931 = vmatpush3.msra.mxu0 %v18711_v33 }
 0x682   : > { %11932 = vmatprep.subr.mxu0 %v18712_v23 }
 0x683   : > { %11933 = vmatpush3.msra.mxu0 %v18713_v17  ;;  %v10796_v17 = vld [vmem:[%s17856_s7 + $0x230] sm:$0xff] }
 0x684   : > { %11934 = vmatprep.subr.mxu0 %v18714_v41  ;;  %v10801_v41 = vld [vmem:[%s17856_s7 + $0x258] sm:$0xff] }
 0x685   : > { %11935 = vmatpush3.msra.mxu0 %v18715_v1 }
 0x686   : > { %8223 = vmatmul.mubr.f32.vlgmr.msra.gmra.mxu0 %v10792_v52  ;;  %11953 = vmatprep.subr.mxu0 %v18716_v16  ;;  %v10800_v52 = vld [vmem:[%s17856_s7 + $0x250] sm:$0xff] }
 0x687   : > { %11954 = vmatpush3.msra.mxu0 %v18660_v5  ;;  %8227 = vmatprep.mubr.f32.mxu0 %v10797_v15  ;;  %v10805_v15 = vld [vmem:[%s17856_s7 + $0x278] sm:$0xff] }
 0x688   : > { %11955 = vmatprep.subr.mxu0 %v18661_v40 }
 0x689   : > { %11956 = vmatpush3.msra.mxu0 %v18662_v29 }
 0x68a   : > { %8228 = vmatmul.mubr.f32.gmra.mxu0 %v10796_v17  ;;  %11957 = vmatprep.subr.mxu0 %v18663_v3  ;;  %v10804_v17 = vld [vmem:[%s17856_s7 + $0x270] sm:$0xff] }
 0x68b   : > { %11958 = vmatpush3.msra.mxu0 %v18664_v47  ;;  %8232 = vmatprep.mubr.f32.mxu0 %v10801_v41  ;;  %v10812_v41 = vld [vmem:[%s17856_s7 + $0x288] sm:$0xff] }
 0x68c   : > { %11959 = vmatprep.subr.mxu0 %v18665_v35 }
 0x68d   : > { %11960 = vmatpush3.msra.mxu0 %v18666_v21 }
 0x68e   : > { %8233 = vmatmul.mubr.f32.gmra.mxu0 %v10800_v52  ;;  %11961 = vmatprep.subr.mxu0 %v18667_v44  ;;  %v10827_v52 = vld [vmem:[%s16438_s24 + $0x28] sm:$0xff] }
 0x68f   : > { %11962 = vmatpush3.msra.mxu0 %v18668_v24  ;;  %8237 = vmatprep.mubr.f32.mxu0 %v10805_v15  ;;  %v10811_v15 = vld [vmem:[%s17856_s7 + $0x280] sm:$0xff] }
 0x690   : > { %11963 = vmatprep.subr.mxu0 %v18669_v61 }
 0x691   : > { %11964 = vmatpush3.msra.mxu0 %v18670_v59 }
 0x692   : > { %8238 = vmatmul.mubr.f32.gmra.mxu0 %v10804_v17  ;;  %11965 = vmatprep.subr.mxu0 %v18671_v56  ;;  %v10816_v17 = vld [vmem:[%s17856_s7 + $0x2a8] sm:$0xff] }
 0x693   : > { %11966 = vmatpush3.msra.mxu0 %v18672_v30  ;;  %8427 = vmatprep.mubr.f32.mxu0 %v10812_v41  ;;  %v10815_v41 = vld [vmem:[%s17856_s7 + $0x2a0] sm:$0xff] }
 0x694   : > { %11967 = vmatprep.subr.mxu0 %v18673_v0 }
 0x695   : > { %11968 = vmatpush3.msra.mxu0 %v18674_v62 }
 0x696   : > { %11969 = vmatprep.subr.mxu0 %v18675_v60 }
 0x697   : > { %11970 = vmatpush3.msra.mxu0 %v18676_v39 }
 0x698   : > { %11971 = vmatprep.subr.mxu0 %v18677_v13 }
 0x699   : > { %11972 = vmatpush3.msra.mxu0 %v18678_v6 }
 0x69a   : > { %11973 = vmatprep.subr.mxu0 %v18679_v10 }
 0x69b   : > { %11974 = vmatpush3.msra.mxu0 %v18680_v9 }
 0x69c   : > { %11975 = vmatprep.subr.mxu0 %v18681_v2 }
 0x69d   : > { %11976 = vmatpush3.msra.mxu0 %v18682_v42 }
 0x69e   : > { %11977 = vmatprep.subr.mxu0 %v18683_v54 }
 0x69f   : > { %11978 = vmatpush3.msra.mxu0 %v18684_v28 }
 0x6a0   : > { %11979 = vmatprep.subr.mxu0 %v18685_v18 }
 0x6a1   : > { %11980 = vmatpush3.msra.mxu0 %v18686_v11  ;;  %v11892_v11 = vpop.f32.mrf.mxu1 }
 0x6a2   : > { %11981 = vmatprep.subr.mxu0 %v18687_v22 }
 0x6a3   : > { %11982 = vmatpush3.msra.mxu0 %v18688_v58  ;;  %v11893_v18 = vpop.f32.mrf.mxu1 }
 0x6a4   : > { %11983 = vmatprep.subr.mxu0 %v18689_v43  ;;  %v10820_v43 = vld [vmem:[%s17856_s7 + $0x2c8] sm:$0xff] }
 0x6a5   : > { %11984 = vmatpush3.msra.mxu0 %v18690_v50  ;;  %v11895_v28 = vpop.f32.mrf.mxu1 }
 0x6a6   : > { %13252 = vmatprep.subr.mxu0 %v10827_v52  ;;  %8428 = vmatmul.mubr.f32.vlgmr.msra.gmra.mxu0 %v10811_v15  ;;  %v10824_v15 = vld [vmem:[%s17856_s7 + $0x2e8] sm:$0xff] }
 0x6a7   : > { %13253 = vmatpush3.msra.mxu0 %v10827_v52  ;;  %8432 = vmatprep.mubr.f32.mxu0 %v10816_v17  ;;  %v10819_v52 = vld [vmem:[%s17856_s7 + $0x2c0] sm:$0xff] }
 0x6a8   : > { %12090 = vmatprep.subr.mxu0 %v16647_v19  ;;  %v10823_v17 = vld [vmem:[%s17856_s7 + $0x2e0] sm:$0xff] }
 0x6aa   : > { %8433 = vmatmul.mubr.f32.gmra.mxu0 %v10815_v41 }
 0x6ab   : > { %8437 = vmatprep.mubr.f32.mxu0 %v10820_v43 }
 0x6ae   : > { %8438 = vmatmul.mubr.f32.gmra.mxu0 %v10819_v52 }
 0x6af   : > { %8442 = vmatprep.mubr.f32.mxu0 %v10824_v15 }
 0x6b2   : > { %8443 = vmatmul.mubr.f32.gmra.mxu0 %v10823_v17  ;;  %v11896_v17 = vpop.f32.mrf.mxu1 }
 0x6b4   : > { %v11898_v54 = vpop.f32.mrf.mxu1 }
 0x726   : > { %v13240_v41 = vpop.f32.mrf.mxu0 }
 0x727   : > { %v17358_v19 = vadd.f32 %v13240_v41, %v17229_v63  ;;  %v11899_v41 = vpop.f32.mrf.mxu1 }
 0x728   : > { %v8033_v43 = vpop.f32.mrf.mxu0 }
 0x729   : > { %18717 = vst [vmem:[#allocation71_spill] sm:$0xff] %v17358_v19  ;;  %v17361_v50 = vadd.f32 %v8033_v43, %v17232_v31  ;;  %v11894_v19 = vadd.f32 %v11893_v18, %v11892_v11  ;;  %v11901_v9 = vpop.f32.mrf.mxu1  ;;  %v18724_v11 = vld [vmem:[#allocation115_spill] sm:$0xff] }
 0x72b   : > { %18718 = vst [vmem:[#allocation70_spill] sm:$0xff] %v17361_v50  ;;  %v11902_v10 = vpop.f32.mrf.mxu1 }
 0x72e   : > { %v13243_v58 = vpop.f32.mrf.mxu0 }
 0x72f   : > { %v17364_v52 = vadd.f32 %v13243_v58, %v17235_v57  ;;  %v11897_v58 = vadd.f32 %v11896_v17, %v11895_v28  ;;  %v18723_v28 = vld [vmem:[#allocation114_spill] sm:$0xff]  ;;  %v18727_v17 = vld [vmem:[#allocation83_spill] sm:$0xff] }
 0x730   : > { %v8043_v22 = vpop.f32.mrf.mxu0 }
 0x731   : > { %18719 = vst [vmem:[#allocation5_spill] sm:$0xff] %v17364_v52  ;;  %v17367_v15 = vadd.f32 %v8043_v22, %v17238_v49 }
 0x733   : > { %18720 = vst [vmem:[#allocation4_spill] sm:$0xff] %v17367_v15  ;;  %v11900_v15 = vadd.f32 %v11899_v41, %v11898_v54  ;;  %v18728_v41 = vld [vmem:[#allocation69_spill] sm:$0xff] }
 0x746   : > { %v11936_v42 = vpop.f32.mrf.mxu0 }
 0x748   : > { %v11937_v63 = vpop.f32.mrf.mxu0 }
 0x749   : > { %v11938_v2 = vadd.f32 %v11937_v63, %v11936_v42  ;;  %v10813_v63 = vld [vmem:[%s17856_s7 + $0x290] sm:$0xff] }
 0x74a   : > { %v11939_v31 = vpop.f32.mrf.mxu0 }
 0x74b   : > { %v8225_v43 = vadd.f32 %v11938_v2, %v11894_v19  ;;  %v11903_v19 = vadd.f32 %v11902_v10, %v11901_v9  ;;  %v18721_v10 = vld [vmem:[#allocation51_spill] sm:$0xff]  ;;  %v18722_v9 = vld [vmem:[#allocation50_spill] sm:$0xff] }
 0x74c   : > { %v11940_v50 = vpop.f32.mrf.mxu0 }
 0x74d   : > { %v11941_v57 = vadd.f32 %v11940_v50, %v11939_v31  ;;  %13246 = vmatprep.mubr.msk.f32.mxu1 %vm537_vm0, %v8225_v43  ;;  %v10818_v31 = vld [vmem:[%s17856_s7 + $0x2b8] sm:$0xff]  ;;  %v10817_v43 = vld [vmem:[%s17856_s7 + $0x2b0] sm:$0xff] }
 0x74e   : > { %v11942_v22 = vpop.f32.mrf.mxu0 }
 0x74f   : > { %v8230_v49 = vadd.f32 %v11941_v57, %v11897_v58  ;;  %v10822_v58 = vld [vmem:[%s17856_s7 + $0x2d8] sm:$0xff]  ;;  %v10821_v57 = vld [vmem:[%s17856_s7 + $0x2d0] sm:$0xff] }
 0x750   : > { %v11943_v52 = vpop.f32.mrf.mxu0 }
 0x751   : > { %v11944_v6 = vadd.f32 %v11943_v52, %v11942_v22  ;;  %13247 = vmatmul.mubr.msk.f32.vlgmr.msra.gmra.mxu1 %vm537_vm0, %v8230_v49  ;;  %v18725_v52 = vld [vmem:[#allocation106_spill] sm:$0xff]  ;;  %v10826_v22 = vld [vmem:[%s17856_s7 + $0x2f8] sm:$0xff]  ;;  %v10825_v49 = vld [vmem:[%s17856_s7 + $0x2f0] sm:$0xff] }
 0x752   : > { %11998 = vmatpush3.msra.mxu1 %v16642_v26  ;;  %v11945_v18 = vpop.f32.mrf.mxu0 }
 0x753   : > { %v8235_v42 = vadd.f32 %v11944_v6, %v11900_v15  ;;  %11999 = vmatprep.subr.mxu1 %v16655_v48  ;;  %v10814_v6 = vld [vmem:[%s17856_s7 + $0x298] sm:$0xff]  ;;  %v18726_v15 = vld [vmem:[#allocation63_spill] sm:$0xff] }
 0x754   : > { %12000 = vmatpush3.msra.mxu1 %v16658_v32  ;;  %v11946_v50 = vpop.f32.mrf.mxu0 }
 0x755   : > { %v11947_v2 = vadd.f32 %v11946_v50, %v11945_v18  ;;  %12001 = vmatprep.subr.mxu1 %v16664_v20  ;;  %13249 = vmatprep.mubr.msk.f32.mxu1 %vm537_vm0, %v8235_v42  ;;  %v10833_v18 = vld [vmem:[%s17856_s7 + $0x308] sm:$0xff]  ;;  %v18729_v42 = vld [vmem:[#allocation30_spill] sm:$0xff]  ;;  %v18731_v50 = vld [vmem:[#allocation29_spill] sm:$0xff] }
 0x756   : > { %12002 = vmatpush3.msra.mxu1 %v16670_v55 }
 0x757   : > { %v8240_v54 = vadd.f32 %v11947_v2, %v11903_v19  ;;  %12003 = vmatprep.subr.mxu1 %v16676_v53  ;;  %v18730_v19 = vld [vmem:[#allocation28_spill] sm:$0xff]  ;;  %v18732_v2 = vld [vmem:[#allocation37_spill] sm:$0xff] }
 0x758   : > { %12004 = vmatpush3.msra.mxu1 %v18691_v34 }
 0x759   : > { %12005 = vmatprep.subr.mxu1 %v18692_v46  ;;  %13250 = vmatmul.mubr.msk.f32.gmra.mxu1 %vm537_vm0, %v8240_v54  ;;  %v18733_v54 = vld [vmem:[#allocation40_spill] sm:$0xff] }
 0x75a   : > { %12006 = vmatpush3.msra.mxu1 %v18693_v7  ;;  %8512 = vmatprep.mubr.f32.mxu1 %v10814_v6  ;;  %v18734_v6 = vld [vmem:[#allocation77_spill] sm:$0xff] }
 0x75b   : > { %12007 = vmatprep.subr.mxu1 %v18694_v12 }
 0x75c   : > { %12008 = vmatpush3.msra.mxu1 %v18695_v38 }
 0x75d   : > { %12009 = vmatprep.subr.mxu1 %v18696_v37 }
 0x75e   : > { %12010 = vmatpush3.msra.mxu1 %v18697_v25 }
 0x75f   : > { %12011 = vmatprep.subr.mxu1 %v18698_v8 }
 0x760   : > { %12012 = vmatpush3.msra.mxu1 %v18699_v4 }
 0x761   : > { %12013 = vmatprep.subr.mxu1 %v18700_v27 }
 0x762   : > { %12014 = vmatpush3.msra.mxu1 %v18701_v45 }
 0x763   : > { %12015 = vmatprep.subr.mxu1 %v18721_v10 }
 0x764   : > { %12016 = vmatpush3.msra.mxu1 %v18703_v36 }
 0x765   : > { %12017 = vmatprep.subr.mxu1 %v18722_v9 }
 0x766   : > { %12018 = vmatpush3.msra.mxu1 %v18723_v28 }
 0x767   : > { %12019 = vmatprep.subr.mxu1 %v18706_v51 }
 0x768   : > { %12020 = vmatpush3.msra.mxu1 %v18724_v11 }
 0x769   : > { %12021 = vmatprep.subr.mxu1 %v18725_v52 }
 0x76a   : > { %12022 = vmatpush3.msra.mxu1 %v18709_v14 }
 0x76b   : > { %12023 = vmatprep.subr.mxu1 %v18726_v15 }
 0x76c   : > { %12024 = vmatpush3.msra.mxu1 %v18711_v33 }
 0x76d   : > { %12025 = vmatprep.subr.mxu1 %v18712_v23 }
 0x76e   : > { %12026 = vmatpush3.msra.mxu1 %v18727_v17 }
 0x76f   : > { %12027 = vmatprep.subr.mxu1 %v18728_v41 }
 0x770   : > { %12028 = vmatpush3.msra.mxu1 %v18715_v1 }
 0x771   : > { %8513 = vmatmul.mubr.f32.vlgmr.msra.gmra.mxu1 %v10813_v63  ;;  %12046 = vmatprep.subr.mxu1 %v18716_v16  ;;  %v18735_v63 = vld [vmem:[#allocation31_spill] sm:$0xff] }
 0x772   : > { %12047 = vmatpush3.msra.mxu1 %v18660_v5  ;;  %8517 = vmatprep.mubr.f32.mxu1 %v10818_v31  ;;  %v18736_v31 = vld [vmem:[#allocation32_spill] sm:$0xff] }
 0x773   : > { %12048 = vmatprep.subr.mxu1 %v18661_v40 }
 0x774   : > { %12049 = vmatpush3.msra.mxu1 %v18662_v29 }
 0x775   : > { %8518 = vmatmul.mubr.f32.gmra.mxu1 %v10817_v43  ;;  %12050 = vmatprep.subr.mxu1 %v18663_v3  ;;  %v18737_v43 = vld [vmem:[#allocation43_spill] sm:$0xff] }
 0x776   : > { %12051 = vmatpush3.msra.mxu1 %v18664_v47  ;;  %8522 = vmatprep.mubr.f32.mxu1 %v10822_v58  ;;  %v18738_v58 = vld [vmem:[#allocation45_spill] sm:$0xff] }
 0x777   : > { %12052 = vmatprep.subr.mxu1 %v18665_v35 }
 0x778   : > { %12053 = vmatpush3.msra.mxu1 %v18666_v21 }
 0x779   : > { %8523 = vmatmul.mubr.f32.gmra.mxu1 %v10821_v57  ;;  %12054 = vmatprep.subr.mxu1 %v18667_v44  ;;  %v18739_v57 = vld [vmem:[#allocation78_spill] sm:$0xff] }
 0x77a   : > { %12055 = vmatpush3.msra.mxu1 %v18668_v24  ;;  %8527 = vmatprep.mubr.f32.mxu1 %v10826_v22  ;;  %v10848_v22 = vld [vmem:[%s16438_s24 + $0x30] sm:$0xff] }
 0x77b   : > { %12056 = vmatprep.subr.mxu1 %v18669_v61 }
 0x77c   : > { %12057 = vmatpush3.msra.mxu1 %v18670_v59 }
 0x77d   : > { %8528 = vmatmul.mubr.f32.gmra.mxu1 %v10825_v49  ;;  %12058 = vmatprep.subr.mxu1 %v18671_v56  ;;  %v10832_v49 = vld [vmem:[%s17856_s7 + $0x300] sm:$0xff] }
 0x77e   : > { %12059 = vmatpush3.msra.mxu1 %v18672_v30  ;;  %8717 = vmatprep.mubr.f32.mxu1 %v10833_v18  ;;  %v18740_v18 = vld [vmem:[#allocation33_spill] sm:$0xff] }
 0x77f   : > { %12060 = vmatprep.subr.mxu1 %v18673_v0 }
 0x780   : > { %12061 = vmatpush3.msra.mxu1 %v18674_v62 }
 0x781   : > { %12062 = vmatprep.subr.mxu1 %v18675_v60 }
 0x782   : > { %12063 = vmatpush3.msra.mxu1 %v18676_v39 }
 0x783   : > { %12064 = vmatprep.subr.mxu1 %v18677_v13 }
 0x784   : > { %12065 = vmatpush3.msra.mxu1 %v18729_v42  ;;  %v11985_v42 = vpop.f32.mrf.mxu0 }
 0x785   : > { %12066 = vmatprep.subr.mxu1 %v18730_v19  ;;  %v18749_v19 = vld [vmem:[#allocation4_spill] sm:$0xff] }
 0x786   : > { %12067 = vmatpush3.msra.mxu1 %v18731_v50  ;;  %v11986_v13 = vpop.f32.mrf.mxu0 }
 0x787   : > { %12068 = vmatprep.subr.mxu1 %v18732_v2 }
 0x788   : > { %12069 = vmatpush3.msra.mxu1 %v18733_v54  ;;  %v18741_v54 = vld [vmem:[#allocation35_spill] sm:$0xff]  ;;  %v11988_v39 = vpop.f32.mrf.mxu0 }
 0x789   : > { %12070 = vmatprep.subr.mxu1 %v18734_v6 }
 0x78a   : > { %12071 = vmatpush3.msra.mxu1 %v18735_v63  ;;  %v18742_v63 = vld [vmem:[#allocation112_spill] sm:$0xff] }
 0x78b   : > { %12072 = vmatprep.subr.mxu1 %v18736_v31 }
 0x78c   : > { %12073 = vmatpush3.msra.mxu1 %v18737_v43  ;;  %v18745_v43 = vld [vmem:[#allocation70_spill] sm:$0xff] }
 0x78d   : > { %12074 = vmatprep.subr.mxu1 %v18738_v58  ;;  %v10837_v58 = vld [vmem:[%s17856_s7 + $0x328] sm:$0xff] }
 0x78e   : > { %12075 = vmatpush3.msra.mxu1 %v18739_v57  ;;  %v10836_v57 = vld [vmem:[%s17856_s7 + $0x320] sm:$0xff] }
 0x78f   : > { %12076 = vmatprep.subr.mxu1 %v18740_v18  ;;  %v10841_v18 = vld [vmem:[%s17856_s7 + $0x348] sm:$0xff] }
 0x790   : > { %12077 = vmatpush3.msra.mxu1 %v18741_v54 }
 0x791   : > { %13260 = vmatprep.subr.mxu1 %v10848_v22  ;;  %8718 = vmatmul.mubr.f32.vlgmr.msra.gmra.mxu1 %v10832_v49  ;;  %v10845_v49 = vld [vmem:[%s17856_s7 + $0x368] sm:$0xff] }
 0x792   : > { %13261 = vmatpush3.msra.mxu1 %v10848_v22  ;;  %8722 = vmatprep.mubr.f32.mxu1 %v10837_v58  ;;  %v10840_v22 = vld [vmem:[%s17856_s7 + $0x340] sm:$0xff] }
 0x793   : > { %12183 = vmatprep.subr.mxu1 %v18742_v63  ;;  %v10844_v58 = vld [vmem:[%s17856_s7 + $0x360] sm:$0xff]  ;;  %v18743_v63 = vld [vmem:[#allocation71_spill] sm:$0xff] }
 0x795   : > { %8723 = vmatmul.mubr.f32.gmra.mxu1 %v10836_v57 }
 0x796   : > { %8727 = vmatprep.mubr.f32.mxu1 %v10841_v18 }
 0x799   : > { %8728 = vmatmul.mubr.f32.gmra.mxu1 %v10840_v22  ;;  %v18747_v22 = vld [vmem:[#allocation5_spill] sm:$0xff] }
 0x79a   : > { %8732 = vmatprep.mubr.f32.mxu1 %v10845_v49 }
 0x79d   : > { %8733 = vmatmul.mubr.f32.gmra.mxu1 %v10844_v58  ;;  %v11989_v58 = vpop.f32.mrf.mxu0 }
 0x79f   : > { %v11991_v60 = vpop.f32.mrf.mxu0 }
 0x811   : > { %v13248_v57 = vpop.f32.mrf.mxu1 }
 0x812   : > { %v17487_v54 = vadd.f32 %v13248_v57, %v18743_v63  ;;  %v11992_v57 = vpop.f32.mrf.mxu0 }
 0x813   : > { %v8323_v18 = vpop.f32.mrf.mxu1 }
 0x814   : > { %18744 = vst [vmem:[#allocation85_spill] sm:$0xff] %v17487_v54  ;;  %v17490_v31 = vadd.f32 %v8323_v18, %v18745_v43  ;;  %v11987_v54 = vadd.f32 %v11986_v13, %v11985_v42  ;;  %v11994_v30 = vpop.f32.mrf.mxu0 }
 0x816   : > { %18746 = vst [vmem:[#allocation73_spill] sm:$0xff] %v17490_v31  ;;  %v11995_v56 = vpop.f32.mrf.mxu0 }
 0x819   : > { %v13251_v6 = vpop.f32.mrf.mxu1 }
 0x81a   : > { %v17493_v2 = vadd.f32 %v13251_v6, %v18747_v22  ;;  %v11990_v6 = vadd.f32 %v11989_v58, %v11988_v39  ;;  %v10846_v58 = vld [vmem:[%s17856_s7 + $0x370] sm:$0xff] }
 0x81b   : > { %v8333_v50 = vpop.f32.mrf.mxu1 }
 0x81c   : > { %18748 = vst [vmem:[#allocation72_spill] sm:$0xff] %v17493_v2  ;;  %v17496_v49 = vadd.f32 %v8333_v50, %v18749_v19 }
 0x81e   : > { %18750 = vst [vmem:[#allocation74_spill] sm:$0xff] %v17496_v49  ;;  %v11993_v49 = vadd.f32 %v11992_v57, %v11991_v60  ;;  %v18751_v57 = vld [vmem:[#allocation21_spill] sm:$0xff] }
 0x831   : > { %v12029_v62 = vpop.f32.mrf.mxu1 }
 0x833   : > { %v12030_v63 = vpop.f32.mrf.mxu1 }
 0x834   : > { %v12031_v0 = vadd.f32 %v12030_v63, %v12029_v62  ;;  %v10854_v63 = vld [vmem:[%s17856_s7 + $0x388] sm:$0xff] }
 0x835   : > { %v12032_v43 = vpop.f32.mrf.mxu1 }
 0x836   : > { %v8515_v18 = vadd.f32 %v12031_v0, %v11987_v54  ;;  %v11996_v0 = vadd.f32 %v11995_v56, %v11994_v30  ;;  %v10834_v56 = vld [vmem:[%s17856_s7 + $0x310] sm:$0xff]  ;;  %v10839_v30 = vld [vmem:[%s17856_s7 + $0x338] sm:$0xff] }
 0x837   : > { %v12033_v31 = vpop.f32.mrf.mxu1  ;;  %v10843_v54 = vld [vmem:[%s17856_s7 + $0x358] sm:$0xff] }
 0x838   : > { %v12034_v22 = vadd.f32 %v12033_v31, %v12032_v43  ;;  %13254 = vmatprep.mubr.msk.f32.mxu0 %vm537_vm0, %v8515_v18  ;;  %v10842_v31 = vld [vmem:[%s17856_s7 + $0x350] sm:$0xff]  ;;  %v18753_v18 = vld [vmem:[#allocation23_spill] sm:$0xff] }
 0x839   : > { %v12035_v19 = vpop.f32.mrf.mxu1  ;;  %v18752_v43 = vld [vmem:[#allocation20_spill] sm:$0xff] }
 0x83a   : > { %v8520_v50 = vadd.f32 %v12034_v22, %v11990_v6  ;;  %v18754_v6 = vld [vmem:[#allocation22_spill] sm:$0xff]  ;;  %v18755_v22 = vld [vmem:[#allocation24_spill] sm:$0xff] }
 0x83b   : > { %v12036_v2 = vpop.f32.mrf.mxu1 }
 0x83c   : > { %v12037_v59 = vadd.f32 %v12036_v2, %v12035_v19  ;;  %13255 = vmatmul.mubr.msk.f32.vlgmr.msra.gmra.mxu0 %vm537_vm0, %v8520_v50  ;;  %v10838_v2 = vld [vmem:[%s17856_s7 + $0x330] sm:$0xff]  ;;  %v18756_v19 = vld [vmem:[#allocation26_spill] sm:$0xff]  ;;  %v18757_v50 = vld [vmem:[#allocation25_spill] sm:$0xff] }
 0x83d   : > { %12091 = vmatpush3.msra.mxu0 %v16642_v26  ;;  %v12038_v13 = vpop.f32.mrf.mxu1 }
 0x83e   : > { %v8525_v62 = vadd.f32 %v12037_v59, %v11993_v49  ;;  %12092 = vmatprep.subr.mxu0 %v16655_v48  ;;  %v10835_v59 = vld [vmem:[%s17856_s7 + $0x318] sm:$0xff] }
 0x83f   : > { %12093 = vmatpush3.msra.mxu0 %v16658_v32  ;;  %v12039_v39 = vpop.f32.mrf.mxu1  ;;  %v10847_v49 = vld [vmem:[%s17856_s7 + $0x378] sm:$0xff] }
 0x840   : > { %v12040_v42 = vadd.f32 %v12039_v39, %v12038_v13  ;;  %12094 = vmatprep.subr.mxu0 %v16664_v20  ;;  %13257 = vmatprep.mubr.msk.f32.mxu0 %vm537_vm0, %v8525_v62  ;;  %v18758_v13 = vld [vmem:[#allocation27_spill] sm:$0xff]  ;;  %v18759_v62 = vld [vmem:[#allocation30_spill] sm:$0xff]  ;;  %v18761_v39 = vld [vmem:[#allocation29_spill] sm:$0xff] }
 0x841   : > { %12095 = vmatpush3.msra.mxu0 %v16670_v55 }
 0x842   : > { %v8530_v60 = vadd.f32 %v12040_v42, %v11996_v0  ;;  %12096 = vmatprep.subr.mxu0 %v16676_v53  ;;  %v18760_v0 = vld [vmem:[#allocation28_spill] sm:$0xff]  ;;  %v18762_v42 = vld [vmem:[#allocation37_spill] sm:$0xff] }
 0x843   : > { %12097 = vmatpush3.msra.mxu0 %v18691_v34 }
 0x844   : > { %12098 = vmatprep.subr.mxu0 %v18692_v46  ;;  %13258 = vmatmul.mubr.msk.f32.gmra.mxu0 %vm537_vm0, %v8530_v60  ;;  %v18763_v60 = vld [vmem:[#allocation40_spill] sm:$0xff] }
 0x845   : > { %12099 = vmatpush3.msra.mxu0 %v18693_v7  ;;  %8802 = vmatprep.mubr.f32.mxu0 %v10835_v59  ;;  %v18764_v59 = vld [vmem:[#allocation77_spill] sm:$0xff] }
 0x846   : > { %12100 = vmatprep.subr.mxu0 %v18694_v12 }
 0x847   : > { %12101 = vmatpush3.msra.mxu0 %v18695_v38 }
 0x848   : > { %12102 = vmatprep.subr.mxu0 %v18696_v37 }
 0x849   : > { %12103 = vmatpush3.msra.mxu0 %v18697_v25 }
 0x84a   : > { %12104 = vmatprep.subr.mxu0 %v18698_v8 }
 0x84b   : > { %12105 = vmatpush3.msra.mxu0 %v18699_v4 }
 0x84c   : > { %12106 = vmatprep.subr.mxu0 %v18700_v27 }
 0x84d   : > { %12107 = vmatpush3.msra.mxu0 %v18701_v45 }
 0x84e   : > { %12108 = vmatprep.subr.mxu0 %v18721_v10 }
 0x84f   : > { %12109 = vmatpush3.msra.mxu0 %v18703_v36 }
 0x850   : > { %12110 = vmatprep.subr.mxu0 %v18722_v9 }
 0x851   : > { %12111 = vmatpush3.msra.mxu0 %v18723_v28 }
 0x852   : > { %12112 = vmatprep.subr.mxu0 %v18706_v51 }
 0x853   : > { %12113 = vmatpush3.msra.mxu0 %v18724_v11 }
 0x854   : > { %12114 = vmatprep.subr.mxu0 %v18725_v52 }
 0x855   : > { %12115 = vmatpush3.msra.mxu0 %v18709_v14 }
 0x856   : > { %12116 = vmatprep.subr.mxu0 %v18726_v15 }
 0x857   : > { %12117 = vmatpush3.msra.mxu0 %v18711_v33 }
 0x858   : > { %12118 = vmatprep.subr.mxu0 %v18712_v23 }
 0x859   : > { %12119 = vmatpush3.msra.mxu0 %v18727_v17 }
 0x85a   : > { %12120 = vmatprep.subr.mxu0 %v18728_v41 }
 0x85b   : > { %12121 = vmatpush3.msra.mxu0 %v18715_v1 }
 0x85c   : > { %8803 = vmatmul.mubr.f32.vlgmr.msra.gmra.mxu0 %v10834_v56  ;;  %12139 = vmatprep.subr.mxu0 %v18716_v16  ;;  %v18765_v56 = vld [vmem:[#allocation31_spill] sm:$0xff] }
 0x85d   : > { %12140 = vmatpush3.msra.mxu0 %v18660_v5  ;;  %8807 = vmatprep.mubr.f32.mxu0 %v10839_v30  ;;  %v18766_v30 = vld [vmem:[#allocation32_spill] sm:$0xff] }
 0x85e   : > { %12141 = vmatprep.subr.mxu0 %v18661_v40 }
 0x85f   : > { %12142 = vmatpush3.msra.mxu0 %v18662_v29 }
 0x860   : > { %8808 = vmatmul.mubr.f32.gmra.mxu0 %v10838_v2  ;;  %12143 = vmatprep.subr.mxu0 %v18663_v3  ;;  %v18767_v2 = vld [vmem:[#allocation43_spill] sm:$0xff] }
 0x861   : > { %12144 = vmatpush3.msra.mxu0 %v18664_v47  ;;  %8812 = vmatprep.mubr.f32.mxu0 %v10843_v54  ;;  %v18768_v54 = vld [vmem:[#allocation45_spill] sm:$0xff] }
 0x862   : > { %12145 = vmatprep.subr.mxu0 %v18665_v35 }
 0x863   : > { %12146 = vmatpush3.msra.mxu0 %v18666_v21 }
 0x864   : > { %8813 = vmatmul.mubr.f32.gmra.mxu0 %v10842_v31  ;;  %12147 = vmatprep.subr.mxu0 %v18667_v44  ;;  %v18769_v31 = vld [vmem:[#allocation78_spill] sm:$0xff] }
 0x865   : > { %12148 = vmatpush3.msra.mxu0 %v18668_v24  ;;  %8817 = vmatprep.mubr.f32.mxu0 %v10847_v49  ;;  %v10869_v49 = vld [vmem:[%s16438_s24 + $0x38] sm:$0xff] }
 0x866   : > { %12149 = vmatprep.subr.mxu0 %v18669_v61 }
 0x867   : > { %12150 = vmatpush3.msra.mxu0 %v18751_v57 }
 0x868   : > { %8818 = vmatmul.mubr.f32.gmra.mxu0 %v10846_v58  ;;  %12151 = vmatprep.subr.mxu0 %v18752_v43  ;;  %v10853_v58 = vld [vmem:[%s17856_s7 + $0x380] sm:$0xff] }
 0x869   : > { %12152 = vmatpush3.msra.mxu0 %v18753_v18  ;;  %9007 = vmatprep.mubr.f32.mxu0 %v10854_v63  ;;  %v18770_v63 = vld [vmem:[#allocation33_spill] sm:$0xff] }
 0x86a   : > { %12153 = vmatprep.subr.mxu0 %v18754_v6 }
 0x86b   : > { %12154 = vmatpush3.msra.mxu0 %v18755_v22 }
 0x86c   : > { %12155 = vmatprep.subr.mxu0 %v18756_v19 }
 0x86d   : > { %12156 = vmatpush3.msra.mxu0 %v18757_v50 }
 0x86e   : > { %12157 = vmatprep.subr.mxu0 %v18758_v13 }
 0x86f   : > { %12158 = vmatpush3.msra.mxu0 %v18759_v62  ;;  %v12078_v62 = vpop.f32.mrf.mxu1 }
 0x870   : > { %12159 = vmatprep.subr.mxu0 %v18760_v0  ;;  %v18779_v0 = vld [vmem:[#allocation74_spill] sm:$0xff] }
 0x871   : > { %12160 = vmatpush3.msra.mxu0 %v18761_v39  ;;  %v12079_v13 = vpop.f32.mrf.mxu1 }
 0x872   : > { %12161 = vmatprep.subr.mxu0 %v18762_v42 }
 0x873   : > { %12162 = vmatpush3.msra.mxu0 %v18763_v60  ;;  %v18771_v60 = vld [vmem:[#allocation35_spill] sm:$0xff]  ;;  %v12081_v50 = vpop.f32.mrf.mxu1 }
 0x874   : > { %12163 = vmatprep.subr.mxu0 %v18764_v59 }
 0x875   : > { %12164 = vmatpush3.msra.mxu0 %v18765_v56  ;;  %v18772_v56 = vld [vmem:[#allocation112_spill] sm:$0xff] }
 0x876   : > { %12165 = vmatprep.subr.mxu0 %v18766_v30 }
 0x877   : > { %12166 = vmatpush3.msra.mxu0 %v18767_v2  ;;  %v18775_v2 = vld [vmem:[#allocation73_spill] sm:$0xff] }
 0x878   : > { %12167 = vmatprep.subr.mxu0 %v18768_v54  ;;  %v10858_v54 = vld [vmem:[%s17856_s7 + $0x3a8] sm:$0xff] }
 0x879   : > { %12168 = vmatpush3.msra.mxu0 %v18769_v31  ;;  %v10857_v31 = vld [vmem:[%s17856_s7 + $0x3a0] sm:$0xff] }
 0x87a   : > { %12169 = vmatprep.subr.mxu0 %v18770_v63  ;;  %v10862_v63 = vld [vmem:[%s17856_s7 + $0x3c8] sm:$0xff] }
 0x87b   : > { %12170 = vmatpush3.msra.mxu0 %v18771_v60 }
 0x87c   : > { %13268 = vmatprep.subr.mxu0 %v10869_v49  ;;  %9008 = vmatmul.mubr.f32.vlgmr.msra.gmra.mxu0 %v10853_v58  ;;  %v18773_v58 = vld [vmem:[#allocation85_spill] sm:$0xff] }
 0x87d   : > { %13269 = vmatpush3.msra.mxu0 %v10869_v49  ;;  %9012 = vmatprep.mubr.f32.mxu0 %v10858_v54  ;;  %v10861_v49 = vld [vmem:[%s17856_s7 + $0x3c0] sm:$0xff] }
 0x87e   : > { %12276 = vmatprep.subr.mxu0 %v18772_v56  ;;  %v10866_v56 = vld [vmem:[%s17856_s7 + $0x3e8] sm:$0xff]  ;;  %v10865_v54 = vld [vmem:[%s17856_s7 + $0x3e0] sm:$0xff] }
 0x880   : > { %9013 = vmatmul.mubr.f32.gmra.mxu0 %v10857_v31 }
 0x881   : > { %9017 = vmatprep.mubr.f32.mxu0 %v10862_v63 }
 0x884   : > { %9018 = vmatmul.mubr.f32.gmra.mxu0 %v10861_v49  ;;  %v18777_v49 = vld [vmem:[#allocation72_spill] sm:$0xff] }
 0x885   : > { %9022 = vmatprep.mubr.f32.mxu0 %v10866_v56 }
 0x888   : > { %9023 = vmatmul.mubr.f32.gmra.mxu0 %v10865_v54  ;;  %v12082_v54 = vpop.f32.mrf.mxu1 }
 0x88a   : > { %v12084_v19 = vpop.f32.mrf.mxu1 }
 0x8fc   : > { %v13256_v31 = vpop.f32.mrf.mxu0 }
 0x8fd   : > { %v17616_v60 = vadd.f32 %v13256_v31, %v18773_v58  ;;  %v12085_v58 = vpop.f32.mrf.mxu1 }
 0x8fe   : > { %v8613_v63 = vpop.f32.mrf.mxu0 }
 0x8ff   : > { %18774 = vst [vmem:[#allocation6_spill] sm:$0xff] %v17616_v60  ;;  %v17619_v30 = vadd.f32 %v8613_v63, %v18775_v2  ;;  %v12080_v60 = vadd.f32 %v12079_v13, %v12078_v62  ;;  %v12087_v18 = vpop.f32.mrf.mxu1 }
 0x901   : > { %18776 = vst [vmem:[#allocation7_spill] sm:$0xff] %v17619_v30  ;;  %v12088_v43 = vpop.f32.mrf.mxu1 }
 0x904   : > { %v13259_v59 = vpop.f32.mrf.mxu0 }
 0x905   : > { %v17622_v42 = vadd.f32 %v13259_v59, %v18777_v49  ;;  %v12083_v59 = vadd.f32 %v12082_v54, %v12081_v50  ;;  %v18791_v54 = vld [vmem:[#allocation29_spill] sm:$0xff] }
 0x906   : > { %v8623_v39 = vpop.f32.mrf.mxu0 }
 0x907   : > { %18778 = vst [vmem:[#allocation75_spill] sm:$0xff] %v17622_v42  ;;  %v17625_v56 = vadd.f32 %v8623_v39, %v18779_v0 }
 0x909   : > { %18780 = vst [vmem:[#allocation9_spill] sm:$0xff] %v17625_v56  ;;  %v12086_v56 = vadd.f32 %v12085_v58, %v12084_v19  ;;  %v18793_v58 = vld [vmem:[#allocation40_spill] sm:$0xff] }
 0x91c   : > { %v12122_v22 = vpop.f32.mrf.mxu0 }
 0x91e   : > { %v12123_v31 = vpop.f32.mrf.mxu0 }
 0x91f   : > { %v12124_v6 = vadd.f32 %v12123_v31, %v12122_v22  ;;  %v18792_v31 = vld [vmem:[#allocation37_spill] sm:$0xff] }
 0x920   : > { %v12125_v2 = vpop.f32.mrf.mxu0 }
 0x921   : > { %v8805_v63 = vadd.f32 %v12124_v6, %v12080_v60  ;;  %v12089_v6 = vadd.f32 %v12088_v43, %v12087_v18  ;;  %v10855_v43 = vld [vmem:[%s17856_s7 + $0x390] sm:$0xff]  ;;  %v10860_v18 = vld [vmem:[%s17856_s7 + $0x3b8] sm:$0xff] }
 0x922   : > { %v12126_v30 = vpop.f32.mrf.mxu0  ;;  %v10864_v60 = vld [vmem:[%s17856_s7 + $0x3d8] sm:$0xff] }
 0x923   : > { %v12127_v49 = vadd.f32 %v12126_v30, %v12125_v2  ;;  %13262 = vmatprep.mubr.msk.f32.mxu1 %vm537_vm0, %v8805_v63  ;;  %v18788_v30 = vld [vmem:[#allocation27_spill] sm:$0xff]  ;;  %v18794_v2 = vld [vmem:[#allocation77_spill] sm:$0xff] }
 0x924   : > { %v12128_v0 = vpop.f32.mrf.mxu0  ;;  %v18795_v63 = vld [vmem:[#allocation31_spill] sm:$0xff] }
 0x925   : > { %v8810_v39 = vadd.f32 %v12127_v49, %v12083_v59  ;;  %v18796_v59 = vld [vmem:[#allocation32_spill] sm:$0xff]  ;;  %v18797_v49 = vld [vmem:[#allocation43_spill] sm:$0xff] }
 0x926   : > { %v12129_v42 = vpop.f32.mrf.mxu0 }
 0x927   : > { %v12130_v57 = vadd.f32 %v12129_v42, %v12128_v0  ;;  %13263 = vmatmul.mubr.msk.f32.vlgmr.msra.gmra.mxu1 %vm537_vm0, %v8810_v39  ;;  %v10859_v42 = vld [vmem:[%s17856_s7 + $0x3b0] sm:$0xff]  ;;  %v18798_v0 = vld [vmem:[#allocation45_spill] sm:$0xff]  ;;  %v18799_v39 = vld [vmem:[#allocation78_spill] sm:$0xff] }
 0x928   : > { %12184 = vmatpush3.msra.mxu1 %v16642_v26  ;;  %v12131_v13 = vpop.f32.mrf.mxu0 }
 0x929   : > { %v8815_v22 = vadd.f32 %v12130_v57, %v12086_v56  ;;  %12185 = vmatprep.subr.mxu1 %v16655_v48  ;;  %v10856_v57 = vld [vmem:[%s17856_s7 + $0x398] sm:$0xff]  ;;  %v18789_v56 = vld [vmem:[#allocation30_spill] sm:$0xff] }
 0x92a   : > { %12186 = vmatpush3.msra.mxu1 %v16658_v32  ;;  %v12132_v50 = vpop.f32.mrf.mxu0 }
 0x92b   : > { %v12133_v62 = vadd.f32 %v12132_v50, %v12131_v13  ;;  %12187 = vmatprep.subr.mxu1 %v16664_v20  ;;  %13265 = vmatprep.mubr.msk.f32.mxu1 %vm537_vm0, %v8815_v22  ;;  %v18800_v13 = vld [vmem:[#allocation33_spill] sm:$0xff]  ;;  %v18801_v22 = vld [vmem:[#allocation35_spill] sm:$0xff]  ;;  %v10874_v50 = vld [vmem:[%s17856_s7 + $0x400] sm:$0xff] }
 0x92c   : > { %12188 = vmatpush3.msra.mxu1 %v16670_v55 }
 0x92d   : > { %v8820_v19 = vadd.f32 %v12133_v62, %v12089_v6  ;;  %12189 = vmatprep.subr.mxu1 %v16676_v53  ;;  %v10875_v6 = vld [vmem:[%s17856_s7 + $0x408] sm:$0xff] }
 0x92e   : > { %12190 = vmatpush3.msra.mxu1 %v18691_v34  ;;  %v10879_v62 = vld [vmem:[%s17856_s7 + $0x428] sm:$0xff] }
 0x92f   : > { %12191 = vmatprep.subr.mxu1 %v18692_v46  ;;  %13266 = vmatmul.mubr.msk.f32.gmra.mxu1 %vm537_vm0, %v8820_v19  ;;  %v10878_v19 = vld [vmem:[%s17856_s7 + $0x420] sm:$0xff] }
 0x930   : > { %12192 = vmatpush3.msra.mxu1 %v18693_v7  ;;  %9092 = vmatprep.mubr.f32.mxu1 %v10856_v57  ;;  %v10883_v57 = vld [vmem:[%s17856_s7 + $0x448] sm:$0xff] }
 0x931   : > { %12193 = vmatprep.subr.mxu1 %v18694_v12 }
 0x932   : > { %12194 = vmatpush3.msra.mxu1 %v18695_v38 }
 0x933   : > { %12195 = vmatprep.subr.mxu1 %v18696_v37 }
 0x934   : > { %12196 = vmatpush3.msra.mxu1 %v18697_v25 }
 0x935   : > { %12197 = vmatprep.subr.mxu1 %v18698_v8 }
 0x936   : > { %12198 = vmatpush3.msra.mxu1 %v18699_v4 }
 0x937   : > { %12199 = vmatprep.subr.mxu1 %v18700_v27 }
 0x938   : > { %12200 = vmatpush3.msra.mxu1 %v18701_v45 }
 0x939   : > { %12201 = vmatprep.subr.mxu1 %v18721_v10 }
 0x93a   : > { %12202 = vmatpush3.msra.mxu1 %v18703_v36 }
 0x93b   : > { %12203 = vmatprep.subr.mxu1 %v18722_v9 }
 0x93c   : > { %12204 = vmatpush3.msra.mxu1 %v18723_v28 }
 0x93d   : > { %12205 = vmatprep.subr.mxu1 %v18706_v51 }
 0x93e   : > { %12206 = vmatpush3.msra.mxu1 %v18724_v11 }
 0x93f   : > { %12207 = vmatprep.subr.mxu1 %v18725_v52 }
 0x940   : > { %12208 = vmatpush3.msra.mxu1 %v18709_v14 }
 0x941   : > { %12209 = vmatprep.subr.mxu1 %v18726_v15 }
 0x942   : > { %12210 = vmatpush3.msra.mxu1 %v18711_v33 }
 0x943   : > { %12211 = vmatprep.subr.mxu1 %v18712_v23 }
 0x944   : > { %12212 = vmatpush3.msra.mxu1 %v18727_v17 }
 0x945   : > { %12213 = vmatprep.subr.mxu1 %v18728_v41 }
 0x946   : > { %12214 = vmatpush3.msra.mxu1 %v18715_v1 }
 0x947   : > { %9093 = vmatmul.mubr.f32.vlgmr.msra.gmra.mxu1 %v10855_v43  ;;  %12232 = vmatprep.subr.mxu1 %v18716_v16  ;;  %v18785_v16 = vld [vmem:[#allocation24_spill] sm:$0xff]  ;;  %v10882_v43 = vld [vmem:[%s17856_s7 + $0x440] sm:$0xff] }
 0x948   : > { %12233 = vmatpush3.msra.mxu1 %v18660_v5  ;;  %9097 = vmatprep.mubr.f32.mxu1 %v10860_v18  ;;  %v10863_v5 = vld [vmem:[%s17856_s7 + $0x3d0] sm:$0xff]  ;;  %v10887_v18 = vld [vmem:[%s17856_s7 + $0x468] sm:$0xff] }
 0x949   : > { %12234 = vmatprep.subr.mxu1 %v18661_v40  ;;  %v10868_v40 = vld [vmem:[%s17856_s7 + $0x3f8] sm:$0xff] }
 0x94a   : > { %12235 = vmatpush3.msra.mxu1 %v18662_v29  ;;  %v10867_v29 = vld [vmem:[%s17856_s7 + $0x3f0] sm:$0xff] }
 0x94b   : > { %9098 = vmatmul.mubr.f32.gmra.mxu1 %v10859_v42  ;;  %12236 = vmatprep.subr.mxu1 %v18663_v3  ;;  %v18781_v3 = vld [vmem:[#allocation21_spill] sm:$0xff]  ;;  %v10886_v42 = vld [vmem:[%s17856_s7 + $0x460] sm:$0xff] }
 0x94c   : > { %12237 = vmatpush3.msra.mxu1 %v18664_v47  ;;  %9102 = vmatprep.mubr.f32.mxu1 %v10864_v60  ;;  %v18782_v47 = vld [vmem:[#allocation20_spill] sm:$0xff] }
 0x94d   : > { %12238 = vmatprep.subr.mxu1 %v18665_v35  ;;  %v18783_v35 = vld [vmem:[#allocation23_spill] sm:$0xff] }
 0x94e   : > { %12239 = vmatpush3.msra.mxu1 %v18666_v21  ;;  %v18784_v21 = vld [vmem:[#allocation22_spill] sm:$0xff] }
 0x94f   : > { %9103 = vmatmul.mubr.f32.gmra.mxu1 %v10863_v5  ;;  %12240 = vmatprep.subr.mxu1 %v18667_v44  ;;  %v18786_v44 = vld [vmem:[#allocation26_spill] sm:$0xff] }
 0x950   : > { %12241 = vmatpush3.msra.mxu1 %v18668_v24  ;;  %9107 = vmatprep.mubr.f32.mxu1 %v10868_v40  ;;  %v18787_v24 = vld [vmem:[#allocation25_spill] sm:$0xff]  ;;  %v18802_v5 = vld [vmem:[#allocation6_spill] sm:$0xff] }
 0x951   : > { %12242 = vmatprep.subr.mxu1 %v18669_v61  ;;  %v18790_v61 = vld [vmem:[#allocation28_spill] sm:$0xff] }
 0x952   : > { %12243 = vmatpush3.msra.mxu1 %v18781_v3  ;;  %v18803_v3 = vld [vmem:[#allocation7_spill] sm:$0xff] }
 0x953   : > { %9108 = vmatmul.mubr.f32.gmra.mxu1 %v10867_v29  ;;  %12244 = vmatprep.subr.mxu1 %v18782_v47 }
 0x954   : > { %12245 = vmatpush3.msra.mxu1 %v18783_v35  ;;  %9297 = vmatprep.mubr.f32.mxu1 %v10875_v6 }
 0x955   : > { %12246 = vmatprep.subr.mxu1 %v18784_v21  ;;  %v18804_v21 = vld [vmem:[#allocation75_spill] sm:$0xff] }
 0x956   : > { %12247 = vmatpush3.msra.mxu1 %v18785_v16 }
 0x957   : > { %12248 = vmatprep.subr.mxu1 %v18786_v44 }
 0x958   : > { %12249 = vmatpush3.msra.mxu1 %v18787_v24  ;;  %v18805_v24 = vld [vmem:[#allocation9_spill] sm:$0xff] }
 0x959   : > { %12250 = vmatprep.subr.mxu1 %v18788_v30 }
 0x95a   : > { %12251 = vmatpush3.msra.mxu1 %v18789_v56  ;;  %v12171_v56 = vpop.f32.mrf.mxu0 }
 0x95b   : > { %12252 = vmatprep.subr.mxu1 %v18790_v61 }
 0x95c   : > { %12253 = vmatpush3.msra.mxu1 %v18791_v54  ;;  %v12172_v61 = vpop.f32.mrf.mxu0 }
 0x95d   : > { %12254 = vmatprep.subr.mxu1 %v18792_v31 }
 0x95e   : > { %12255 = vmatpush3.msra.mxu1 %v18793_v58  ;;  %v12174_v54 = vpop.f32.mrf.mxu0 }
 0x95f   : > { %12256 = vmatprep.subr.mxu1 %v18794_v2 }
 0x960   : > { %12257 = vmatpush3.msra.mxu1 %v18795_v63  ;;  %v12175_v31 = vpop.f32.mrf.mxu0 }
 0x961   : > { %12258 = vmatprep.subr.mxu1 %v18796_v59 }
 0x962   : > { %12259 = vmatpush3.msra.mxu1 %v18797_v49  ;;  %v12177_v58 = vpop.f32.mrf.mxu0  ;;  %v12173_v49 = vadd.f32 %v12172_v61, %v12171_v56 }
 0x963   : > { %12260 = vmatprep.subr.mxu1 %v18798_v0 }
 0x964   : > { %12261 = vmatpush3.msra.mxu1 %v18799_v39  ;;  %v12178_v59 = vpop.f32.mrf.mxu0 }
 0x965   : > { %12262 = vmatprep.subr.mxu1 %v18800_v13 }
 0x966   : > { %12263 = vmatpush3.msra.mxu1 %v18801_v22  ;;  %v12180_v6 = vpop.f32.mrf.mxu0 }
 0x967   : > { %9298 = vmatmul.mubr.f32.vlgmr.msra.gmra.mxu1 %v10874_v50  ;;  %v12176_v50 = vadd.f32 %v12175_v31, %v12174_v54 }
 0x968   : > { %9302 = vmatprep.mubr.f32.mxu1 %v10879_v62 }
 0x96b   : > { %9303 = vmatmul.mubr.f32.gmra.mxu1 %v10878_v19 }
 0x96c   : > { %9307 = vmatprep.mubr.f32.mxu1 %v10883_v57 }
 0x96f   : > { %9308 = vmatmul.mubr.f32.gmra.mxu1 %v10882_v43  ;;  %v12179_v43 = vadd.f32 %v12178_v59, %v12177_v58 }
 0x970   : > { %9312 = vmatprep.mubr.f32.mxu1 %v10887_v18 }
 0x973   : > { %9313 = vmatmul.mubr.f32.gmra.mxu1 %v10886_v42  ;;  %v12181_v42 = vpop.f32.mrf.mxu0 }
 0x9e7   : > { %v13264_v60 = vpop.f32.mrf.mxu1 }
 0x9e8   : > { %v17743_v40 = vadd.f32 %v13264_v60, %v18802_v5 }
 0x9e9   : > { %v8903_v29 = vpop.f32.mrf.mxu1 }
 0x9ea   : > { %v17746_v47 = vadd.f32 %v8903_v29, %v18803_v3  ;;  %v12182_v3 = vadd.f32 %v12181_v42, %v12180_v6 }
 0x9ef   : > { %v13267_v35 = vpop.f32.mrf.mxu1 }
 0x9f0   : > { %v17749_v16 = vadd.f32 %v13267_v35, %v18804_v21 }
 0x9f1   : > { %v8913_v44 = vpop.f32.mrf.mxu1 }
 0x9f2   : > { %v17752_v30 = vadd.f32 %v8913_v44, %v18805_v24 }
 0xa07   : > { %v12215_v2 = vpop.f32.mrf.mxu1 }
 0xa09   : > { %v12216_v63 = vpop.f32.mrf.mxu1 }
 0xa0a   : > { %v12217_v0 = vadd.f32 %v12216_v63, %v12215_v2 }
 0xa0b   : > { %v12218_v39 = vpop.f32.mrf.mxu1 }
 0xa0c   : > { %v9095_v13 = vadd.f32 %v12217_v0, %v12173_v49  ;;  %v13317_v0 = vmov 0.0  }
 0xa0d   : > { %v12219_v22 = vpop.f32.mrf.mxu1 }
 0xa0e   : > { %v12220_v62 = vadd.f32 %v12219_v22, %v12218_v39  ;;  %13270 = vmatprep.mubr.msk.f32.mxu0 %vm537_vm0, %v9095_v13  ;;  %v13319_v39 = vmov 0  }
 0xa0f   : > { %v12221_v19 = vpop.f32.mrf.mxu1  ;;  %13308 = vset.pattern.permute.xlu0 %v13319_v39 }
 0xa10   : > { %v9100_v57 = vadd.f32 %v12220_v62, %v12176_v50 }
 0xa11   : > { %v12222_v18 = vpop.f32.mrf.mxu1 }
 0xa12   : > { %v12223_v60 = vadd.f32 %v12222_v18, %v12221_v19  ;;  %13271 = vmatmul.mubr.msk.f32.vlgmr.msra.gmra.mxu0 %vm537_vm0, %v9100_v57  ;;  %v10895_v19 = vld [vmem:[%s393_s9] ss:$0 sm:$0xff] }
 0xa13   : > { %12277 = vmatpush3.msra.mxu0 %v16642_v26  ;;  %v12224_v5 = vpop.f32.mrf.mxu1  ;;  %v10877_v26 = vld [vmem:[%s17856_s7 + $0x418] sm:$0xff] }
 0xa14   : > { %v9105_v29 = vadd.f32 %v12223_v60, %v12179_v43  ;;  %12278 = vmatprep.subr.mxu0 %v16655_v48  ;;  %v10876_v48 = vld [vmem:[%s17856_s7 + $0x410] sm:$0xff] }
 0xa15   : > { %12279 = vmatpush3.msra.mxu0 %v16658_v32  ;;  %v12225_v35 = vpop.f32.mrf.mxu1  ;;  %v10881_v32 = vld [vmem:[%s17856_s7 + $0x438] sm:$0xff] }
 0xa16   : > { %v12226_v21 = vadd.f32 %v12225_v35, %v12224_v5  ;;  %12280 = vmatprep.subr.mxu0 %v16664_v20  ;;  %13273 = vmatprep.mubr.msk.f32.mxu0 %vm537_vm0, %v9105_v29  ;;  %v10880_v20 = vld [vmem:[%s17856_s7 + $0x430] sm:$0xff] }
 0xa17   : > { %12281 = vmatpush3.msra.mxu0 %v16670_v55  ;;  %v10885_v55 = vld [vmem:[%s17856_s7 + $0x458] sm:$0xff] }
 0xa18   : > { %v9110_v44 = vadd.f32 %v12226_v21, %v12182_v3  ;;  %12282 = vmatprep.subr.mxu0 %v16676_v53  ;;  %v10884_v53 = vld [vmem:[%s17856_s7 + $0x450] sm:$0xff] }
 0xa19   : > { %12283 = vmatpush3.msra.mxu0 %v18691_v34  ;;  %v10889_v34 = vld [vmem:[%s17856_s7 + $0x478] sm:$0xff] }
 0xa1a   : > { %12284 = vmatprep.subr.mxu0 %v18692_v46  ;;  %13274 = vmatmul.mubr.msk.f32.gmra.mxu0 %vm537_vm0, %v9110_v44  ;;  %v10888_v46 = vld [vmem:[%s17856_s7 + $0x470] sm:$0xff] }
 0xa1b   : > { %12285 = vmatpush3.msra.mxu0 %v18693_v7  ;;  %9382 = vmatprep.mubr.f32.mxu0 %v10877_v26  ;;  %v10890_v7 = vld [vmem:[%s16438_s24 + $0x40] sm:$0xff]  ;;  %s17823_s24 = sshll.u32 %s18807_s28, 3 }
 0xa1c   : > { %12286 = vmatprep.subr.mxu0 %v18694_v12  ;;  %13276 = vmatprep.subr.mxu1 %v10890_v7  ;;  %s401_s26 = scalar_lea.vmem %s17855_s6, %s17823_s24  ;;  %s397_s11 = scalar_lea.vmem %s17854_s5, %s17823_s24 }
 0xa1d   : > { %12287 = vmatpush3.msra.mxu0 %v18695_v38  ;;  %13277 = vmatpush3.msra.mxu1 %v10890_v7  ;;  %v9530_v13 = vld [vmem:[%s401_s26] sm:$0xff]  ;;  %s405_s14 = scalar_lea.vmem %s17857_s8, %s17823_s24 }
 0xa1e   : > { %12288 = vmatprep.subr.mxu0 %v18696_v37  ;;  %9533 = vperm.xlu0 %13308, %v9530_v13  }
 0xa1f   : > { %12289 = vmatpush3.msra.mxu0 %v18697_v25 }
 0xa20   : > { %12290 = vmatprep.subr.mxu0 %v18698_v8 }
 0xa21   : > { %12291 = vmatpush3.msra.mxu0 %v18699_v4 }
 0xa22   : > { %12292 = vmatprep.subr.mxu0 %v18700_v27 }
 0xa23   : > { %12293 = vmatpush3.msra.mxu0 %v18701_v45 }
 0xa24   : > { %12294 = vmatprep.subr.mxu0 %v18721_v10 }
 0xa25   : > { %12295 = vmatpush3.msra.mxu0 %v18703_v36 }
 0xa26   : > { %12296 = vmatprep.subr.mxu0 %v18722_v9 }
 0xa27   : > { %12297 = vmatpush3.msra.mxu0 %v18723_v28  ;;  %v12264_v36 = vpop.f32.mrf.mxu1 }
 0xa28   : > { %12298 = vmatprep.subr.mxu0 %v18706_v51 }
 0xa29   : > { %12299 = vmatpush3.msra.mxu0 %v18724_v11  ;;  %v12265_v51 = vpop.f32.mrf.mxu1 }
 0xa2a   : > { %12300 = vmatprep.subr.mxu0 %v18725_v52  ;;  %v12266_v9 = vadd.f32 %v12265_v51, %v12264_v36 }
 0xa2b   : > { %12301 = vmatpush3.msra.mxu0 %v18709_v14 }
 0xa2c   : > { %12302 = vmatprep.subr.mxu0 %v18726_v15 }
 0xa2d   : > { %12303 = vmatpush3.msra.mxu0 %v18711_v33 }
 0xa2e   : > { %12304 = vmatprep.subr.mxu0 %v18712_v23 }
 0xa2f   : > { %12305 = vmatpush3.msra.mxu0 %v18727_v17 }
 0xa30   : > { %12306 = vmatprep.subr.mxu0 %v18728_v41 }
 0xa31   : > { %12307 = vmatpush3.msra.mxu0 %v18715_v1  ;;  %v12267_v1 = vpop.f32.mrf.mxu1 }
 0xa32   : > { %9383 = vmatmul.mubr.f32.vlgmr.msra.gmra.mxu0 %v10876_v48  ;;  %13284 = vmatprep.subr.mxu0 %v13317_v0 }
 0xa33   : > { %9387 = vmatprep.mubr.f32.mxu0 %v10881_v32  ;;  %v12268_v14 = vpop.f32.mrf.mxu1 }
 0xa34   : > { %v12269_v41 = vadd.f32 %v12268_v14, %v12267_v1 }
 0xa35   : > { %v12270_v23 = vpop.f32.mrf.mxu1 }
 0xa36   : > { %9388 = vmatmul.mubr.f32.gmra.mxu0 %v10880_v20 }
 0xa37   : > { %9392 = vmatprep.mubr.f32.mxu0 %v10885_v55  ;;  %v12271_v52 = vpop.f32.mrf.mxu1 }
 0xa38   : > { %v12272_v56 = vadd.f32 %v12271_v52, %v12270_v23 }
 0xa3a   : > { %9393 = vmatmul.mubr.f32.gmra.mxu0 %v10884_v53  ;;  %v9529_v53 = vld [vmem:[%s397_s11] sm:$0xff] }
 0xa3b   : > { %9397 = vmatprep.mubr.f32.mxu0 %v10889_v34 }
 0xa3e   : > { %9398 = vmatmul.mubr.f32.gmra.mxu0 %v10888_v46 }
 0xa3f   : > { %13292 = vmatprep.mubr.msk.f32.mxu0 %vm13318_vm5, %v13317_v0 }
 0xa99   : > { %v9534_v34 = vpop.permute.xlu0 %9533 }
 0xad2   : > { %v13272_v12 = vpop.f32.mrf.mxu0 }
 0xad3   : > { %v9213_v38 = vadd.f32 %v13272_v12, %v17743_v40 }
 0xad4   : > { %v9193_v37 = vpop.f32.mrf.mxu0 }
 0xad5   : > { %v9212_v25 = vadd.f32 %v9193_v37, %v17746_v47 }
 0xada   : > { %v13275_v8 = vpop.f32.mrf.mxu0 }
 0xadb   : > { %v9215_v4 = vadd.f32 %v13275_v8, %v17749_v16  ;;  %v12273_v16 = vpop.f32.mrf.mxu1 }
 0xadc   : > { %v9203_v27 = vpop.f32.mrf.mxu0 }
 0xadd   : > { %v9214_v45 = vadd.f32 %v9203_v27, %v17752_v30  ;;  %v12274_v31 = vpop.f32.mrf.mxu1 }
 0xade   : > { %v12275_v63 = vadd.f32 %v12274_v31, %v12273_v16 }
 0xaf2   : > { %v12308_v33 = vpop.f32.mrf.mxu0 }
 0xaf4   : > { %v12309_v10 = vpop.f32.mrf.mxu0 }
 0xaf5   : > { %v12310_v28 = vadd.f32 %v12309_v10, %v12308_v33 }
 0xaf6   : > { %v12311_v11 = vpop.f32.mrf.mxu0 }
 0xaf7   : > { %v9385_v15 = vadd.f32 %v12310_v28, %v12266_v9 }
 0xaf8   : > { %v12312_v17 = vpop.f32.mrf.mxu0 }
 0xaf9   : > { %v12313_v40 = vadd.f32 %v12312_v17, %v12311_v11  ;;  %13278 = vmatprep.mubr.msk.f32.mxu1 %vm537_vm0, %v9385_v15 }
 0xafa   : > { %v12314_v47 = vpop.f32.mrf.mxu0 }
 0xafb   : > { %v9390_v24 = vadd.f32 %v12313_v40, %v12269_v41 }
 0xafc   : > { %v12315_v30 = vpop.f32.mrf.mxu0 }
 0xafd   : > { %v12316_v61 = vadd.f32 %v12315_v30, %v12314_v47  ;;  %13279 = vmatmul.mubr.msk.f32.vlgmr.msra.gmra.mxu1 %vm537_vm0, %v9390_v24 }
 0xafe   : > { %v12317_v54 = vpop.f32.mrf.mxu0 }
 0xaff   : > { %v9395_v58 = vadd.f32 %v12316_v61, %v12272_v56 }
 0xb00   : > { %v12318_v2 = vpop.f32.mrf.mxu0 }
 0xb01   : > { %v12319_v59 = vadd.f32 %v12318_v2, %v12317_v54  ;;  %13281 = vmatprep.mubr.msk.f32.mxu1 %vm537_vm0, %v9395_v58 }
 0xb03   : > { %v9400_v49 = vadd.f32 %v12319_v59, %v12275_v63 }
 0xb05   : > { %13282 = vmatmul.mubr.msk.f32.gmra.mxu1 %vm537_vm0, %v9400_v49 }
 0xbbd   : > { %v13280_v22 = vpop.f32.mrf.mxu1 }
 0xbbe   : > { %v9503_v43 = vadd.f32 %v13280_v22, %v9213_v38 }
 0xbbf   : > { %v9483_v6 = vpop.f32.mrf.mxu1 }
 0xbc0   : > { %v9514_v29 = vadd.f32 %v10895_v19, %v9503_v43  ;;  %v9502_v3 = vadd.f32 %v9483_v6, %v9212_v25 }
 0xbc2   : > { %v9522_v44 = vmul.f32 0.01, %v9514_v29  ;;  %v9513_v26 = vadd.f32 %v10895_v19, %v9502_v3  ;;  %vm9518_vm8 = vcmp.ge.f32.partialorder %v9514_v29, 0.0 }
 0xbc4   : > { %v9521_v32 = vmul.f32 0.01, %v9513_v26  ;;  %v9526_v20 = vsel %vm9518_vm8, %v9514_v29, %v9522_v44  ;;  %vm9517_vm9 = vcmp.ge.f32.partialorder %v9513_v26, 0.0 }
 0xbc5   : > { %v13283_v50 = vpop.f32.mrf.mxu1 }
 0xbc6   : > { %v9505_v62 = vadd.f32 %v13283_v50, %v9215_v4  ;;  %v9525_v55 = vsel %vm9517_vm9, %v9513_v26, %v9521_v32 }
 0xbc7   : > { %v9493_v57 = vpop.f32.mrf.mxu1 }
 0xbc8   : > { %v9516_v18 = vadd.f32 %v10895_v19, %v9505_v62  ;;  %v9504_v42 = vadd.f32 %v9493_v57, %v9214_v45 }
 0xbca   : > { %vm9520_vm0 = vcmp.ge.f32.partialorder %v9516_v18, 0.0  ;;  %v9524_v60 = vmul.f32 0.01, %v9516_v18  ;;  %v9515_v5 = vadd.f32 %v10895_v19, %v9504_v42 }
 0xbcc   : > { %v9523_v35 = vmul.f32 0.01, %v9515_v5  ;;  %v9528_v21 = vsel %vm9520_vm0, %v9516_v18, %v9524_v60  ;;  %vm9519_vm7 = vcmp.ge.f32.partialorder %v9515_v5, 0.0 }
 0xbcd   : > { %13285 = vmatpush3.xpose.msk.msra.mxu0 %vm9536_vm6, %v9528_v21 }
 0xbce   : > { %13286 = vmatprep.subr.mxu0 %v13317_v0  ;;  %v9527_v48 = vsel %vm9519_vm7, %v9515_v5, %v9523_v35 }
 0xbd1   : > { %13287 = vmatpush3.xpose.msk.msra.mxu0 %vm9536_vm6, %v9527_v48 }
 0xbd2   : > { %13288 = vmatprep.subr.mxu0 %v13317_v0 }
 0xbd5   : > { %13289 = vmatpush3.xpose.msk.msra.mxu0 %vm9536_vm6, %v9526_v20 }
 0xbd6   : > { %13290 = vmatprep.subr.mxu0 %v13317_v0 }
 0xbd9   : > { %13291 = vmatpush3.xpose.msk.msra.mxu0 %vm9536_vm6, %v9525_v55 }
 0xbdc   : > { %13293 = vmatmul.mubr.msk.f32.vlgmr.msra.gmra.mxu0 %vm9536_vm6, %v9529_v53 }
 0xc9c   : > { %v9618_v46 = vpop.f32.mrf.mxu0 }
 0xc9d   : > { %v9619_v7 = vadd.f32 %v9618_v46, %v9534_v34 }
 0xc9e   : > { %v13294_v12 = vpop.f32.mrf.mxu0 }
 0xc9f   : > { %9623 = vst.msk [vmem:[%s405_s14] sm:$0xff] %vm9622_vm10, %v9619_v7 }
 0xca0 PF: > { %s18_s27 = sadd.s32 1, %s13315_s27  }
 0xca1   : > { %p15_p4 = scmp.ge.s32.totalorder %s18_s27, 6  }
 0xca3   :  { %17 = sbr.rel (!%p15_p4) target bundleno = 1 (0x1), region = 126 }

</bundles_post_ra>
